<compile_context>
chip_gen: v7x
topology: tpu7x:2x2x1
jax: 0.10.0
libtpu: 0.0.40
codegen_flags: <defaults>
</compile_context>

<pallas_src>
import functools
import math

import jax
import jax.numpy as jnp
from jax import lax
from jax.experimental import pallas as pl
from jax.experimental.pallas import tpu as pltpu

EMBED_DIM = 32
KDIM = 16
VDIM = 32                       # must equal EMBED_DIM (residual x + att)
NUM_HEADS = 4
HEAD_DIM = EMBED_DIM // NUM_HEADS
LN_EPS = 1e-5
NEG_INF = -1e30

# Packed-weight order (each entry zero-padded to an (E, E) tile, stacked along rows).
_W_ORDER = ("wq", "wk", "wv", "wqp", "wkp", "wvp", "wo", "wf")
# Packed bias / LayerNorm-parameter order (each zero-padded to (1, E), stacked along rows).
_B_ORDER = ("bq", "bk", "bv", "bqp", "bkp", "bvp", "bo",
            "g1", "be1", "bf", "g2", "be2")


def mab_kernel(x_ref, y_ref, w_ref, b_ref, hmask_ref, sbias_ref, o_ref, *,
               nq, nk, num_heads, head_dim, att_sub, approx_recip, exp_dtype):
    """One batch-tile of the MAB forward pass.

    x_ref:     (Bt*nq, E)            query-side input slab (compute dtype)
    y_ref:     (Bt*nk, E)            key/value-side input slab (compute dtype)
    w_ref:     (8*E, E)              packed weights (compute dtype)
    b_ref:     (12, E)               packed biases + LN params (f32)
    hmask_ref: (H*att_sub*nq, E)     per-head lane mask, 0/1 (compute dtype)
    sbias_ref: (H*att_sub*nq, att_sub*nk) block-diagonal batch bias, 0/-1e30 (f32)
    o_ref:     (Bt*nq, E)            output slab (f32)
    """
    f32 = jnp.float32
    cdt = w_ref.dtype                      # MXU operand dtype (bf16 fast / f32 exact)
    M, E = x_ref.shape                     # M = Bt*nq query rows in this block
    bt = M // nq
    n_sub = bt // att_sub                  # attention sub-tiles per grid step
    msub = att_sub * nq                    # query rows per sub-tile
    mksub = att_sub * nk                   # key rows per sub-tile
    H = num_heads

    x_c = x_ref[...]                       # compute-dtype activations (fed straight to MXU)
    y_c = y_ref[...]
    x_res = x_c.astype(f32)                # f32 copy only for the residual

    def w(i):                              # i-th packed (E, E) weight (compute dtype)
        return w_ref[E * i:E * (i + 1), :]

    def b(i):                              # i-th packed (1, E) f32 bias / LN parameter
        return b_ref[i:i + 1, :].astype(f32)

    def mm(a, wi, bi):                     # a @ W_wi + b_bi, f32 accumulation
        return jnp.dot(a.astype(cdt), w(wi), preferred_element_type=f32) + b(bi)

    # ---- linear_q / linear_k / linear_v ---------------------------------------------------
    q = mm(x_c, 0, 0)                      # (M,  E)
    k = mm(y_c, 1, 1)                      # (Mk, E)  (lanes KDIM..E-1 exactly zero)
    v = mm(y_c, 2, 2)                      # (Mk, E)

    # ---- MultiheadAttention input projections (query pre-scaled, as PyTorch does) ----------
    q2 = (mm(q, 3, 3) * (1.0 / math.sqrt(head_dim))).astype(cdt)   # (M,  E)
    k2 = mm(k, 4, 4).astype(cdt)                                    # (Mk, E)
    v2 = mm(v, 5, 5).astype(cdt)                                    # (Mk, E)

    # Precomputed masks (resident inputs; no per-step iota chains).
    hmask3 = hmask_ref[...].reshape(H, msub, E)   # 0/1 per-head lane mask
    sbias = sbias_ref[...]                        # additive 0/-1e30 block-diagonal batch bias

    # ---- attention, sub-tiled by batch (trace-time unrolled loop) ---------------------------
    att_parts = []
    for st in range(n_sub):
        q2s = q2[st * msub:(st + 1) * msub, :]        # (msub,  E)
        k2s = k2[st * mksub:(st + 1) * mksub, :]      # (mksub, E)
        v2s = v2[st * mksub:(st + 1) * mksub, :]      # (mksub, E)

        # Head-expanded rows via a single masked broadcast-multiply (no concatenate copy):
        # row r = h*msub + m carries query m restricted to head h's lanes.
        q_exp = (hmask3 * q2s).reshape(H * msub, E)   # (H*msub, E), compute dtype

        s = lax.dot_general(q_exp, k2s, (((1,), (1,)), ((), ())),
                            preferred_element_type=f32)              # (H*msub, mksub)
        s = s + sbias                                                 # kill cross-batch cols
        s = s - jnp.max(s, axis=-1, keepdims=True)
        p = jnp.exp(s.astype(exp_dtype))                              # bf16 exp on v6e/v7x
        denom = jnp.sum(p.astype(f32), axis=-1, keepdims=True)
        o = jnp.dot(p.astype(cdt), v2s, preferred_element_type=f32)   # (H*msub, E)
        # Normalize after P@V (per-row denominator commutes with the matmul; E < mksub lanes).
        o = o * pl.reciprocal(denom, approx=approx_recip)

        # Fold head-expanded rows back: att[m, e] = o[(e // head_dim)*msub + m, e].
        att_parts.append(jnp.sum(hmask3 * o.reshape(H, msub, E), axis=0))   # (msub, E) f32

    att = att_parts[0] if n_sub == 1 else jnp.concatenate(att_parts, axis=0)   # (M, E)

    att = mm(att, 6, 6)                    # out_proj

    # ---- h = ln1(x + att) -------------------------------------------------------------------
    h1 = x_res + att
    mu1 = jnp.mean(h1, axis=-1, keepdims=True)
    var1 = jnp.mean((h1 - mu1) ** 2, axis=-1, keepdims=True)
    h1n = (h1 - mu1) * lax.rsqrt(var1 + LN_EPS) * b(7) + b(8)        # g1 / be1

    # ---- out = ln2(h + relu(h @ Wf + bf)) -----------------------------------------------------
    ff = jnp.maximum(mm(h1n, 7, 9), 0.0)                             # wf / bf
    h2 = h1n + ff
    mu2 = jnp.mean(h2, axis=-1, keepdims=True)
    var2 = jnp.mean((h2 - mu2) ** 2, axis=-1, keepdims=True)
    out = (h2 - mu2) * lax.rsqrt(var2 + LN_EPS) * b(10) + b(11)      # g2 / be2

    o_ref[...] = out.astype(o_ref.dtype)


def _pad_tile(a, rows, cols):
    out = jnp.zeros((rows, cols), jnp.float32)
    return out.at[:a.shape[0], :a.shape[1]].set(a.astype(jnp.float32))


def pack_params(p, compute_dtype):
    """Pack the 8 weight matrices and 12 bias/LN vectors into two arrays."""
    E = EMBED_DIM
    w_pack = jnp.concatenate([_pad_tile(p[name], E, E) for name in _W_ORDER],
                             axis=0).astype(compute_dtype)             # (8*E, E)
    b_pack = jnp.concatenate([_pad_tile(p[name].reshape(1, -1), 1, E) for name in _B_ORDER],
                             axis=0).astype(jnp.float32)               # (12, E)
    return w_pack, b_pack


def _make_attention_masks(att_sub, nq, nk, compute_dtype):
    """Host-precomputed masks for one attention sub-tile (resident kernel inputs)."""
    E, H, hd = EMBED_DIM, NUM_HEADS, HEAD_DIM
    msub, mksub = att_sub * nq, att_sub * nk
    hm = H * msub
    lane_head = jnp.arange(E, dtype=jnp.int32)[None, :] // hd
    row_head = jnp.arange(hm, dtype=jnp.int32)[:, None] // msub
    head_mask = (lane_head == row_head).astype(compute_dtype)          # (H*msub, E), 0/1
    qb = (jnp.arange(hm, dtype=jnp.int32)[:, None] % msub) // nq
    kb = jnp.arange(mksub, dtype=jnp.int32)[None, :] // nk
    score_bias = jnp.where(qb == kb, 0.0, NEG_INF).astype(jnp.float32)  # (H*msub, mksub)
    return head_mask, score_bias


def _tpu_generation():
    """Best-effort TPU generation detection (used only for perf heuristics)."""
    try:
        kind = jax.devices()[0].device_kind.lower()
        for g in (7, 6, 5, 4, 3, 2):
            if f"v{g}" in kind:
                return g
    except Exception:
        pass
    return 6


def _choose_batch_tile(B, nq, gen):
    # Single-TC chips (<= v6e): bigger sequential tiles amortize ~0.35us/step overhead.
    # v7x: two TensorCores share the grid -> prefer >= 4 steps so each core pipelines DMA.
    rows_target = 256 if gen <= 6 else 128
    bt = max(1, rows_target // max(nq, 1))
    bt = min(bt, 32)                      # VMEM / score-size guard (matters on v7x's 64 MiB)
    bt = min(bt, max(B, 1))
    if gen >= 7:
        while bt > 1 and (B + bt - 1) // bt < 4 and B >= 2 * bt:
            bt //= 2
    return bt


def mab_forward(x, y, params, *, compute_dtype=jnp.bfloat16, batch_tile=None,
                att_sub_tile=None):
    B, Nq, E = x.shape
    By, Nk, Ey = y.shape
    assert By == B and E == EMBED_DIM and Ey == EMBED_DIM
    # The module's residual `x + att` (and ln/ff over vdim) only typechecks when
    # vdim == embed_dim; fail loudly otherwise.
    assert VDIM == EMBED_DIM, "MAB requires vdim == embed_dim"

    gen = _tpu_generation()
    fast = jnp.dtype(compute_dtype) == jnp.dtype(jnp.bfloat16)
    approx_recip = fast                                   # exact path stays exact
    exp_dtype = compute_dtype if (fast and gen >= 6) else jnp.float32   # v5e has no bf16 EUP

    if batch_tile is None:
        batch_tile = _choose_batch_tile(B, Nq, gen)
    Bt = max(1, min(batch_tile, B))

    if att_sub_tile is None:
        att_sub_tile = max(d for d in (4, 2, 1) if Bt % d == 0)
    St = att_sub_tile
    assert Bt % St == 0, "att_sub_tile must divide batch_tile"

    # Pad B up to a multiple of Bt (handles prime / awkward batch sizes without collapsing
    # the tile to tiny matmuls); padded rows are sliced off after the call.
    n_steps = (B + Bt - 1) // Bt
    B_pad = n_steps * Bt
    if B_pad != B:
        x = jnp.concatenate([x, jnp.zeros((B_pad - B, Nq, E), x.dtype)], axis=0)
        y = jnp.concatenate([y, jnp.zeros((B_pad - B, Nk, E), y.dtype)], axis=0)

    w_pack, b_pack = pack_params(params, compute_dtype)
    head_mask, score_bias = _make_attention_masks(St, Nq, Nk, compute_dtype)

    # Activations are DMA'd in the compute dtype (bf16 on the fast path: half the slab bytes).
    x2 = x.reshape(B_pad * Nq, E).astype(compute_dtype)
    y2 = y.reshape(B_pad * Nk, E).astype(compute_dtype)

    kernel = functools.partial(
        mab_kernel, nq=Nq, nk=Nk, num_heads=NUM_HEADS, head_dim=HEAD_DIM,
        att_sub=St, approx_recip=approx_recip, exp_dtype=exp_dtype)

    # Advisory cost hint so XLA schedules this small custom call sensibly.
    itemsize = jnp.dtype(compute_dtype).itemsize
    flops = (2 * E * E * (4 * B_pad * Nq + 4 * B_pad * Nk)
             + 4 * B_pad * NUM_HEADS * Nq * (St * Nk) * E)
    transcendentals = B_pad * NUM_HEADS * Nq * (St * Nk) + 2 * B_pad * Nq
    bytes_accessed = ((B_pad * Nq * E + B_pad * Nk * E) * itemsize + 4 * B_pad * Nq * E
                      + 8 * E * E * itemsize + 12 * E * 4
                      + int(head_mask.size) * itemsize + int(score_bias.size) * 4)

    out = pl.pallas_call(
        kernel,
        out_shape=jax.ShapeDtypeStruct((B_pad * Nq, E), jnp.float32),
        grid_spec=pltpu.PrefetchScalarGridSpec(
            num_scalar_prefetch=0,
            grid=(n_steps,),
            in_specs=[
                pl.BlockSpec((Bt * Nq, E), lambda i: (i, 0)),      # query-side slab
                pl.BlockSpec((Bt * Nk, E), lambda i: (i, 0)),      # key/value-side slab
                pl.BlockSpec(w_pack.shape, lambda i: (0, 0)),      # packed weights (resident)
                pl.BlockSpec(b_pack.shape, lambda i: (0, 0)),      # packed biases  (resident)
                pl.BlockSpec(head_mask.shape, lambda i: (0, 0)),   # per-head lane mask
                pl.BlockSpec(score_bias.shape, lambda i: (0, 0)),  # block-diag batch bias
            ],
            out_specs=pl.BlockSpec((Bt * Nq, E), lambda i: (i, 0)),
        ),
        compiler_params=pltpu.CompilerParams(dimension_semantics=("parallel",)),
        cost_estimate=pl.CostEstimate(flops=flops, transcendentals=transcendentals,
                                      bytes_accessed=bytes_accessed),
    )(x2, y2, w_pack, b_pack, head_mask, score_bias)
    return out.reshape(B_pad, Nq, E)[:B]


def mab_reference(x, y, p):
    """Pure-JAX reference of the PyTorch forward pass (original module semantics)."""
    q = x @ p["wq"] + p["bq"]
    k = y @ p["wk"] + p["bk"]
    v = y @ p["wv"] + p["bv"]
    q2 = q @ p["wqp"] + p["bqp"]
    k2 = k @ p["wkp"] + p["bkp"]
    v2 = v @ p["wvp"] + p["bvp"]
    B, Nq, E = q2.shape
    Nk = k2.shape[1]
    qh = q2.reshape(B, Nq, NUM_HEADS, HEAD_DIM).transpose(0, 2, 1, 3)
    kh = k2.reshape(B, Nk, NUM_HEADS, HEAD_DIM).transpose(0, 2, 1, 3)
    vh = v2.reshape(B, Nk, NUM_HEADS, HEAD_DIM).transpose(0, 2, 1, 3)
    s = jnp.einsum("bhqd,bhkd->bhqk", qh, kh) / math.sqrt(HEAD_DIM)
    pw = jax.nn.softmax(s, axis=-1)
    o = jnp.einsum("bhqk,bhkd->bhqd", pw, vh).transpose(0, 2, 1, 3).reshape(B, Nq, E)
    att = o @ p["wo"] + p["bo"]

    def ln(t, g, b):
        mu = t.mean(-1, keepdims=True)
        var = ((t - mu) ** 2).mean(-1, keepdims=True)
        return (t - mu) / jnp.sqrt(var + LN_EPS) * g + b

    h = ln(x + att, p["g1"], p["be1"])
    ff = jax.nn.relu(h @ p["wf"] + p["bf"])
    return ln(h + ff, p["g2"], p["be2"])


def init_params(key):
    ks = jax.random.split(key, 20)
    n = lambda k, shape, s=0.1: (jax.random.normal(k, shape, jnp.float32) * s)
    E, Kd, Vd = EMBED_DIM, KDIM, VDIM
    return {
        # kernel-layout (in_dim, out_dim) weights; biases stored as (1, dim)
        "wq": n(ks[0], (E, E)),    "bq": n(ks[1], (1, E)),
        "wk": n(ks[2], (E, Kd)),   "bk": n(ks[3], (1, Kd)),
        "wv": n(ks[4], (E, Vd)),   "bv": n(ks[5], (1, Vd)),
        "wqp": n(ks[6], (E, E)),   "bqp": n(ks[7], (1, E)),
        "wkp": n(ks[8], (Kd, E)),  "bkp": n(ks[9], (1, E)),
        "wvp": n(ks[10], (Vd, E)), "bvp": n(ks[11], (1, E)),
        "wo": n(ks[12], (E, E)),   "bo": n(ks[13], (1, E)),
        "g1": jnp.ones((1, Vd), jnp.float32) + n(ks[14], (1, Vd), 0.01),
        "be1": n(ks[15], (1, Vd), 0.01),
        "wf": n(ks[16], (Vd, Vd)), "bf": n(ks[17], (1, Vd)),
        "g2": jnp.ones((1, Vd), jnp.float32) + n(ks[18], (1, Vd), 0.01),
        "be2": n(ks[19], (1, Vd), 0.01),
    }


if __name__ == "__main__":
    key = jax.random.PRNGKey(0)
    kx, ky, kp = jax.random.split(key, 3)

    B, Nq, Nk = 32, 8, 16
    x = jax.random.normal(kx, (B, Nq, EMBED_DIM), jnp.float32)
    y = jax.random.normal(ky, (B, Nk, EMBED_DIM), jnp.float32)
    params = init_params(kp)

    ref = mab_reference(x, y, params)

    # Exact path: f32 MXU operands, exact reciprocal, f32 exp -> tight check.
    out_f32 = jax.block_until_ready(mab_forward(x, y, params, compute_dtype=jnp.float32))
    assert out_f32.shape == (B, Nq, EMBED_DIM)
    assert jnp.allclose(out_f32, ref, atol=1e-3, rtol=1e-3), \
        f"f32 max abs diff = {jnp.max(jnp.abs(out_f32 - ref))}"

    # Fast path (default): bf16 MXU operands + bf16 activation DMA + approx reciprocal
    # (+ bf16 exp on v6e/v7x), f32 accumulation and f32 LN/softmax statistics.
    out_bf16 = jax.block_until_ready(mab_forward(x, y, params))
    assert out_bf16.shape == (B, Nq, EMBED_DIM)
    assert jnp.allclose(out_bf16, ref, atol=1e-1, rtol=1e-1), \
        f"bf16 max abs diff = {jnp.max(jnp.abs(out_bf16 - ref))}"

    # Awkward batch size with a forced tile: exercises the batch-padding path
    # (B=5 padded up to 8 with Bt=4 -> grid=(2,), padded rows sliced off).
    B2 = 5
    x5 = jax.random.normal(jax.random.PRNGKey(1), (B2, Nq, EMBED_DIM), jnp.float32)
    y5 = jax.random.normal(jax.random.PRNGKey(2), (B2, Nk, EMBED_DIM), jnp.float32)
    ref5 = mab_reference(x5, y5, params)
    out5 = jax.block_until_ready(mab_forward(x5, y5, params, batch_tile=4))
    assert out5.shape == (B2, Nq, EMBED_DIM)
    assert jnp.allclose(out5, ref5, atol=1e-1, rtol=1e-1), \
        f"padded-batch max abs diff = {jnp.max(jnp.abs(out5 - ref5))}"

    print("KERNEL_OK")
</pallas_src>

<mosaic_0001>
module attributes {stable_mosaic.version = 11 : i64} {
  func.func @mab_kernel(%arg0: i32, %arg1: memref<256x32xf32, #tpu.memory_space<vmem>>, %arg2: memref<512x32xf32, #tpu.memory_space<vmem>>, %arg3: memref<256x32xf32, #tpu.memory_space<vmem>>, %arg4: memref<12x32xf32, #tpu.memory_space<vmem>>, %arg5: memref<128x32xf32, #tpu.memory_space<vmem>>, %arg6: memref<128x64xf32, #tpu.memory_space<vmem>>, %arg7: memref<256x32xf32, #tpu.memory_space<vmem>>) attributes {dimension_semantics = [#tpu.dimension_semantics<parallel>], iteration_bounds = array<i64: 1>, scalar_prefetch = 0 : i64, scratch_operands = 0 : i64, tpu.core_type = #tpu.core_type<tc>, window_params = [{transform_indices = @transform_0, window_bounds = array<i64: 256, 32>}, {transform_indices = @transform_1, window_bounds = array<i64: 512, 32>}, {pipeline_mode = #tpu.pipeline_mode<synchronous>, transform_indices = @transform_2, window_bounds = array<i64: 256, 32>}, {pipeline_mode = #tpu.pipeline_mode<synchronous>, transform_indices = @transform_3, window_bounds = array<i64: 12, 32>}, {pipeline_mode = #tpu.pipeline_mode<synchronous>, transform_indices = @transform_4, window_bounds = array<i64: 128, 32>}, {pipeline_mode = #tpu.pipeline_mode<synchronous>, transform_indices = @transform_5, window_bounds = array<i64: 128, 64>}, {transform_indices = @transform_6, window_bounds = array<i64: 256, 32>}]} {
    %c0 = arith.constant 0 : index
    %c0_0 = arith.constant 0 : index
    %0 = vector.load %arg1[%c0, %c0_0] : memref<256x32xf32, #tpu.memory_space<vmem>>, vector<256x32xf32>
    %c0_1 = arith.constant 0 : index
    %c0_2 = arith.constant 0 : index
    %1 = vector.load %arg2[%c0_1, %c0_2] : memref<512x32xf32, #tpu.memory_space<vmem>>, vector<512x32xf32>
    %c0_3 = arith.constant 0 : index
    %c0_4 = arith.constant 0 : index
    %2 = vector.load %arg3[%c0_3, %c0_4] : memref<256x32xf32, #tpu.memory_space<vmem>>, vector<32x32xf32>
    %cst = arith.constant dense<0.000000e+00> : vector<256x32xf32>
    %3 = tpu.matmul %0, %2, %cst {dimension_numbers = #tpu.dot_dimension_numbers<[1], [0], [0], [1], [0, 0, 1, 1], [], []>} : vector<256x32xf32>, vector<32x32xf32>, vector<256x32xf32> -> vector<256x32xf32>
    %c0_5 = arith.constant 0 : index
    %c0_6 = arith.constant 0 : index
    %4 = vector.load %arg4[%c0_5, %c0_6] : memref<12x32xf32, #tpu.memory_space<vmem>>, vector<1x32xf32>
    %5 = vector.broadcast %4 : vector<1x32xf32> to vector<256x32xf32>
    %6 = arith.addf %3, %5 : vector<256x32xf32>
    %c32 = arith.constant 32 : index
    %c0_7 = arith.constant 0 : index
    %7 = vector.load %arg3[%c32, %c0_7] : memref<256x32xf32, #tpu.memory_space<vmem>>, vector<32x32xf32>
    %cst_8 = arith.constant dense<0.000000e+00> : vector<512x32xf32>
    %8 = tpu.matmul %1, %7, %cst_8 {dimension_numbers = #tpu.dot_dimension_numbers<[1], [0], [0], [1], [0, 0, 1, 1], [], []>} : vector<512x32xf32>, vector<32x32xf32>, vector<512x32xf32> -> vector<512x32xf32>
    %c1 = arith.constant 1 : index
    %c0_9 = arith.constant 0 : index
    %9 = vector.load %arg4[%c1, %c0_9] : memref<12x32xf32, #tpu.memory_space<vmem>>, vector<1x32xf32>
    %10 = vector.broadcast %9 : vector<1x32xf32> to vector<512x32xf32>
    %11 = arith.addf %8, %10 : vector<512x32xf32>
    %c64 = arith.constant 64 : index
    %c0_10 = arith.constant 0 : index
    %12 = vector.load %arg3[%c64, %c0_10] : memref<256x32xf32, #tpu.memory_space<vmem>>, vector<32x32xf32>
    %cst_11 = arith.constant dense<0.000000e+00> : vector<512x32xf32>
    %13 = tpu.matmul %1, %12, %cst_11 {dimension_numbers = #tpu.dot_dimension_numbers<[1], [0], [0], [1], [0, 0, 1, 1], [], []>} : vector<512x32xf32>, vector<32x32xf32>, vector<512x32xf32> -> vector<512x32xf32>
    %c2 = arith.constant 2 : index
    %c0_12 = arith.constant 0 : index
    %14 = vector.load %arg4[%c2, %c0_12] : memref<12x32xf32, #tpu.memory_space<vmem>>, vector<1x32xf32>
    %15 = vector.broadcast %14 : vector<1x32xf32> to vector<512x32xf32>
    %16 = arith.addf %13, %15 : vector<512x32xf32>
    %c96 = arith.constant 96 : index
    %c0_13 = arith.constant 0 : index
    %17 = vector.load %arg3[%c96, %c0_13] : memref<256x32xf32, #tpu.memory_space<vmem>>, vector<32x32xf32>
    %cst_14 = arith.constant dense<0.000000e+00> : vector<256x32xf32>
    %18 = tpu.matmul %6, %17, %cst_14 {dimension_numbers = #tpu.dot_dimension_numbers<[1], [0], [0], [1], [0, 0, 1, 1], [], []>} : vector<256x32xf32>, vector<32x32xf32>, vector<256x32xf32> -> vector<256x32xf32>
    %c3 = arith.constant 3 : index
    %c0_15 = arith.constant 0 : index
    %19 = vector.load %arg4[%c3, %c0_15] : memref<12x32xf32, #tpu.memory_space<vmem>>, vector<1x32xf32>
    %20 = vector.broadcast %19 : vector<1x32xf32> to vector<256x32xf32>
    %21 = arith.addf %18, %20 : vector<256x32xf32>
    %cst_16 = arith.constant 0.353553385 : f32
    %22 = vector.broadcast %cst_16 : f32 to vector<256x32xf32>
    %23 = arith.mulf %21, %22 : vector<256x32xf32>
    %c128 = arith.constant 128 : index
    %c0_17 = arith.constant 0 : index
    %24 = vector.load %arg3[%c128, %c0_17] : memref<256x32xf32, #tpu.memory_space<vmem>>, vector<32x32xf32>
    %cst_18 = arith.constant dense<0.000000e+00> : vector<512x32xf32>
    %25 = tpu.matmul %11, %24, %cst_18 {dimension_numbers = #tpu.dot_dimension_numbers<[1], [0], [0], [1], [0, 0, 1, 1], [], []>} : vector<512x32xf32>, vector<32x32xf32>, vector<512x32xf32> -> vector<512x32xf32>
    %c4 = arith.constant 4 : index
    %c0_19 = arith.constant 0 : index
    %26 = vector.load %arg4[%c4, %c0_19] : memref<12x32xf32, #tpu.memory_space<vmem>>, vector<1x32xf32>
    %27 = vector.broadcast %26 : vector<1x32xf32> to vector<512x32xf32>
    %28 = arith.addf %25, %27 : vector<512x32xf32>
    %c160 = arith.constant 160 : index
    %c0_20 = arith.constant 0 : index
    %29 = vector.load %arg3[%c160, %c0_20] : memref<256x32xf32, #tpu.memory_space<vmem>>, vector<32x32xf32>
    %cst_21 = arith.constant dense<0.000000e+00> : vector<512x32xf32>
    %30 = tpu.matmul %16, %29, %cst_21 {dimension_numbers = #tpu.dot_dimension_numbers<[1], [0], [0], [1], [0, 0, 1, 1], [], []>} : vector<512x32xf32>, vector<32x32xf32>, vector<512x32xf32> -> vector<512x32xf32>
    %c5 = arith.constant 5 : index
    %c0_22 = arith.constant 0 : index
    %31 = vector.load %arg4[%c5, %c0_22] : memref<12x32xf32, #tpu.memory_space<vmem>>, vector<1x32xf32>
    %32 = vector.broadcast %31 : vector<1x32xf32> to vector<512x32xf32>
    %33 = arith.addf %30, %32 : vector<512x32xf32>
    %c0_23 = arith.constant 0 : index
    %c0_24 = arith.constant 0 : index
    %34 = vector.load %arg5[%c0_23, %c0_24] : memref<128x32xf32, #tpu.memory_space<vmem>>, vector<128x32xf32>
    %35 = vector.shape_cast %34 : vector<128x32xf32> to vector<4x32x32xf32>
    %c0_25 = arith.constant 0 : index
    %c0_26 = arith.constant 0 : index
    %36 = vector.load %arg6[%c0_25, %c0_26] : memref<128x64xf32, #tpu.memory_space<vmem>>, vector<128x64xf32>
    %37 = vector.extract_strided_slice %23 {offsets = [0, 0], sizes = [32, 32], strides = [1, 1]} : vector<256x32xf32> to vector<32x32xf32>
    %38 = vector.extract_strided_slice %28 {offsets = [0, 0], sizes = [64, 32], strides = [1, 1]} : vector<512x32xf32> to vector<64x32xf32>
    %39 = vector.extract_strided_slice %33 {offsets = [0, 0], sizes = [64, 32], strides = [1, 1]} : vector<512x32xf32> to vector<64x32xf32>
    %40 = vector.shape_cast %37 : vector<32x32xf32> to vector<1x32x32xf32>
    %41 = vector.broadcast %40 : vector<1x32x32xf32> to vector<4x32x32xf32>
    %42 = arith.mulf %35, %41 : vector<4x32x32xf32>
    %43 = vector.shape_cast %42 : vector<4x32x32xf32> to vector<128x32xf32>
    %cst_27 = arith.constant dense<0.000000e+00> : vector<128x64xf32>
    %44 = tpu.matmul %43, %38, %cst_27 {dimension_numbers = #tpu.dot_dimension_numbers<[1], [1], [0], [0], [0, 0, 1, 0], [], []>} : vector<128x32xf32>, vector<64x32xf32>, vector<128x64xf32> -> vector<128x64xf32>
    %45 = arith.addf %44, %36 : vector<128x64xf32>
    %cst_28 = arith.constant dense<0xFF800000> : vector<128xf32>
    %46 = vector.multi_reduction <maximumf>, %45, %cst_28 [1] : vector<128x64xf32> to vector<128xf32>
    %47 = vector.shape_cast %46 : vector<128xf32> to vector<128x1xf32>
    %48 = vector.broadcast %47 : vector<128x1xf32> to vector<128x64xf32>
    %49 = arith.subf %45, %48 : vector<128x64xf32>
    %50 = math.exp %49 : vector<128x64xf32>
    %cst_29 = arith.constant dense<0.000000e+00> : vector<128xf32>
    %51 = vector.multi_reduction <add>, %50, %cst_29 [1] : vector<128x64xf32> to vector<128xf32>
    %52 = vector.shape_cast %51 : vector<128xf32> to vector<128x1xf32>
    %cst_30 = arith.constant dense<0.000000e+00> : vector<128x32xf32>
    %53 = tpu.matmul %50, %39, %cst_30 {dimension_numbers = #tpu.dot_dimension_numbers<[1], [0], [0], [1], [0, 0, 1, 1], [], []>} : vector<128x64xf32>, vector<64x32xf32>, vector<128x32xf32> -> vector<128x32xf32>
    %54 = tpu.reciprocal %52 : vector<128x1xf32> -> vector<128x1xf32>
    %55 = vector.broadcast %54 : vector<128x1xf32> to vector<128x32xf32>
    %56 = arith.mulf %53, %55 : vector<128x32xf32>
    %57 = vector.shape_cast %56 : vector<128x32xf32> to vector<4x32x32xf32>
    %58 = arith.mulf %35, %57 : vector<4x32x32xf32>
    %cst_31 = arith.constant dense<0.000000e+00> : vector<32x32xf32>
    %59 = vector.multi_reduction <add>, %58, %cst_31 [0] : vector<4x32x32xf32> to vector<32x32xf32>
    %60 = vector.extract_strided_slice %23 {offsets = [32, 0], sizes = [32, 32], strides = [1, 1]} : vector<256x32xf32> to vector<32x32xf32>
    %61 = vector.extract_strided_slice %28 {offsets = [64, 0], sizes = [64, 32], strides = [1, 1]} : vector<512x32xf32> to vector<64x32xf32>
    %62 = vector.extract_strided_slice %33 {offsets = [64, 0], sizes = [64, 32], strides = [1, 1]} : vector<512x32xf32> to vector<64x32xf32>
    %63 = vector.shape_cast %60 : vector<32x32xf32> to vector<1x32x32xf32>
    %64 = vector.broadcast %63 : vector<1x32x32xf32> to vector<4x32x32xf32>
    %65 = arith.mulf %35, %64 : vector<4x32x32xf32>
    %66 = vector.shape_cast %65 : vector<4x32x32xf32> to vector<128x32xf32>
    %cst_32 = arith.constant dense<0.000000e+00> : vector<128x64xf32>
    %67 = tpu.matmul %66, %61, %cst_32 {dimension_numbers = #tpu.dot_dimension_numbers<[1], [1], [0], [0], [0, 0, 1, 0], [], []>} : vector<128x32xf32>, vector<64x32xf32>, vector<128x64xf32> -> vector<128x64xf32>
    %68 = arith.addf %67, %36 : vector<128x64xf32>
    %cst_33 = arith.constant dense<0xFF800000> : vector<128xf32>
    %69 = vector.multi_reduction <maximumf>, %68, %cst_33 [1] : vector<128x64xf32> to vector<128xf32>
    %70 = vector.shape_cast %69 : vector<128xf32> to vector<128x1xf32>
    %71 = vector.broadcast %70 : vector<128x1xf32> to vector<128x64xf32>
    %72 = arith.subf %68, %71 : vector<128x64xf32>
    %73 = math.exp %72 : vector<128x64xf32>
    %cst_34 = arith.constant dense<0.000000e+00> : vector<128xf32>
    %74 = vector.multi_reduction <add>, %73, %cst_34 [1] : vector<128x64xf32> to vector<128xf32>
    %75 = vector.shape_cast %74 : vector<128xf32> to vector<128x1xf32>
    %cst_35 = arith.constant dense<0.000000e+00> : vector<128x32xf32>
    %76 = tpu.matmul %73, %62, %cst_35 {dimension_numbers = #tpu.dot_dimension_numbers<[1], [0], [0], [1], [0, 0, 1, 1], [], []>} : vector<128x64xf32>, vector<64x32xf32>, vector<128x32xf32> -> vector<128x32xf32>
    %77 = tpu.reciprocal %75 : vector<128x1xf32> -> vector<128x1xf32>
    %78 = vector.broadcast %77 : vector<128x1xf32> to vector<128x32xf32>
    %79 = arith.mulf %76, %78 : vector<128x32xf32>
    %80 = vector.shape_cast %79 : vector<128x32xf32> to vector<4x32x32xf32>
    %81 = arith.mulf %35, %80 : vector<4x32x32xf32>
    %cst_36 = arith.constant dense<0.000000e+00> : vector<32x32xf32>
    %82 = vector.multi_reduction <add>, %81, %cst_36 [0] : vector<4x32x32xf32> to vector<32x32xf32>
    %83 = vector.extract_strided_slice %23 {offsets = [64, 0], sizes = [32, 32], strides = [1, 1]} : vector<256x32xf32> to vector<32x32xf32>
    %84 = vector.extract_strided_slice %28 {offsets = [128, 0], sizes = [64, 32], strides = [1, 1]} : vector<512x32xf32> to vector<64x32xf32>
    %85 = vector.extract_strided_slice %33 {offsets = [128, 0], sizes = [64, 32], strides = [1, 1]} : vector<512x32xf32> to vector<64x32xf32>
    %86 = vector.shape_cast %83 : vector<32x32xf32> to vector<1x32x32xf32>
    %87 = vector.broadcast %86 : vector<1x32x32xf32> to vector<4x32x32xf32>
    %88 = arith.mulf %35, %87 : vector<4x32x32xf32>
    %89 = vector.shape_cast %88 : vector<4x32x32xf32> to vector<128x32xf32>
    %cst_37 = arith.constant dense<0.000000e+00> : vector<128x64xf32>
    %90 = tpu.matmul %89, %84, %cst_37 {dimension_numbers = #tpu.dot_dimension_numbers<[1], [1], [0], [0], [0, 0, 1, 0], [], []>} : vector<128x32xf32>, vector<64x32xf32>, vector<128x64xf32> -> vector<128x64xf32>
    %91 = arith.addf %90, %36 : vector<128x64xf32>
    %cst_38 = arith.constant dense<0xFF800000> : vector<128xf32>
    %92 = vector.multi_reduction <maximumf>, %91, %cst_38 [1] : vector<128x64xf32> to vector<128xf32>
    %93 = vector.shape_cast %92 : vector<128xf32> to vector<128x1xf32>
    %94 = vector.broadcast %93 : vector<128x1xf32> to vector<128x64xf32>
    %95 = arith.subf %91, %94 : vector<128x64xf32>
    %96 = math.exp %95 : vector<128x64xf32>
    %cst_39 = arith.constant dense<0.000000e+00> : vector<128xf32>
    %97 = vector.multi_reduction <add>, %96, %cst_39 [1] : vector<128x64xf32> to vector<128xf32>
    %98 = vector.shape_cast %97 : vector<128xf32> to vector<128x1xf32>
    %cst_40 = arith.constant dense<0.000000e+00> : vector<128x32xf32>
    %99 = tpu.matmul %96, %85, %cst_40 {dimension_numbers = #tpu.dot_dimension_numbers<[1], [0], [0], [1], [0, 0, 1, 1], [], []>} : vector<128x64xf32>, vector<64x32xf32>, vector<128x32xf32> -> vector<128x32xf32>
    %100 = tpu.reciprocal %98 : vector<128x1xf32> -> vector<128x1xf32>
    %101 = vector.broadcast %100 : vector<128x1xf32> to vector<128x32xf32>
    %102 = arith.mulf %99, %101 : vector<128x32xf32>
    %103 = vector.shape_cast %102 : vector<128x32xf32> to vector<4x32x32xf32>
    %104 = arith.mulf %35, %103 : vector<4x32x32xf32>
    %cst_41 = arith.constant dense<0.000000e+00> : vector<32x32xf32>
    %105 = vector.multi_reduction <add>, %104, %cst_41 [0] : vector<4x32x32xf32> to vector<32x32xf32>
    %106 = vector.extract_strided_slice %23 {offsets = [96, 0], sizes = [32, 32], strides = [1, 1]} : vector<256x32xf32> to vector<32x32xf32>
    %107 = vector.extract_strided_slice %28 {offsets = [192, 0], sizes = [64, 32], strides = [1, 1]} : vector<512x32xf32> to vector<64x32xf32>
    %108 = vector.extract_strided_slice %33 {offsets = [192, 0], sizes = [64, 32], strides = [1, 1]} : vector<512x32xf32> to vector<64x32xf32>
    %109 = vector.shape_cast %106 : vector<32x32xf32> to vector<1x32x32xf32>
    %110 = vector.broadcast %109 : vector<1x32x32xf32> to vector<4x32x32xf32>
    %111 = arith.mulf %35, %110 : vector<4x32x32xf32>
    %112 = vector.shape_cast %111 : vector<4x32x32xf32> to vector<128x32xf32>
    %cst_42 = arith.constant dense<0.000000e+00> : vector<128x64xf32>
    %113 = tpu.matmul %112, %107, %cst_42 {dimension_numbers = #tpu.dot_dimension_numbers<[1], [1], [0], [0], [0, 0, 1, 0], [], []>} : vector<128x32xf32>, vector<64x32xf32>, vector<128x64xf32> -> vector<128x64xf32>
    %114 = arith.addf %113, %36 : vector<128x64xf32>
    %cst_43 = arith.constant dense<0xFF800000> : vector<128xf32>
    %115 = vector.multi_reduction <maximumf>, %114, %cst_43 [1] : vector<128x64xf32> to vector<128xf32>
    %116 = vector.shape_cast %115 : vector<128xf32> to vector<128x1xf32>
    %117 = vector.broadcast %116 : vector<128x1xf32> to vector<128x64xf32>
    %118 = arith.subf %114, %117 : vector<128x64xf32>
    %119 = math.exp %118 : vector<128x64xf32>
    %cst_44 = arith.constant dense<0.000000e+00> : vector<128xf32>
    %120 = vector.multi_reduction <add>, %119, %cst_44 [1] : vector<128x64xf32> to vector<128xf32>
    %121 = vector.shape_cast %120 : vector<128xf32> to vector<128x1xf32>
    %cst_45 = arith.constant dense<0.000000e+00> : vector<128x32xf32>
    %122 = tpu.matmul %119, %108, %cst_45 {dimension_numbers = #tpu.dot_dimension_numbers<[1], [0], [0], [1], [0, 0, 1, 1], [], []>} : vector<128x64xf32>, vector<64x32xf32>, vector<128x32xf32> -> vector<128x32xf32>
    %123 = tpu.reciprocal %121 : vector<128x1xf32> -> vector<128x1xf32>
    %124 = vector.broadcast %123 : vector<128x1xf32> to vector<128x32xf32>
    %125 = arith.mulf %122, %124 : vector<128x32xf32>
    %126 = vector.shape_cast %125 : vector<128x32xf32> to vector<4x32x32xf32>
    %127 = arith.mulf %35, %126 : vector<4x32x32xf32>
    %cst_46 = arith.constant dense<0.000000e+00> : vector<32x32xf32>
    %128 = vector.multi_reduction <add>, %127, %cst_46 [0] : vector<4x32x32xf32> to vector<32x32xf32>
    %129 = vector.extract_strided_slice %23 {offsets = [128, 0], sizes = [32, 32], strides = [1, 1]} : vector<256x32xf32> to vector<32x32xf32>
    %130 = vector.extract_strided_slice %28 {offsets = [256, 0], sizes = [64, 32], strides = [1, 1]} : vector<512x32xf32> to vector<64x32xf32>
    %131 = vector.extract_strided_slice %33 {offsets = [256, 0], sizes = [64, 32], strides = [1, 1]} : vector<512x32xf32> to vector<64x32xf32>
    %132 = vector.shape_cast %129 : vector<32x32xf32> to vector<1x32x32xf32>
    %133 = vector.broadcast %132 : vector<1x32x32xf32> to vector<4x32x32xf32>
    %134 = arith.mulf %35, %133 : vector<4x32x32xf32>
    %135 = vector.shape_cast %134 : vector<4x32x32xf32> to vector<128x32xf32>
    %cst_47 = arith.constant dense<0.000000e+00> : vector<128x64xf32>
    %136 = tpu.matmul %135, %130, %cst_47 {dimension_numbers = #tpu.dot_dimension_numbers<[1], [1], [0], [0], [0, 0, 1, 0], [], []>} : vector<128x32xf32>, vector<64x32xf32>, vector<128x64xf32> -> vector<128x64xf32>
    %137 = arith.addf %136, %36 : vector<128x64xf32>
    %cst_48 = arith.constant dense<0xFF800000> : vector<128xf32>
    %138 = vector.multi_reduction <maximumf>, %137, %cst_48 [1] : vector<128x64xf32> to vector<128xf32>
    %139 = vector.shape_cast %138 : vector<128xf32> to vector<128x1xf32>
    %140 = vector.broadcast %139 : vector<128x1xf32> to vector<128x64xf32>
    %141 = arith.subf %137, %140 : vector<128x64xf32>
    %142 = math.exp %141 : vector<128x64xf32>
    %cst_49 = arith.constant dense<0.000000e+00> : vector<128xf32>
    %143 = vector.multi_reduction <add>, %142, %cst_49 [1] : vector<128x64xf32> to vector<128xf32>
    %144 = vector.shape_cast %143 : vector<128xf32> to vector<128x1xf32>
    %cst_50 = arith.constant dense<0.000000e+00> : vector<128x32xf32>
    %145 = tpu.matmul %142, %131, %cst_50 {dimension_numbers = #tpu.dot_dimension_numbers<[1], [0], [0], [1], [0, 0, 1, 1], [], []>} : vector<128x64xf32>, vector<64x32xf32>, vector<128x32xf32> -> vector<128x32xf32>
    %146 = tpu.reciprocal %144 : vector<128x1xf32> -> vector<128x1xf32>
    %147 = vector.broadcast %146 : vector<128x1xf32> to vector<128x32xf32>
    %148 = arith.mulf %145, %147 : vector<128x32xf32>
    %149 = vector.shape_cast %148 : vector<128x32xf32> to vector<4x32x32xf32>
    %150 = arith.mulf %35, %149 : vector<4x32x32xf32>
    %cst_51 = arith.constant dense<0.000000e+00> : vector<32x32xf32>
    %151 = vector.multi_reduction <add>, %150, %cst_51 [0] : vector<4x32x32xf32> to vector<32x32xf32>
    %152 = vector.extract_strided_slice %23 {offsets = [160, 0], sizes = [32, 32], strides = [1, 1]} : vector<256x32xf32> to vector<32x32xf32>
    %153 = vector.extract_strided_slice %28 {offsets = [320, 0], sizes = [64, 32], strides = [1, 1]} : vector<512x32xf32> to vector<64x32xf32>
    %154 = vector.extract_strided_slice %33 {offsets = [320, 0], sizes = [64, 32], strides = [1, 1]} : vector<512x32xf32> to vector<64x32xf32>
    %155 = vector.shape_cast %152 : vector<32x32xf32> to vector<1x32x32xf32>
    %156 = vector.broadcast %155 : vector<1x32x32xf32> to vector<4x32x32xf32>
    %157 = arith.mulf %35, %156 : vector<4x32x32xf32>
    %158 = vector.shape_cast %157 : vector<4x32x32xf32> to vector<128x32xf32>
    %cst_52 = arith.constant dense<0.000000e+00> : vector<128x64xf32>
    %159 = tpu.matmul %158, %153, %cst_52 {dimension_numbers = #tpu.dot_dimension_numbers<[1], [1], [0], [0], [0, 0, 1, 0], [], []>} : vector<128x32xf32>, vector<64x32xf32>, vector<128x64xf32> -> vector<128x64xf32>
    %160 = arith.addf %159, %36 : vector<128x64xf32>
    %cst_53 = arith.constant dense<0xFF800000> : vector<128xf32>
    %161 = vector.multi_reduction <maximumf>, %160, %cst_53 [1] : vector<128x64xf32> to vector<128xf32>
    %162 = vector.shape_cast %161 : vector<128xf32> to vector<128x1xf32>
    %163 = vector.broadcast %162 : vector<128x1xf32> to vector<128x64xf32>
    %164 = arith.subf %160, %163 : vector<128x64xf32>
    %165 = math.exp %164 : vector<128x64xf32>
    %cst_54 = arith.constant dense<0.000000e+00> : vector<128xf32>
    %166 = vector.multi_reduction <add>, %165, %cst_54 [1] : vector<128x64xf32> to vector<128xf32>
    %167 = vector.shape_cast %166 : vector<128xf32> to vector<128x1xf32>
    %cst_55 = arith.constant dense<0.000000e+00> : vector<128x32xf32>
    %168 = tpu.matmul %165, %154, %cst_55 {dimension_numbers = #tpu.dot_dimension_numbers<[1], [0], [0], [1], [0, 0, 1, 1], [], []>} : vector<128x64xf32>, vector<64x32xf32>, vector<128x32xf32> -> vector<128x32xf32>
    %169 = tpu.reciprocal %167 : vector<128x1xf32> -> vector<128x1xf32>
    %170 = vector.broadcast %169 : vector<128x1xf32> to vector<128x32xf32>
    %171 = arith.mulf %168, %170 : vector<128x32xf32>
    %172 = vector.shape_cast %171 : vector<128x32xf32> to vector<4x32x32xf32>
    %173 = arith.mulf %35, %172 : vector<4x32x32xf32>
    %cst_56 = arith.constant dense<0.000000e+00> : vector<32x32xf32>
    %174 = vector.multi_reduction <add>, %173, %cst_56 [0] : vector<4x32x32xf32> to vector<32x32xf32>
    %175 = vector.extract_strided_slice %23 {offsets = [192, 0], sizes = [32, 32], strides = [1, 1]} : vector<256x32xf32> to vector<32x32xf32>
    %176 = vector.extract_strided_slice %28 {offsets = [384, 0], sizes = [64, 32], strides = [1, 1]} : vector<512x32xf32> to vector<64x32xf32>
    %177 = vector.extract_strided_slice %33 {offsets = [384, 0], sizes = [64, 32], strides = [1, 1]} : vector<512x32xf32> to vector<64x32xf32>
    %178 = vector.shape_cast %175 : vector<32x32xf32> to vector<1x32x32xf32>
    %179 = vector.broadcast %178 : vector<1x32x32xf32> to vector<4x32x32xf32>
    %180 = arith.mulf %35, %179 : vector<4x32x32xf32>
    %181 = vector.shape_cast %180 : vector<4x32x32xf32> to vector<128x32xf32>
    %cst_57 = arith.constant dense<0.000000e+00> : vector<128x64xf32>
    %182 = tpu.matmul %181, %176, %cst_57 {dimension_numbers = #tpu.dot_dimension_numbers<[1], [1], [0], [0], [0, 0, 1, 0], [], []>} : vector<128x32xf32>, vector<64x32xf32>, vector<128x64xf32> -> vector<128x64xf32>
    %183 = arith.addf %182, %36 : vector<128x64xf32>
    %cst_58 = arith.constant dense<0xFF800000> : vector<128xf32>
    %184 = vector.multi_reduction <maximumf>, %183, %cst_58 [1] : vector<128x64xf32> to vector<128xf32>
    %185 = vector.shape_cast %184 : vector<128xf32> to vector<128x1xf32>
    %186 = vector.broadcast %185 : vector<128x1xf32> to vector<128x64xf32>
    %187 = arith.subf %183, %186 : vector<128x64xf32>
    %188 = math.exp %187 : vector<128x64xf32>
    %cst_59 = arith.constant dense<0.000000e+00> : vector<128xf32>
    %189 = vector.multi_reduction <add>, %188, %cst_59 [1] : vector<128x64xf32> to vector<128xf32>
    %190 = vector.shape_cast %189 : vector<128xf32> to vector<128x1xf32>
    %cst_60 = arith.constant dense<0.000000e+00> : vector<128x32xf32>
    %191 = tpu.matmul %188, %177, %cst_60 {dimension_numbers = #tpu.dot_dimension_numbers<[1], [0], [0], [1], [0, 0, 1, 1], [], []>} : vector<128x64xf32>, vector<64x32xf32>, vector<128x32xf32> -> vector<128x32xf32>
    %192 = tpu.reciprocal %190 : vector<128x1xf32> -> vector<128x1xf32>
    %193 = vector.broadcast %192 : vector<128x1xf32> to vector<128x32xf32>
    %194 = arith.mulf %191, %193 : vector<128x32xf32>
    %195 = vector.shape_cast %194 : vector<128x32xf32> to vector<4x32x32xf32>
    %196 = arith.mulf %35, %195 : vector<4x32x32xf32>
    %cst_61 = arith.constant dense<0.000000e+00> : vector<32x32xf32>
    %197 = vector.multi_reduction <add>, %196, %cst_61 [0] : vector<4x32x32xf32> to vector<32x32xf32>
    %198 = vector.extract_strided_slice %23 {offsets = [224, 0], sizes = [32, 32], strides = [1, 1]} : vector<256x32xf32> to vector<32x32xf32>
    %199 = vector.extract_strided_slice %28 {offsets = [448, 0], sizes = [64, 32], strides = [1, 1]} : vector<512x32xf32> to vector<64x32xf32>
    %200 = vector.extract_strided_slice %33 {offsets = [448, 0], sizes = [64, 32], strides = [1, 1]} : vector<512x32xf32> to vector<64x32xf32>
    %201 = vector.shape_cast %198 : vector<32x32xf32> to vector<1x32x32xf32>
    %202 = vector.broadcast %201 : vector<1x32x32xf32> to vector<4x32x32xf32>
    %203 = arith.mulf %35, %202 : vector<4x32x32xf32>
    %204 = vector.shape_cast %203 : vector<4x32x32xf32> to vector<128x32xf32>
    %cst_62 = arith.constant dense<0.000000e+00> : vector<128x64xf32>
    %205 = tpu.matmul %204, %199, %cst_62 {dimension_numbers = #tpu.dot_dimension_numbers<[1], [1], [0], [0], [0, 0, 1, 0], [], []>} : vector<128x32xf32>, vector<64x32xf32>, vector<128x64xf32> -> vector<128x64xf32>
    %206 = arith.addf %205, %36 : vector<128x64xf32>
    %cst_63 = arith.constant dense<0xFF800000> : vector<128xf32>
    %207 = vector.multi_reduction <maximumf>, %206, %cst_63 [1] : vector<128x64xf32> to vector<128xf32>
    %208 = vector.shape_cast %207 : vector<128xf32> to vector<128x1xf32>
    %209 = vector.broadcast %208 : vector<128x1xf32> to vector<128x64xf32>
    %210 = arith.subf %206, %209 : vector<128x64xf32>
    %211 = math.exp %210 : vector<128x64xf32>
    %cst_64 = arith.constant dense<0.000000e+00> : vector<128xf32>
    %212 = vector.multi_reduction <add>, %211, %cst_64 [1] : vector<128x64xf32> to vector<128xf32>
    %213 = vector.shape_cast %212 : vector<128xf32> to vector<128x1xf32>
    %cst_65 = arith.constant dense<0.000000e+00> : vector<128x32xf32>
    %214 = tpu.matmul %211, %200, %cst_65 {dimension_numbers = #tpu.dot_dimension_numbers<[1], [0], [0], [1], [0, 0, 1, 1], [], []>} : vector<128x64xf32>, vector<64x32xf32>, vector<128x32xf32> -> vector<128x32xf32>
    %215 = tpu.reciprocal %213 : vector<128x1xf32> -> vector<128x1xf32>
    %216 = vector.broadcast %215 : vector<128x1xf32> to vector<128x32xf32>
    %217 = arith.mulf %214, %216 : vector<128x32xf32>
    %218 = vector.shape_cast %217 : vector<128x32xf32> to vector<4x32x32xf32>
    %219 = arith.mulf %35, %218 : vector<4x32x32xf32>
    %cst_66 = arith.constant dense<0.000000e+00> : vector<32x32xf32>
    %220 = vector.multi_reduction <add>, %219, %cst_66 [0] : vector<4x32x32xf32> to vector<32x32xf32>
    %221 = tpu.concatenate %59, %82, %105, %128, %151, %174, %197, %220 in 0 : vector<32x32xf32>, vector<32x32xf32>, vector<32x32xf32>, vector<32x32xf32>, vector<32x32xf32>, vector<32x32xf32>, vector<32x32xf32>, vector<32x32xf32> -> vector<256x32xf32>
    %c192 = arith.constant 192 : index
    %c0_67 = arith.constant 0 : index
    %222 = vector.load %arg3[%c192, %c0_67] : memref<256x32xf32, #tpu.memory_space<vmem>>, vector<32x32xf32>
    %cst_68 = arith.constant dense<0.000000e+00> : vector<256x32xf32>
    %223 = tpu.matmul %221, %222, %cst_68 {dimension_numbers = #tpu.dot_dimension_numbers<[1], [0], [0], [1], [0, 0, 1, 1], [], []>} : vector<256x32xf32>, vector<32x32xf32>, vector<256x32xf32> -> vector<256x32xf32>
    %c6 = arith.constant 6 : index
    %c0_69 = arith.constant 0 : index
    %224 = vector.load %arg4[%c6, %c0_69] : memref<12x32xf32, #tpu.memory_space<vmem>>, vector<1x32xf32>
    %225 = vector.broadcast %224 : vector<1x32xf32> to vector<256x32xf32>
    %226 = arith.addf %223, %225 : vector<256x32xf32>
    %227 = arith.addf %0, %226 : vector<256x32xf32>
    %cst_70 = arith.constant dense<0.000000e+00> : vector<256xf32>
    %228 = vector.multi_reduction <add>, %227, %cst_70 [1] : vector<256x32xf32> to vector<256xf32>
    %229 = vector.shape_cast %228 : vector<256xf32> to vector<256x1xf32>
    %cst_71 = arith.constant 3.200000e+01 : f32
    %230 = vector.broadcast %cst_71 : f32 to vector<256x1xf32>
    %231 = arith.divf %229, %230 : vector<256x1xf32>
    %232 = vector.broadcast %231 : vector<256x1xf32> to vector<256x32xf32>
    %233 = arith.subf %227, %232 : vector<256x32xf32>
    %234 = arith.mulf %233, %233 : vector<256x32xf32>
    %cst_72 = arith.constant dense<0.000000e+00> : vector<256xf32>
    %235 = vector.multi_reduction <add>, %234, %cst_72 [1] : vector<256x32xf32> to vector<256xf32>
    %236 = vector.shape_cast %235 : vector<256xf32> to vector<256x1xf32>
    %cst_73 = arith.constant 3.200000e+01 : f32
    %237 = vector.broadcast %cst_73 : f32 to vector<256x1xf32>
    %238 = arith.divf %236, %237 : vector<256x1xf32>
    %239 = vector.broadcast %231 : vector<256x1xf32> to vector<256x32xf32>
    %240 = arith.subf %227, %239 : vector<256x32xf32>
    %cst_74 = arith.constant 9.99999974E-6 : f32
    %241 = vector.broadcast %cst_74 : f32 to vector<256x1xf32>
    %242 = arith.addf %238, %241 : vector<256x1xf32>
    %243 = math.rsqrt %242 : vector<256x1xf32>
    %244 = vector.broadcast %243 : vector<256x1xf32> to vector<256x32xf32>
    %245 = arith.mulf %240, %244 : vector<256x32xf32>
    %c7 = arith.constant 7 : index
    %c0_75 = arith.constant 0 : index
    %246 = vector.load %arg4[%c7, %c0_75] : memref<12x32xf32, #tpu.memory_space<vmem>>, vector<1x32xf32>
    %247 = vector.broadcast %246 : vector<1x32xf32> to vector<256x32xf32>
    %248 = arith.mulf %245, %247 : vector<256x32xf32>
    %c8 = arith.constant 8 : index
    %c0_76 = arith.constant 0 : index
    %249 = vector.load %arg4[%c8, %c0_76] : memref<12x32xf32, #tpu.memory_space<vmem>>, vector<1x32xf32>
    %250 = vector.broadcast %249 : vector<1x32xf32> to vector<256x32xf32>
    %251 = arith.addf %248, %250 : vector<256x32xf32>
    %c224 = arith.constant 224 : index
    %c0_77 = arith.constant 0 : index
    %252 = vector.load %arg3[%c224, %c0_77] : memref<256x32xf32, #tpu.memory_space<vmem>>, vector<32x32xf32>
    %cst_78 = arith.constant dense<0.000000e+00> : vector<256x32xf32>
    %253 = tpu.matmul %251, %252, %cst_78 {dimension_numbers = #tpu.dot_dimension_numbers<[1], [0], [0], [1], [0, 0, 1, 1], [], []>} : vector<256x32xf32>, vector<32x32xf32>, vector<256x32xf32> -> vector<256x32xf32>
    %c9 = arith.constant 9 : index
    %c0_79 = arith.constant 0 : index
    %254 = vector.load %arg4[%c9, %c0_79] : memref<12x32xf32, #tpu.memory_space<vmem>>, vector<1x32xf32>
    %255 = vector.broadcast %254 : vector<1x32xf32> to vector<256x32xf32>
    %256 = arith.addf %253, %255 : vector<256x32xf32>
    %cst_80 = arith.constant 0.000000e+00 : f32
    %257 = vector.broadcast %cst_80 : f32 to vector<256x32xf32>
    %258 = arith.maximumf %256, %257 : vector<256x32xf32>
    %259 = arith.addf %251, %258 : vector<256x32xf32>
    %cst_81 = arith.constant dense<0.000000e+00> : vector<256xf32>
    %260 = vector.multi_reduction <add>, %259, %cst_81 [1] : vector<256x32xf32> to vector<256xf32>
    %261 = vector.shape_cast %260 : vector<256xf32> to vector<256x1xf32>
    %cst_82 = arith.constant 3.200000e+01 : f32
    %262 = vector.broadcast %cst_82 : f32 to vector<256x1xf32>
    %263 = arith.divf %261, %262 : vector<256x1xf32>
    %264 = vector.broadcast %263 : vector<256x1xf32> to vector<256x32xf32>
    %265 = arith.subf %259, %264 : vector<256x32xf32>
    %266 = arith.mulf %265, %265 : vector<256x32xf32>
    %cst_83 = arith.constant dense<0.000000e+00> : vector<256xf32>
    %267 = vector.multi_reduction <add>, %266, %cst_83 [1] : vector<256x32xf32> to vector<256xf32>
    %268 = vector.shape_cast %267 : vector<256xf32> to vector<256x1xf32>
    %cst_84 = arith.constant 3.200000e+01 : f32
    %269 = vector.broadcast %cst_84 : f32 to vector<256x1xf32>
    %270 = arith.divf %268, %269 : vector<256x1xf32>
    %271 = vector.broadcast %263 : vector<256x1xf32> to vector<256x32xf32>
    %272 = arith.subf %259, %271 : vector<256x32xf32>
    %cst_85 = arith.constant 9.99999974E-6 : f32
    %273 = vector.broadcast %cst_85 : f32 to vector<256x1xf32>
    %274 = arith.addf %270, %273 : vector<256x1xf32>
    %275 = math.rsqrt %274 : vector<256x1xf32>
    %276 = vector.broadcast %275 : vector<256x1xf32> to vector<256x32xf32>
    %277 = arith.mulf %272, %276 : vector<256x32xf32>
    %c10 = arith.constant 10 : index
    %c0_86 = arith.constant 0 : index
    %278 = vector.load %arg4[%c10, %c0_86] : memref<12x32xf32, #tpu.memory_space<vmem>>, vector<1x32xf32>
    %279 = vector.broadcast %278 : vector<1x32xf32> to vector<256x32xf32>
    %280 = arith.mulf %277, %279 : vector<256x32xf32>
    %c11 = arith.constant 11 : index
    %c0_87 = arith.constant 0 : index
    %281 = vector.load %arg4[%c11, %c0_87] : memref<12x32xf32, #tpu.memory_space<vmem>>, vector<1x32xf32>
    %282 = vector.broadcast %281 : vector<1x32xf32> to vector<256x32xf32>
    %283 = arith.addf %280, %282 : vector<256x32xf32>
    %c0_88 = arith.constant 0 : index
    %c0_89 = arith.constant 0 : index
    %284 = vector.load %arg7[%c0_88, %c0_89] : memref<256x32xf32, #tpu.memory_space<vmem>>, vector<256x32xf32>
    tpu.vector_store %arg7[%c0_88, %c0_89], %283 {strides = array<i32>} : memref<256x32xf32, #tpu.memory_space<vmem>>, vector<256x32xf32>,
    return
  }
  func.func @transform_0(%arg0: i32) -> (i32, i32) {
    %c0_i32 = arith.constant 0 : i32
    %c0_i32_0 = arith.constant 0 : i32
    return %arg0, %c0_i32 : i32, i32
  }
  func.func @transform_1(%arg0: i32) -> (i32, i32) {
    %c0_i32 = arith.constant 0 : i32
    %c0_i32_0 = arith.constant 0 : i32
    return %arg0, %c0_i32 : i32, i32
  }
  func.func @transform_2(%arg0: i32) -> (i32, i32) {
    %c0_i32 = arith.constant 0 : i32
    %c0_i32_0 = arith.constant 0 : i32
    %c0_i32_1 = arith.constant 0 : i32
    return %c0_i32, %c0_i32_0 : i32, i32
  }
  func.func @transform_3(%arg0: i32) -> (i32, i32) {
    %c0_i32 = arith.constant 0 : i32
    %c0_i32_0 = arith.constant 0 : i32
    %c0_i32_1 = arith.constant 0 : i32
    return %c0_i32, %c0_i32_0 : i32, i32
  }
  func.func @transform_4(%arg0: i32) -> (i32, i32) {
    %c0_i32 = arith.constant 0 : i32
    %c0_i32_0 = arith.constant 0 : i32
    %c0_i32_1 = arith.constant 0 : i32
    return %c0_i32, %c0_i32_0 : i32, i32
  }
  func.func @transform_5(%arg0: i32) -> (i32, i32) {
    %c0_i32 = arith.constant 0 : i32
    %c0_i32_0 = arith.constant 0 : i32
    %c0_i32_1 = arith.constant 0 : i32
    return %c0_i32, %c0_i32_0 : i32, i32
  }
  func.func @transform_6(%arg0: i32) -> (i32, i32) {
    %c0_i32 = arith.constant 0 : i32
    %c0_i32_0 = arith.constant 0 : i32
    return %arg0, %c0_i32 : i32, i32
  }
}

</mosaic_0001>

<bundles_post_ra>
// kernel: tpu_custom_call.1
= control target key start
LH: loop header
LB: loop body
LE: loop exit
PB: predicated region body
PF: predicated region fallthrough
CT: control target
= control target key end

     0   :  { %vm128_vm0 = vcmask 261120   ;;  %vm3229_vm2 = vcmask 523264   ;;  %s20081_s2 = inlined_call_operand.vmem [shape: f32[256,32], index: 2, kind: input, shape index: {}]   ;;  %s20082_s1 = inlined_call_operand.vmem [shape: f32[512,32], index: 1, kind: input, shape index: {}]   ;;  %s20083_s0 = inlined_call_operand.vmem [shape: f32[256,32], index: 0, kind: input, shape index: {}]   ;;  %s20084_s3 = inlined_call_operand.vmem [shape: f32[12,32], index: 3, kind: input, shape index: {}]   ;;  %s20085_s4 = inlined_call_operand.vmem [shape: f32[128,32], index: 4, kind: input, shape index: {}]   ;;  %s20086_s5 = inlined_call_operand.vmem [shape: f32[128,64], index: 5, kind: input, shape index: {}]   ;;  %s20087_s6 = inlined_call_operand.vmem [shape: f32[256,32], index: 6, kind: output, shape index: {}]  }
   0x1   :  { %v450_v0 = vld [vmem:[%s20081_s2 + $0x20] sm:$0xff]  ;;  %v451_v1 = vld [vmem:[%s20081_s2 + $0x28] sm:$0xff]  ;;  %v452_v2 = vld [vmem:[%s20081_s2 + $0x30] sm:$0xff] }
   0x2   :  { %v12742_v3 = vpack.c.bf16 %v451_v1, %v450_v0  ;;  %v453_v4 = vld [vmem:[%s20081_s2 + $0x38] sm:$0xff]  ;;  %v13917_v5 = vld [vmem:[%s20082_s1] sm:$0xff]  ;;  %v120_v8 = vld [vmem:[%s20081_s2 + $0x8] sm:$0xff] }
   0x3   :  { %v12746_v6 = vpack.c.bf16 %v453_v4, %v452_v2  ;;  %11518 = vmatprep.mubr.msk.f32.mxu1 %vm128_vm0, %v13917_v5  ;;  %v119_v7 = vld [vmem:[%s20081_s2] sm:$0xff]  ;;  %v121_v9 = vld [vmem:[%s20081_s2 + $0x10] sm:$0xff]  ;;  %v122_v11 = vld [vmem:[%s20081_s2 + $0x18] sm:$0xff] }
   0x4   :  { %12743 = vmatprep.subr.bf16.mxu1 %v12742_v3  ;;  %v12734_v10 = vpack.c.bf16 %v120_v8, %v119_v7  ;;  %v23_v12 = vld [vmem:[%s20083_s0] sm:$0xff]  ;;  %v12738_v13 = vpack.c.bf16 %v122_v11, %v121_v9  ;;  %v13940_v14 = vld [vmem:[%s20082_s1 + $0x8] sm:$0xff]  ;;  %v13945_v15 = vld [vmem:[%s20082_s1 + $0x10] sm:$0xff] }
   0x5   :  { %12745 = vmatpush3.bf16.msra.mxu1 %v12742_v3  ;;  %11462 = vmatprep.mubr.msk.f32.mxu0 %vm128_vm0, %v23_v12  ;;  %v24_v16 = vld [vmem:[%s20083_s0 + $0x8] sm:$0xff]  ;;  %v13957_v17 = vld [vmem:[%s20082_s1 + $0x18] sm:$0xff]  ;;  %v25_v18 = vld [vmem:[%s20083_s0 + $0x10] sm:$0xff] }
   0x6   :  { %12747 = vmatprep.subr.bf16.mxu1 %v12746_v6  ;;  %12735 = vmatprep.subr.bf16.mxu0 %v12734_v10  ;;  %v13965_v19 = vld [vmem:[%s20082_s1 + $0x20] sm:$0xff]  ;;  %v26_v20 = vld [vmem:[%s20083_s0 + $0x18] sm:$0xff]  ;;  %v13979_v21 = vld [vmem:[%s20082_s1 + $0x28] sm:$0xff] }
   0x7   :  { %12737 = vmatpush3.bf16.msra.mxu0 %v12734_v10  ;;  %v27_v22 = vld [vmem:[%s20083_s0 + $0x20] sm:$0xff]  ;;  %v13987_v23 = vld [vmem:[%s20082_s1 + $0x30] sm:$0xff]  ;;  %v28_v24 = vld [vmem:[%s20083_s0 + $0x28] sm:$0xff] }
   0x8   :  { %12739 = vmatprep.subr.bf16.mxu0 %v12738_v13  ;;  %v1036_v25 = vld [vmem:[%s20081_s2 + $0x40] sm:$0xff]  ;;  %v1037_v26 = vld [vmem:[%s20081_s2 + $0x48] sm:$0xff]  ;;  %v14007_v27 = vld [vmem:[%s20082_s1 + $0x38] sm:$0xff] }
   0x9   :  { %12749 = vmatpush3.bf16.msra.mxu1 %v12746_v6  ;;  %v29_v28 = vld [vmem:[%s20083_s0 + $0x30] sm:$0xff]  ;;  %v12750_v29 = vpack.c.bf16 %v1037_v26, %v1036_v25  ;;  %v14015_v30 = vld [vmem:[%s20082_s1 + $0x40] sm:$0xff]  ;;  %v1039_v32 = vld [vmem:[%s20081_s2 + $0x58] sm:$0xff] }
   0xa   :  { %v1038_v31 = vld [vmem:[%s20081_s2 + $0x50] sm:$0xff]  ;;  %v30_v34 = vld [vmem:[%s20083_s0 + $0x38] sm:$0xff]  ;;  %v14035_v35 = vld [vmem:[%s20082_s1 + $0x48] sm:$0xff] }
   0xb   :  { %12741 = vmatpush3.bf16.msra.mxu0 %v12738_v13  ;;  %v12754_v33 = vpack.c.bf16 %v1039_v32, %v1038_v31  ;;  %v31_v36 = vld [vmem:[%s20083_s0 + $0x40] sm:$0xff]  ;;  %v14043_v37 = vld [vmem:[%s20082_s1 + $0x50] sm:$0xff]  ;;  %v32_v38 = vld [vmem:[%s20083_s0 + $0x48] sm:$0xff] }
   0xc   :  { %11519 = vmatmul.mubr.msk.f32.vlgmr.msra.gmra.mrb[0].mxu1 %vm128_vm0, %v13940_v14  ;;  %12751 = vmatprep.subr.bf16.mxu0 %v12750_v29  ;;  %v33_v39 = vld [vmem:[%s20083_s0 + $0x50] sm:$0xff]  ;;  %v14060_v40 = vld [vmem:[%s20082_s1 + $0x58] sm:$0xff]  ;;  %v14065_v41 = vld [vmem:[%s20082_s1 + $0x60] sm:$0xff] }
   0xd   :  { %11521 = vmatprep.mubr.msk.f32.mxu1 %vm128_vm0, %v13945_v15  ;;  %v34_v42 = vld [vmem:[%s20083_s0 + $0x58] sm:$0xff]  ;;  %v35_v43 = vld [vmem:[%s20083_s0 + $0x60] sm:$0xff]  ;;  %v14082_v44 = vld [vmem:[%s20082_s1 + $0x68] sm:$0xff] }
   0xe   :  { %11463 = vmatmul.mubr.msk.f32.vlgmr.msra.gmra.mrb[0].mxu0 %vm128_vm0, %v24_v16  ;;  %v14087_v45 = vld [vmem:[%s20082_s1 + $0x70] sm:$0xff]  ;;  %v36_v46 = vld [vmem:[%s20083_s0 + $0x68] sm:$0xff]  ;;  %v14104_v48 = vld [vmem:[%s20082_s1 + $0x78] sm:$0xff] }
   0xf   :  { %11465 = vmatprep.mubr.msk.f32.mxu0 %vm128_vm0, %v25_v18  ;;  %12753 = vmatpush3.bf16.msra.mxu0 %v12750_v29  ;;  %v37_v47 = vld [vmem:[%s20083_s0 + $0x70] sm:$0xff]  ;;  %v14109_v49 = vld [vmem:[%s20082_s1 + $0x80] sm:$0xff]  ;;  %v38_v50 = vld [vmem:[%s20083_s0 + $0x78] sm:$0xff] }
  0x10   :  { %11522 = vmatmul.mubr.msk.f32.gmra.mrb[2].mxu1 %vm128_vm0, %v13957_v17  ;;  %12755 = vmatprep.subr.bf16.mxu0 %v12754_v33  ;;  %v39_v51 = vld [vmem:[%s20083_s0 + $0x80] sm:$0xff]  ;;  %v14126_v52 = vld [vmem:[%s20082_s1 + $0x88] sm:$0xff]  ;;  %v14131_v53 = vld [vmem:[%s20082_s1 + $0x90] sm:$0xff] }
  0x11   :  { %11524 = vmatprep.mubr.msk.f32.mxu1 %vm128_vm0, %v13965_v19  ;;  %v40_v54 = vld [vmem:[%s20083_s0 + $0x88] sm:$0xff]  ;;  %v41_v55 = vld [vmem:[%s20083_s0 + $0x90] sm:$0xff]  ;;  %v14148_v56 = vld [vmem:[%s20082_s1 + $0x98] sm:$0xff] }
  0x12   :  { %11466 = vmatmul.mubr.msk.f32.gmra.mrb[2].mxu0 %vm128_vm0, %v26_v20  ;;  %v14153_v57 = vld [vmem:[%s20082_s1 + $0xa0] sm:$0xff]  ;;  %v42_v58 = vld [vmem:[%s20083_s0 + $0x98] sm:$0xff]  ;;  %v1793_v60 = vld [vmem:[%s20081_s2 + $0x88] sm:$0xff] }
  0x13   :  { %11468 = vmatprep.mubr.msk.f32.mxu0 %vm128_vm0, %v27_v22  ;;  %12757 = vmatpush3.bf16.msra.mxu0 %v12754_v33  ;;  %v1792_v59 = vld [vmem:[%s20081_s2 + $0x80] sm:$0xff]  ;;  %v14176_v62 = vld [vmem:[%s20082_s1 + $0xa8] sm:$0xff]  ;;  %v14181_v0 = vld [vmem:[%s20082_s1 + $0xb0] sm:$0xff] }
  0x14   :  { %11525 = vmatmul.mubr.msk.f32.gmra.mrb[4].mxu1 %vm128_vm0, %v13979_v21  ;;  %v43_v61 = vld [vmem:[%s20083_s0 + $0xa0] sm:$0xff]  ;;  %v12766_v63 = vpack.c.bf16 %v1793_v60, %v1792_v59  ;;  %v44_v1 = vld [vmem:[%s20083_s0 + $0xa8] sm:$0xff]  ;;  %v45_v2 = vld [vmem:[%s20083_s0 + $0xb0] sm:$0xff] }
  0x15   :  { %11527 = vmatprep.mubr.msk.f32.mxu1 %vm128_vm0, %v13987_v23  ;;  %v14198_v3 = vld [vmem:[%s20082_s1 + $0xb8] sm:$0xff]  ;;  %v14203_v4 = vld [vmem:[%s20082_s1 + $0xc0] sm:$0xff]  ;;  %v14220_v8 = vld [vmem:[%s20082_s1 + $0xc8] sm:$0xff] }
  0x16   :  { %11469 = vmatmul.mubr.msk.f32.gmra.mrb[4].mxu0 %vm128_vm0, %v28_v24  ;;  %12767 = vmatprep.subr.bf16.mxu0 %v12766_v63  ;;  %v46_v6 = vld [vmem:[%s20083_s0 + $0xb8] sm:$0xff]  ;;  %v47_v7 = vld [vmem:[%s20083_s0 + $0xc0] sm:$0xff]  ;;  %v14225_v9 = vld [vmem:[%s20082_s1 + $0xd0] sm:$0xff] }
  0x17   :  { %11471 = vmatprep.mubr.msk.f32.mxu0 %vm128_vm0, %v29_v28  ;;  %v48_v10 = vld [vmem:[%s20083_s0 + $0xc8] sm:$0xff]  ;;  %v49_v11 = vld [vmem:[%s20083_s0 + $0xd0] sm:$0xff]  ;;  %v14242_v12 = vld [vmem:[%s20082_s1 + $0xd8] sm:$0xff] }
  0x18   :  { %11528 = vmatmul.mubr.msk.f32.gmra.mrb[6].mxu1 %vm128_vm0, %v14007_v27  ;;  %v14247_v13 = vld [vmem:[%s20082_s1 + $0xe0] sm:$0xff]  ;;  %v50_v16 = vld [vmem:[%s20083_s0 + $0xd8] sm:$0xff]  ;;  %v14264_v20 = vld [vmem:[%s20082_s1 + $0xe8] sm:$0xff] }
  0x19   :  { %11530 = vmatprep.mubr.msk.f32.mxu1 %vm128_vm0, %v14015_v30  ;;  %v51_v18 = vld [vmem:[%s20083_s0 + $0xe0] sm:$0xff]  ;;  %v14269_v22 = vld [vmem:[%s20082_s1 + $0xf0] sm:$0xff]  ;;  %v52_v24 = vld [vmem:[%s20083_s0 + $0xe8] sm:$0xff] }
  0x1a   :  { %11472 = vmatmul.mubr.msk.f32.gmra.mrb[6].mxu0 %vm128_vm0, %v30_v34  ;;  %v53_v25 = vld [vmem:[%s20083_s0 + $0xf0] sm:$0xff]  ;;  %v14286_v26 = vld [vmem:[%s20082_s1 + $0xf8] sm:$0xff]  ;;  %v14291_v28 = vld [vmem:[%s20082_s1 + $0x100] sm:$0xff] }
  0x1b   :  { %11474 = vmatprep.mubr.msk.f32.mxu0 %vm128_vm0, %v31_v36  ;;  %v54_v29 = vld [vmem:[%s20083_s0 + $0xf8] sm:$0xff]  ;;  %v14305_v31 = vld [vmem:[%s20082_s1 + $0x108] sm:$0xff]  ;;  %v14310_v32 = vld [vmem:[%s20082_s1 + $0x110] sm:$0xff] }
  0x1c   :  { %11531 = vmatmul.mubr.msk.f32.gmra.mrb[8].mxu1 %vm128_vm0, %v14035_v35  ;;  %v14322_v33 = vld [vmem:[%s20082_s1 + $0x118] sm:$0xff]  ;;  %v14327_v34 = vld [vmem:[%s20082_s1 + $0x120] sm:$0xff]  ;;  %v14345_v36 = vld [vmem:[%s20082_s1 + $0x130] sm:$0xff] }
  0x1d   :  { %11533 = vmatprep.mubr.msk.f32.mxu1 %vm128_vm0, %v14043_v37  ;;  %v116_v59 = vld [vmem:[%s20082_s1 + $0x1e8] sm:$0xff]  ;;  %v117_v60 = vld [vmem:[%s20082_s1 + $0x1f0] sm:$0xff]  ;;  %vm14979_vm1 = vmpackc.low %vm128_vm0, %vm128_vm0 }
  0x1e   :  { %11475 = vmatmul.mubr.msk.f32.gmra.mrb[8].mxu0 %vm128_vm0, %v32_v38  ;;  %v14411_v38 = vld [vmem:[%s20082_s1 + $0x160] sm:$0xff] }
  0x1f   :  { %11477 = vmatprep.mubr.msk.f32.mxu0 %vm128_vm0, %v33_v39  ;;  %v1430_v39 = vld [vmem:[%s20081_s2 + $0x60] sm:$0xff] }
  0x20   :  { %11534 = vmatmul.mubr.msk.f32.gmra.mrb[10].mxu1 %vm128_vm0, %v14060_v40 }
  0x21   :  { %11536 = vmatprep.mubr.msk.f32.mxu1 %vm128_vm0, %v14065_v41 }
  0x22   :  { %11478 = vmatmul.mubr.msk.f32.gmra.mrb[10].mxu0 %vm128_vm0, %v34_v42  ;;  %v14426_v42 = vld [vmem:[%s20082_s1 + $0x168] sm:$0xff] }
  0x23   :  { %11480 = vmatprep.mubr.msk.f32.mxu0 %vm128_vm0, %v35_v43  ;;  %v14435_v43 = vld [vmem:[%s20082_s1 + $0x170] sm:$0xff] }
  0x24   :  { %11537 = vmatmul.mubr.msk.f32.gmra.mrb[12].mxu1 %vm128_vm0, %v14082_v44 }
  0x25   :  { %11539 = vmatprep.mubr.msk.f32.mxu1 %vm128_vm0, %v14087_v45 }
  0x26   :  { %11481 = vmatmul.mubr.msk.f32.gmra.mrb[12].mxu0 %vm128_vm0, %v36_v46  ;;  %v1433_v46 = vld [vmem:[%s20081_s2 + $0x78] sm:$0xff] }
  0x27   :  { %11483 = vmatprep.mubr.msk.f32.mxu0 %vm128_vm0, %v37_v47  ;;  %v14475_v47 = vld [vmem:[%s20082_s1 + $0x190] sm:$0xff] }
  0x28   :  { %11540 = vmatmul.mubr.msk.f32.gmra.mrb[14].mxu1 %vm128_vm0, %v14104_v48 }
  0x29   :  { %11542 = vmatprep.mubr.msk.f32.mxu1 %vm128_vm0, %v14109_v49 }
  0x2a   :  { %11484 = vmatmul.mubr.msk.f32.gmra.mrb[14].mxu0 %vm128_vm0, %v38_v50  ;;  %v107_v50 = vld [vmem:[%s20082_s1 + $0x1a0] sm:$0xff] }
  0x2b   :  { %11486 = vmatprep.mubr.msk.f32.mxu0 %vm128_vm0, %v39_v51  ;;  %v108_v51 = vld [vmem:[%s20082_s1 + $0x1a8] sm:$0xff] }
  0x2c   :  { %11543 = vmatmul.mubr.msk.f32.gmra.mrb[16].mxu1 %vm128_vm0, %v14126_v52 }
  0x2d   :  { %11545 = vmatprep.mubr.msk.f32.mxu1 %vm128_vm0, %v14131_v53 }
  0x2e   :  { %11487 = vmatmul.mubr.msk.f32.gmra.mrb[16].mxu0 %vm128_vm0, %v40_v54  ;;  %v111_v54 = vld [vmem:[%s20082_s1 + $0x1c0] sm:$0xff] }
  0x2f   :  { %11489 = vmatprep.mubr.msk.f32.mxu0 %vm128_vm0, %v41_v55  ;;  %v112_v55 = vld [vmem:[%s20082_s1 + $0x1c8] sm:$0xff] }
  0x30   :  { %11546 = vmatmul.mubr.msk.f32.gmra.mrb[18].mxu1 %vm128_vm0, %v14148_v56 }
  0x31   :  { %11548 = vmatprep.mubr.msk.f32.mxu1 %vm128_vm0, %v14153_v57 }
  0x32   :  { %11490 = vmatmul.mubr.msk.f32.gmra.mrb[18].mxu0 %vm128_vm0, %v42_v58  ;;  %v115_v58 = vld [vmem:[%s20082_s1 + $0x1e0] sm:$0xff] }
  0x33   :  { %11492 = vmatprep.mubr.msk.f32.mxu0 %vm128_vm0, %v43_v61  ;;  %v118_v61 = vld [vmem:[%s20082_s1 + $0x1f8] sm:$0xff] }
  0x34   :  { %11549 = vmatmul.mubr.msk.f32.gmra.mrb[20].mxu1 %vm128_vm0, %v14176_v62 }
  0x35   :  { %11551 = vmatprep.mubr.msk.f32.mxu1 %vm128_vm0, %v14181_v0 }
  0x36   :  { %11493 = vmatmul.mubr.msk.f32.gmra.mrb[20].mxu0 %vm128_vm0, %v44_v1  ;;  %v14627_v1 = vld [vmem:[%s20084_s3 + $0x1] ss:$0 sm:$0xff] }
  0x37   :  { %11495 = vmatprep.mubr.msk.f32.mxu0 %vm128_vm0, %v45_v2 }
  0x38   :  { %11552 = vmatmul.mubr.msk.f32.gmra.mrb[22].mxu1 %vm128_vm0, %v14198_v3 }
  0x39   :  { %11554 = vmatprep.mubr.msk.f32.mxu1 %vm128_vm0, %v14203_v4 }
  0x3a   :  { %11496 = vmatmul.mubr.msk.f32.gmra.mrb[22].mxu0 %vm128_vm0, %v46_v6 }
  0x3b   :  { %11498 = vmatprep.mubr.msk.f32.mxu0 %vm128_vm0, %v47_v7 }
  0x3c   :  { %11555 = vmatmul.mubr.msk.f32.gmra.mrb[24].mxu1 %vm128_vm0, %v14220_v8 }
  0x3d   :  { %11557 = vmatprep.mubr.msk.f32.mxu1 %vm128_vm0, %v14225_v9 }
  0x3e   :  { %11499 = vmatmul.mubr.msk.f32.gmra.mrb[24].mxu0 %vm128_vm0, %v48_v10  ;;  %v2381_v10 = vld [vmem:[%s20081_s2 + $0xb8] sm:$0xff] }
  0x3f   :  { %11501 = vmatprep.mubr.msk.f32.mxu0 %vm128_vm0, %v49_v11 }
  0x40   :  { %11558 = vmatmul.mubr.msk.f32.gmra.mrb[26].mxu1 %vm128_vm0, %v14242_v12 }
  0x41   :  { %11560 = vmatprep.mubr.msk.f32.mxu1 %vm128_vm0, %v14247_v13 }
  0x42   :  { %11502 = vmatmul.mubr.msk.f32.gmra.mrb[26].mxu0 %vm128_vm0, %v50_v16 }
  0x43   :  { %11504 = vmatprep.mubr.msk.f32.mxu0 %vm128_vm0, %v51_v18 }
  0x44   :  { %11561 = vmatmul.mubr.msk.f32.gmra.mrb[28].mxu1 %vm128_vm0, %v14264_v20 }
  0x45   :  { %11563 = vmatprep.mubr.msk.f32.mxu1 %vm128_vm0, %v14269_v22 }
  0x46   :  { %11505 = vmatmul.mubr.msk.f32.gmra.mrb[28].mxu0 %vm128_vm0, %v52_v24 }
  0x47   :  { %11507 = vmatprep.mubr.msk.f32.mxu0 %vm128_vm0, %v53_v25 }
  0x48   :  { %11564 = vmatmul.mubr.msk.f32.gmra.mrb[30].mxu1 %vm128_vm0, %v14286_v26 }
  0x49   :  { %11566 = vmatprep.mubr.msk.f32.mxu1 %vm128_vm0, %v14291_v28 }
  0x4a   :  { %11508 = vmatmul.mubr.msk.f32.gmra.mrb[30].mxu0 %vm128_vm0, %v54_v29 }
  0x4b   :  { %11622 = vmatprep.mubr.msk.f32.mxu0 %vm128_vm0, %v13917_v5  ;;  %v14340_v5 = vld [vmem:[%s20082_s1 + $0x128] sm:$0xff] }
  0x4c   :  { %11567 = vmatmul.mubr.msk.f32.gmra.mrb[32].mxu1 %vm128_vm0, %v14305_v31 }
  0x4d   :  { %11569 = vmatprep.mubr.msk.f32.mxu1 %vm128_vm0, %v14310_v32 }
  0x4e   :  { %11623 = vmatmul.mubr.msk.f32.vlgmr.msra.gmra.mrb[32].mxu0 %vm128_vm0, %v13940_v14  ;;  %v14358_v14 = vld [vmem:[%s20082_s1 + $0x138] sm:$0xff] }
  0x4f   :  { %11625 = vmatprep.mubr.msk.f32.mxu0 %vm128_vm0, %v13945_v15  ;;  %12769 = vmatpush3.bf16.msra.mxu0 %v12766_v63  ;;  %v14363_v15 = vld [vmem:[%s20082_s1 + $0x140] sm:$0xff]  ;;  %v2379_v63 = vld [vmem:[%s20081_s2 + $0xa8] sm:$0xff] }
  0x50   :  { %11570 = vmatmul.mubr.msk.f32.gmra.mrb[34].mxu1 %vm128_vm0, %v14322_v33 }
  0x51   :  { %11572 = vmatprep.mubr.msk.f32.mxu1 %vm128_vm0, %v14327_v34 }
  0x52   :  { %11626 = vmatmul.mubr.msk.f32.gmra.mrb[34].mxu0 %vm128_vm0, %v13957_v17  ;;  %v14376_v17 = vld [vmem:[%s20082_s1 + $0x148] sm:$0xff] }
  0x53   :  { %11628 = vmatprep.mubr.msk.f32.mxu0 %vm128_vm0, %v13965_v19  ;;  %v14381_v19 = vld [vmem:[%s20082_s1 + $0x150] sm:$0xff] }
  0x54   :  { %11573 = vmatmul.mubr.msk.f32.gmra.mrb[36].mxu1 %vm128_vm0, %v14340_v5 }
  0x55   :  { %11575 = vmatprep.mubr.msk.f32.mxu1 %vm128_vm0, %v14345_v36 }
  0x56   :  { %11629 = vmatmul.mubr.msk.f32.gmra.mrb[36].mxu0 %vm128_vm0, %v13979_v21  ;;  %v14394_v21 = vld [vmem:[%s20082_s1 + $0x158] sm:$0xff] }
  0x57   :  { %11631 = vmatprep.mubr.msk.f32.mxu0 %vm128_vm0, %v13987_v23  ;;  %v1794_v23 = vld [vmem:[%s20081_s2 + $0x90] sm:$0xff] }
  0x58   :  { %11576 = vmatmul.mubr.msk.f32.gmra.mrb[38].mxu1 %vm128_vm0, %v14358_v14 }
  0x59   :  { %11578 = vmatprep.mubr.msk.f32.mxu1 %vm128_vm0, %v14363_v15 }
  0x5a   :  { %11632 = vmatmul.mubr.msk.f32.gmra.mrb[38].mxu0 %vm128_vm0, %v14007_v27  ;;  %v1795_v27 = vld [vmem:[%s20081_s2 + $0x98] sm:$0xff] }
  0x5b   :  { %11634 = vmatprep.mubr.msk.f32.mxu0 %vm128_vm0, %v14015_v30  ;;  %v12770_v30 = vpack.c.bf16 %v1795_v27, %v1794_v23 }
  0x5c   :  { %11579 = vmatmul.mubr.msk.f32.gmra.mrb[40].mxu1 %vm128_vm0, %v14376_v17 }
  0x5d   :  { %11581 = vmatprep.mubr.msk.f32.mxu1 %vm128_vm0, %v14381_v19  ;;  %12771 = vmatprep.subr.bf16.mxu0 %v12770_v30 }
  0x5e   :  { %11635 = vmatmul.mubr.msk.f32.gmra.mrb[40].mxu0 %vm128_vm0, %v14035_v35  ;;  %v1431_v35 = vld [vmem:[%s20081_s2 + $0x68] sm:$0xff] }
  0x5f   :  { %11637 = vmatprep.mubr.msk.f32.mxu0 %vm128_vm0, %v14043_v37  ;;  %v12758_v37 = vpack.c.bf16 %v1431_v35, %v1430_v39  ;;  %12773 = vmatpush3.bf16.msra.mxu0 %v12770_v30 }
  0x60   :  { %11582 = vmatmul.mubr.msk.f32.gmra.mrb[42].mxu1 %vm128_vm0, %v14394_v21 }
  0x61   :  { %11584 = vmatprep.mubr.msk.f32.mxu1 %vm128_vm0, %v14411_v38  ;;  %12759 = vmatprep.subr.bf16.mxu1 %v12758_v37 }
  0x62   :  { %11638 = vmatmul.mubr.msk.f32.gmra.mrb[42].mxu0 %vm128_vm0, %v14060_v40  ;;  %12761 = vmatpush3.bf16.msra.mxu1 %v12758_v37  ;;  %v14444_v40 = vld [vmem:[%s20082_s1 + $0x178] sm:$0xff] }
  0x63   :  { %11640 = vmatprep.mubr.msk.f32.mxu0 %vm128_vm0, %v14065_v41  ;;  %v14451_v41 = vld [vmem:[%s20082_s1 + $0x180] sm:$0xff] }
  0x64   :  { %11585 = vmatmul.mubr.msk.f32.gmra.mrb[44].mxu1 %vm128_vm0, %v14426_v42 }
  0x65   :  { %11587 = vmatprep.mubr.msk.f32.mxu1 %vm128_vm0, %v14435_v43 }
  0x66   :  { %11641 = vmatmul.mubr.msk.f32.gmra.mrb[44].mxu0 %vm128_vm0, %v14082_v44  ;;  %v14462_v44 = vld [vmem:[%s20082_s1 + $0x188] sm:$0xff] }
  0x67   :  { %11643 = vmatprep.mubr.msk.f32.mxu0 %vm128_vm0, %v14087_v45  ;;  %v1432_v45 = vld [vmem:[%s20081_s2 + $0x70] sm:$0xff] }
  0x68   :  { %11588 = vmatmul.mubr.msk.f32.gmra.mrb[46].mxu1 %vm128_vm0, %v14444_v40 }
  0x69   :  { %11590 = vmatprep.mubr.msk.f32.mxu1 %vm128_vm0, %v14451_v41 }
  0x6a   :  { %11644 = vmatmul.mubr.msk.f32.gmra.mrb[46].mxu0 %vm128_vm0, %v14104_v48  ;;  %v12762_v48 = vpack.c.bf16 %v1433_v46, %v1432_v45 }
  0x6b   :  { %11646 = vmatprep.mubr.msk.f32.mxu0 %vm128_vm0, %v14109_v49  ;;  %v14486_v49 = vld [vmem:[%s20082_s1 + $0x198] sm:$0xff] }
  0x6c   :  { %11591 = vmatmul.mubr.msk.f32.gmra.mrb[48].mxu1 %vm128_vm0, %v14462_v44  ;;  %12763 = vmatprep.subr.bf16.mxu1 %v12762_v48 }
  0x6d   :  { %11593 = vmatprep.mubr.msk.f32.mxu1 %vm128_vm0, %v14475_v47  ;;  %12765 = vmatpush3.bf16.msra.mxu1 %v12762_v48 }
  0x6e   :  { %11647 = vmatmul.mubr.msk.f32.gmra.mrb[48].mxu0 %vm128_vm0, %v14126_v52  ;;  %v109_v52 = vld [vmem:[%s20082_s1 + $0x1b0] sm:$0xff] }
  0x6f   :  { %11649 = vmatprep.mubr.msk.f32.mxu0 %vm128_vm0, %v14131_v53  ;;  %v110_v53 = vld [vmem:[%s20082_s1 + $0x1b8] sm:$0xff] }
  0x70   :  { %11594 = vmatmul.mubr.msk.f32.gmra.mrb[50].mxu1 %vm128_vm0, %v14486_v49 }
  0x71   :  { %11596 = vmatprep.mubr.msk.f32.mxu1 %vm128_vm0, %v107_v50 }
  0x72   :  { %11650 = vmatmul.mubr.msk.f32.gmra.mrb[50].mxu0 %vm128_vm0, %v14148_v56  ;;  %v113_v56 = vld [vmem:[%s20082_s1 + $0x1d0] sm:$0xff] }
  0x73   :  { %11652 = vmatprep.mubr.msk.f32.mxu0 %vm128_vm0, %v14153_v57  ;;  %v114_v57 = vld [vmem:[%s20082_s1 + $0x1d8] sm:$0xff] }
  0x74   :  { %11597 = vmatmul.mubr.msk.f32.gmra.mrb[52].mxu1 %vm128_vm0, %v108_v51 }
  0x75   :  { %11599 = vmatprep.mubr.msk.f32.mxu1 %vm128_vm0, %v109_v52 }
  0x76   :  { %11653 = vmatmul.mubr.msk.f32.gmra.mrb[52].mxu0 %vm128_vm0, %v14176_v62  ;;  %v2378_v62 = vld [vmem:[%s20081_s2 + $0xa0] sm:$0xff] }
  0x77   :  { %11655 = vmatprep.mubr.msk.f32.mxu0 %vm128_vm0, %v14181_v0  ;;  %v12774_v0 = vpack.c.bf16 %v2379_v63, %v2378_v62 }
  0x78   :  { %11600 = vmatmul.mubr.msk.f32.gmra.mrb[54].mxu1 %vm128_vm0, %v110_v53 }
  0x79   :  { %11602 = vmatprep.mubr.msk.f32.mxu1 %vm128_vm0, %v111_v54  ;;  %12775 = vmatprep.subr.bf16.mxu1 %v12774_v0 }
  0x7a   :  { %11656 = vmatmul.mubr.msk.f32.gmra.mrb[54].mxu0 %vm128_vm0, %v14198_v3 }
  0x7b   :  { %11658 = vmatprep.mubr.msk.f32.mxu0 %vm128_vm0, %v14203_v4  ;;  %v14632_v4 = vld [vmem:[%s20084_s3] ss:$0 sm:$0xff] }
  0x7c   :  { %11603 = vmatmul.mubr.msk.f32.gmra.mrb[56].mxu1 %vm128_vm0, %v112_v55 }
  0x7d   :  { %11605 = vmatprep.mubr.msk.f32.mxu1 %vm128_vm0, %v113_v56 }
  0x7e   :  { %11659 = vmatmul.mubr.msk.f32.gmra.mrb[56].mxu0 %vm128_vm0, %v14220_v8 }
  0x7f   :  { %11661 = vmatprep.mubr.msk.f32.mxu0 %vm128_vm0, %v14225_v9  ;;  %v2380_v9 = vld [vmem:[%s20081_s2 + $0xb0] sm:$0xff] }
  0x80   :  { %11606 = vmatmul.mubr.msk.f32.gmra.mrb[58].mxu1 %vm128_vm0, %v114_v57  ;;  %v12778_v24 = vpack.c.bf16 %v2381_v10, %v2380_v9 }
  0x81   :  { %11608 = vmatprep.mubr.msk.f32.mxu1 %vm128_vm0, %v115_v58 }
  0x82   :  { %11662 = vmatmul.mubr.msk.f32.gmra.mrb[58].mxu0 %vm128_vm0, %v14242_v12 }
  0x83   :  { %11664 = vmatprep.mubr.msk.f32.mxu0 %vm128_vm0, %v14247_v13 }
  0x84   :  { %11609 = vmatmul.mubr.msk.f32.gmra.mrb[60].mxu1 %vm128_vm0, %v116_v59 }
  0x85   :  { %11611 = vmatprep.mubr.msk.f32.mxu1 %vm128_vm0, %v117_v60 }
  0x86   :  { %11665 = vmatmul.mubr.msk.f32.gmra.mrb[60].mxu0 %vm128_vm0, %v14264_v20 }
  0x87   :  { %11667 = vmatprep.mubr.msk.f32.mxu0 %vm128_vm0, %v14269_v22 }
  0x88   :  { %11612 = vmatmul.mubr.msk.f32.gmra.mrb[62].mxu1 %vm128_vm0, %v118_v61 }
  0x8a   :  { %11668 = vmatmul.mubr.msk.f32.gmra.mrb[62].mxu0 %vm128_vm0, %v14286_v26 }
  0x8b   :  { %11670 = vmatprep.mubr.msk.f32.mxu0 %vm128_vm0, %v14291_v28 }
  0x8e   :  { %11671 = vmatmul.mubr.msk.f32.gmra.mrb[64].mxu0 %vm128_vm0, %v14305_v31 }
  0x8f   :  { %11673 = vmatprep.mubr.msk.f32.mxu0 %vm128_vm0, %v14310_v32 }
  0x92   :  { %11674 = vmatmul.mubr.msk.f32.gmra.mrb[66].mxu0 %vm128_vm0, %v14322_v33 }
  0x93   :  { %11676 = vmatprep.mubr.msk.f32.mxu0 %vm128_vm0, %v14327_v34 }
  0x96   :  { %11677 = vmatmul.mubr.msk.f32.gmra.mrb[68].mxu0 %vm128_vm0, %v14340_v5 }
  0x97   :  { %11679 = vmatprep.mubr.msk.f32.mxu0 %vm128_vm0, %v14345_v36 }
  0x9a   :  { %11680 = vmatmul.mubr.msk.f32.gmra.mrb[70].mxu0 %vm128_vm0, %v14358_v14 }
  0x9b   :  { %11682 = vmatprep.mubr.msk.f32.mxu0 %vm128_vm0, %v14363_v15 }
  0x9e   :  { %11683 = vmatmul.mubr.msk.f32.gmra.mrb[72].mxu0 %vm128_vm0, %v14376_v17 }
  0x9f   :  { %11685 = vmatprep.mubr.msk.f32.mxu0 %vm128_vm0, %v14381_v19 }
  0xa2   :  { %11686 = vmatmul.mubr.msk.f32.gmra.mrb[74].mxu0 %vm128_vm0, %v14394_v21 }
  0xa3   :  { %11688 = vmatprep.mubr.msk.f32.mxu0 %vm128_vm0, %v14411_v38 }
  0xa6   :  { %11689 = vmatmul.mubr.msk.f32.gmra.mrb[76].mxu0 %vm128_vm0, %v14426_v42 }
  0xa7   :  { %11691 = vmatprep.mubr.msk.f32.mxu0 %vm128_vm0, %v14435_v43 }
  0xaa   :  { %11692 = vmatmul.mubr.msk.f32.gmra.mrb[78].mxu0 %vm128_vm0, %v14444_v40 }
  0xab   :  { %11694 = vmatprep.mubr.msk.f32.mxu0 %vm128_vm0, %v14451_v41 }
  0xae   :  { %11695 = vmatmul.mubr.msk.f32.gmra.mrb[80].mxu0 %vm128_vm0, %v14462_v44 }
  0xaf   :  { %11697 = vmatprep.mubr.msk.f32.mxu0 %vm128_vm0, %v14475_v47 }
  0xb2   :  { %11698 = vmatmul.mubr.msk.f32.gmra.mrb[82].mxu0 %vm128_vm0, %v14486_v49 }
  0xb3   :  { %11700 = vmatprep.mubr.msk.f32.mxu0 %vm128_vm0, %v107_v50 }
  0xb6   :  { %11701 = vmatmul.mubr.msk.f32.gmra.mrb[84].mxu0 %vm128_vm0, %v108_v51 }
  0xb7   :  { %11703 = vmatprep.mubr.msk.f32.mxu0 %vm128_vm0, %v109_v52 }
  0xba   :  { %11704 = vmatmul.mubr.msk.f32.gmra.mrb[86].mxu0 %vm128_vm0, %v110_v53 }
  0xbb   :  { %11706 = vmatprep.mubr.msk.f32.mxu0 %vm128_vm0, %v111_v54 }
  0xbe   :  { %11707 = vmatmul.mubr.msk.f32.gmra.mrb[88].mxu0 %vm128_vm0, %v112_v55 }
  0xbf   :  { %11709 = vmatprep.mubr.msk.f32.mxu0 %vm128_vm0, %v113_v56 }
  0xc2   :  { %11710 = vmatmul.mubr.msk.f32.gmra.mrb[90].mxu0 %vm128_vm0, %v114_v57 }
  0xc3   :  { %11712 = vmatprep.mubr.msk.f32.mxu0 %vm128_vm0, %v115_v58 }
  0xc6   :  { %11713 = vmatmul.mubr.msk.f32.gmra.mrb[92].mxu0 %vm128_vm0, %v116_v59 }
  0xc7   :  { %11715 = vmatprep.mubr.msk.f32.mxu0 %vm128_vm0, %v117_v60 }
  0xca   :  { %11716 = vmatmul.mubr.msk.f32.gmra.mrb[94].mxu0 %vm128_vm0, %v118_v61 }
  0xdf   :  { %v11520_v2 = vpop.f32.mrb[0].mxu1 }
  0xe0   :  { %v717_v3 = vpop.f32.mrb[1].mxu1  ;;  %v723_v7 = vadd.f32 %v11520_v2, %v14627_v1 }
  0xe1   :  { %v718_v6 = vadd.f32 %v14627_v1, %v717_v3  ;;  %v11464_v8 = vpop.f32.mrb[0].mxu0 }
  0xe2   :  { %v297_v12 = vadd.f32 %v11464_v8, %v14632_v4  ;;  %v291_v13 = vpop.f32.mrb[1].mxu0 }
  0xe3   :  { %11782 = vmatprep.mubr.msk.f32.mxu0 %vm128_vm0, %v718_v6  ;;  %v11523_v11 = vpop.f32.mrb[2].mxu1  ;;  %v292_v20 = vadd.f32 %v14632_v4, %v291_v13 }
  0xe4   :  { %11783 = vmatmul.mubr.msk.f32.vlgmr.msra.gmra.mrb[96].mxu0 %vm128_vm0, %v723_v7  ;;  %v733_v16 = vadd.f32 %v11523_v11, %v14627_v1  ;;  %v727_v18 = vpop.f32.mrb[3].mxu1 }
  0xe5   :  { %v728_v22 = vadd.f32 %v14627_v1, %v727_v18  ;;  %v11467_v25 = vpop.f32.mrb[2].mxu0  ;;  %11726 = vmatprep.mubr.msk.f32.mxu1 %vm128_vm0, %v292_v20 }
  0xe6   :  { %v307_v28 = vadd.f32 %v11467_v25, %v14632_v4  ;;  %v301_v29 = vpop.f32.mrb[3].mxu0  ;;  %11727 = vmatmul.mubr.msk.f32.vlgmr.msra.gmra.mrb[64].mxu1 %vm128_vm0, %v297_v12 }
  0xe7   :  { %11785 = vmatprep.mubr.msk.f32.mxu0 %vm128_vm0, %v728_v22  ;;  %v11526_v26 = vpop.f32.mrb[4].mxu1  ;;  %v302_v33 = vadd.f32 %v14632_v4, %v301_v29  ;;  %12777 = vmatpush3.bf16.msra.mxu1 %v12774_v0 }
  0xe8   :  { %11786 = vmatmul.mubr.msk.f32.gmra.mrb[98].mxu0 %vm128_vm0, %v733_v16  ;;  %v743_v31 = vadd.f32 %v11526_v26, %v14627_v1  ;;  %v737_v32 = vpop.f32.mrb[5].mxu1  ;;  %12779 = vmatprep.subr.bf16.mxu1 %v12778_v24 }
  0xe9   :  { %v738_v34 = vadd.f32 %v14627_v1, %v737_v32  ;;  %v11470_v5 = vpop.f32.mrb[4].mxu0  ;;  %11729 = vmatprep.mubr.msk.f32.mxu1 %vm128_vm0, %v302_v33 }
  0xea   :  { %v317_v14 = vadd.f32 %v11470_v5, %v14632_v4  ;;  %v311_v15 = vpop.f32.mrb[5].mxu0  ;;  %11730 = vmatmul.mubr.msk.f32.gmra.mrb[66].mxu1 %vm128_vm0, %v307_v28 }
  0xeb   :  { %11788 = vmatprep.mubr.msk.f32.mxu0 %vm128_vm0, %v738_v34  ;;  %v11529_v36 = vpop.f32.mrb[6].mxu1  ;;  %v312_v21 = vadd.f32 %v14632_v4, %v311_v15  ;;  %12781 = vmatpush3.bf16.msra.mxu1 %v12778_v24 }
  0xec   :  { %11789 = vmatmul.mubr.msk.f32.gmra.mrb[100].mxu0 %vm128_vm0, %v743_v31  ;;  %v753_v17 = vadd.f32 %v11529_v36, %v14627_v1  ;;  %v747_v19 = vpop.f32.mrb[7].mxu1 }
  0xed   :  { %v748_v23 = vadd.f32 %v14627_v1, %v747_v19  ;;  %v11473_v27 = vpop.f32.mrb[6].mxu0  ;;  %11732 = vmatprep.mubr.msk.f32.mxu1 %vm128_vm0, %v312_v21 }
  0xee   :  { %v327_v30 = vadd.f32 %v11473_v27, %v14632_v4  ;;  %v321_v39 = vpop.f32.mrb[7].mxu0  ;;  %11733 = vmatmul.mubr.msk.f32.gmra.mrb[68].mxu1 %vm128_vm0, %v317_v14 }
  0xef   :  { %11791 = vmatprep.mubr.msk.f32.mxu0 %vm128_vm0, %v748_v23  ;;  %v11532_v38 = vpop.f32.mrb[8].mxu1  ;;  %v322_v37 = vadd.f32 %v14632_v4, %v321_v39 }
  0xf0   :  { %11792 = vmatmul.mubr.msk.f32.gmra.mrb[102].mxu0 %vm128_vm0, %v753_v17  ;;  %v763_v35 = vadd.f32 %v11532_v38, %v14627_v1  ;;  %v757_v42 = vpop.f32.mrb[9].mxu1 }
  0xf1   :  { %v758_v43 = vadd.f32 %v14627_v1, %v757_v42  ;;  %v11476_v40 = vpop.f32.mrb[8].mxu0  ;;  %11735 = vmatprep.mubr.msk.f32.mxu1 %vm128_vm0, %v322_v37 }
  0xf2   :  { %v337_v41 = vadd.f32 %v11476_v40, %v14632_v4  ;;  %v331_v44 = vpop.f32.mrb[9].mxu0  ;;  %11736 = vmatmul.mubr.msk.f32.gmra.mrb[70].mxu1 %vm128_vm0, %v327_v30 }
  0xf3   :  { %11794 = vmatprep.mubr.msk.f32.mxu0 %vm128_vm0, %v758_v43  ;;  %v11535_v45 = vpop.f32.mrb[10].mxu1  ;;  %v332_v46 = vadd.f32 %v14632_v4, %v331_v44 }
  0xf4   :  { %11795 = vmatmul.mubr.msk.f32.gmra.mrb[104].mxu0 %vm128_vm0, %v763_v35  ;;  %v773_v47 = vadd.f32 %v11535_v45, %v14627_v1  ;;  %v767_v48 = vpop.f32.mrb[11].mxu1 }
  0xf5   :  { %v768_v49 = vadd.f32 %v14627_v1, %v767_v48  ;;  %v11479_v50 = vpop.f32.mrb[10].mxu0  ;;  %11738 = vmatprep.mubr.msk.f32.mxu1 %vm128_vm0, %v332_v46 }
  0xf6   :  { %v347_v51 = vadd.f32 %v11479_v50, %v14632_v4  ;;  %v341_v52 = vpop.f32.mrb[11].mxu0  ;;  %11739 = vmatmul.mubr.msk.f32.gmra.mrb[72].mxu1 %vm128_vm0, %v337_v41 }
  0xf7   :  { %11797 = vmatprep.mubr.msk.f32.mxu0 %vm128_vm0, %v768_v49  ;;  %v11538_v53 = vpop.f32.mrb[12].mxu1  ;;  %v342_v54 = vadd.f32 %v14632_v4, %v341_v52 }
  0xf8   :  { %11798 = vmatmul.mubr.msk.f32.gmra.mrb[106].mxu0 %vm128_vm0, %v773_v47  ;;  %v783_v55 = vadd.f32 %v11538_v53, %v14627_v1  ;;  %v777_v56 = vpop.f32.mrb[13].mxu1 }
  0xf9   :  { %v778_v57 = vadd.f32 %v14627_v1, %v777_v56  ;;  %v11482_v58 = vpop.f32.mrb[12].mxu0  ;;  %11741 = vmatprep.mubr.msk.f32.mxu1 %vm128_vm0, %v342_v54 }
  0xfa   :  { %v357_v59 = vadd.f32 %v11482_v58, %v14632_v4  ;;  %v351_v60 = vpop.f32.mrb[13].mxu0  ;;  %11742 = vmatmul.mubr.msk.f32.gmra.mrb[74].mxu1 %vm128_vm0, %v347_v51 }
  0xfb   :  { %11800 = vmatprep.mubr.msk.f32.mxu0 %vm128_vm0, %v778_v57  ;;  %v11541_v61 = vpop.f32.mrb[14].mxu1  ;;  %v352_v62 = vadd.f32 %v14632_v4, %v351_v60 }
  0xfc   :  { %11801 = vmatmul.mubr.msk.f32.gmra.mrb[108].mxu0 %vm128_vm0, %v783_v55  ;;  %v793_v63 = vadd.f32 %v11541_v61, %v14627_v1  ;;  %v787_v0 = vpop.f32.mrb[15].mxu1 }
  0xfd   :  { %v788_v2 = vadd.f32 %v14627_v1, %v787_v0  ;;  %v11485_v3 = vpop.f32.mrb[14].mxu0  ;;  %11744 = vmatprep.mubr.msk.f32.mxu1 %vm128_vm0, %v352_v62 }
  0xfe   :  { %v367_v6 = vadd.f32 %v11485_v3, %v14632_v4  ;;  %v361_v7 = vpop.f32.mrb[15].mxu0  ;;  %11745 = vmatmul.mubr.msk.f32.gmra.mrb[76].mxu1 %vm128_vm0, %v357_v59 }
  0xff   :  { %11803 = vmatprep.mubr.msk.f32.mxu0 %vm128_vm0, %v788_v2  ;;  %v11544_v8 = vpop.f32.mrb[16].mxu1  ;;  %v362_v9 = vadd.f32 %v14632_v4, %v361_v7 }
 0x100   :  { %11804 = vmatmul.mubr.msk.f32.gmra.mrb[110].mxu0 %vm128_vm0, %v793_v63  ;;  %v803_v10 = vadd.f32 %v11544_v8, %v14627_v1  ;;  %v797_v11 = vpop.f32.mrb[17].mxu1 }
 0x101   :  { %v798_v12 = vadd.f32 %v14627_v1, %v797_v11  ;;  %v11488_v13 = vpop.f32.mrb[16].mxu0  ;;  %11747 = vmatprep.mubr.msk.f32.mxu1 %vm128_vm0, %v362_v9 }
 0x102   :  { %v377_v16 = vadd.f32 %v11488_v13, %v14632_v4  ;;  %v371_v18 = vpop.f32.mrb[17].mxu0  ;;  %11748 = vmatmul.mubr.msk.f32.gmra.mrb[78].mxu1 %vm128_vm0, %v367_v6 }
 0x103   :  { %11806 = vmatprep.mubr.msk.f32.mxu0 %vm128_vm0, %v798_v12  ;;  %v11547_v20 = vpop.f32.mrb[18].mxu1  ;;  %v372_v22 = vadd.f32 %v14632_v4, %v371_v18  ;;  %v14768_v12 = vld [vmem:[%s20084_s3 + $0x2] ss:$0 sm:$0xff] }
 0x104   :  { %11807 = vmatmul.mubr.msk.f32.gmra.mrb[112].mxu0 %vm128_vm0, %v803_v10  ;;  %v813_v24 = vadd.f32 %v11547_v20, %v14627_v1  ;;  %v807_v25 = vpop.f32.mrb[19].mxu1 }
 0x105   :  { %v808_v26 = vadd.f32 %v14627_v1, %v807_v25  ;;  %v11491_v28 = vpop.f32.mrb[18].mxu0  ;;  %11750 = vmatprep.mubr.msk.f32.mxu1 %vm128_vm0, %v372_v22 }
 0x106   :  { %v387_v29 = vadd.f32 %v11491_v28, %v14632_v4  ;;  %v381_v31 = vpop.f32.mrb[19].mxu0  ;;  %11751 = vmatmul.mubr.msk.f32.gmra.mrb[80].mxu1 %vm128_vm0, %v377_v16 }
 0x107   :  { %11809 = vmatprep.mubr.msk.f32.mxu0 %vm128_vm0, %v808_v26  ;;  %v11550_v32 = vpop.f32.mrb[20].mxu1  ;;  %v382_v33 = vadd.f32 %v14632_v4, %v381_v31 }
 0x108   :  { %11810 = vmatmul.mubr.msk.f32.gmra.mrb[114].mxu0 %vm128_vm0, %v813_v24  ;;  %v823_v34 = vadd.f32 %v11550_v32, %v14627_v1  ;;  %v817_v5 = vpop.f32.mrb[21].mxu1 }
 0x109   :  { %v818_v36 = vadd.f32 %v14627_v1, %v817_v5  ;;  %v11494_v14 = vpop.f32.mrb[20].mxu0  ;;  %11753 = vmatprep.mubr.msk.f32.mxu1 %vm128_vm0, %v382_v33 }
 0x10a   :  { %v397_v15 = vadd.f32 %v11494_v14, %v14632_v4  ;;  %v391_v17 = vpop.f32.mrb[21].mxu0  ;;  %11754 = vmatmul.mubr.msk.f32.gmra.mrb[82].mxu1 %vm128_vm0, %v387_v29 }
 0x10b   :  { %11812 = vmatprep.mubr.msk.f32.mxu0 %vm128_vm0, %v818_v36  ;;  %v11553_v19 = vpop.f32.mrb[22].mxu1  ;;  %v392_v21 = vadd.f32 %v14632_v4, %v391_v17 }
 0x10c   :  { %11813 = vmatmul.mubr.msk.f32.gmra.mrb[116].mxu0 %vm128_vm0, %v823_v34  ;;  %v833_v23 = vadd.f32 %v11553_v19, %v14627_v1  ;;  %v827_v27 = vpop.f32.mrb[23].mxu1 }
 0x10d   :  { %v828_v30 = vadd.f32 %v14627_v1, %v827_v27  ;;  %v11497_v38 = vpop.f32.mrb[22].mxu0  ;;  %11756 = vmatprep.mubr.msk.f32.mxu1 %vm128_vm0, %v392_v21 }
 0x10e   :  { %v407_v39 = vadd.f32 %v11497_v38, %v14632_v4  ;;  %v401_v35 = vpop.f32.mrb[23].mxu0  ;;  %11757 = vmatmul.mubr.msk.f32.gmra.mrb[84].mxu1 %vm128_vm0, %v397_v15 }
 0x10f   :  { %11815 = vmatprep.mubr.msk.f32.mxu0 %vm128_vm0, %v828_v30  ;;  %v11556_v37 = vpop.f32.mrb[24].mxu1  ;;  %v402_v42 = vadd.f32 %v14632_v4, %v401_v35 }
 0x110   :  { %11816 = vmatmul.mubr.msk.f32.gmra.mrb[118].mxu0 %vm128_vm0, %v833_v23  ;;  %v843_v43 = vadd.f32 %v11556_v37, %v14627_v1  ;;  %v837_v40 = vpop.f32.mrb[25].mxu1 }
 0x111   :  { %v838_v41 = vadd.f32 %v14627_v1, %v837_v40  ;;  %v11500_v44 = vpop.f32.mrb[24].mxu0  ;;  %11759 = vmatprep.mubr.msk.f32.mxu1 %vm128_vm0, %v402_v42 }
 0x112   :  { %v417_v45 = vadd.f32 %v11500_v44, %v14632_v4  ;;  %v411_v46 = vpop.f32.mrb[25].mxu0  ;;  %11760 = vmatmul.mubr.msk.f32.gmra.mrb[86].mxu1 %vm128_vm0, %v407_v39 }
 0x113   :  { %11818 = vmatprep.mubr.msk.f32.mxu0 %vm128_vm0, %v838_v41  ;;  %v11559_v47 = vpop.f32.mrb[26].mxu1  ;;  %v412_v48 = vadd.f32 %v14632_v4, %v411_v46 }
 0x114   :  { %11819 = vmatmul.mubr.msk.f32.gmra.mrb[120].mxu0 %vm128_vm0, %v843_v43  ;;  %v853_v49 = vadd.f32 %v11559_v47, %v14627_v1  ;;  %v847_v50 = vpop.f32.mrb[27].mxu1 }
 0x115   :  { %v848_v51 = vadd.f32 %v14627_v1, %v847_v50  ;;  %v11503_v52 = vpop.f32.mrb[26].mxu0  ;;  %11762 = vmatprep.mubr.msk.f32.mxu1 %vm128_vm0, %v412_v48 }
 0x116   :  { %v427_v53 = vadd.f32 %v11503_v52, %v14632_v4  ;;  %v421_v54 = vpop.f32.mrb[27].mxu0  ;;  %11763 = vmatmul.mubr.msk.f32.gmra.mrb[88].mxu1 %vm128_vm0, %v417_v45 }
 0x117   :  { %11821 = vmatprep.mubr.msk.f32.mxu0 %vm128_vm0, %v848_v51  ;;  %v11562_v55 = vpop.f32.mrb[28].mxu1  ;;  %v422_v56 = vadd.f32 %v14632_v4, %v421_v54 }
 0x118   :  { %11822 = vmatmul.mubr.msk.f32.gmra.mrb[122].mxu0 %vm128_vm0, %v853_v49  ;;  %v863_v57 = vadd.f32 %v11562_v55, %v14627_v1  ;;  %v857_v58 = vpop.f32.mrb[29].mxu1 }
 0x119   :  { %v858_v59 = vadd.f32 %v14627_v1, %v857_v58  ;;  %v11506_v60 = vpop.f32.mrb[28].mxu0  ;;  %11765 = vmatprep.mubr.msk.f32.mxu1 %vm128_vm0, %v422_v56 }
 0x11a   :  { %v437_v61 = vadd.f32 %v11506_v60, %v14632_v4  ;;  %v431_v62 = vpop.f32.mrb[29].mxu0  ;;  %11766 = vmatmul.mubr.msk.f32.gmra.mrb[90].mxu1 %vm128_vm0, %v427_v53 }
 0x11b   :  { %11824 = vmatprep.mubr.msk.f32.mxu0 %vm128_vm0, %v858_v59  ;;  %v11565_v63 = vpop.f32.mrb[30].mxu1  ;;  %v432_v0 = vadd.f32 %v14632_v4, %v431_v62 }
 0x11c   :  { %11825 = vmatmul.mubr.msk.f32.gmra.mrb[124].mxu0 %vm128_vm0, %v863_v57  ;;  %v873_v2 = vadd.f32 %v11565_v63, %v14627_v1  ;;  %v867_v3 = vpop.f32.mrb[31].mxu1 }
 0x11d   :  { %v868_v6 = vadd.f32 %v14627_v1, %v867_v3  ;;  %v11509_v7 = vpop.f32.mrb[30].mxu0  ;;  %11768 = vmatprep.mubr.msk.f32.mxu1 %vm128_vm0, %v432_v0 }
 0x11e   :  { %v447_v8 = vadd.f32 %v11509_v7, %v14632_v4  ;;  %v441_v9 = vpop.f32.mrb[31].mxu0  ;;  %11769 = vmatmul.mubr.msk.f32.gmra.mrb[92].mxu1 %vm128_vm0, %v437_v61 }
 0x11f   :  { %11827 = vmatprep.mubr.msk.f32.mxu0 %vm128_vm0, %v868_v6  ;;  %v11568_v10 = vpop.f32.mrb[32].mxu1  ;;  %v442_v11 = vadd.f32 %v14632_v4, %v441_v9 }
 0x120   :  { %11828 = vmatmul.mubr.msk.f32.gmra.mrb[126].mxu0 %vm128_vm0, %v873_v2  ;;  %v883_v13 = vadd.f32 %v11568_v10, %v14627_v1  ;;  %v877_v16 = vpop.f32.mrb[33].mxu1 }
 0x121   :  { %v878_v18 = vadd.f32 %v14627_v1, %v877_v16  ;;  %v11624_v20 = vpop.f32.mrb[32].mxu0  ;;  %11771 = vmatprep.mubr.msk.f32.mxu1 %vm128_vm0, %v442_v11 }
 0x122   :  { %v1117_v22 = vadd.f32 %v11624_v20, %v14768_v12  ;;  %v1111_v24 = vpop.f32.mrb[33].mxu0  ;;  %11772 = vmatmul.mubr.msk.f32.gmra.mrb[94].mxu1 %vm128_vm0, %v447_v8 }
 0x123   :  { %11830 = vmatprep.mubr.msk.f32.mxu0 %vm128_vm0, %v878_v18  ;;  %v11571_v4 = vpop.f32.mrb[34].mxu1  ;;  %v1112_v25 = vadd.f32 %v14768_v12, %v1111_v24 }
 0x124   :  { %11831 = vmatmul.mubr.msk.f32.gmra.mrb[128].mxu0 %vm128_vm0, %v883_v13  ;;  %v893_v26 = vadd.f32 %v11571_v4, %v14627_v1  ;;  %v887_v28 = vpop.f32.mrb[35].mxu1 }
 0x125   :  { %v888_v29 = vadd.f32 %v14627_v1, %v887_v28  ;;  %v11627_v31 = vpop.f32.mrb[34].mxu0  ;;  %11886 = vmatprep.mubr.msk.f32.mxu1 %vm128_vm0, %v1112_v25 }
 0x126   :  { %v1127_v32 = vadd.f32 %v11627_v31, %v14768_v12  ;;  %v1121_v33 = vpop.f32.mrb[35].mxu0  ;;  %11887 = vmatmul.mubr.msk.f32.vlgmr.msra.gmra.mrb[96].mxu1 %vm128_vm0, %v1117_v22 }
 0x127   :  { %11833 = vmatprep.mubr.msk.f32.mxu0 %vm128_vm0, %v888_v29  ;;  %v11574_v34 = vpop.f32.mrb[36].mxu1  ;;  %v1122_v5 = vadd.f32 %v14768_v12, %v1121_v33 }
 0x128   :  { %11834 = vmatmul.mubr.msk.f32.gmra.mrb[130].mxu0 %vm128_vm0, %v893_v26  ;;  %v903_v36 = vadd.f32 %v11574_v34, %v14627_v1  ;;  %v897_v14 = vpop.f32.mrb[37].mxu1 }
 0x129   :  { %v898_v15 = vadd.f32 %v14627_v1, %v897_v14  ;;  %v11630_v17 = vpop.f32.mrb[36].mxu0  ;;  %11889 = vmatprep.mubr.msk.f32.mxu1 %vm128_vm0, %v1122_v5 }
 0x12a   :  { %v1137_v19 = vadd.f32 %v11630_v17, %v14768_v12  ;;  %v1131_v21 = vpop.f32.mrb[37].mxu0  ;;  %11890 = vmatmul.mubr.msk.f32.gmra.mrb[98].mxu1 %vm128_vm0, %v1127_v32 }
 0x12b   :  { %11836 = vmatprep.mubr.msk.f32.mxu0 %vm128_vm0, %v898_v15  ;;  %v11577_v23 = vpop.f32.mrb[38].mxu1  ;;  %v1132_v27 = vadd.f32 %v14768_v12, %v1131_v21 }
 0x12c   :  { %11837 = vmatmul.mubr.msk.f32.gmra.mrb[132].mxu0 %vm128_vm0, %v903_v36  ;;  %v913_v30 = vadd.f32 %v11577_v23, %v14627_v1  ;;  %v907_v38 = vpop.f32.mrb[39].mxu1 }
 0x12d   :  { %v908_v39 = vadd.f32 %v14627_v1, %v907_v38  ;;  %v11633_v35 = vpop.f32.mrb[38].mxu0  ;;  %11892 = vmatprep.mubr.msk.f32.mxu1 %vm128_vm0, %v1132_v27 }
 0x12e   :  { %v1147_v37 = vadd.f32 %v11633_v35, %v14768_v12  ;;  %v1141_v42 = vpop.f32.mrb[39].mxu0  ;;  %11893 = vmatmul.mubr.msk.f32.gmra.mrb[100].mxu1 %vm128_vm0, %v1137_v19 }
 0x12f   :  { %11839 = vmatprep.mubr.msk.f32.mxu0 %vm128_vm0, %v908_v39  ;;  %v11580_v43 = vpop.f32.mrb[40].mxu1  ;;  %v1142_v40 = vadd.f32 %v14768_v12, %v1141_v42 }
 0x130   :  { %11840 = vmatmul.mubr.msk.f32.gmra.mrb[134].mxu0 %vm128_vm0, %v913_v30  ;;  %v923_v41 = vadd.f32 %v11580_v43, %v14627_v1  ;;  %v917_v44 = vpop.f32.mrb[41].mxu1 }
 0x131   :  { %v918_v45 = vadd.f32 %v14627_v1, %v917_v44  ;;  %11895 = vmatprep.mubr.msk.f32.mxu1 %vm128_vm0, %v1142_v40  ;;  %v11636_v46 = vpop.f32.mrb[40].mxu0 }
 0x132   :  { %v1157_v47 = vadd.f32 %v11636_v46, %v14768_v12  ;;  %11896 = vmatmul.mubr.msk.f32.gmra.mrb[102].mxu1 %vm128_vm0, %v1147_v37  ;;  %v1151_v48 = vpop.f32.mrb[41].mxu0 }
 0x133   :  { %11842 = vmatprep.mubr.msk.f32.mxu0 %vm128_vm0, %v918_v45  ;;  %v11583_v49 = vpop.f32.mrb[42].mxu1  ;;  %v1152_v50 = vadd.f32 %v14768_v12, %v1151_v48 }
 0x134   :  { %11843 = vmatmul.mubr.msk.f32.gmra.mrb[136].mxu0 %vm128_vm0, %v923_v41  ;;  %v933_v51 = vadd.f32 %v11583_v49, %v14627_v1  ;;  %v927_v52 = vpop.f32.mrb[43].mxu1 }
 0x135   :  { %v928_v53 = vadd.f32 %v14627_v1, %v927_v52  ;;  %v11639_v54 = vpop.f32.mrb[42].mxu0  ;;  %11898 = vmatprep.mubr.msk.f32.mxu1 %vm128_vm0, %v1152_v50 }
 0x136   :  { %v1167_v55 = vadd.f32 %v11639_v54, %v14768_v12  ;;  %v1161_v56 = vpop.f32.mrb[43].mxu0  ;;  %11899 = vmatmul.mubr.msk.f32.gmra.mrb[104].mxu1 %vm128_vm0, %v1157_v47 }
 0x137   :  { %11845 = vmatprep.mubr.msk.f32.mxu0 %vm128_vm0, %v928_v53  ;;  %v11586_v57 = vpop.f32.mrb[44].mxu1  ;;  %v1162_v58 = vadd.f32 %v14768_v12, %v1161_v56 }
 0x138   :  { %11846 = vmatmul.mubr.msk.f32.gmra.mrb[138].mxu0 %vm128_vm0, %v933_v51  ;;  %v943_v59 = vadd.f32 %v11586_v57, %v14627_v1  ;;  %v937_v60 = vpop.f32.mrb[45].mxu1 }
 0x139   :  { %v938_v61 = vadd.f32 %v14627_v1, %v937_v60  ;;  %v11642_v62 = vpop.f32.mrb[44].mxu0  ;;  %11901 = vmatprep.mubr.msk.f32.mxu1 %vm128_vm0, %v1162_v58 }
 0x13a   :  { %v1177_v63 = vadd.f32 %v11642_v62, %v14768_v12  ;;  %v1171_v0 = vpop.f32.mrb[45].mxu0  ;;  %11902 = vmatmul.mubr.msk.f32.gmra.mrb[106].mxu1 %vm128_vm0, %v1167_v55 }
 0x13b   :  { %11848 = vmatprep.mubr.msk.f32.mxu0 %vm128_vm0, %v938_v61  ;;  %v11589_v2 = vpop.f32.mrb[46].mxu1  ;;  %v1172_v3 = vadd.f32 %v14768_v12, %v1171_v0 }
 0x13c   :  { %11849 = vmatmul.mubr.msk.f32.gmra.mrb[140].mxu0 %vm128_vm0, %v943_v59  ;;  %v953_v6 = vadd.f32 %v11589_v2, %v14627_v1  ;;  %v947_v7 = vpop.f32.mrb[47].mxu1 }
 0x13d   :  { %v948_v8 = vadd.f32 %v14627_v1, %v947_v7  ;;  %v11645_v9 = vpop.f32.mrb[46].mxu0  ;;  %11904 = vmatprep.mubr.msk.f32.mxu1 %vm128_vm0, %v1172_v3 }
 0x13e   :  { %v1187_v10 = vadd.f32 %v11645_v9, %v14768_v12  ;;  %v1181_v11 = vpop.f32.mrb[47].mxu0  ;;  %11905 = vmatmul.mubr.msk.f32.gmra.mrb[108].mxu1 %vm128_vm0, %v1177_v63 }
 0x13f   :  { %11851 = vmatprep.mubr.msk.f32.mxu0 %vm128_vm0, %v948_v8  ;;  %v11592_v13 = vpop.f32.mrb[48].mxu1  ;;  %v1182_v16 = vadd.f32 %v14768_v12, %v1181_v11 }
 0x140   :  { %11852 = vmatmul.mubr.msk.f32.gmra.mrb[142].mxu0 %vm128_vm0, %v953_v6  ;;  %v963_v18 = vadd.f32 %v11592_v13, %v14627_v1  ;;  %v957_v20 = vpop.f32.mrb[49].mxu1 }
 0x141   :  { %v958_v22 = vadd.f32 %v14627_v1, %v957_v20  ;;  %v11648_v24 = vpop.f32.mrb[48].mxu0  ;;  %11907 = vmatprep.mubr.msk.f32.mxu1 %vm128_vm0, %v1182_v16 }
 0x142   :  { %v1197_v4 = vadd.f32 %v11648_v24, %v14768_v12  ;;  %v1191_v25 = vpop.f32.mrb[49].mxu0  ;;  %11908 = vmatmul.mubr.msk.f32.gmra.mrb[110].mxu1 %vm128_vm0, %v1187_v10 }
 0x143   :  { %11854 = vmatprep.mubr.msk.f32.mxu0 %vm128_vm0, %v958_v22  ;;  %v11595_v26 = vpop.f32.mrb[50].mxu1  ;;  %v1192_v28 = vadd.f32 %v14768_v12, %v1191_v25 }
 0x144   :  { %11855 = vmatmul.mubr.msk.f32.gmra.mrb[144].mxu0 %vm128_vm0, %v963_v18  ;;  %v973_v29 = vadd.f32 %v11595_v26, %v14627_v1  ;;  %v967_v31 = vpop.f32.mrb[51].mxu1 }
 0x145   :  { %v968_v32 = vadd.f32 %v14627_v1, %v967_v31  ;;  %v11651_v33 = vpop.f32.mrb[50].mxu0  ;;  %11910 = vmatprep.mubr.msk.f32.mxu1 %vm128_vm0, %v1192_v28 }
 0x146   :  { %v1207_v34 = vadd.f32 %v11651_v33, %v14768_v12  ;;  %v1201_v5 = vpop.f32.mrb[51].mxu0  ;;  %11911 = vmatmul.mubr.msk.f32.gmra.mrb[112].mxu1 %vm128_vm0, %v1197_v4 }
 0x147   :  { %11857 = vmatprep.mubr.msk.f32.mxu0 %vm128_vm0, %v968_v32  ;;  %v11598_v36 = vpop.f32.mrb[52].mxu1  ;;  %v1202_v14 = vadd.f32 %v14768_v12, %v1201_v5 }
 0x148   :  { %11858 = vmatmul.mubr.msk.f32.gmra.mrb[146].mxu0 %vm128_vm0, %v973_v29  ;;  %v983_v15 = vadd.f32 %v11598_v36, %v14627_v1  ;;  %v977_v17 = vpop.f32.mrb[53].mxu1 }
 0x149   :  { %v978_v19 = vadd.f32 %v14627_v1, %v977_v17  ;;  %v11654_v21 = vpop.f32.mrb[52].mxu0  ;;  %11913 = vmatprep.mubr.msk.f32.mxu1 %vm128_vm0, %v1202_v14 }
 0x14a   :  { %v1217_v23 = vadd.f32 %v11654_v21, %v14768_v12  ;;  %v1211_v27 = vpop.f32.mrb[53].mxu0  ;;  %11914 = vmatmul.mubr.msk.f32.gmra.mrb[114].mxu1 %vm128_vm0, %v1207_v34 }
 0x14b   :  { %11860 = vmatprep.mubr.msk.f32.mxu0 %vm128_vm0, %v978_v19  ;;  %v11601_v30 = vpop.f32.mrb[54].mxu1  ;;  %v1212_v38 = vadd.f32 %v14768_v12, %v1211_v27 }
 0x14c   :  { %11861 = vmatmul.mubr.msk.f32.gmra.mrb[148].mxu0 %vm128_vm0, %v983_v15  ;;  %v993_v39 = vadd.f32 %v11601_v30, %v14627_v1  ;;  %v987_v35 = vpop.f32.mrb[55].mxu1 }
 0x14d   :  { %v988_v37 = vadd.f32 %v14627_v1, %v987_v35  ;;  %v11657_v42 = vpop.f32.mrb[54].mxu0  ;;  %11916 = vmatprep.mubr.msk.f32.mxu1 %vm128_vm0, %v1212_v38 }
 0x14e   :  { %v1227_v43 = vadd.f32 %v11657_v42, %v14768_v12  ;;  %v1221_v40 = vpop.f32.mrb[55].mxu0  ;;  %11917 = vmatmul.mubr.msk.f32.gmra.mrb[116].mxu1 %vm128_vm0, %v1217_v23 }
 0x14f   :  { %11863 = vmatprep.mubr.msk.f32.mxu0 %vm128_vm0, %v988_v37  ;;  %v11604_v41 = vpop.f32.mrb[56].mxu1  ;;  %v1222_v44 = vadd.f32 %v14768_v12, %v1221_v40 }
 0x150   :  { %11864 = vmatmul.mubr.msk.f32.gmra.mrb[150].mxu0 %vm128_vm0, %v993_v39  ;;  %v1003_v45 = vadd.f32 %v11604_v41, %v14627_v1  ;;  %v997_v46 = vpop.f32.mrb[57].mxu1 }
 0x151   :  { %v998_v47 = vadd.f32 %v14627_v1, %v997_v46  ;;  %v11660_v48 = vpop.f32.mrb[56].mxu0  ;;  %11919 = vmatprep.mubr.msk.f32.mxu1 %vm128_vm0, %v1222_v44 }
 0x152   :  { %v1237_v49 = vadd.f32 %v11660_v48, %v14768_v12  ;;  %v1231_v50 = vpop.f32.mrb[57].mxu0  ;;  %11920 = vmatmul.mubr.msk.f32.gmra.mrb[118].mxu1 %vm128_vm0, %v1227_v43 }
 0x153   :  { %11866 = vmatprep.mubr.msk.f32.mxu0 %vm128_vm0, %v998_v47  ;;  %v11607_v51 = vpop.f32.mrb[58].mxu1  ;;  %v1232_v52 = vadd.f32 %v14768_v12, %v1231_v50 }
 0x154   :  { %11867 = vmatmul.mubr.msk.f32.gmra.mrb[152].mxu0 %vm128_vm0, %v1003_v45  ;;  %v1013_v53 = vadd.f32 %v11607_v51, %v14627_v1  ;;  %v1007_v54 = vpop.f32.mrb[59].mxu1 }
 0x155   :  { %v1008_v55 = vadd.f32 %v14627_v1, %v1007_v54  ;;  %v11663_v56 = vpop.f32.mrb[58].mxu0  ;;  %11922 = vmatprep.mubr.msk.f32.mxu1 %vm128_vm0, %v1232_v52 }
 0x156   :  { %v1247_v57 = vadd.f32 %v11663_v56, %v14768_v12  ;;  %v1241_v58 = vpop.f32.mrb[59].mxu0  ;;  %11923 = vmatmul.mubr.msk.f32.gmra.mrb[120].mxu1 %vm128_vm0, %v1237_v49 }
 0x157   :  { %v11610_v59 = vpop.f32.mrb[60].mxu1  ;;  %11869 = vmatprep.mubr.msk.f32.mxu0 %vm128_vm0, %v1008_v55  ;;  %v1242_v60 = vadd.f32 %v14768_v12, %v1241_v58 }
 0x158   :  { %v1023_v61 = vadd.f32 %v11610_v59, %v14627_v1  ;;  %v1017_v62 = vpop.f32.mrb[61].mxu1  ;;  %11870 = vmatmul.mubr.msk.f32.gmra.mrb[154].mxu0 %vm128_vm0, %v1013_v53 }
 0x159   :  { %v1018_v63 = vadd.f32 %v14627_v1, %v1017_v62  ;;  %v11666_v0 = vpop.f32.mrb[60].mxu0  ;;  %11925 = vmatprep.mubr.msk.f32.mxu1 %vm128_vm0, %v1242_v60 }
 0x15a   :  { %v1257_v2 = vadd.f32 %v11666_v0, %v14768_v12  ;;  %v1251_v3 = vpop.f32.mrb[61].mxu0  ;;  %11926 = vmatmul.mubr.msk.f32.gmra.mrb[122].mxu1 %vm128_vm0, %v1247_v57 }
 0x15b   :  { %v11613_v6 = vpop.f32.mrb[62].mxu1  ;;  %11872 = vmatprep.mubr.msk.f32.mxu0 %vm128_vm0, %v1018_v63  ;;  %v1252_v7 = vadd.f32 %v14768_v12, %v1251_v3 }
 0x15c   :  { %v1033_v8 = vadd.f32 %v11613_v6, %v14627_v1  ;;  %v1027_v9 = vpop.f32.mrb[63].mxu1  ;;  %11873 = vmatmul.mubr.msk.f32.gmra.mrb[156].mxu0 %vm128_vm0, %v1023_v61 }
 0x15d   :  { %v1028_v10 = vadd.f32 %v14627_v1, %v1027_v9  ;;  %v11669_v11 = vpop.f32.mrb[62].mxu0  ;;  %11928 = vmatprep.mubr.msk.f32.mxu1 %vm128_vm0, %v1252_v7 }
 0x15e   :  { %v1267_v13 = vadd.f32 %v11669_v11, %v14768_v12  ;;  %v1261_v16 = vpop.f32.mrb[63].mxu0  ;;  %11929 = vmatmul.mubr.msk.f32.gmra.mrb[124].mxu1 %vm128_vm0, %v1257_v2 }
 0x15f   :  { %11875 = vmatprep.mubr.msk.f32.mxu0 %vm128_vm0, %v1028_v10  ;;  %v1262_v18 = vadd.f32 %v14768_v12, %v1261_v16 }
 0x160   :  { %11876 = vmatmul.mubr.msk.f32.gmra.mrb[158].mxu0 %vm128_vm0, %v1033_v8 }
 0x161   :  { %v11672_v20 = vpop.f32.mrb[64].mxu0  ;;  %11931 = vmatprep.mubr.msk.f32.mxu1 %vm128_vm0, %v1262_v18 }
 0x162   :  { %v1277_v22 = vadd.f32 %v11672_v20, %v14768_v12  ;;  %v1271_v1 = vpop.f32.mrb[65].mxu0  ;;  %11932 = vmatmul.mubr.msk.f32.gmra.mrb[126].mxu1 %vm128_vm0, %v1267_v13 }
 0x163   :  { %v1272_v24 = vadd.f32 %v14768_v12, %v1271_v1 }
 0x165   :  { %v11675_v4 = vpop.f32.mrb[66].mxu0  ;;  %11934 = vmatprep.mubr.msk.f32.mxu1 %vm128_vm0, %v1272_v24 }
 0x166   :  { %v1287_v25 = vadd.f32 %v11675_v4, %v14768_v12  ;;  %v1281_v26 = vpop.f32.mrb[67].mxu0  ;;  %11935 = vmatmul.mubr.msk.f32.gmra.mrb[128].mxu1 %vm128_vm0, %v1277_v22  ;;  %v14968_v22 = vld [vmem:[%s20084_s3 + $0x4] ss:$0 sm:$0xff] }
 0x167   :  { %v1282_v28 = vadd.f32 %v14768_v12, %v1281_v26  ;;  %v14975_v26 = vld [vmem:[%s20084_s3 + $0x3] ss:$0 sm:$0xff] }
 0x169   :  { %v11678_v29 = vpop.f32.mrb[68].mxu0  ;;  %11937 = vmatprep.mubr.msk.f32.mxu1 %vm128_vm0, %v1282_v28 }
 0x16a   :  { %v1297_v31 = vadd.f32 %v11678_v29, %v14768_v12  ;;  %v1291_v32 = vpop.f32.mrb[69].mxu0  ;;  %11938 = vmatmul.mubr.msk.f32.gmra.mrb[130].mxu1 %vm128_vm0, %v1287_v25 }
 0x16b   :  { %v1292_v33 = vadd.f32 %v14768_v12, %v1291_v32 }
 0x16d   :  { %v11681_v34 = vpop.f32.mrb[70].mxu0  ;;  %11940 = vmatprep.mubr.msk.f32.mxu1 %vm128_vm0, %v1292_v33 }
 0x16e   :  { %v1307_v5 = vadd.f32 %v11681_v34, %v14768_v12  ;;  %v1301_v36 = vpop.f32.mrb[71].mxu0  ;;  %11941 = vmatmul.mubr.msk.f32.gmra.mrb[132].mxu1 %vm128_vm0, %v1297_v31 }
 0x16f   :  { %v1302_v14 = vadd.f32 %v14768_v12, %v1301_v36 }
 0x171   :  { %v11684_v15 = vpop.f32.mrb[72].mxu0  ;;  %11943 = vmatprep.mubr.msk.f32.mxu1 %vm128_vm0, %v1302_v14  ;;  %v14991_v14 = vld [vmem:[%s20085_s4] sm:$0xff] }
 0x172   :  { %v1317_v17 = vadd.f32 %v11684_v15, %v14768_v12  ;;  %v1311_v19 = vpop.f32.mrb[73].mxu0  ;;  %11944 = vmatmul.mubr.msk.f32.gmra.mrb[134].mxu1 %vm128_vm0, %v1307_v5 }
 0x173   :  { %v1312_v21 = vadd.f32 %v14768_v12, %v1311_v19 }
 0x175   :  { %v11687_v23 = vpop.f32.mrb[74].mxu0  ;;  %11946 = vmatprep.mubr.msk.f32.mxu1 %vm128_vm0, %v1312_v21 }
 0x176   :  { %v1327_v27 = vadd.f32 %v11687_v23, %v14768_v12  ;;  %v1321_v30 = vpop.f32.mrb[75].mxu0  ;;  %11947 = vmatmul.mubr.msk.f32.gmra.mrb[136].mxu1 %vm128_vm0, %v1317_v17 }
 0x177   :  { %v1322_v38 = vadd.f32 %v14768_v12, %v1321_v30 }
 0x179   :  { %v11690_v39 = vpop.f32.mrb[76].mxu0  ;;  %11949 = vmatprep.mubr.msk.f32.mxu1 %vm128_vm0, %v1322_v38 }
 0x17a   :  { %v1337_v35 = vadd.f32 %v11690_v39, %v14768_v12  ;;  %v1331_v37 = vpop.f32.mrb[77].mxu0  ;;  %11950 = vmatmul.mubr.msk.f32.gmra.mrb[138].mxu1 %vm128_vm0, %v1327_v27 }
 0x17b   :  { %v1332_v42 = vadd.f32 %v14768_v12, %v1331_v37 }
 0x17d   :  { %v11693_v43 = vpop.f32.mrb[78].mxu0  ;;  %11952 = vmatprep.mubr.msk.f32.mxu1 %vm128_vm0, %v1332_v42 }
 0x17e   :  { %v1347_v40 = vadd.f32 %v11693_v43, %v14768_v12  ;;  %v1341_v41 = vpop.f32.mrb[79].mxu0  ;;  %11953 = vmatmul.mubr.msk.f32.gmra.mrb[140].mxu1 %vm128_vm0, %v1337_v35 }
 0x17f   :  { %v1342_v44 = vadd.f32 %v14768_v12, %v1341_v41 }
 0x181   :  { %v11696_v45 = vpop.f32.mrb[80].mxu0  ;;  %11955 = vmatprep.mubr.msk.f32.mxu1 %vm128_vm0, %v1342_v44 }
 0x182   :  { %v1357_v46 = vadd.f32 %v11696_v45, %v14768_v12  ;;  %v1351_v47 = vpop.f32.mrb[81].mxu0  ;;  %11956 = vmatmul.mubr.msk.f32.gmra.mrb[142].mxu1 %vm128_vm0, %v1347_v40 }
 0x183   :  { %v1352_v48 = vadd.f32 %v14768_v12, %v1351_v47 }
 0x185   :  { %v11699_v49 = vpop.f32.mrb[82].mxu0  ;;  %11958 = vmatprep.mubr.msk.f32.mxu1 %vm128_vm0, %v1352_v48 }
 0x186   :  { %v1367_v50 = vadd.f32 %v11699_v49, %v14768_v12  ;;  %v1361_v51 = vpop.f32.mrb[83].mxu0  ;;  %11959 = vmatmul.mubr.msk.f32.gmra.mrb[144].mxu1 %vm128_vm0, %v1357_v46 }
 0x187   :  { %v1362_v52 = vadd.f32 %v14768_v12, %v1361_v51 }
 0x189   :  { %v11702_v53 = vpop.f32.mrb[84].mxu0  ;;  %11961 = vmatprep.mubr.msk.f32.mxu1 %vm128_vm0, %v1362_v52 }
 0x18a   :  { %v1377_v54 = vadd.f32 %v11702_v53, %v14768_v12  ;;  %v1371_v55 = vpop.f32.mrb[85].mxu0  ;;  %11962 = vmatmul.mubr.msk.f32.gmra.mrb[146].mxu1 %vm128_vm0, %v1367_v50 }
 0x18b   :  { %v1372_v56 = vadd.f32 %v14768_v12, %v1371_v55 }
 0x18d   :  { %v11705_v57 = vpop.f32.mrb[86].mxu0  ;;  %11964 = vmatprep.mubr.msk.f32.mxu1 %vm128_vm0, %v1372_v56 }
 0x18e   :  { %v1387_v58 = vadd.f32 %v11705_v57, %v14768_v12  ;;  %v1381_v59 = vpop.f32.mrb[87].mxu0  ;;  %11965 = vmatmul.mubr.msk.f32.gmra.mrb[148].mxu1 %vm128_vm0, %v1377_v54 }
 0x18f   :  { %v1382_v60 = vadd.f32 %v14768_v12, %v1381_v59 }
 0x191   :  { %v11708_v61 = vpop.f32.mrb[88].mxu0  ;;  %11967 = vmatprep.mubr.msk.f32.mxu1 %vm128_vm0, %v1382_v60 }
 0x192   :  { %v1397_v62 = vadd.f32 %v11708_v61, %v14768_v12  ;;  %v1391_v63 = vpop.f32.mrb[89].mxu0  ;;  %11968 = vmatmul.mubr.msk.f32.gmra.mrb[150].mxu1 %vm128_vm0, %v1387_v58 }
 0x193   :  { %v1392_v0 = vadd.f32 %v14768_v12, %v1391_v63 }
 0x195   :  { %v11711_v2 = vpop.f32.mrb[90].mxu0  ;;  %11970 = vmatprep.mubr.msk.f32.mxu1 %vm128_vm0, %v1392_v0 }
 0x196   :  { %v1407_v3 = vadd.f32 %v11711_v2, %v14768_v12  ;;  %v1401_v6 = vpop.f32.mrb[91].mxu0  ;;  %11971 = vmatmul.mubr.msk.f32.gmra.mrb[152].mxu1 %vm128_vm0, %v1397_v62 }
 0x197   :  { %v1402_v7 = vadd.f32 %v14768_v12, %v1401_v6 }
 0x199   :  { %v11714_v8 = vpop.f32.mrb[92].mxu0  ;;  %11973 = vmatprep.mubr.msk.f32.mxu1 %vm128_vm0, %v1402_v7 }
 0x19a   :  { %v1417_v9 = vadd.f32 %v11714_v8, %v14768_v12  ;;  %v1411_v10 = vpop.f32.mrb[93].mxu0  ;;  %11974 = vmatmul.mubr.msk.f32.gmra.mrb[154].mxu1 %vm128_vm0, %v1407_v3 }
 0x19b   :  { %v1412_v11 = vadd.f32 %v14768_v12, %v1411_v10 }
 0x19d   :  { %v11717_v13 = vpop.f32.mrb[94].mxu0  ;;  %11976 = vmatprep.mubr.msk.f32.mxu1 %vm128_vm0, %v1412_v11 }
 0x19e   :  { %v1427_v16 = vadd.f32 %v11717_v13, %v14768_v12  ;;  %v1421_v18 = vpop.f32.mrb[95].mxu0  ;;  %11977 = vmatmul.mubr.msk.f32.gmra.mrb[156].mxu1 %vm128_vm0, %v1417_v9 }
 0x19f   :  { %v1422_v20 = vadd.f32 %v14768_v12, %v1421_v18 }
 0x1a1   :  { %11979 = vmatprep.mubr.msk.f32.mxu1 %vm128_vm0, %v1422_v20 }
 0x1a2   :  { %11980 = vmatmul.mubr.msk.f32.gmra.mrb[158].mxu1 %vm128_vm0, %v1427_v16 }
 0x1b7   :  { %v11784_v1 = vpop.f32.mrb[96].mxu0 }
 0x1b8   :  { %v2065_v24 = vadd.f32 %v11784_v1, %v14968_v22  ;;  %v2059_v4 = vpop.f32.mrb[97].mxu0 }
 0x1b9   :  { %v2060_v25 = vadd.f32 %v14968_v22, %v2059_v4  ;;  %v11728_v28 = vpop.f32.mrb[64].mxu1 }
 0x1ba   :  { %v1601_v32 = vpop.f32.mrb[65].mxu1  ;;  %v1607_v10 = vadd.f32 %v11728_v28, %v14975_v26 }
 0x1bb   :  { %v12782_v29 = vpack.c.bf16 %v2065_v24, %v2060_v25  ;;  %v11787_v31 = vpop.f32.mrb[98].mxu0  ;;  %v1602_v5 = vadd.f32 %v14975_v26, %v1601_v32 }
 0x1bc   :  { %v2075_v33 = vadd.f32 %v11787_v31, %v14968_v22  ;;  %v2069_v34 = vpop.f32.mrb[99].mxu0 }
 0x1bd   :  { %12784 = vmatprep.subr.msk.bf16.mxu0 %vm14979_vm1, %v12782_v29  ;;  %v2070_v36 = vadd.f32 %v14968_v22, %v2069_v34  ;;  %v14995_v15 = vmul.f32 0.35355338, %v1602_v5  ;;  %v11731_v17 = vpop.f32.mrb[66].mxu1 }
 0x1be   :  { %12787 = vmatpush3.bf16.xpose.msk.msra.mxu0 %vm14979_vm1, %v12782_v29  ;;  %v1611_v23 = vpop.f32.mrb[67].mxu1  ;;  %v15056_v29 = vmul.f32 0.35355338, %v1607_v10  ;;  %v1617_v31 = vadd.f32 %v11731_v17, %v14975_v26 }
 0x1bf   :  { %v12788_v19 = vpack.c.bf16 %v2075_v33, %v2070_v36  ;;  %v11790_v21 = vpop.f32.mrb[100].mxu0  ;;  %v2996_v38 = vmul.f32 %v14991_v14, %v14995_v15  ;;  %v1612_v20 = vadd.f32 %v14975_v26, %v1611_v23  ;;  %v15069_v36 = vld [vmem:[%s20085_s4 + $0x8] sm:$0xff] }
 0x1c0   :  { %v2085_v27 = vadd.f32 %v11790_v21, %v14968_v22  ;;  %v2079_v30 = vpop.f32.mrb[101].mxu0 }
 0x1c1   :  { %12790 = vmatprep.subr.msk.bf16.mxu0 %vm14979_vm1, %v12788_v19  ;;  %v2080_v39 = vadd.f32 %v14968_v22, %v2079_v30  ;;  %v15003_v35 = vpop.f32.mrb[68].mxu1  ;;  %11998 = vmatprep.mubr.msk.f32.mxu0 %vm128_vm0, %v2996_v38 }
 0x1c2   :  { %v15006_v43 = vpop.f32.mrb[69].mxu1 }
 0x1c3   :  { %v12794_v37 = vpack.c.bf16 %v2085_v27, %v2080_v39  ;;  %v11793_v42 = vpop.f32.mrb[102].mxu0  ;;  %v15080_v27 = vld [vmem:[%s20085_s4 + $0x10] sm:$0xff]  ;;  %v2997_v39 = vmul.f32 %v15069_v36, %v15056_v29 }
 0x1c4   :  { %v2095_v40 = vadd.f32 %v11793_v42, %v14968_v22  ;;  %v2089_v41 = vpop.f32.mrb[103].mxu0 }
 0x1c5   :  { %v2090_v44 = vadd.f32 %v14968_v22, %v2089_v41  ;;  %v15012_v45 = vpop.f32.mrb[70].mxu1 }
 0x1c6   :  { %12793 = vmatpush3.bf16.xpose.msk.msra.mxu0 %vm14979_vm1, %v12788_v19  ;;  %v15016_v48 = vpop.f32.mrb[71].mxu1  ;;  %v15071_v19 = vmul.f32 0.35355338, %v1612_v20 }
 0x1c7   :  { %12796 = vmatprep.subr.msk.bf16.mxu0 %vm14979_vm1, %v12794_v37  ;;  %v12800_v46 = vpack.c.bf16 %v2095_v40, %v2090_v44  ;;  %v11796_v47 = vpop.f32.mrb[104].mxu0 }
 0x1c8   :  { %v2105_v49 = vadd.f32 %v11796_v47, %v14968_v22  ;;  %v2099_v50 = vpop.f32.mrb[105].mxu0  ;;  %v15097_v47 = vld [vmem:[%s20085_s4 + $0x18] sm:$0xff] }
 0x1c9   :  { %v2100_v51 = vadd.f32 %v14968_v22, %v2099_v50  ;;  %v11740_v52 = vpop.f32.mrb[72].mxu1 }
 0x1ca   :  { %v15021_v54 = vadd.f32 %v11740_v52, %v14975_v26  ;;  %v1641_v55 = vpop.f32.mrb[73].mxu1  ;;  %v15107_v52 = vld [vmem:[%s20085_s4 + $0x20] sm:$0xff] }
 0x1cb   :  { %v12822_v53 = vpack.c.bf16 %v2105_v49, %v2100_v51  ;;  %v11799_v56 = vpop.f32.mrb[106].mxu0  ;;  %v15024_v57 = vadd.f32 %v14975_v26, %v1641_v55 }
 0x1cc   :  { %v2115_v58 = vadd.f32 %v11799_v56, %v14968_v22  ;;  %v2109_v59 = vpop.f32.mrb[107].mxu0 }
 0x1cd   :  { %v2110_v60 = vadd.f32 %v14968_v22, %v2109_v59  ;;  %v11743_v61 = vpop.f32.mrb[74].mxu1 }
 0x1ce   :  { %12799 = vmatpush3.bf16.xpose.msk.msra.mxu0 %vm14979_vm1, %v12794_v37  ;;  %v15033_v62 = vadd.f32 %v11743_v61, %v14975_v26  ;;  %v1651_v0 = vpop.f32.mrb[75].mxu1  ;;  %v15085_v37 = vmul.f32 0.35355338, %v1617_v31  ;;  %v15154_v31 = vld [vmem:[%s20085_s4 + $0x38] sm:$0xff] }
 0x1cf   :  { %12802 = vmatprep.subr.msk.bf16.mxu0 %vm14979_vm1, %v12800_v46  ;;  %v15035_v63 = vpack.c.bf16 %v2115_v58, %v2110_v60  ;;  %v11802_v2 = vpop.f32.mrb[108].mxu0  ;;  %v15038_v3 = vadd.f32 %v14975_v26, %v1651_v0 }
 0x1d0   :  { %v2125_v6 = vadd.f32 %v11802_v2, %v14968_v22  ;;  %v2119_v7 = vpop.f32.mrb[109].mxu0  ;;  %v2999_v58 = vmul.f32 %v15097_v47, %v15085_v37  ;;  %v3000_v2 = vmul.f32 %v15107_v52, %v14995_v15 }
 0x1d1   :  { %v2120_v8 = vadd.f32 %v14968_v22, %v2119_v7  ;;  %v11746_v9 = vpop.f32.mrb[76].mxu1 }
 0x1d2   :  { %v15044_v11 = vadd.f32 %v11746_v9, %v14975_v26  ;;  %v1661_v13 = vpop.f32.mrb[77].mxu1  ;;  %v15138_v9 = vld [vmem:[%s20085_s4 + $0x30] sm:$0xff] }
 0x1d3   :  { %v15046_v16 = vpack.c.bf16 %v2125_v6, %v2120_v8  ;;  %v11805_v18 = vpop.f32.mrb[110].mxu0  ;;  %v15050_v1 = vadd.f32 %v14975_v26, %v1661_v13 }
 0x1d4   :  { %v2135_v24 = vadd.f32 %v11805_v18, %v14968_v22  ;;  %v2129_v4 = vpop.f32.mrb[111].mxu0 }
 0x1d5   :  { %v2130_v25 = vadd.f32 %v14968_v22, %v2129_v4  ;;  %v11749_v28 = vpop.f32.mrb[78].mxu1 }
 0x1d6   :  { %12805 = vmatpush3.bf16.xpose.msk.msra.mxu0 %vm14979_vm1, %v12800_v46  ;;  %v15062_v32 = vadd.f32 %v11749_v28, %v14975_v26  ;;  %v1671_v33 = vpop.f32.mrb[79].mxu1  ;;  %v2998_v46 = vmul.f32 %v15080_v27, %v15071_v19  ;;  %v3002_v28 = vmul.f32 %v15138_v9, %v15071_v19 }
 0x1d7   :  { %12824 = vmatprep.subr.msk.bf16.mxu0 %vm14979_vm1, %v12822_v53  ;;  %v15064_v34 = vpack.c.bf16 %v2135_v24, %v2130_v25  ;;  %v11808_v5 = vpop.f32.mrb[112].mxu0  ;;  %v15074_v21 = vadd.f32 %v14975_v26, %v1671_v33 }
 0x1d8   :  { %v2145_v17 = vadd.f32 %v11808_v5, %v14968_v22  ;;  %v2139_v23 = vpop.f32.mrb[113].mxu0 }
 0x1d9   :  { %v2140_v30 = vadd.f32 %v14968_v22, %v2139_v23  ;;  %v11752_v38 = vpop.f32.mrb[80].mxu1  ;;  %v15164_v23 = vld [vmem:[%s20085_s4 + $0x40] sm:$0xff] }
 0x1da   :  { %v15088_v42 = vadd.f32 %v11752_v38, %v14975_v26  ;;  %v1681_v40 = vpop.f32.mrb[81].mxu1 }
 0x1db   :  { %v15090_v41 = vpack.c.bf16 %v2145_v17, %v2140_v30  ;;  %v11811_v44 = vpop.f32.mrb[114].mxu0  ;;  %v15100_v49 = vadd.f32 %v14975_v26, %v1681_v40 }
 0x1dc   :  { %v2155_v50 = vadd.f32 %v11811_v44, %v14968_v22  ;;  %v2149_v51 = vpop.f32.mrb[115].mxu0 }
 0x1dd   :  { %11999 = vmatmul.mubr.msk.f32.vlgmr.msra.gmra.mrb[160].mxu0 %vm128_vm0, %v2997_v39  ;;  %v2150_v55 = vadd.f32 %v14968_v22, %v2149_v51  ;;  %v11755_v56 = vpop.f32.mrb[82].mxu1  ;;  %v3003_v39 = vmul.f32 %v15154_v31, %v15085_v37  ;;  %v3004_v51 = vmul.f32 %v15164_v23, %v14995_v15 }
 0x1de   :  { %12001 = vmatprep.mubr.msk.f32.mxu0 %vm128_vm0, %v2998_v46  ;;  %12827 = vmatpush3.bf16.xpose.msk.msra.mxu0 %vm14979_vm1, %v12822_v53  ;;  %v15119_v59 = vadd.f32 %v11755_v56, %v14975_v26  ;;  %v1691_v60 = vpop.f32.mrb[83].mxu1  ;;  %v15128_v53 = vld [vmem:[%s20085_s4 + $0x28] sm:$0xff] }
 0x1df   :  { %12830 = vmatprep.subr.msk.bf16.mxu0 %vm14979_vm1, %v15035_v63  ;;  %v15121_v61 = vpack.c.bf16 %v2155_v50, %v2150_v55  ;;  %v11814_v0 = vpop.f32.mrb[116].mxu0  ;;  %v15131_v6 = vadd.f32 %v14975_v26, %v1691_v60  ;;  %v3001_v18 = vmul.f32 %v15128_v53, %v15056_v29  ;;  %v15196_v60 = vld [vmem:[%s20085_s4 + $0x50] sm:$0xff] }
 0x1e0   :  { %v2165_v7 = vadd.f32 %v11814_v0, %v14968_v22  ;;  %v2159_v8 = vpop.f32.mrb[117].mxu0 }
 0x1e1   :  { %12002 = vmatmul.mubr.msk.f32.gmra.mrb[162].mxu0 %vm128_vm0, %v2999_v58  ;;  %v2160_v10 = vadd.f32 %v14968_v22, %v2159_v8  ;;  %v11758_v13 = vpop.f32.mrb[84].mxu1 }
 0x1e2   :  { %12004 = vmatprep.mubr.msk.f32.mxu0 %vm128_vm0, %v3000_v2  ;;  %v15145_v20 = vadd.f32 %v11758_v13, %v14975_v26  ;;  %v1701_v24 = vpop.f32.mrb[85].mxu1 }
 0x1e3   :  { %v15147_v4 = vpack.c.bf16 %v2165_v7, %v2160_v10  ;;  %v11817_v25 = vpop.f32.mrb[118].mxu0  ;;  %v15157_v33 = vadd.f32 %v14975_v26, %v1701_v24  ;;  %v3006_v24 = vmul.f32 %v15196_v60, %v15071_v19 }
 0x1e4   :  { %v2175_v5 = vadd.f32 %v11817_v25, %v14968_v22  ;;  %v2169_v17 = vpop.f32.mrb[119].mxu0  ;;  %v15212_v25 = vld [vmem:[%s20085_s4 + $0x58] sm:$0xff] }
 0x1e5   :  { %12005 = vmatmul.mubr.msk.f32.gmra.mrb[164].mxu0 %vm128_vm0, %v3001_v18  ;;  %v2170_v30 = vadd.f32 %v14968_v22, %v2169_v17  ;;  %v11761_v38 = vpop.f32.mrb[86].mxu1 }
 0x1e6   :  { %12007 = vmatprep.mubr.msk.f32.mxu0 %vm128_vm0, %v3002_v28  ;;  %12833 = vmatpush3.bf16.xpose.msk.msra.mxu0 %vm14979_vm1, %v15035_v63  ;;  %v15177_v40 = vadd.f32 %v11761_v38, %v14975_v26  ;;  %v1711_v44 = vpop.f32.mrb[87].mxu1  ;;  %v15186_v63 = vld [vmem:[%s20085_s4 + $0x48] sm:$0xff]  ;;  %v15217_v28 = vld [vmem:[%s20085_s4 + $0x60] sm:$0xff] }
 0x1e7   :  { %12836 = vmatprep.subr.msk.bf16.mxu0 %vm14979_vm1, %v15046_v16  ;;  %v15179_v46 = vpack.c.bf16 %v2175_v5, %v2170_v30  ;;  %v11820_v50 = vpop.f32.mrb[120].mxu0  ;;  %v15189_v55 = vadd.f32 %v14975_v26, %v1711_v44  ;;  %v3005_v7 = vmul.f32 %v15186_v63, %v15056_v29  ;;  %v1622_v44 = vadd.f32 %v14975_v26, %v15006_v43 }
 0x1e8   :  { %20246 = vst [vmem:[#allocation2_spill] sm:$0xff] %v15177_v40  ;;  %v2185_v56 = vadd.f32 %v11820_v50, %v14968_v22  ;;  %v2179_v58 = vpop.f32.mrb[121].mxu0  ;;  %v3007_v50 = vmul.f32 %v15212_v25, %v15085_v37 }
 0x1e9   :  { %12008 = vmatmul.mubr.msk.f32.gmra.mrb[166].mxu0 %vm128_vm0, %v3003_v39  ;;  %v2180_v0 = vadd.f32 %v14968_v22, %v2179_v58  ;;  %v11764_v2 = vpop.f32.mrb[88].mxu1 }
 0x1ea   :  { %12010 = vmatprep.mubr.msk.f32.mxu0 %vm128_vm0, %v3004_v51  ;;  %v15203_v8 = vadd.f32 %v11764_v2, %v14975_v26  ;;  %v1721_v10 = vpop.f32.mrb[89].mxu1  ;;  %v3008_v51 = vmul.f32 %v15217_v28, %v14995_v15 }
 0x1eb   :  { %v15205_v13 = vpack.c.bf16 %v2185_v56, %v2180_v0  ;;  %v11823_v18 = vpop.f32.mrb[122].mxu0  ;;  %v15220_v5 = vadd.f32 %v14975_v26, %v1721_v10  ;;  %v15238_v56 = vld [vmem:[%s20085_s4 + $0x68] sm:$0xff]  ;;  %v15256_v10 = vld [vmem:[%s20085_s4 + $0x70] sm:$0xff] }
 0x1ec   :  { %20247 = vst [vmem:[#allocation3_spill] sm:$0xff] %v15203_v8  ;;  %v2195_v17 = vadd.f32 %v11823_v18, %v14968_v22  ;;  %v2189_v30 = vpop.f32.mrb[123].mxu0 }
 0x1ed   :  { %20248 = vst [vmem:[#allocation4_spill] sm:$0xff] %v15220_v5  ;;  %12011 = vmatmul.mubr.msk.f32.gmra.mrb[168].mxu0 %vm128_vm0, %v3005_v7  ;;  %v2190_v38 = vadd.f32 %v14968_v22, %v2189_v30  ;;  %v11767_v39 = vpop.f32.mrb[90].mxu1 }
 0x1ee   :  { %12013 = vmatprep.mubr.msk.f32.mxu0 %vm128_vm0, %v3006_v24  ;;  %12839 = vmatpush3.bf16.xpose.msk.msra.mxu0 %vm14979_vm1, %v15046_v16  ;;  %v1731_v16 = vpop.f32.mrb[91].mxu1  ;;  %v15244_v0 = vadd.f32 %v11767_v39, %v14975_v26  ;;  %v3009_v24 = vmul.f32 %v15238_v56, %v15056_v29  ;;  %v15278_v29 = vld [vmem:[%s20085_s4 + $0x78] sm:$0xff] }
 0x1ef   :  { %12842 = vmatprep.subr.msk.bf16.mxu0 %vm14979_vm1, %v15064_v34  ;;  %v11826_v58 = vpop.f32.mrb[124].mxu0  ;;  %v15247_v43 = vadd.f32 %v14975_v26, %v1731_v16  ;;  %v15249_v2 = vpack.c.bf16 %v2195_v17, %v2190_v38  ;;  %v1627_v17 = vadd.f32 %v15003_v35, %v14975_v26  ;;  %v15264_v38 = vmul.f32 0.35355338, %v1622_v44 }
 0x1f0   :  { %20249 = vst [vmem:[#allocation5_spill] sm:$0xff] %v15244_v0  ;;  %v2205_v15 = vadd.f32 %v11826_v58, %v14968_v22  ;;  %v2199_v7 = vpop.f32.mrb[125].mxu0 }
 0x1f1   :  { %20250 = vst [vmem:[#allocation6_spill] sm:$0xff] %v15247_v43  ;;  %12014 = vmatmul.mubr.msk.f32.gmra.mrb[170].mxu0 %vm128_vm0, %v3007_v50  ;;  %v2200_v18 = vadd.f32 %v14968_v22, %v2199_v7  ;;  %v11770_v30 = vpop.f32.mrb[92].mxu1  ;;  %v1632_v7 = vadd.f32 %v14975_v26, %v15016_v48 }
 0x1f2   :  { %12016 = vmatprep.mubr.msk.f32.mxu0 %vm128_vm0, %v3008_v51  ;;  %v15267_v39 = vadd.f32 %v11770_v30, %v14975_v26  ;;  %v1741_v50 = vpop.f32.mrb[93].mxu1  ;;  %v3010_v51 = vmul.f32 %v15256_v10, %v15071_v19  ;;  %v15290_v19 = vmul.f32 0.35355338, %v1627_v17  ;;  %v1637_v30 = vadd.f32 %v15012_v45, %v14975_v26  ;;  %v15312_v45 = vld [vmem:[%s20084_s3 + $0x5] ss:$0 sm:$0xff] }
 0x1f3   :  { %v15269_v16 = vpack.c.bf16 %v2205_v15, %v2200_v18  ;;  %v11829_v58 = vpop.f32.mrb[126].mxu0  ;;  %v15282_v44 = vadd.f32 %v14975_v26, %v1741_v50  ;;  %v3643_v50 = vmul.f32 %v14991_v14, %v15264_v38 }
 0x1f4   :  { %20251 = vst [vmem:[#allocation7_spill] sm:$0xff] %v15267_v39  ;;  %v2209_v35 = vpop.f32.mrb[127].mxu0  ;;  %v2215_v15 = vadd.f32 %v11829_v58, %v14968_v22 }
 0x1f5   :  { %12017 = vmatmul.mubr.msk.f32.gmra.mrb[172].mxu0 %vm128_vm0, %v3009_v24  ;;  %20252 = vst [vmem:[#allocation8_spill] sm:$0xff] %v15282_v44  ;;  %v2210_v18 = vadd.f32 %v14968_v22, %v2209_v35  ;;  %v11773_v48 = vpop.f32.mrb[94].mxu1  ;;  %v3011_v24 = vmul.f32 %v15278_v29, %v15085_v37  ;;  %v15301_v35 = vmul.f32 0.35355338, %v1632_v7 }
 0x1f6   :  { %12019 = vmatprep.mubr.msk.f32.mxu0 %vm128_vm0, %v3010_v51  ;;  %12845 = vmatpush3.bf16.xpose.msk.msra.mxu0 %vm14979_vm1, %v15064_v34  ;;  %v1751_v58 = vpop.f32.mrb[95].mxu1  ;;  %v15304_v34 = vadd.f32 %v11773_v48, %v14975_v26 }
 0x1f7   :  { %12864 = vmatprep.subr.msk.bf16.mxu0 %vm14979_vm1, %v15090_v41  ;;  %v11832_v51 = vpop.f32.mrb[128].mxu0  ;;  %v15307_v17 = vadd.f32 %v14975_v26, %v1751_v58  ;;  %v15314_v37 = vpack.c.bf16 %v2215_v15, %v2210_v18  ;;  %v3644_v26 = vmul.f32 %v15069_v36, %v15290_v19  ;;  %v15322_v58 = vmul.f32 0.35355338, %v1637_v30 }
 0x1f8   :  { %20253 = vst [vmem:[#allocation9_spill] sm:$0xff] %v15304_v34  ;;  %v2219_v39 = vpop.f32.mrb[129].mxu0  ;;  %v2225_v44 = vadd.f32 %v11832_v51, %v14968_v22 }
 0x1f9   :  { %20254 = vst [vmem:[#allocation10_spill] sm:$0xff] %v15307_v17  ;;  %12020 = vmatmul.mubr.msk.f32.gmra.mrb[174].mxu0 %vm128_vm0, %v3011_v24  ;;  %v2220_v7 = vadd.f32 %v14968_v22, %v2219_v39  ;;  %v11888_v48 = vpop.f32.mrb[96].mxu1  ;;  %v3645_v24 = vmul.f32 %v15080_v27, %v15301_v35  ;;  %v3646_v30 = vmul.f32 %v15097_v47, %v15322_v58 }
 0x1fa   :  { %12078 = vmatprep.mubr.msk.f32.mxu0 %vm128_vm0, %v3643_v50  ;;  %v2651_v34 = vadd.f32 %v11888_v48, %v15312_v45  ;;  %v2645_v17 = vpop.f32.mrb[97].mxu1 }
 0x1fb   :  { %v15325_v15 = vpack.c.bf16 %v2225_v44, %v2220_v7  ;;  %v11835_v18 = vpop.f32.mrb[130].mxu0  ;;  %v2646_v39 = vadd.f32 %v15312_v45, %v2645_v17 }
 0x1fc   :  { %v2229_v51 = vpop.f32.mrb[131].mxu0  ;;  %v2235_v50 = vadd.f32 %v11835_v18, %v14968_v22 }
 0x1fd   :  { %12079 = vmatmul.mubr.msk.f32.vlgmr.msra.gmra.mrb[176].mxu0 %vm128_vm0, %v3644_v26  ;;  %v2230_v0 = vadd.f32 %v14968_v22, %v2229_v51  ;;  %v11891_v44 = vpop.f32.mrb[98].mxu1  ;;  %v12806_v7 = vpack.c.bf16 %v2651_v34, %v2646_v39  ;;  %v3648_v39 = vmul.f32 %v15128_v53, %v15290_v19 }
 0x1fe   :  { %12081 = vmatprep.mubr.msk.f32.mxu0 %vm128_vm0, %v3645_v24  ;;  %12867 = vmatpush3.bf16.xpose.msk.msra.mxu0 %vm14979_vm1, %v15090_v41  ;;  %v2661_v17 = vadd.f32 %v11891_v44, %v15312_v45  ;;  %v2655_v48 = vpop.f32.mrb[99].mxu1  ;;  %v3647_v24 = vmul.f32 %v15107_v52, %v15264_v38 }
 0x1ff   :  { %12870 = vmatprep.subr.msk.bf16.mxu0 %vm14979_vm1, %v15121_v61  ;;  %v15343_v26 = vpack.c.bf16 %v2235_v50, %v2230_v0  ;;  %v11838_v18 = vpop.f32.mrb[132].mxu0  ;;  %v2656_v41 = vadd.f32 %v15312_v45, %v2655_v48  ;;  %12807 = vmatprep.subr.bf16.mxu1 %v12806_v7 }
 0x200   :  { %v2245_v51 = vadd.f32 %v11838_v18, %v14968_v22  ;;  %v2239_v43 = vpop.f32.mrb[133].mxu0  ;;  %12809 = vmatpush3.bf16.msra.mxu1 %v12806_v7 }
 0x201   :  { %12082 = vmatmul.mubr.msk.f32.gmra.mrb[178].mxu0 %vm128_vm0, %v3646_v30  ;;  %v2240_v8 = vadd.f32 %v14968_v22, %v2239_v43  ;;  %v12810_v34 = vpack.c.bf16 %v2661_v17, %v2656_v41  ;;  %v11894_v0 = vpop.f32.mrb[100].mxu1  ;;  %v3649_v30 = vmul.f32 %v15138_v9, %v15301_v35  ;;  %v3650_v41 = vmul.f32 %v15154_v31, %v15322_v58 }
 0x202   :  { %12084 = vmatprep.mubr.msk.f32.mxu0 %vm128_vm0, %v3647_v24  ;;  %v2671_v50 = vadd.f32 %v11894_v0, %v15312_v45  ;;  %v2665_v44 = vpop.f32.mrb[101].mxu1 }
 0x203   :  { %v15355_v48 = vpack.c.bf16 %v2245_v51, %v2240_v8  ;;  %v11841_v18 = vpop.f32.mrb[134].mxu0  ;;  %v2666_v5 = vadd.f32 %v15312_v45, %v2665_v44  ;;  %12811 = vmatprep.subr.bf16.mxu1 %v12810_v34 }
 0x204   :  { %v2255_v43 = vadd.f32 %v11841_v18, %v14968_v22  ;;  %v2249_v17 = vpop.f32.mrb[135].mxu0  ;;  %12813 = vmatpush3.bf16.msra.mxu1 %v12810_v34  ;;  %v3651_v18 = vmul.f32 %v15164_v23, %v15264_v38 }
 0x205   :  { %12085 = vmatmul.mubr.msk.f32.gmra.mrb[180].mxu0 %vm128_vm0, %v3648_v39  ;;  %v2250_v7 = vadd.f32 %v14968_v22, %v2249_v17  ;;  %v12814_v8 = vpack.c.bf16 %v2671_v50, %v2666_v5  ;;  %v11897_v24 = vpop.f32.mrb[102].mxu1 }
 0x206   :  { %12087 = vmatprep.mubr.msk.f32.mxu0 %vm128_vm0, %v3649_v30  ;;  %12873 = vmatpush3.bf16.xpose.msk.msra.mxu0 %vm14979_vm1, %v15121_v61  ;;  %v2681_v51 = vadd.f32 %v11897_v24, %v15312_v45  ;;  %v2675_v0 = vpop.f32.mrb[103].mxu1 }
 0x207   :  { %12876 = vmatprep.subr.msk.bf16.mxu0 %vm14979_vm1, %v15147_v4  ;;  %v15373_v39 = vpack.c.bf16 %v2255_v43, %v2250_v7  ;;  %v11844_v44 = vpop.f32.mrb[136].mxu0  ;;  %v2676_v61 = vadd.f32 %v15312_v45, %v2675_v0  ;;  %12815 = vmatprep.subr.bf16.mxu1 %v12814_v8  ;;  %v3652_v43 = vmul.f32 %v15186_v63, %v15290_v19 }
 0x208   :  { %v2265_v5 = vadd.f32 %v11844_v44, %v14968_v22  ;;  %v2259_v50 = vpop.f32.mrb[137].mxu0  ;;  %12817 = vmatpush3.bf16.msra.mxu1 %v12814_v8  ;;  %v3653_v44 = vmul.f32 %v15196_v60, %v15301_v35 }
 0x209   :  { %12088 = vmatmul.mubr.msk.f32.gmra.mrb[182].mxu0 %vm128_vm0, %v3650_v41  ;;  %v2260_v30 = vadd.f32 %v14968_v22, %v2259_v50  ;;  %v12818_v34 = vpack.c.bf16 %v2681_v51, %v2676_v61  ;;  %v11900_v17 = vpop.f32.mrb[104].mxu1  ;;  %v3654_v50 = vmul.f32 %v15212_v25, %v15322_v58 }
 0x20a   :  { %12090 = vmatprep.mubr.msk.f32.mxu0 %vm128_vm0, %v3651_v18  ;;  %v2691_v7 = vadd.f32 %v11900_v17, %v15312_v45  ;;  %v2685_v24 = vpop.f32.mrb[105].mxu1 }
 0x20b   :  { %v15385_v0 = vpack.c.bf16 %v2265_v5, %v2260_v30  ;;  %v11847_v40 = vpop.f32.mrb[138].mxu0  ;;  %v2686_v41 = vadd.f32 %v15312_v45, %v2685_v24  ;;  %12819 = vmatprep.subr.bf16.mxu1 %v12818_v34 }
 0x20c   :  { %v2275_v18 = vadd.f32 %v11847_v40, %v14968_v22  ;;  %v2269_v51 = vpop.f32.mrb[139].mxu0  ;;  %12821 = vmatpush3.bf16.msra.mxu1 %v12818_v34 }
 0x20d   :  { %12091 = vmatmul.mubr.msk.f32.gmra.mrb[184].mxu0 %vm128_vm0, %v3652_v43  ;;  %v2270_v61 = vadd.f32 %v14968_v22, %v2269_v51  ;;  %v15397_v8 = vpack.c.bf16 %v2691_v7, %v2686_v41  ;;  %v11903_v5 = vpop.f32.mrb[106].mxu1  ;;  %v3656_v51 = vmul.f32 %v15238_v56, %v15290_v19 }
 0x20e   :  { %12093 = vmatprep.mubr.msk.f32.mxu0 %vm128_vm0, %v3653_v44  ;;  %12879 = vmatpush3.bf16.xpose.msk.msra.mxu0 %vm14979_vm1, %v15147_v4  ;;  %v2701_v40 = vadd.f32 %v11903_v5, %v15312_v45  ;;  %v2695_v30 = vpop.f32.mrb[107].mxu1  ;;  %v3655_v4 = vmul.f32 %v15217_v28, %v15264_v38 }
 0x20f   :  { %12882 = vmatprep.subr.msk.bf16.mxu0 %vm14979_vm1, %v15179_v46  ;;  %v15405_v17 = vpack.c.bf16 %v2275_v18, %v2270_v61  ;;  %v11850_v43 = vpop.f32.mrb[140].mxu0  ;;  %v2696_v7 = vadd.f32 %v15312_v45, %v2695_v30  ;;  %12847 = vmatprep.subr.bf16.mxu1 %v15397_v8 }
 0x210   :  { %v2285_v24 = vadd.f32 %v11850_v43, %v14968_v22  ;;  %v2279_v44 = vpop.f32.mrb[141].mxu0  ;;  %v15423_v43 = vmul.f32 0.35355338, %v15024_v57 }
 0x211   :  { %12094 = vmatmul.mubr.msk.f32.gmra.mrb[186].mxu0 %vm128_vm0, %v3654_v50  ;;  %v2280_v34 = vadd.f32 %v14968_v22, %v2279_v44  ;;  %v15415_v41 = vpack.c.bf16 %v2701_v40, %v2696_v7  ;;  %v11906_v18 = vpop.f32.mrb[108].mxu1  ;;  %v3657_v50 = vmul.f32 %v15256_v10, %v15301_v35  ;;  %v15438_v35 = vmul.f32 0.35355338, %v15021_v54 }
 0x212   :  { %12096 = vmatprep.mubr.msk.f32.mxu0 %vm128_vm0, %v3655_v4  ;;  %v2711_v38 = vadd.f32 %v11906_v18, %v15312_v45  ;;  %v2705_v61 = vpop.f32.mrb[109].mxu1  ;;  %v3658_v44 = vmul.f32 %v15278_v29, %v15322_v58  ;;  %v4289_v54 = vmul.f32 %v14991_v14, %v15423_v43 }
 0x213   :  { %20255 = vst [vmem:[#allocation11_spill] sm:$0xff] %v15415_v41  ;;  %v15420_v5 = vpack.c.bf16 %v2285_v24, %v2280_v34  ;;  %v11853_v30 = vpop.f32.mrb[142].mxu0  ;;  %v2706_v4 = vadd.f32 %v15312_v45, %v2705_v61 }
 0x214   :  { %v2295_v40 = vadd.f32 %v11853_v30, %v14968_v22  ;;  %v2289_v7 = vpop.f32.mrb[143].mxu0 }
 0x215   :  { %12097 = vmatmul.mubr.msk.f32.gmra.mrb[188].mxu0 %vm128_vm0, %v3656_v51  ;;  %v2290_v19 = vadd.f32 %v14968_v22, %v2289_v7  ;;  %v15435_v57 = vpack.c.bf16 %v2711_v38, %v2706_v4  ;;  %v11909_v24 = vpop.f32.mrb[110].mxu1  ;;  %v15463_v7 = vmul.f32 0.35355338, %v15033_v62 }
 0x216   :  { %12099 = vmatprep.mubr.msk.f32.mxu0 %vm128_vm0, %v3657_v50  ;;  %12885 = vmatpush3.bf16.xpose.msk.msra.mxu0 %vm14979_vm1, %v15179_v46  ;;  %v2721_v34 = vadd.f32 %v11909_v24, %v15312_v45  ;;  %v2715_v18 = vpop.f32.mrb[111].mxu1  ;;  %v15449_v46 = vmul.f32 0.35355338, %v15038_v3  ;;  %v4290_v3 = vmul.f32 %v15069_v36, %v15438_v35 }
 0x217   :  { %20256 = vst [vmem:[#allocation12_spill] sm:$0xff] %v15435_v57  ;;  %12904 = vmatprep.subr.msk.bf16.mxu0 %vm14979_vm1, %v15205_v13  ;;  %v15446_v51 = vpack.c.bf16 %v2295_v40, %v2290_v19  ;;  %v11856_v61 = vpop.f32.mrb[144].mxu0  ;;  %v2716_v38 = vadd.f32 %v15312_v45, %v2715_v18 }
 0x218   :  { %v2305_v58 = vadd.f32 %v11856_v61, %v14968_v22  ;;  %v2299_v30 = vpop.f32.mrb[145].mxu0 }
 0x219   :  { %12100 = vmatmul.mubr.msk.f32.gmra.mrb[190].mxu0 %vm128_vm0, %v3658_v44  ;;  %v2300_v50 = vadd.f32 %v14968_v22, %v2299_v30  ;;  %v15458_v4 = vpack.c.bf16 %v2721_v34, %v2716_v38  ;;  %v11912_v40 = vpop.f32.mrb[112].mxu1  ;;  %v4291_v44 = vmul.f32 %v15080_v27, %v15449_v46 }
 0x21a   :  { %12158 = vmatprep.mubr.msk.f32.mxu0 %vm128_vm0, %v4289_v54  ;;  %v2731_v19 = vadd.f32 %v11912_v40, %v15312_v45  ;;  %v2725_v24 = vpop.f32.mrb[113].mxu1 }
 0x21b   :  { %20257 = vst [vmem:[#allocation13_spill] sm:$0xff] %v15458_v4  ;;  %v15466_v18 = vpack.c.bf16 %v2305_v58, %v2300_v50  ;;  %v11859_v61 = vpop.f32.mrb[146].mxu0  ;;  %v2726_v54 = vadd.f32 %v15312_v45, %v2725_v24  ;;  %v4292_v50 = vmul.f32 %v15097_v47, %v15463_v7 }
 0x21c   :  { %v2315_v34 = vadd.f32 %v11859_v61, %v14968_v22  ;;  %v2309_v38 = vpop.f32.mrb[147].mxu0 }
 0x21d   :  { %12159 = vmatmul.mubr.msk.f32.vlgmr.msra.gmra.mrb[192].mxu0 %vm128_vm0, %v4290_v3  ;;  %v2310_v30 = vadd.f32 %v14968_v22, %v2309_v38  ;;  %v15478_v62 = vpack.c.bf16 %v2731_v19, %v2726_v54  ;;  %v11915_v58 = vpop.f32.mrb[114].mxu1 }
 0x21e   :  { %12161 = vmatprep.mubr.msk.f32.mxu0 %vm128_vm0, %v4291_v44  ;;  %12907 = vmatpush3.bf16.xpose.msk.msra.mxu0 %vm14979_vm1, %v15205_v13  ;;  %v2741_v40 = vadd.f32 %v11915_v58, %v15312_v45  ;;  %v2735_v3 = vpop.f32.mrb[115].mxu1  ;;  %v4293_v44 = vmul.f32 %v15107_v52, %v15423_v43 }
 0x21f   :  { %20258 = vst [vmem:[#allocation14_spill] sm:$0xff] %v15478_v62  ;;  %12910 = vmatprep.subr.msk.bf16.mxu0 %vm14979_vm1, %v15249_v2  ;;  %v15486_v24 = vpack.c.bf16 %v2315_v34, %v2310_v30  ;;  %v11862_v61 = vpop.f32.mrb[148].mxu0  ;;  %v2736_v13 = vadd.f32 %v15312_v45, %v2735_v3  ;;  %v4294_v34 = vmul.f32 %v15128_v53, %v15438_v35 }
 0x220   :  { %v2325_v19 = vadd.f32 %v11862_v61, %v14968_v22  ;;  %v2319_v54 = vpop.f32.mrb[149].mxu0  ;;  %v4295_v61 = vmul.f32 %v15138_v9, %v15449_v46 }
 0x221   :  { %12162 = vmatmul.mubr.msk.f32.gmra.mrb[194].mxu0 %vm128_vm0, %v4292_v50  ;;  %v2320_v38 = vadd.f32 %v14968_v22, %v2319_v54  ;;  %v15495_v62 = vpack.c.bf16 %v2741_v40, %v2736_v13  ;;  %v11918_v58 = vpop.f32.mrb[116].mxu1 }
 0x222   :  { %12164 = vmatprep.mubr.msk.f32.mxu0 %vm128_vm0, %v4293_v44  ;;  %v2751_v30 = vadd.f32 %v11918_v58, %v15312_v45  ;;  %v2745_v4 = vpop.f32.mrb[117].mxu1 }
 0x223   :  { %20259 = vst [vmem:[#allocation15_spill] sm:$0xff] %v15495_v62  ;;  %v15500_v57 = vpack.c.bf16 %v2325_v19, %v2320_v38  ;;  %v11865_v3 = vpop.f32.mrb[150].mxu0  ;;  %v2746_v50 = vadd.f32 %v15312_v45, %v2745_v4  ;;  %v4296_v38 = vmul.f32 %v15154_v31, %v15463_v7 }
 0x224   :  { %v2335_v54 = vadd.f32 %v11865_v3, %v14968_v22  ;;  %v2329_v44 = vpop.f32.mrb[151].mxu0 }
 0x225   :  { %12165 = vmatmul.mubr.msk.f32.gmra.mrb[196].mxu0 %vm128_vm0, %v4294_v34  ;;  %v2330_v40 = vadd.f32 %v14968_v22, %v2329_v44  ;;  %v15512_v13 = vpack.c.bf16 %v2751_v30, %v2746_v50  ;;  %v11921_v19 = vpop.f32.mrb[118].mxu1 }
 0x226   :  { %12167 = vmatprep.mubr.msk.f32.mxu0 %vm128_vm0, %v4295_v61  ;;  %12913 = vmatpush3.bf16.xpose.msk.msra.mxu0 %vm14979_vm1, %v15249_v2  ;;  %v2761_v4 = vadd.f32 %v11921_v19, %v15312_v45  ;;  %v2755_v58 = vpop.f32.mrb[119].mxu1  ;;  %v4297_v61 = vmul.f32 %v15164_v23, %v15423_v43 }
 0x227   :  { %20260 = vst [vmem:[#allocation16_spill] sm:$0xff] %v15512_v13  ;;  %12916 = vmatprep.subr.msk.bf16.mxu0 %vm14979_vm1, %v15269_v16  ;;  %v15520_v34 = vpack.c.bf16 %v2335_v54, %v2330_v40  ;;  %v11868_v3 = vpop.f32.mrb[152].mxu0  ;;  %v2756_v2 = vadd.f32 %v15312_v45, %v2755_v58  ;;  %v4298_v54 = vmul.f32 %v15186_v63, %v15438_v35 }
 0x228   :  { %v2345_v30 = vadd.f32 %v11868_v3, %v14968_v22  ;;  %v2339_v50 = vpop.f32.mrb[153].mxu0  ;;  %v4299_v3 = vmul.f32 %v15196_v60, %v15449_v46 }
 0x229   :  { %12168 = vmatmul.mubr.msk.f32.gmra.mrb[198].mxu0 %vm128_vm0, %v4296_v38  ;;  %v2340_v44 = vadd.f32 %v14968_v22, %v2339_v50  ;;  %v15529_v13 = vpack.c.bf16 %v2761_v4, %v2756_v2  ;;  %v11924_v19 = vpop.f32.mrb[120].mxu1 }
 0x22a   :  { %12170 = vmatprep.mubr.msk.f32.mxu0 %vm128_vm0, %v4297_v61  ;;  %v2771_v40 = vadd.f32 %v11924_v19, %v15312_v45  ;;  %v2765_v62 = vpop.f32.mrb[121].mxu1 }
 0x22b   :  { %20261 = vst [vmem:[#allocation17_spill] sm:$0xff] %v15529_v13  ;;  %v15534_v41 = vpack.c.bf16 %v2345_v30, %v2340_v44  ;;  %v11871_v58 = vpop.f32.mrb[154].mxu0  ;;  %v2766_v38 = vadd.f32 %v15312_v45, %v2765_v62  ;;  %v4300_v44 = vmul.f32 %v15212_v25, %v15463_v7 }
 0x22c   :  { %v2355_v50 = vadd.f32 %v11871_v58, %v14968_v22  ;;  %v2349_v61 = vpop.f32.mrb[155].mxu0 }
 0x22d   :  { %12171 = vmatmul.mubr.msk.f32.gmra.mrb[200].mxu0 %vm128_vm0, %v4298_v54  ;;  %v2350_v4 = vadd.f32 %v14968_v22, %v2349_v61  ;;  %v15546_v2 = vpack.c.bf16 %v2771_v40, %v2766_v38  ;;  %v11927_v30 = vpop.f32.mrb[122].mxu1 }
 0x22e   :  { %12173 = vmatprep.mubr.msk.f32.mxu0 %vm128_vm0, %v4299_v3  ;;  %12919 = vmatpush3.bf16.xpose.msk.msra.mxu0 %vm14979_vm1, %v15269_v16  ;;  %v2781_v62 = vadd.f32 %v11927_v30, %v15312_v45  ;;  %v2775_v19 = vpop.f32.mrb[123].mxu1  ;;  %v4301_v3 = vmul.f32 %v15217_v28, %v15423_v43 }
 0x22f   :  { %20262 = vst [vmem:[#allocation18_spill] sm:$0xff] %v15546_v2  ;;  %12922 = vmatprep.subr.msk.bf16.mxu0 %vm14979_vm1, %v15314_v37  ;;  %v15554_v54 = vpack.c.bf16 %v2355_v50, %v2350_v4  ;;  %v11874_v58 = vpop.f32.mrb[156].mxu0  ;;  %v2776_v16 = vadd.f32 %v15312_v45, %v2775_v19  ;;  %v4302_v50 = vmul.f32 %v15238_v56, %v15438_v35 }
 0x230   :  { %v2365_v40 = vadd.f32 %v11874_v58, %v14968_v22  ;;  %v2359_v38 = vpop.f32.mrb[157].mxu0  ;;  %v15571_v58 = vmul.f32 0.35355338, %v15050_v1 }
 0x231   :  { %12174 = vmatmul.mubr.msk.f32.gmra.mrb[202].mxu0 %vm128_vm0, %v4300_v44  ;;  %v2360_v61 = vadd.f32 %v14968_v22, %v2359_v38  ;;  %v15563_v2 = vpack.c.bf16 %v2781_v62, %v2776_v16  ;;  %v11930_v30 = vpop.f32.mrb[124].mxu1  ;;  %v4303_v44 = vmul.f32 %v15256_v10, %v15449_v46  ;;  %v15586_v46 = vmul.f32 0.35355338, %v15044_v11 }
 0x232   :  { %12176 = vmatprep.mubr.msk.f32.mxu0 %vm128_vm0, %v4301_v3  ;;  %v2791_v4 = vadd.f32 %v11930_v30, %v15312_v45  ;;  %v2785_v43 = vpop.f32.mrb[125].mxu1  ;;  %v4304_v38 = vmul.f32 %v15278_v29, %v15463_v7 }
 0x233   :  { %20263 = vst [vmem:[#allocation19_spill] sm:$0xff] %v15563_v2  ;;  %v15568_v13 = vpack.c.bf16 %v2365_v40, %v2360_v61  ;;  %v11877_v19 = vpop.f32.mrb[158].mxu0  ;;  %v2786_v3 = vadd.f32 %v15312_v45, %v2785_v43  ;;  %v4936_v43 = vmul.f32 %v15069_v36, %v15586_v46 }
 0x234   :  { %v2375_v62 = vadd.f32 %v11877_v19, %v14968_v22  ;;  %v2369_v16 = vpop.f32.mrb[159].mxu0  ;;  %v15609_v19 = vmul.f32 0.35355338, %v15062_v32 }
 0x235   :  { %12177 = vmatmul.mubr.msk.f32.gmra.mrb[204].mxu0 %vm128_vm0, %v4302_v50  ;;  %v2370_v35 = vadd.f32 %v14968_v22, %v2369_v16  ;;  %v15583_v1 = vpack.c.bf16 %v2791_v4, %v2786_v3  ;;  %v11933_v40 = vpop.f32.mrb[126].mxu1  ;;  %v4935_v50 = vmul.f32 %v14991_v14, %v15571_v58 }
 0x236   :  { %12179 = vmatprep.mubr.msk.f32.mxu0 %vm128_vm0, %v4303_v44  ;;  %12925 = vmatpush3.bf16.xpose.msk.msra.mxu0 %vm14979_vm1, %v15314_v37  ;;  %v2801_v22 = vadd.f32 %v11933_v40, %v15312_v45  ;;  %v2795_v61 = vpop.f32.mrb[127].mxu1  ;;  %v15597_v37 = vmul.f32 0.35355338, %v15074_v21  ;;  %v4938_v16 = vmul.f32 %v15097_v47, %v15609_v19 }
 0x237   :  { %20264 = vst [vmem:[#allocation20_spill] sm:$0xff] %v15583_v1  ;;  %12944 = vmatprep.subr.msk.bf16.mxu0 %vm14979_vm1, %v15325_v15  ;;  %v15594_v30 = vpack.c.bf16 %v2375_v62, %v2370_v35  ;;  %v2796_v11 = vadd.f32 %v15312_v45, %v2795_v61 }
 0x238   :  { %v4937_v14 = vmul.f32 %v15080_v27, %v15597_v37 }
 0x239   :  { %12180 = vmatmul.mubr.msk.f32.gmra.mrb[206].mxu0 %vm128_vm0, %v4304_v38  ;;  %v15604_v7 = vpack.c.bf16 %v2801_v22, %v2796_v11  ;;  %v11936_v4 = vpop.f32.mrb[128].mxu1  ;;  %v4939_v38 = vmul.f32 %v15107_v52, %v15571_v58 }
 0x23a   :  { %12238 = vmatprep.mubr.msk.f32.mxu0 %vm128_vm0, %v4935_v50  ;;  %v2811_v21 = vadd.f32 %v11936_v4, %v15312_v45  ;;  %v2805_v44 = vpop.f32.mrb[129].mxu1  ;;  %v4940_v50 = vmul.f32 %v15128_v53, %v15586_v46 }
 0x23b   :  { %20265 = vst [vmem:[#allocation21_spill] sm:$0xff] %v15604_v7  ;;  %v2806_v3 = vadd.f32 %v15312_v45, %v2805_v44 }
 0x23d   :  { %12239 = vmatmul.mubr.msk.f32.vlgmr.msra.gmra.mrb[208].mxu0 %vm128_vm0, %v4936_v43  ;;  %v15620_v62 = vpack.c.bf16 %v2811_v21, %v2806_v3  ;;  %v11939_v32 = vpop.f32.mrb[130].mxu1  ;;  %v4941_v43 = vmul.f32 %v15138_v9, %v15597_v37  ;;  %v4942_v3 = vmul.f32 %v15154_v31, %v15609_v19 }
 0x23e   :  { %12241 = vmatprep.mubr.msk.f32.mxu0 %vm128_vm0, %v4937_v14  ;;  %12947 = vmatpush3.bf16.xpose.msk.msra.mxu0 %vm14979_vm1, %v15325_v15  ;;  %v2821_v35 = vadd.f32 %v11939_v32, %v15312_v45  ;;  %v2815_v40 = vpop.f32.mrb[131].mxu1 }
 0x23f   :  { %20266 = vst [vmem:[#allocation22_spill] sm:$0xff] %v15620_v62  ;;  %12950 = vmatprep.subr.msk.bf16.mxu0 %vm14979_vm1, %v15343_v26  ;;  %v2816_v22 = vadd.f32 %v15312_v45, %v2815_v40 }
 0x241   :  { %12242 = vmatmul.mubr.msk.f32.gmra.mrb[210].mxu0 %vm128_vm0, %v4938_v16  ;;  %v15633_v15 = vpack.c.bf16 %v2821_v35, %v2816_v22  ;;  %v11942_v61 = vpop.f32.mrb[132].mxu1  ;;  %v4943_v35 = vmul.f32 %v15164_v23, %v15571_v58  ;;  %v4944_v22 = vmul.f32 %v15186_v63, %v15586_v46 }
 0x242   :  { %12244 = vmatprep.mubr.msk.f32.mxu0 %vm128_vm0, %v4939_v38  ;;  %v2831_v11 = vadd.f32 %v11942_v61, %v15312_v45  ;;  %v2825_v4 = vpop.f32.mrb[133].mxu1 }
 0x243   :  { %20267 = vst [vmem:[#allocation23_spill] sm:$0xff] %v15633_v15  ;;  %v2826_v21 = vadd.f32 %v15312_v45, %v2825_v4 }
 0x245   :  { %12245 = vmatmul.mubr.msk.f32.gmra.mrb[212].mxu0 %vm128_vm0, %v4940_v50  ;;  %v15646_v44 = vpack.c.bf16 %v2831_v11, %v2826_v21  ;;  %v11945_v14 = vpop.f32.mrb[134].mxu1  ;;  %v4945_v11 = vmul.f32 %v15196_v60, %v15597_v37 }
 0x246   :  { %12247 = vmatprep.mubr.msk.f32.mxu0 %vm128_vm0, %v4941_v43  ;;  %12953 = vmatpush3.bf16.xpose.msk.msra.mxu0 %vm14979_vm1, %v15343_v26  ;;  %v2841_v32 = vadd.f32 %v11945_v14, %v15312_v45  ;;  %v2835_v16 = vpop.f32.mrb[135].mxu1  ;;  %v4946_v14 = vmul.f32 %v15212_v25, %v15609_v19 }
 0x247   :  { %20268 = vst [vmem:[#allocation24_spill] sm:$0xff] %v15646_v44  ;;  %12956 = vmatprep.subr.msk.bf16.mxu0 %vm14979_vm1, %v15355_v48  ;;  %v2836_v40 = vadd.f32 %v15312_v45, %v2835_v16  ;;  %v4947_v16 = vmul.f32 %v15217_v28, %v15571_v58  ;;  %v4949_v58 = vmul.f32 %v15256_v10, %v15597_v37 }
 0x249   :  { %12248 = vmatmul.mubr.msk.f32.gmra.mrb[214].mxu0 %vm128_vm0, %v4942_v3  ;;  %v15659_v26 = vpack.c.bf16 %v2841_v32, %v2836_v40  ;;  %v11948_v38 = vpop.f32.mrb[136].mxu1 }
 0x24a   :  { %12250 = vmatprep.mubr.msk.f32.mxu0 %vm128_vm0, %v4943_v35  ;;  %v2851_v61 = vadd.f32 %v11948_v38, %v15312_v45  ;;  %v2845_v50 = vpop.f32.mrb[137].mxu1  ;;  %v4948_v38 = vmul.f32 %v15238_v56, %v15586_v46 }
 0x24b   :  { %20269 = vst [vmem:[#allocation25_spill] sm:$0xff] %v15659_v26  ;;  %v2846_v4 = vadd.f32 %v15312_v45, %v2845_v50  ;;  %v15691_v50 = vmul.f32 0.35355338, %v15100_v49  ;;  %v4950_v49 = vmul.f32 %v15278_v29, %v15609_v19 }
 0x24d   :  { %12251 = vmatmul.mubr.msk.f32.gmra.mrb[216].mxu0 %vm128_vm0, %v4944_v22  ;;  %v15672_v43 = vpack.c.bf16 %v2851_v61, %v2846_v4  ;;  %v11951_v21 = vpop.f32.mrb[138].mxu1 }
 0x24e   :  { %12253 = vmatprep.mubr.msk.f32.mxu0 %vm128_vm0, %v4945_v11  ;;  %12959 = vmatpush3.bf16.xpose.msk.msra.mxu0 %vm14979_vm1, %v15355_v48  ;;  %v2861_v3 = vadd.f32 %v11951_v21, %v15312_v45  ;;  %v2855_v32 = vpop.f32.mrb[139].mxu1  ;;  %v15704_v21 = vmul.f32 0.35355338, %v15088_v42 }
 0x24f   :  { %20270 = vst [vmem:[#allocation26_spill] sm:$0xff] %v15672_v43  ;;  %12962 = vmatprep.subr.msk.bf16.mxu0 %vm14979_vm1, %v15373_v39  ;;  %v2856_v35 = vadd.f32 %v15312_v45, %v2855_v32 }
 0x251   :  { %12254 = vmatmul.mubr.msk.f32.gmra.mrb[218].mxu0 %vm128_vm0, %v4946_v14  ;;  %v15685_v48 = vpack.c.bf16 %v2861_v3, %v2856_v35  ;;  %v11954_v40 = vpop.f32.mrb[140].mxu1  ;;  %v15713_v3 = vmul.f32 0.35355338, %v15131_v6  ;;  %v5582_v6 = vmul.f32 %v15069_v36, %v15704_v21  ;;  %v15730_v35 = vmul.f32 0.35355338, %v15119_v59 }
 0x252   :  { %12256 = vmatprep.mubr.msk.f32.mxu0 %vm128_vm0, %v4947_v16  ;;  %v2871_v22 = vadd.f32 %v11954_v40, %v15312_v45  ;;  %v2865_v61 = vpop.f32.mrb[141].mxu1 }
 0x253   :  { %20271 = vst [vmem:[#allocation27_spill] sm:$0xff] %v15685_v48  ;;  %v2866_v11 = vadd.f32 %v15312_v45, %v2865_v61 }
 0x255   :  { %12257 = vmatmul.mubr.msk.f32.gmra.mrb[220].mxu0 %vm128_vm0, %v4948_v38  ;;  %v15701_v46 = vpack.c.bf16 %v2871_v22, %v2866_v11  ;;  %v11957_v4 = vpop.f32.mrb[142].mxu1  ;;  %v5583_v22 = vmul.f32 %v15080_v27, %v15713_v3 }
 0x256   :  { %12259 = vmatprep.mubr.msk.f32.mxu0 %vm128_vm0, %v4949_v58  ;;  %12965 = vmatpush3.bf16.xpose.msk.msra.mxu0 %vm14979_vm1, %v15373_v39  ;;  %v2881_v37 = vadd.f32 %v11957_v4, %v15312_v45  ;;  %v2875_v14 = vpop.f32.mrb[143].mxu1  ;;  %v15718_v39 = vld [vmem:[%s20085_s4] sm:$0xff]  ;;  %v5584_v58 = vmul.f32 %v15097_v47, %v15730_v35  ;;  %v5585_v4 = vmul.f32 %v15107_v52, %v15691_v50 }
 0x257   :  { %20272 = vst [vmem:[#allocation28_spill] sm:$0xff] %v15701_v46  ;;  %12984 = vmatprep.subr.msk.bf16.mxu0 %vm14979_vm1, %v15385_v0  ;;  %v5581_v42 = vmul.f32 %v15718_v39, %v15691_v50  ;;  %v2876_v19 = vadd.f32 %v15312_v45, %v2875_v14  ;;  %v5586_v47 = vmul.f32 %v15128_v53, %v15704_v21 }
 0x258   :  { %v5588_v53 = vmul.f32 %v15154_v31, %v15730_v35  ;;  %v5590_v31 = vmul.f32 %v15186_v63, %v15704_v21  ;;  %v5592_v63 = vmul.f32 %v15212_v25, %v15730_v35 }
 0x259   :  { %12260 = vmatmul.mubr.msk.f32.gmra.mrb[222].mxu0 %vm128_vm0, %v4950_v49  ;;  %v15725_v32 = vpack.c.bf16 %v2881_v37, %v2876_v19  ;;  %v11960_v16 = vpop.f32.mrb[144].mxu1  ;;  %v5587_v19 = vmul.f32 %v15138_v9, %v15713_v3 }
 0x25a   :  { %12318 = vmatprep.mubr.msk.f32.mxu0 %vm128_vm0, %v5581_v42  ;;  %v2891_v40 = vadd.f32 %v11960_v16, %v15312_v45  ;;  %v2885_v38 = vpop.f32.mrb[145].mxu1 }
 0x25b   :  { %20273 = vst [vmem:[#allocation29_spill] sm:$0xff] %v15725_v32  ;;  %v2886_v61 = vadd.f32 %v15312_v45, %v2885_v38  ;;  %v5589_v38 = vmul.f32 %v15164_v23, %v15691_v50 }
 0x25d   :  { %12319 = vmatmul.mubr.msk.f32.vlgmr.msra.gmra.mrb[224].mxu0 %vm128_vm0, %v5582_v6  ;;  %v15741_v36 = vpack.c.bf16 %v2891_v40, %v2886_v61  ;;  %v11963_v59 = vpop.f32.mrb[146].mxu1 }
 0x25e   :  { %12321 = vmatprep.mubr.msk.f32.mxu0 %vm128_vm0, %v5583_v22  ;;  %12987 = vmatpush3.bf16.xpose.msk.msra.mxu0 %vm14979_vm1, %v15385_v0  ;;  %v2901_v27 = vadd.f32 %v11963_v59, %v15312_v45  ;;  %v2895_v11 = vpop.f32.mrb[147].mxu1 }
 0x25f   :  { %20274 = vst [vmem:[#allocation30_spill] sm:$0xff] %v15741_v36  ;;  %12990 = vmatprep.subr.msk.bf16.mxu0 %vm14979_vm1, %v15405_v17  ;;  %v2896_v49 = vadd.f32 %v15312_v45, %v2895_v11 }
 0x261   :  { %12322 = vmatmul.mubr.msk.f32.gmra.mrb[226].mxu0 %vm128_vm0, %v5584_v58  ;;  %v15754_v0 = vpack.c.bf16 %v2901_v27, %v2896_v49  ;;  %v11966_v37 = vpop.f32.mrb[148].mxu1  ;;  %v5591_v27 = vmul.f32 %v15196_v60, %v15713_v3 }
 0x262   :  { %12324 = vmatprep.mubr.msk.f32.mxu0 %vm128_vm0, %v5585_v4  ;;  %v2911_v14 = vadd.f32 %v11966_v37, %v15312_v45  ;;  %v2905_v42 = vpop.f32.mrb[149].mxu1  ;;  %v5593_v37 = vmul.f32 %v15217_v28, %v15691_v50  ;;  %v5595_v50 = vmul.f32 %v15256_v10, %v15713_v3 }
 0x263   :  { %20275 = vst [vmem:[#allocation31_spill] sm:$0xff] %v15754_v0  ;;  %v2906_v52 = vadd.f32 %v15312_v45, %v2905_v42  ;;  %v5594_v42 = vmul.f32 %v15238_v56, %v15704_v21 }
 0x265   :  { %12325 = vmatmul.mubr.msk.f32.gmra.mrb[228].mxu0 %vm128_vm0, %v5586_v47  ;;  %v15767_v16 = vpack.c.bf16 %v2911_v14, %v2906_v52  ;;  %v11969_v6 = vpop.f32.mrb[150].mxu1 }
 0x266   :  { %12327 = vmatprep.mubr.msk.f32.mxu0 %vm128_vm0, %v5587_v19  ;;  %12993 = vmatpush3.bf16.xpose.msk.msra.mxu0 %vm14979_vm1, %v15405_v17  ;;  %v2921_v9 = vadd.f32 %v11969_v6, %v15312_v45  ;;  %v2915_v40 = vpop.f32.mrb[151].mxu1  ;;  %v1780_v6 = vmul.f32 0.35355338, %v15157_v33  ;;  %v5596_v33 = vmul.f32 %v15278_v29, %v15730_v35  ;;  %v15839_v35 = vld [vmem:[%s20085_s4 + $0x8] sm:$0xff] }
 0x267   :  { %20276 = vst [vmem:[#allocation32_spill] sm:$0xff] %v15767_v16  ;;  %12996 = vmatprep.subr.msk.bf16.mxu0 %vm14979_vm1, %v15420_v5  ;;  %v2916_v22 = vadd.f32 %v15312_v45, %v2915_v40  ;;  %v1781_v40 = vmul.f32 0.35355338, %v15145_v20 }
 0x269   :  { %12328 = vmatmul.mubr.msk.f32.gmra.mrb[230].mxu0 %vm128_vm0, %v5588_v53  ;;  %v15780_v17 = vpack.c.bf16 %v2921_v9, %v2916_v22  ;;  %v11972_v61 = vpop.f32.mrb[152].mxu1  ;;  %v1782_v22 = vmul.f32 0.35355338, %v15189_v55  ;;  %v15846_v55 = vld [vmem:[%s20085_s4 + $0x10] sm:$0xff] }
 0x26a   :  { %12330 = vmatprep.mubr.msk.f32.mxu0 %vm128_vm0, %v5589_v38  ;;  %v2931_v59 = vadd.f32 %v11972_v61, %v15312_v45  ;;  %v2925_v58 = vpop.f32.mrb[153].mxu1  ;;  %v6227_v61 = vmul.f32 %v15718_v39, %v1780_v6 }
 0x26b   :  { %20277 = vst [vmem:[#allocation33_spill] sm:$0xff] %v15780_v17  ;;  %v2926_v23 = vadd.f32 %v15312_v45, %v2925_v58 }
 0x26d   :  { %12331 = vmatmul.mubr.msk.f32.gmra.mrb[232].mxu0 %vm128_vm0, %v5590_v31  ;;  %v15793_v11 = vpack.c.bf16 %v2931_v59, %v2926_v23  ;;  %v11975_v4 = vpop.f32.mrb[154].mxu1  ;;  %v6228_v31 = vmul.f32 %v15839_v35, %v1781_v40  ;;  %v20282_v59 = vld [vmem:[#allocation2_spill] sm:$0xff] }
 0x26e   :  { %12333 = vmatprep.mubr.msk.f32.mxu0 %vm128_vm0, %v5591_v27  ;;  %12999 = vmatpush3.bf16.xpose.msk.msra.mxu0 %vm14979_vm1, %v15420_v5  ;;  %v2941_v60 = vadd.f32 %v11975_v4, %v15312_v45  ;;  %v2935_v49 = vpop.f32.mrb[155].mxu1  ;;  %v1783_v58 = vmul.f32 0.35355338, %v20282_v59  ;;  %v15857_v27 = vld [vmem:[%s20085_s4 + $0x18] sm:$0xff]  ;;  %v15866_v4 = vld [vmem:[%s20085_s4 + $0x20] sm:$0xff] }
 0x26f   :  { %20278 = vst [vmem:[#allocation34_spill] sm:$0xff] %v15793_v11  ;;  %13002 = vmatprep.subr.msk.bf16.mxu0 %vm14979_vm1, %v15446_v51  ;;  %v2936_v47 = vadd.f32 %v15312_v45, %v2935_v49  ;;  %v15880_v49 = vld [vmem:[%s20085_s4 + $0x30] sm:$0xff] }
 0x270   :  { %v6230_v23 = vmul.f32 %v15857_v27, %v1783_v58 }
 0x271   :  { %12334 = vmatmul.mubr.msk.f32.gmra.mrb[234].mxu0 %vm128_vm0, %v5592_v63  ;;  %v15806_v5 = vpack.c.bf16 %v2941_v60, %v2936_v47  ;;  %v11978_v14 = vpop.f32.mrb[156].mxu1  ;;  %v6231_v63 = vmul.f32 %v15866_v4, %v1780_v6  ;;  %v15891_v47 = vld [vmem:[%s20085_s4 + $0x38] sm:$0xff] }
 0x272   :  { %12336 = vmatprep.mubr.msk.f32.mxu0 %vm128_vm0, %v5593_v37  ;;  %v2951_v19 = vadd.f32 %v11978_v14, %v15312_v45  ;;  %v2945_v52 = vpop.f32.mrb[157].mxu1  ;;  %v6233_v37 = vmul.f32 %v15880_v49, %v1782_v22  ;;  %v6234_v14 = vmul.f32 %v15891_v47, %v1783_v58 }
 0x273   :  { %20279 = vst [vmem:[#allocation35_spill] sm:$0xff] %v15806_v5  ;;  %v2946_v53 = vadd.f32 %v15312_v45, %v2945_v52 }
 0x275   :  { %12337 = vmatmul.mubr.msk.f32.gmra.mrb[236].mxu0 %vm128_vm0, %v5594_v42  ;;  %v15820_v9 = vpack.c.bf16 %v2951_v19, %v2946_v53  ;;  %v11981_v21 = vpop.f32.mrb[158].mxu1  ;;  %v15900_v42 = vld [vmem:[%s20085_s4 + $0x40] sm:$0xff] }
 0x276   :  { %12339 = vmatprep.mubr.msk.f32.mxu0 %vm128_vm0, %v5595_v50  ;;  %13005 = vmatpush3.bf16.xpose.msk.msra.mxu0 %vm14979_vm1, %v15446_v51  ;;  %v2961_v3 = vadd.f32 %v11981_v21, %v15312_v45  ;;  %v2955_v38 = vpop.f32.mrb[159].mxu1  ;;  %v6235_v19 = vmul.f32 %v15900_v42, %v1780_v6  ;;  %v15914_v50 = vld [vmem:[%s20085_s4 + $0x50] sm:$0xff]  ;;  %v6238_v21 = vmul.f32 %v15212_v25, %v1783_v58  ;;  %v20284_v25 = vld [vmem:[#allocation3_spill] sm:$0xff] }
 0x277   :  { %20280 = vst [vmem:[#allocation36_spill] sm:$0xff] %v15820_v9  ;;  %13024 = vmatprep.subr.msk.bf16.mxu0 %vm14979_vm1, %v15466_v18  ;;  %v2956_v51 = vadd.f32 %v15312_v45, %v2955_v38  ;;  %v6229_v45 = vmul.f32 %v15846_v55, %v1782_v22  ;;  %v6237_v53 = vmul.f32 %v15914_v50, %v1782_v22  ;;  %v20283_v38 = vld [vmem:[#allocation4_spill] sm:$0xff] }
 0x279   :  { %12340 = vmatmul.mubr.msk.f32.gmra.mrb[238].mxu0 %vm128_vm0, %v5596_v33  ;;  %v15834_v20 = vpack.c.bf16 %v2961_v3, %v2956_v51  ;;  %v6239_v33 = vmul.f32 %v15217_v28, %v1780_v6  ;;  %v6240_v3 = vmul.f32 %v15238_v56, %v1781_v40  ;;  %v6241_v51 = vmul.f32 %v15256_v10, %v1782_v22  ;;  %v20285_v56 = vld [vmem:[#allocation6_spill] sm:$0xff]  ;;  %v20286_v22 = vld [vmem:[#allocation5_spill] sm:$0xff] }
 0x27a   :  { %12398 = vmatprep.mubr.msk.f32.mxu0 %vm128_vm0, %v6227_v61  ;;  %v1784_v61 = vmul.f32 0.35355338, %v20283_v38  ;;  %v1785_v28 = vmul.f32 0.35355338, %v20284_v25  ;;  %v1786_v6 = vmul.f32 0.35355338, %v20285_v56 }
 0x27b   :  { %20281 = vst [vmem:[#allocation37_spill] sm:$0xff] %v15834_v20  ;;  %v16020_v38 = vld [vmem:[%s20085_s4 + $0x68] sm:$0xff] }
 0x27c   :  { %v6873_v10 = vmul.f32 %v15718_v39, %v1784_v61  ;;  %v6877_v59 = vmul.f32 %v15866_v4, %v1784_v61 }
 0x27d   :  { %12399 = vmatmul.mubr.msk.f32.vlgmr.msra.gmra.mrb[240].mxu0 %vm128_vm0, %v6228_v31  ;;  %v6875_v31 = vmul.f32 %v15846_v55, %v1786_v6 }
 0x27e   :  { %12401 = vmatprep.mubr.msk.f32.mxu0 %vm128_vm0, %v6229_v45  ;;  %13027 = vmatpush3.bf16.xpose.msk.msra.mxu0 %vm14979_vm1, %v15466_v18  ;;  %v15874_v18 = vld [vmem:[%s20085_s4 + $0x28] sm:$0xff]  ;;  %v6879_v45 = vmul.f32 %v15880_v49, %v1786_v6 }
 0x27f   :  { %13030 = vmatprep.subr.msk.bf16.mxu0 %vm14979_vm1, %v15486_v24  ;;  %v6232_v60 = vmul.f32 %v15874_v18, %v1781_v40 }
 0x281   :  { %12402 = vmatmul.mubr.msk.f32.gmra.mrb[242].mxu0 %vm128_vm0, %v6230_v23  ;;  %v6881_v23 = vmul.f32 %v15900_v42, %v1784_v61 }
 0x282   :  { %12404 = vmatprep.mubr.msk.f32.mxu0 %vm128_vm0, %v6231_v63 }
 0x285   :  { %12405 = vmatmul.mubr.msk.f32.gmra.mrb[244].mxu0 %vm128_vm0, %v6232_v60  ;;  %v6883_v60 = vmul.f32 %v15914_v50, %v1786_v6 }
 0x286   :  { %12407 = vmatprep.mubr.msk.f32.mxu0 %vm128_vm0, %v6233_v37  ;;  %13033 = vmatpush3.bf16.xpose.msk.msra.mxu0 %vm14979_vm1, %v15486_v24  ;;  %v15908_v24 = vld [vmem:[%s20085_s4 + $0x48] sm:$0xff]  ;;  %v15990_v37 = vld [vmem:[%s20085_s4 + $0x58] sm:$0xff] }
 0x287   :  { %13036 = vmatprep.subr.msk.bf16.mxu0 %vm14979_vm1, %v15500_v57  ;;  %v6236_v52 = vmul.f32 %v15908_v24, %v1781_v40  ;;  %v6874_v40 = vmul.f32 %v15839_v35, %v1785_v28  ;;  %v6882_v63 = vmul.f32 %v15908_v24, %v1785_v28 }
 0x289   :  { %12408 = vmatmul.mubr.msk.f32.gmra.mrb[246].mxu0 %vm128_vm0, %v6234_v14 }
 0x28a   :  { %12410 = vmatprep.mubr.msk.f32.mxu0 %vm128_vm0, %v6235_v19 }
 0x28d   :  { %12411 = vmatmul.mubr.msk.f32.gmra.mrb[248].mxu0 %vm128_vm0, %v6236_v52  ;;  %v16004_v52 = vld [vmem:[%s20085_s4 + $0x60] sm:$0xff] }
 0x28e   :  { %12413 = vmatprep.mubr.msk.f32.mxu0 %vm128_vm0, %v6237_v53  ;;  %13039 = vmatpush3.bf16.xpose.msk.msra.mxu0 %vm14979_vm1, %v15500_v57  ;;  %v6242_v57 = vmul.f32 %v15278_v29, %v1783_v58  ;;  %v6878_v58 = vmul.f32 %v15874_v18, %v1785_v28  ;;  %v6885_v53 = vmul.f32 %v16004_v52, %v1784_v61 }
 0x28f   :  { %13042 = vmatprep.subr.msk.bf16.mxu0 %vm14979_vm1, %v15520_v34  ;;  %v6886_v61 = vmul.f32 %v16020_v38, %v1785_v28  ;;  %v16039_v28 = vld [vmem:[%s20085_s4 + $0x70] sm:$0xff] }
 0x291   :  { %12414 = vmatmul.mubr.msk.f32.gmra.mrb[250].mxu0 %vm128_vm0, %v6238_v21 }
 0x292   :  { %12416 = vmatprep.mubr.msk.f32.mxu0 %vm128_vm0, %v6239_v33 }
 0x295   :  { %12417 = vmatmul.mubr.msk.f32.gmra.mrb[252].mxu0 %vm128_vm0, %v6240_v3  ;;  %v16015_v3 = vld [vmem:[%s20086_s5 + $0x18] sm:$0xff] }
 0x296   :  { %12419 = vmatprep.mubr.msk.f32.mxu0 %vm128_vm0, %v6241_v51  ;;  %13045 = vmatpush3.bf16.xpose.msk.msra.mxu0 %vm14979_vm1, %v15520_v34  ;;  %v1787_v34 = vmul.f32 0.35355338, %v20286_v22  ;;  %v6887_v22 = vmul.f32 %v16039_v28, %v1786_v6  ;;  %v20288_v6 = vld [vmem:[#allocation7_spill] sm:$0xff] }
 0x297   :  { %13064 = vmatprep.subr.msk.bf16.mxu0 %vm14979_vm1, %v15534_v41 }
 0x298   :  { %v6876_v29 = vmul.f32 %v15857_v27, %v1787_v34  ;;  %v6884_v14 = vmul.f32 %v15990_v37, %v1787_v34 }
 0x299   :  { %12420 = vmatmul.mubr.msk.f32.gmra.mrb[254].mxu0 %vm128_vm0, %v6242_v57  ;;  %v20287_v57 = vld [vmem:[#allocation8_spill] sm:$0xff] }
 0x29a   :  { %12478 = vmatprep.mubr.msk.f32.mxu0 %vm128_vm0, %v6873_v10  ;;  %v16029_v56 = vmul.f32 0.35355338, %v20287_v57 }
 0x29d   :  { %12479 = vmatmul.mubr.msk.f32.vlgmr.msra.gmra.mrb[0].mxu0 %vm128_vm0, %v6874_v40  ;;  %v16034_v40 = vld [vmem:[%s20086_s5 + $0x10] sm:$0xff] }
 0x29e   :  { %12481 = vmatprep.mubr.msk.f32.mxu0 %vm128_vm0, %v6875_v31  ;;  %13067 = vmatpush3.bf16.xpose.msk.msra.mxu0 %vm14979_vm1, %v15534_v41  ;;  %v6880_v41 = vmul.f32 %v15891_v47, %v1787_v34 }
 0x29f   :  { %13070 = vmatprep.subr.msk.bf16.mxu0 %vm14979_vm1, %v15554_v54 }
 0x2a1   :  { %12482 = vmatmul.mubr.msk.f32.gmra.mrb[2].mxu0 %vm128_vm0, %v6876_v29 }
 0x2a2   :  { %12484 = vmatprep.mubr.msk.f32.mxu0 %vm128_vm0, %v6877_v59  ;;  %v16049_v59 = vld [vmem:[%s20085_s4 + $0x78] sm:$0xff] }
 0x2a5   :  { %12485 = vmatmul.mubr.msk.f32.gmra.mrb[4].mxu0 %vm128_vm0, %v6878_v58  ;;  %v6888_v58 = vmul.f32 %v16049_v59, %v1787_v34  ;;  %v16069_v34 = vld [vmem:[%s20086_s5 + $0x20] sm:$0xff] }
 0x2a6   :  { %12487 = vmatprep.mubr.msk.f32.mxu0 %vm128_vm0, %v6879_v45  ;;  %13073 = vmatpush3.bf16.xpose.msk.msra.mxu0 %vm14979_vm1, %v15554_v54  ;;  %v15985_v54 = vld [vmem:[%s20086_s5 + $0x8] sm:$0xff]  ;;  %v16057_v45 = vmul.f32 0.35355338, %v20288_v6 }
 0x2a7   :  { %13076 = vmatprep.subr.msk.bf16.mxu0 %vm14979_vm1, %v15568_v13 }
 0x2a8   :  { %v7528_v9 = vmul.f32 %v15908_v24, %v16057_v45 }
 0x2a9   :  { %12488 = vmatmul.mubr.msk.f32.gmra.mrb[6].mxu0 %vm128_vm0, %v6880_v41 }
 0x2aa   :  { %12490 = vmatprep.mubr.msk.f32.mxu0 %vm128_vm0, %v6881_v23 }
 0x2ad   :  { %12491 = vmatmul.mubr.msk.f32.gmra.mrb[8].mxu0 %vm128_vm0, %v6882_v63 }
 0x2ae   :  { %12493 = vmatprep.mubr.msk.f32.mxu0 %vm128_vm0, %v6883_v60  ;;  %13079 = vmatpush3.bf16.xpose.msk.msra.mxu0 %vm14979_vm1, %v15568_v13  ;;  %v15999_v13 = vld [vmem:[%s20086_s5] sm:$0xff] }
 0x2af   :  { %13082 = vmatprep.subr.msk.bf16.mxu0 %vm14979_vm1, %v15594_v30  ;;  %v20289_v60 = vld [vmem:[#allocation10_spill] sm:$0xff] }
 0x2b0   :  { %v12000_v19 = vpop.f32.mrb[160].mxu0  ;;  %v16072_v12 = vmul.f32 0.35355338, %v20289_v60 }
 0x2b1   :  { %v16008_v21 = vadd.f32 %v12000_v19, %v15985_v54  ;;  %v3150_v33 = vpop.f32.mrb[161].mxu0  ;;  %12494 = vmatmul.mubr.msk.f32.gmra.mrb[10].mxu0 %vm128_vm0, %v6884_v14  ;;  %v7519_v19 = vmul.f32 %v15718_v39, %v16029_v56 }
 0x2b2   :  { %12496 = vmatprep.mubr.msk.f32.mxu0 %vm128_vm0, %v6885_v53  ;;  %v16024_v51 = vadd.f32 %v3150_v33, %v15999_v13  ;;  %v7521_v6 = vmul.f32 %v15846_v55, %v16072_v12  ;;  %v16125_v55 = vld [vmem:[%s20086_s5 + $0x40] sm:$0xff] }
 0x2b3   :  { %v3233_v25 = vsel %vm3229_vm2, %v16008_v21, -inf }
 0x2b4   :  { %3234 = vmax.xlane.f32.xlu0 %v3233_v25  ;;  %v12003_v10 = vpop.f32.mrb[162].mxu0  ;;  %v3230_v63 = vsel %vm3229_vm2, %v16024_v51, -inf  ;;  %v20290_v25 = vld [vmem:[#allocation9_spill] sm:$0xff] }
 0x2b5   :  { %v16043_v31 = vadd.f32 %v12003_v10, %v16015_v3  ;;  %v3160_v29 = vpop.f32.mrb[163].mxu0  ;;  %12497 = vmatmul.mubr.msk.f32.gmra.mrb[12].mxu0 %vm128_vm0, %v6886_v61  ;;  %v7520_v61 = vmul.f32 %v15839_v35, %v16057_v45  ;;  %v16089_v57 = vmul.f32 0.35355338, %v20290_v25  ;;  %v7523_v25 = vmul.f32 %v15866_v4, %v16029_v56  ;;  %v16151_v4 = vld [vmem:[%s20086_s5 + $0x50] sm:$0xff] }
 0x2b6   :  { %12499 = vmatprep.mubr.msk.f32.mxu0 %vm128_vm0, %v6887_v22  ;;  %13085 = vmatpush3.bf16.xpose.msk.msra.mxu0 %vm14979_vm1, %v15594_v30  ;;  %v16060_v41 = vadd.f32 %v3160_v29, %v16034_v40  ;;  %v16077_v30 = vld [vmem:[%s20086_s5 + $0x28] sm:$0xff]  ;;  %v16099_v22 = vld [vmem:[%s20086_s5 + $0x30] sm:$0xff]  ;;  %v16104_v29 = vld [vmem:[%s20086_s5 + $0x38] sm:$0xff] }
 0x2b7   :  { %v3239_v23 = vsel %vm3229_vm2, %v16043_v31, -inf  ;;  %v7522_v60 = vmul.f32 %v15857_v27, %v16089_v57  ;;  %v7530_v11 = vmul.f32 %v15990_v37, %v16089_v57 }
 0x2b8   :  { %3240 = vmax.xlane.f32.xlu1 %v3239_v23  ;;  %v12006_v14 = vpop.f32.mrb[164].mxu0  ;;  %3231 = vmax.xlane.f32.xlu0 %v3230_v63  ;;  %v3236_v39 = vsel %vm3229_vm2, %v16060_v41, -inf }
 0x2b9   :  { %v3170_v53 = vpop.f32.mrb[165].mxu0  ;;  %12500 = vmatmul.mubr.msk.f32.gmra.mrb[14].mxu0 %vm128_vm0, %v6888_v58  ;;  %v16092_v10 = vadd.f32 %v12006_v14, %v16077_v30 }
 0x2ba   :  { %v16083_v33 = vadd.f32 %v3170_v53, %v16069_v34  ;;  %12558 = vmatprep.mubr.msk.f32.mxu0 %vm128_vm0, %v7519_v19  ;;  %v16130_v53 = vld [vmem:[%s20086_s5 + $0x48] sm:$0xff] }
 0x2bb   :  { %v3245_v19 = vsel %vm3229_vm2, %v16092_v10, -inf }
 0x2bc   :  { %v12009_v35 = vpop.f32.mrb[166].mxu0  ;;  %3237 = vmax.xlane.f32.xlu1 %v3236_v39  ;;  %v3242_v58 = vsel %vm3229_vm2, %v16083_v33, -inf }
 0x2bd   :  { %v3180_v23 = vpop.f32.mrb[167].mxu0  ;;  %12559 = vmatmul.mubr.msk.f32.vlgmr.msra.gmra.mrb[16].mxu0 %vm128_vm0, %v7520_v61  ;;  %3243 = vmax.xlane.f32.xlu0 %v3242_v58  ;;  %v16118_v14 = vadd.f32 %v12009_v35, %v16104_v29  ;;  %v7524_v58 = vmul.f32 %v15874_v18, %v16057_v45 }
 0x2be   :  { %v16112_v63 = vadd.f32 %v3180_v23, %v16099_v22  ;;  %12561 = vmatprep.mubr.msk.f32.mxu0 %vm128_vm0, %v7521_v6 }
 0x2bf   :  { %v3251_v23 = vsel %vm3229_vm2, %v16118_v14, -inf }
 0x2c0   :  { %v12012_v61 = vpop.f32.mrb[168].mxu0  ;;  %3246 = vmax.xlane.f32.xlu1 %v3245_v19  ;;  %v3248_v27 = vsel %vm3229_vm2, %v16112_v63, -inf }
 0x2c1   :  { %v3190_v39 = vpop.f32.mrb[169].mxu0  ;;  %12562 = vmatmul.mubr.msk.f32.gmra.mrb[18].mxu0 %vm128_vm0, %v7522_v60  ;;  %3249 = vmax.xlane.f32.xlu0 %v3248_v27  ;;  %v16144_v6 = vadd.f32 %v12012_v61, %v16130_v53  ;;  %v16156_v60 = vld [vmem:[%s20086_s5 + $0x58] sm:$0xff]  ;;  %v7525_v61 = vmul.f32 %v15880_v49, %v16072_v12  ;;  %v16177_v49 = vld [vmem:[%s20086_s5 + $0x60] sm:$0xff] }
 0x2c2   :  { %v16138_v35 = vadd.f32 %v3190_v39, %v16125_v55  ;;  %12564 = vmatprep.mubr.msk.f32.mxu0 %vm128_vm0, %v7523_v25  ;;  %v7526_v39 = vmul.f32 %v15891_v47, %v16089_v57 }
 0x2c3   :  { %v3257_v20 = vsel %vm3229_vm2, %v16144_v6, -inf }
 0x2c4   :  { %v12015_v19 = vpop.f32.mrb[170].mxu0  ;;  %3252 = vmax.xlane.f32.xlu1 %v3251_v23  ;;  %v3254_v18 = vsel %vm3229_vm2, %v16138_v35, -inf }
 0x2c5   :  { %v3200_v27 = vpop.f32.mrb[171].mxu0  ;;  %12565 = vmatmul.mubr.msk.f32.gmra.mrb[20].mxu0 %vm128_vm0, %v7524_v58  ;;  %3255 = vmax.xlane.f32.xlu0 %v3254_v18  ;;  %v16170_v23 = vadd.f32 %v12015_v19, %v16156_v60  ;;  %v16182_v58 = vld [vmem:[%s20086_s5 + $0x68] sm:$0xff]  ;;  %v7527_v19 = vmul.f32 %v15900_v42, %v16029_v56  ;;  %v16203_v42 = vld [vmem:[%s20086_s5 + $0x70] sm:$0xff] }
 0x2c6   :  { %v16164_v25 = vadd.f32 %v3200_v27, %v16151_v4  ;;  %12567 = vmatprep.mubr.msk.f32.mxu0 %vm128_vm0, %v7525_v61 }
 0x2c7   :  { %v3263_v5 = vsel %vm3229_vm2, %v16170_v23, -inf }
 0x2c8   :  { %v12018_v18 = vpop.f32.mrb[172].mxu0  ;;  %3258 = vmax.xlane.f32.xlu1 %v3257_v20  ;;  %v3260_v47 = vsel %vm3229_vm2, %v16164_v25, -inf }
 0x2c9   :  { %v3210_v61 = vpop.f32.mrb[173].mxu0  ;;  %12568 = vmatmul.mubr.msk.f32.gmra.mrb[22].mxu0 %vm128_vm0, %v7526_v39  ;;  %3261 = vmax.xlane.f32.xlu0 %v3260_v47  ;;  %v16196_v20 = vadd.f32 %v12018_v18, %v16182_v58  ;;  %v16208_v39 = vld [vmem:[%s20086_s5 + $0x78] sm:$0xff]  ;;  %v7529_v18 = vmul.f32 %v15914_v50, %v16072_v12  ;;  %v7531_v50 = vmul.f32 %v16004_v52, %v16029_v56 }
 0x2ca   :  { %v16190_v27 = vadd.f32 %v3210_v61, %v16177_v49  ;;  %12570 = vmatprep.mubr.msk.f32.mxu0 %vm128_vm0, %v7527_v19  ;;  %v7533_v52 = vmul.f32 %v16039_v28, %v16072_v12 }
 0x2cb   :  { %v3269_v17 = vsel %vm3229_vm2, %v16196_v20, -inf }
 0x2cc   :  { %v12021_v47 = vpop.f32.mrb[174].mxu0  ;;  %3264 = vmax.xlane.f32.xlu1 %v3263_v5  ;;  %v3266_v24 = vsel %vm3229_vm2, %v16190_v27, -inf }
 0x2cd   :  { %v3220_v19 = vpop.f32.mrb[175].mxu0  ;;  %12571 = vmatmul.mubr.msk.f32.gmra.mrb[24].mxu0 %vm128_vm0, %v7528_v9  ;;  %3267 = vmax.xlane.f32.xlu0 %v3266_v24  ;;  %v16222_v5 = vadd.f32 %v12021_v47, %v16208_v39  ;;  %v7532_v47 = vmul.f32 %v16020_v38, %v16057_v45 }
 0x2ce   :  { %v16216_v61 = vadd.f32 %v3220_v19, %v16203_v42  ;;  %12573 = vmatprep.mubr.msk.f32.mxu0 %vm128_vm0, %v7529_v18 }
 0x2cf   :  { %v3275_v18 = vsel %vm3229_vm2, %v16222_v5, -inf }
 0x2d0   :  { %v12080_v16 = vpop.f32.mrb[176].mxu0  ;;  %3270 = vmax.xlane.f32.xlu1 %v3269_v17  ;;  %v3272_v9 = vsel %vm3229_vm2, %v16216_v61, -inf }
 0x2d1   :  { %v3797_v24 = vpop.f32.mrb[177].mxu0  ;;  %12574 = vmatmul.mubr.msk.f32.gmra.mrb[26].mxu0 %vm128_vm0, %v7530_v11  ;;  %3273 = vmax.xlane.f32.xlu0 %v3272_v9  ;;  %v16238_v17 = vadd.f32 %v12080_v16, %v15985_v54  ;;  %v7534_v16 = vmul.f32 %v16049_v59, %v16089_v57 }
 0x2d2   :  { %v16232_v37 = vadd.f32 %v3797_v24, %v15999_v13  ;;  %12576 = vmatprep.mubr.msk.f32.mxu0 %vm128_vm0, %v7531_v50 }
 0x2d3   :  { %v3879_v9 = vsel %vm3229_vm2, %v16238_v17, -inf }
 0x2d4   :  { %v12083_v19 = vpop.f32.mrb[178].mxu0  ;;  %3276 = vmax.xlane.f32.xlu1 %v3275_v18  ;;  %v3876_v11 = vsel %vm3229_vm2, %v16232_v37, -inf }
 0x2d5   :  { %v3807_v56 = vpop.f32.mrb[179].mxu0  ;;  %12577 = vmatmul.mubr.msk.f32.gmra.mrb[28].mxu0 %vm128_vm0, %v7532_v47  ;;  %3877 = vmax.xlane.f32.xlu0 %v3876_v11  ;;  %v16254_v45 = vadd.f32 %v12083_v19, %v16015_v3 }
 0x2d6   :  { %v16248_v38 = vadd.f32 %v3807_v56, %v16034_v40  ;;  %12579 = vmatprep.mubr.msk.f32.mxu0 %vm128_vm0, %v7533_v52 }
 0x2d7   :  { %v3885_v57 = vsel %vm3229_vm2, %v16254_v45, -inf }
 0x2d8   :  { %v12086_v50 = vpop.f32.mrb[180].mxu0  ;;  %3880 = vmax.xlane.f32.xlu1 %v3879_v9  ;;  %v3882_v28 = vsel %vm3229_vm2, %v16248_v38, -inf }
 0x2d9   :  { %v3817_v12 = vpop.f32.mrb[181].mxu0  ;;  %12580 = vmatmul.mubr.msk.f32.gmra.mrb[30].mxu0 %vm128_vm0, %v7534_v16  ;;  %3883 = vmax.xlane.f32.xlu0 %v3882_v28  ;;  %v16265_v59 = vadd.f32 %v12086_v50, %v16077_v30 }
 0x2da   :  { %v16262_v24 = vadd.f32 %v3817_v12, %v16069_v34 }
 0x2db   :  { %v3891_v56 = vsel %vm3229_vm2, %v16265_v59, -inf }
 0x2dc   :  { %v12089_v47 = vpop.f32.mrb[182].mxu0  ;;  %3886 = vmax.xlane.f32.xlu1 %v3885_v57  ;;  %v3888_v18 = vsel %vm3229_vm2, %v16262_v24, -inf }
 0x2dd   :  { %v3827_v19 = vpop.f32.mrb[183].mxu0  ;;  %3889 = vmax.xlane.f32.xlu0 %v3888_v18  ;;  %v16275_v52 = vadd.f32 %v12089_v47, %v16104_v29 }
 0x2de   :  { %v16272_v11 = vadd.f32 %v3827_v19, %v16099_v22 }
 0x2df   :  { %v3897_v57 = vsel %vm3229_vm2, %v16275_v52, -inf }
 0x2e0   :  { %v12092_v16 = vpop.f32.mrb[184].mxu0  ;;  %3892 = vmax.xlane.f32.xlu1 %v3891_v56  ;;  %v3894_v9 = vsel %vm3229_vm2, %v16272_v11, -inf }
 0x2e1   :  { %v3837_v50 = vpop.f32.mrb[185].mxu0  ;;  %3895 = vmax.xlane.f32.xlu0 %v3894_v9  ;;  %v16285_v12 = vadd.f32 %v12092_v16, %v16130_v53 }
 0x2e2   :  { %v16282_v28 = vadd.f32 %v3837_v50, %v16125_v55 }
 0x2e3   :  { %v3903_v16 = vsel %vm3229_vm2, %v16285_v12, -inf }
 0x2e4   :  { %v12095_v47 = vpop.f32.mrb[186].mxu0  ;;  %3898 = vmax.xlane.f32.xlu1 %v3897_v57  ;;  %v3900_v18 = vsel %vm3229_vm2, %v16282_v28, -inf }
 0x2e5   :  { %v3847_v19 = vpop.f32.mrb[187].mxu0  ;;  %3901 = vmax.xlane.f32.xlu0 %v3900_v18  ;;  %v16295_v9 = vadd.f32 %v12095_v47, %v16156_v60 }
 0x2e6   :  { %v16292_v56 = vadd.f32 %v3847_v19, %v16151_v4 }
 0x2e7   :  { %v3909_v47 = vsel %vm3229_vm2, %v16295_v9, -inf }
 0x2e8   :  { %v12098_v50 = vpop.f32.mrb[188].mxu0  ;;  %3904 = vmax.xlane.f32.xlu1 %v3903_v16  ;;  %v3906_v0 = vsel %vm3229_vm2, %v16292_v56, -inf }
 0x2e9   :  { %v3857_v57 = vpop.f32.mrb[189].mxu0  ;;  %3907 = vmax.xlane.f32.xlu0 %v3906_v0  ;;  %v16305_v18 = vadd.f32 %v12098_v50, %v16182_v58 }
 0x2ea   :  { %v16302_v36 = vadd.f32 %v3857_v57, %v16177_v49 }
 0x2eb   :  { %v3915_v50 = vsel %vm3229_vm2, %v16305_v18, -inf }
 0x2ec   :  { %v12101_v19 = vpop.f32.mrb[190].mxu0  ;;  %3910 = vmax.xlane.f32.xlu1 %v3909_v47  ;;  %v3912_v32 = vsel %vm3229_vm2, %v16302_v36, -inf }
 0x2ed   :  { %v3867_v16 = vpop.f32.mrb[191].mxu0  ;;  %3913 = vmax.xlane.f32.xlu0 %v3912_v32  ;;  %v16315_v0 = vadd.f32 %v12101_v19, %v16208_v39 }
 0x2ee   :  { %v16312_v46 = vadd.f32 %v3867_v16, %v16203_v42 }
 0x2ef   :  { %v3921_v19 = vsel %vm3229_vm2, %v16315_v0, -inf }
 0x2f0   :  { %v12160_v57 = vpop.f32.mrb[192].mxu0  ;;  %3916 = vmax.xlane.f32.xlu1 %v3915_v50  ;;  %v3918_v48 = vsel %vm3229_vm2, %v16312_v46, -inf }
 0x2f1   :  { %v4443_v47 = vpop.f32.mrb[193].mxu0  ;;  %3919 = vmax.xlane.f32.xlu0 %v3918_v48  ;;  %v16325_v32 = vadd.f32 %v12160_v57, %v15985_v54 }
 0x2f2   :  { %v16322_v43 = vadd.f32 %v4443_v47, %v15999_v13 }
 0x2f3   :  { %v4525_v57 = vsel %vm3229_vm2, %v16325_v32, -inf }
 0x2f4   :  { %v12163_v16 = vpop.f32.mrb[194].mxu0  ;;  %3922 = vmax.xlane.f32.xlu1 %v3921_v19  ;;  %v4522_v26 = vsel %vm3229_vm2, %v16322_v43, -inf }
 0x2f5   :  { %v4453_v50 = vpop.f32.mrb[195].mxu0  ;;  %4523 = vmax.xlane.f32.xlu0 %v4522_v26  ;;  %v16335_v48 = vadd.f32 %v12163_v16, %v16015_v3 }
 0x2f6   :  { %v16332_v44 = vadd.f32 %v4453_v50, %v16034_v40 }
 0x2f7   :  { %20292 = vst [vmem:[#allocation4_spill] sm:$0xff] %v16335_v48  ;;  %v4531_v16 = vsel %vm3229_vm2, %v16335_v48, -inf }
 0x2f8   :  { %20291 = vst [vmem:[#allocation2_spill] sm:$0xff] %v16332_v44  ;;  %v12166_v47 = vpop.f32.mrb[196].mxu0  ;;  %4526 = vmax.xlane.f32.xlu1 %v4525_v57  ;;  %v4528_v15 = vsel %vm3229_vm2, %v16332_v44, -inf }
 0x2f9   :  { %v4463_v19 = vpop.f32.mrb[197].mxu0  ;;  %4529 = vmax.xlane.f32.xlu0 %v4528_v15  ;;  %v16345_v26 = vadd.f32 %v12166_v47, %v16077_v30 }
 0x2fa   :  { %v16342_v62 = vadd.f32 %v4463_v19, %v16069_v34 }
 0x2fb   :  { %20294 = vst [vmem:[#allocation6_spill] sm:$0xff] %v16345_v26  ;;  %v4537_v47 = vsel %vm3229_vm2, %v16345_v26, -inf }
 0x2fc   :  { %20293 = vst [vmem:[#allocation3_spill] sm:$0xff] %v16342_v62  ;;  %v12169_v50 = vpop.f32.mrb[198].mxu0  ;;  %4532 = vmax.xlane.f32.xlu1 %v4531_v16  ;;  %v4534_v7 = vsel %vm3229_vm2, %v16342_v62, -inf }
 0x2fd   :  { %v4473_v57 = vpop.f32.mrb[199].mxu0  ;;  %4535 = vmax.xlane.f32.xlu0 %v4534_v7  ;;  %v16355_v15 = vadd.f32 %v12169_v50, %v16104_v29 }
 0x2fe   :  { %v16352_v1 = vadd.f32 %v4473_v57, %v16099_v22 }
 0x2ff   :  { %20296 = vst [vmem:[#allocation8_spill] sm:$0xff] %v16355_v15  ;;  %v4543_v50 = vsel %vm3229_vm2, %v16355_v15, -inf }
 0x300   :  { %20295 = vst [vmem:[#allocation5_spill] sm:$0xff] %v16352_v1  ;;  %v12172_v19 = vpop.f32.mrb[200].mxu0  ;;  %4538 = vmax.xlane.f32.xlu1 %v4537_v47  ;;  %v4540_v2 = vsel %vm3229_vm2, %v16352_v1, -inf }
 0x301   :  { %v4483_v16 = vpop.f32.mrb[201].mxu0  ;;  %4541 = vmax.xlane.f32.xlu0 %v4540_v2  ;;  %v16365_v7 = vadd.f32 %v12172_v19, %v16130_v53 }
 0x302   :  { %v16362_v62 = vadd.f32 %v4483_v16, %v16125_v55 }
 0x303   :  { %20298 = vst [vmem:[#allocation10_spill] sm:$0xff] %v16365_v7  ;;  %v4549_v19 = vsel %vm3229_vm2, %v16365_v7, -inf }
 0x304   :  { %20297 = vst [vmem:[#allocation7_spill] sm:$0xff] %v16362_v62  ;;  %v12175_v57 = vpop.f32.mrb[202].mxu0  ;;  %4544 = vmax.xlane.f32.xlu1 %v4543_v50  ;;  %v4546_v26 = vsel %vm3229_vm2, %v16362_v62, -inf }
 0x305   :  { %v4493_v47 = vpop.f32.mrb[203].mxu0  ;;  %4547 = vmax.xlane.f32.xlu0 %v4546_v26  ;;  %v16375_v2 = vadd.f32 %v12175_v57, %v16156_v60 }
 0x306   :  { %v16372_v1 = vadd.f32 %v4493_v47, %v16151_v4 }
 0x307   :  { %20300 = vst [vmem:[#allocation38_spill] sm:$0xff] %v16375_v2  ;;  %v4555_v57 = vsel %vm3229_vm2, %v16375_v2, -inf }
 0x308   :  { %20299 = vst [vmem:[#allocation9_spill] sm:$0xff] %v16372_v1  ;;  %v12178_v16 = vpop.f32.mrb[204].mxu0  ;;  %4550 = vmax.xlane.f32.xlu1 %v4549_v19  ;;  %v4552_v15 = vsel %vm3229_vm2, %v16372_v1, -inf }
 0x309   :  { %v4503_v50 = vpop.f32.mrb[205].mxu0  ;;  %4553 = vmax.xlane.f32.xlu0 %v4552_v15  ;;  %v16385_v26 = vadd.f32 %v12178_v16, %v16182_v58 }
 0x30a   :  { %v16382_v62 = vadd.f32 %v4503_v50, %v16177_v49 }
 0x30b   :  { %20302 = vst [vmem:[#allocation40_spill] sm:$0xff] %v16385_v26  ;;  %v4561_v16 = vsel %vm3229_vm2, %v16385_v26, -inf }
 0x30c   :  { %20301 = vst [vmem:[#allocation39_spill] sm:$0xff] %v16382_v62  ;;  %v12181_v47 = vpop.f32.mrb[206].mxu0  ;;  %4556 = vmax.xlane.f32.xlu1 %v4555_v57  ;;  %v4558_v7 = vsel %vm3229_vm2, %v16382_v62, -inf }
 0x30d   :  { %v4513_v19 = vpop.f32.mrb[207].mxu0  ;;  %4559 = vmax.xlane.f32.xlu0 %v4558_v7  ;;  %v16395_v15 = vadd.f32 %v12181_v47, %v16208_v39 }
 0x30e   :  { %v16392_v1 = vadd.f32 %v4513_v19, %v16203_v42 }
 0x30f   :  { %20304 = vst [vmem:[#allocation42_spill] sm:$0xff] %v16395_v15  ;;  %v4567_v47 = vsel %vm3229_vm2, %v16395_v15, -inf }
 0x310   :  { %20303 = vst [vmem:[#allocation41_spill] sm:$0xff] %v16392_v1  ;;  %v12240_v50 = vpop.f32.mrb[208].mxu0  ;;  %4562 = vmax.xlane.f32.xlu1 %v4561_v16  ;;  %v4564_v2 = vsel %vm3229_vm2, %v16392_v1, -inf }
 0x311   :  { %v5089_v57 = vpop.f32.mrb[209].mxu0  ;;  %4565 = vmax.xlane.f32.xlu0 %v4564_v2  ;;  %v16405_v7 = vadd.f32 %v12240_v50, %v15985_v54 }
 0x312   :  { %v16402_v62 = vadd.f32 %v5089_v57, %v15999_v13 }
 0x313   :  { %20306 = vst [vmem:[#allocation44_spill] sm:$0xff] %v16405_v7  ;;  %v5171_v50 = vsel %vm3229_vm2, %v16405_v7, -inf }
 0x314   :  { %20305 = vst [vmem:[#allocation43_spill] sm:$0xff] %v16402_v62  ;;  %v12243_v19 = vpop.f32.mrb[210].mxu0  ;;  %4568 = vmax.xlane.f32.xlu1 %v4567_v47  ;;  %v5168_v26 = vsel %vm3229_vm2, %v16402_v62, -inf }
 0x315   :  { %v5099_v16 = vpop.f32.mrb[211].mxu0  ;;  %5169 = vmax.xlane.f32.xlu0 %v5168_v26  ;;  %v16415_v2 = vadd.f32 %v12243_v19, %v16015_v3 }
 0x316   :  { %v16412_v1 = vadd.f32 %v5099_v16, %v16034_v40 }
 0x317   :  { %20308 = vst [vmem:[#allocation46_spill] sm:$0xff] %v16415_v2  ;;  %v5177_v19 = vsel %vm3229_vm2, %v16415_v2, -inf }
 0x318   :  { %20307 = vst [vmem:[#allocation45_spill] sm:$0xff] %v16412_v1  ;;  %v12246_v57 = vpop.f32.mrb[212].mxu0  ;;  %5172 = vmax.xlane.f32.xlu1 %v5171_v50  ;;  %v5174_v15 = vsel %vm3229_vm2, %v16412_v1, -inf }
 0x319   :  { %v5109_v47 = vpop.f32.mrb[213].mxu0  ;;  %5175 = vmax.xlane.f32.xlu0 %v5174_v15  ;;  %v16425_v26 = vadd.f32 %v12246_v57, %v16077_v30 }
 0x31a   :  { %v16422_v62 = vadd.f32 %v5109_v47, %v16069_v34 }
 0x31b   :  { %20310 = vst [vmem:[#allocation48_spill] sm:$0xff] %v16425_v26  ;;  %v5183_v57 = vsel %vm3229_vm2, %v16425_v26, -inf }
 0x31c   :  { %20309 = vst [vmem:[#allocation47_spill] sm:$0xff] %v16422_v62  ;;  %v12249_v16 = vpop.f32.mrb[214].mxu0  ;;  %5178 = vmax.xlane.f32.xlu1 %v5177_v19  ;;  %v5180_v7 = vsel %vm3229_vm2, %v16422_v62, -inf }
 0x31d   :  { %v5119_v50 = vpop.f32.mrb[215].mxu0  ;;  %5181 = vmax.xlane.f32.xlu0 %v5180_v7  ;;  %v16435_v15 = vadd.f32 %v12249_v16, %v16104_v29 }
 0x31e   :  { %v16432_v1 = vadd.f32 %v5119_v50, %v16099_v22 }
 0x31f   :  { %20312 = vst [vmem:[#allocation50_spill] sm:$0xff] %v16435_v15  ;;  %v5189_v16 = vsel %vm3229_vm2, %v16435_v15, -inf }
 0x320   :  { %20311 = vst [vmem:[#allocation49_spill] sm:$0xff] %v16432_v1  ;;  %v12252_v47 = vpop.f32.mrb[216].mxu0  ;;  %5184 = vmax.xlane.f32.xlu1 %v5183_v57  ;;  %v5186_v2 = vsel %vm3229_vm2, %v16432_v1, -inf }
 0x321   :  { %v5129_v19 = vpop.f32.mrb[217].mxu0  ;;  %5187 = vmax.xlane.f32.xlu0 %v5186_v2  ;;  %v16445_v7 = vadd.f32 %v12252_v47, %v16130_v53 }
 0x322   :  { %v16442_v62 = vadd.f32 %v5129_v19, %v16125_v55 }
 0x323   :  { %20314 = vst [vmem:[#allocation52_spill] sm:$0xff] %v16445_v7  ;;  %v5195_v47 = vsel %vm3229_vm2, %v16445_v7, -inf }
 0x324   :  { %20313 = vst [vmem:[#allocation51_spill] sm:$0xff] %v16442_v62  ;;  %v12255_v50 = vpop.f32.mrb[218].mxu0  ;;  %5190 = vmax.xlane.f32.xlu1 %v5189_v16  ;;  %v5192_v26 = vsel %vm3229_vm2, %v16442_v62, -inf }
 0x325   :  { %v5139_v57 = vpop.f32.mrb[219].mxu0  ;;  %5193 = vmax.xlane.f32.xlu0 %v5192_v26  ;;  %v16455_v2 = vadd.f32 %v12255_v50, %v16156_v60 }
 0x326   :  { %v16452_v1 = vadd.f32 %v5139_v57, %v16151_v4 }
 0x327   :  { %20316 = vst [vmem:[#allocation54_spill] sm:$0xff] %v16455_v2  ;;  %v5201_v50 = vsel %vm3229_vm2, %v16455_v2, -inf }
 0x328   :  { %20315 = vst [vmem:[#allocation53_spill] sm:$0xff] %v16452_v1  ;;  %v12258_v19 = vpop.f32.mrb[220].mxu0  ;;  %5196 = vmax.xlane.f32.xlu1 %v5195_v47  ;;  %v5198_v15 = vsel %vm3229_vm2, %v16452_v1, -inf }
 0x329   :  { %v5149_v16 = vpop.f32.mrb[221].mxu0  ;;  %5199 = vmax.xlane.f32.xlu0 %v5198_v15  ;;  %v16465_v26 = vadd.f32 %v12258_v19, %v16182_v58 }
 0x32a   :  { %v16462_v62 = vadd.f32 %v5149_v16, %v16177_v49 }
 0x32b   :  { %20318 = vst [vmem:[#allocation56_spill] sm:$0xff] %v16465_v26  ;;  %v5207_v19 = vsel %vm3229_vm2, %v16465_v26, -inf }
 0x32c   :  { %20317 = vst [vmem:[#allocation55_spill] sm:$0xff] %v16462_v62  ;;  %v12261_v57 = vpop.f32.mrb[222].mxu0  ;;  %5202 = vmax.xlane.f32.xlu1 %v5201_v50  ;;  %v5204_v7 = vsel %vm3229_vm2, %v16462_v62, -inf }
 0x32d   :  { %v5159_v47 = vpop.f32.mrb[223].mxu0  ;;  %5205 = vmax.xlane.f32.xlu0 %v5204_v7  ;;  %v16475_v15 = vadd.f32 %v12261_v57, %v16208_v39 }
 0x32e   :  { %v16472_v1 = vadd.f32 %v5159_v47, %v16203_v42 }
 0x32f   :  { %20320 = vst [vmem:[#allocation58_spill] sm:$0xff] %v16475_v15  ;;  %v5213_v57 = vsel %vm3229_vm2, %v16475_v15, -inf }
 0x330   :  { %20319 = vst [vmem:[#allocation57_spill] sm:$0xff] %v16472_v1  ;;  %v12320_v16 = vpop.f32.mrb[224].mxu0  ;;  %5208 = vmax.xlane.f32.xlu1 %v5207_v19  ;;  %v5210_v2 = vsel %vm3229_vm2, %v16472_v1, -inf }
 0x331   :  { %v5735_v50 = vpop.f32.mrb[225].mxu0  ;;  %5211 = vmax.xlane.f32.xlu0 %v5210_v2  ;;  %v16485_v7 = vadd.f32 %v12320_v16, %v15985_v54 }
 0x332   :  { %v16482_v62 = vadd.f32 %v5735_v50, %v15999_v13 }
 0x333   :  { %20322 = vst [vmem:[#allocation60_spill] sm:$0xff] %v16485_v7  ;;  %v5817_v16 = vsel %vm3229_vm2, %v16485_v7, -inf }
 0x334   :  { %20321 = vst [vmem:[#allocation59_spill] sm:$0xff] %v16482_v62  ;;  %v12323_v47 = vpop.f32.mrb[226].mxu0  ;;  %5214 = vmax.xlane.f32.xlu1 %v5213_v57  ;;  %v5814_v26 = vsel %vm3229_vm2, %v16482_v62, -inf }
 0x335   :  { %v5745_v19 = vpop.f32.mrb[227].mxu0  ;;  %5815 = vmax.xlane.f32.xlu0 %v5814_v26  ;;  %v16495_v2 = vadd.f32 %v12323_v47, %v16015_v3 }
 0x336   :  { %v16492_v1 = vadd.f32 %v5745_v19, %v16034_v40 }
 0x337   :  { %20324 = vst [vmem:[#allocation62_spill] sm:$0xff] %v16495_v2  ;;  %v5823_v47 = vsel %vm3229_vm2, %v16495_v2, -inf }
 0x338   :  { %20323 = vst [vmem:[#allocation61_spill] sm:$0xff] %v16492_v1  ;;  %v12326_v50 = vpop.f32.mrb[228].mxu0  ;;  %5818 = vmax.xlane.f32.xlu1 %v5817_v16  ;;  %v5820_v15 = vsel %vm3229_vm2, %v16492_v1, -inf }
 0x339   :  { %v5755_v57 = vpop.f32.mrb[229].mxu0  ;;  %5821 = vmax.xlane.f32.xlu0 %v5820_v15  ;;  %v16505_v26 = vadd.f32 %v12326_v50, %v16077_v30 }
 0x33a   :  { %v16502_v62 = vadd.f32 %v5755_v57, %v16069_v34 }
 0x33b   :  { %20326 = vst [vmem:[#allocation64_spill] sm:$0xff] %v16505_v26  ;;  %v5829_v50 = vsel %vm3229_vm2, %v16505_v26, -inf }
 0x33c   :  { %20325 = vst [vmem:[#allocation63_spill] sm:$0xff] %v16502_v62  ;;  %v12329_v19 = vpop.f32.mrb[230].mxu0  ;;  %5824 = vmax.xlane.f32.xlu1 %v5823_v47  ;;  %v5826_v7 = vsel %vm3229_vm2, %v16502_v62, -inf }
 0x33d   :  { %v5765_v16 = vpop.f32.mrb[231].mxu0  ;;  %5827 = vmax.xlane.f32.xlu0 %v5826_v7  ;;  %v16515_v15 = vadd.f32 %v12329_v19, %v16104_v29 }
 0x33e   :  { %v16512_v1 = vadd.f32 %v5765_v16, %v16099_v22 }
 0x33f   :  { %v5835_v29 = vsel %vm3229_vm2, %v16515_v15, -inf }
 0x340   :  { %20327 = vst [vmem:[#allocation65_spill] sm:$0xff] %v16512_v1  ;;  %v12332_v57 = vpop.f32.mrb[232].mxu0  ;;  %5830 = vmax.xlane.f32.xlu1 %v5829_v50  ;;  %v5832_v2 = vsel %vm3229_vm2, %v16512_v1, -inf }
 0x341   :  { %v3235_v47 = vpop.xlane.xlu0 %3234  ;;  %v5775_v48 = vpop.f32.mrb[233].mxu0  ;;  %5833 = vmax.xlane.f32.xlu0 %v5832_v2  ;;  %v16526_v16 = vadd.f32 %v12332_v57, %v16130_v53 }
 0x342   :  { %v3279_v62 = vsub.f32 %v16008_v21, %v3235_v47  ;;  %v16523_v7 = vadd.f32 %v5775_v48, %v16125_v55 }
 0x343   :  { %v5841_v2 = vsel %vm3229_vm2, %v16526_v16, -inf }
 0x344   :  { %v3296_v19 = vmul.f32 1.442695, %v3279_v62  ;;  %v12335_v26 = vpop.f32.mrb[234].mxu0  ;;  %5836 = vmax.xlane.f32.xlu1 %v5835_v29  ;;  %v5838_v50 = vsel %vm3229_vm2, %v16523_v7, -inf }
 0x345   :  { %v3241_v1 = vpop.xlane.xlu1 %3240  ;;  %v5785_v44 = vpop.f32.mrb[235].mxu0  ;;  %5839 = vmax.xlane.f32.xlu0 %v5838_v50  ;;  %v16537_v53 = vadd.f32 %v12335_v26, %v16156_v60 }
 0x346   :  { %v3281_v21 = vsub.f32 %v16043_v31, %v3241_v1  ;;  %v16534_v55 = vadd.f32 %v5785_v44, %v16151_v4  ;;  %v3232_v48 = vpop.xlane.xlu0 %3231  ;;  %13118 = vpow2.f32 %v3296_v19 }
 0x347   :  { %v3278_v62 = vsub.f32 %v16024_v51, %v3232_v48  ;;  %v5847_v50 = vsel %vm3229_vm2, %v16537_v53, -inf }
 0x348   :  { %v12338_v57 = vpop.f32.mrb[236].mxu0  ;;  %5842 = vmax.xlane.f32.xlu1 %v5841_v2  ;;  %v5844_v47 = vsel %vm3229_vm2, %v16534_v55, -inf  ;;  %v3300_v29 = vmul.f32 1.442695, %v3281_v21 }
 0x349   :  { %v3294_v1 = vmul.f32 1.442695, %v3278_v62  ;;  %v5795_v31 = vpop.f32.mrb[237].mxu0  ;;  %v3238_v44 = vpop.xlane.xlu1 %3237  ;;  %5845 = vmax.xlane.f32.xlu0 %v5844_v47  ;;  %v16549_v51 = vadd.f32 %v12338_v57, %v16182_v58 }
 0x34a   :  { %v16545_v4 = vadd.f32 %v5795_v31, %v16177_v49  ;;  %v3280_v60 = vsub.f32 %v16060_v41, %v3238_v44  ;;  %v3244_v26 = vpop.xlane.xlu0 %3243 }
 0x34b   :  { %13120 = vpow2.f32 %v3294_v1  ;;  %v3282_v19 = vsub.f32 %v16083_v33, %v3244_v26 }
 0x34c   :  { %v3298_v21 = vmul.f32 1.442695, %v3280_v60  ;;  %v12341_v48 = vpop.f32.mrb[238].mxu0  ;;  %5848 = vmax.xlane.f32.xlu1 %v5847_v50  ;;  %v5850_v62 = vsel %vm3229_vm2, %v16545_v4, -inf  ;;  %13122 = vpow2.f32 %v3300_v29  ;;  %v5853_v29 = vsel %vm3229_vm2, %v16549_v51, -inf }
 0x34d   :  { %v3302_v49 = vmul.f32 1.442695, %v3282_v19  ;;  %v5805_v2 = vpop.f32.mrb[239].mxu0  ;;  %v3247_v41 = vpop.xlane.xlu1 %3246  ;;  %5851 = vmax.xlane.f32.xlu0 %v5850_v62  ;;  %v16561_v47 = vadd.f32 %v12341_v48, %v16208_v39 }
 0x34e   :  { %13124 = vpow2.f32 %v3298_v21  ;;  %v16557_v58 = vadd.f32 %v5805_v2, %v16203_v42  ;;  %v3283_v33 = vsub.f32 %v16092_v10, %v3247_v41  ;;  %v3250_v57 = vpop.xlane.xlu0 %3249 }
 0x34f   :  { %13126 = vpow2.f32 %v3302_v49  ;;  %20328 = vst [vmem:[#allocation66_spill] sm:$0xff] %v16561_v47  ;;  %v3284_v1 = vsub.f32 %v16112_v63, %v3250_v57  ;;  %v5859_v48 = vsel %vm3229_vm2, %v16561_v47, -inf }
 0x350   :  { %v3304_v31 = vmul.f32 1.442695, %v3283_v33  ;;  %v12400_v44 = vpop.f32.mrb[240].mxu0  ;;  %5854 = vmax.xlane.f32.xlu1 %v5853_v29  ;;  %v5856_v60 = vsel %vm3229_vm2, %v16557_v58, -inf  ;;  %v13119_v42 = vpop.eup %13118 }
 0x351   :  { %v3306_v26 = vmul.f32 1.442695, %v3284_v1  ;;  %v6381_v19 = vpop.f32.mrb[241].mxu0  ;;  %v3253_v10 = vpop.xlane.xlu1 %3252  ;;  %5857 = vmax.xlane.f32.xlu0 %v5856_v60  ;;  %v16570_v63 = vadd.f32 %v12400_v44, %v15985_v54  ;;  %v3329_v2 = vsel %vm3229_vm2, %v13119_v42, 0.0 }
 0x352   :  { %13128 = vpow2.f32 %v3304_v31  ;;  %v3285_v39 = vsub.f32 %v16118_v14, %v3253_v10  ;;  %v3256_v50 = vpop.xlane.xlu0 %3255  ;;  %v16588_v10 = vadd.f32 %v6381_v19, %v15999_v13 }
 0x353   :  { %13130 = vpow2.f32 %v3306_v26  ;;  %20329 = vst [vmem:[#allocation67_spill] sm:$0xff] %v16570_v63  ;;  %v3286_v21 = vsub.f32 %v16138_v35, %v3256_v50  ;;  %v6463_v31 = vsel %vm3229_vm2, %v16570_v63, -inf  ;;  %v20331_v50 = vld [vmem:[#allocation11_spill] sm:$0xff] }
 0x354   :  { %v3308_v62 = vmul.f32 1.442695, %v3285_v39  ;;  %v12403_v49 = vpop.f32.mrb[242].mxu0  ;;  %5860 = vmax.xlane.f32.xlu1 %v5859_v48  ;;  %20330 = vst [vmem:[#allocation68_spill] sm:$0xff] %v16588_v10 }
 0x355   :  { %v13121_v41 = vpop.eup %13120  ;;  %v3310_v33 = vmul.f32 1.442695, %v3286_v21  ;;  %v6391_v57 = vpop.f32.mrb[243].mxu0  ;;  %3330 = vadd.xlane.f32.xlu0 %v3329_v2 }
 0x356   :  { %v3259_v1 = vpop.xlane.xlu1 %3258  ;;  %13132 = vpow2.f32 %v3308_v62  ;;  %12038 = vmatprep.mubr.msk.f32.mxu1 %vm3229_vm2, %v13121_v41  ;;  %v3262_v54 = vpop.xlane.xlu0 %3261  ;;  %v3326_v21 = vsel %vm3229_vm2, %v13121_v41, 0.0  ;;  %v16597_v62 = vadd.f32 %v12403_v49, %v16015_v3  ;;  %v6460_v49 = vsel %vm3229_vm2, %v16588_v10, -inf }
 0x357   :  { %v3287_v14 = vsub.f32 %v16144_v6, %v3259_v1  ;;  %v13123_v35 = vpop.eup %13122  ;;  %13134 = vpow2.f32 %v3310_v33  ;;  %12039 = vmatmul.mubr.msk.f32.vlgmr.msra.gmra.mrb[160].mxu1 %vm3229_vm2, %v13119_v42  ;;  %v3288_v29 = vsub.f32 %v16164_v25, %v3262_v54 }
 0x358   :  { %v13125_v44 = vpop.eup %13124  ;;  %12849 = vmatpush3.bf16.msra.mxu1 %v15397_v8  ;;  %v16583_v26 = vpop.f32.mrb[244].mxu0  ;;  %6464 = vmax.xlane.f32.xlu1 %v6463_v31  ;;  %20332 = vst [vmem:[#allocation11_spill] sm:$0xff] %v16597_v62 }
 0x359   :  { %v3312_v60 = vmul.f32 1.442695, %v3287_v14  ;;  %v16585_v6 = vpop.eup %13126  ;;  %v3314_v39 = vmul.f32 1.442695, %v3288_v29  ;;  %12851 = vmatprep.subr.bf16.mxu1 %v20331_v50  ;;  %v6401_v42 = vpop.f32.mrb[245].mxu0  ;;  %12041 = vmatprep.mubr.msk.f32.mxu1 %vm3229_vm2, %v13125_v44  ;;  %v20333_v14 = vld [vmem:[#allocation12_spill] sm:$0xff] }
 0x35a   :  { %v3265_v25 = vpop.xlane.xlu1 %3264  ;;  %3327 = vadd.xlane.f32.xlu0 %v3326_v21  ;;  %v3268_v48 = vpop.xlane.xlu0 %3267 }
 0x35b   :  { %13136 = vpow2.f32 %v3312_v60  ;;  %v3289_v8 = vsub.f32 %v16170_v23, %v3265_v25  ;;  %12042 = vmatmul.mubr.msk.f32.gmra.mrb[162].mxu1 %vm3229_vm2, %v13123_v35  ;;  %v3290_v13 = vsub.f32 %v16190_v27, %v3268_v48  ;;  %v3335_v23 = vsel %vm3229_vm2, %v13123_v35, 0.0 }
 0x35c   :  { %13138 = vpow2.f32 %v3314_v39  ;;  %v13129_v19 = vpop.eup %13128  ;;  %12853 = vmatpush3.bf16.msra.mxu1 %v20331_v50  ;;  %12044 = vmatprep.mubr.msk.f32.mxu1 %vm3229_vm2, %v16585_v6  ;;  %v16602_v41 = vpop.f32.mrb[246].mxu0  ;;  %v16627_v25 = vadd.f32 %v6391_v57, %v16034_v40 }
 0x35d   :  { %v3316_v2 = vmul.f32 1.442695, %v3289_v8  ;;  %v16605_v33 = vpop.eup %13130  ;;  %v3318_v1 = vmul.f32 1.442695, %v3290_v13  ;;  %12855 = vmatprep.subr.bf16.mxu1 %v20333_v14  ;;  %3336 = vadd.xlane.f32.xlu1 %v3335_v23  ;;  %v16608_v27 = vpop.f32.mrb[247].mxu0  ;;  %v3332_v13 = vsel %vm3229_vm2, %v13125_v44, 0.0 }
 0x35e   :  { %v3271_v3 = vpop.xlane.xlu1 %3270  ;;  %6461 = vmax.xlane.f32.xlu0 %v6460_v49  ;;  %v3274_v29 = vpop.xlane.xlu0 %3273  ;;  %20334 = vst [vmem:[#allocation12_spill] sm:$0xff] %v16627_v25 }
 0x35f   :  { %13140 = vpow2.f32 %v3316_v2  ;;  %v3291_v54 = vsub.f32 %v16196_v20, %v3271_v3  ;;  %12045 = vmatmul.mubr.msk.f32.gmra.mrb[164].mxu1 %vm3229_vm2, %v13129_v19  ;;  %v3292_v35 = vsub.f32 %v16216_v61, %v3274_v29  ;;  %v6469_v20 = vsel %vm3229_vm2, %v16597_v62, -inf  ;;  %v20335_v61 = vld [vmem:[#allocation13_spill] sm:$0xff] }
 0x360   :  { %13142 = vpow2.f32 %v3318_v1  ;;  %v16615_v31 = vpop.eup %13132  ;;  %12857 = vmatpush3.bf16.msra.mxu1 %v20333_v14  ;;  %12047 = vmatprep.mubr.msk.f32.mxu1 %vm3229_vm2, %v16605_v33  ;;  %v16620_v39 = vpop.f32.mrb[248].mxu0  ;;  %v16648_v3 = vadd.f32 %v6401_v42, %v16069_v34 }
 0x361   :  { %v3320_v60 = vmul.f32 1.442695, %v3291_v54  ;;  %v16624_v50 = vpop.eup %13134  ;;  %v3322_v21 = vmul.f32 1.442695, %v3292_v35  ;;  %12859 = vmatprep.subr.bf16.mxu1 %v20335_v61  ;;  %6470 = vmax.xlane.f32.xlu1 %v6469_v20  ;;  %v16630_v8 = vpop.f32.mrb[249].mxu0  ;;  %v20337_v54 = vld [vmem:[#allocation14_spill] sm:$0xff]  ;;  %v16663_v20 = vadd.f32 %v16583_v26, %v16077_v30 }
 0x362   :  { %v3277_v48 = vpop.xlane.xlu1 %3276  ;;  %3333 = vadd.xlane.f32.xlu0 %v3332_v13  ;;  %v3878_v23 = vpop.xlane.xlu0 %3877  ;;  %20336 = vst [vmem:[#allocation13_spill] sm:$0xff] %v16648_v3  ;;  %v6466_v35 = vsel %vm3229_vm2, %v16627_v25, -inf  ;;  %v6472_v30 = vsel %vm3229_vm2, %v16648_v3, -inf }
 0x363   :  { %13144 = vpow2.f32 %v3320_v60  ;;  %v3293_v2 = vsub.f32 %v16222_v5, %v3277_v48  ;;  %12048 = vmatmul.mubr.msk.f32.gmra.mrb[166].mxu1 %vm3229_vm2, %v16615_v31  ;;  %v3924_v40 = vsub.f32 %v16232_v37, %v3878_v23  ;;  %v3341_v5 = vsel %vm3229_vm2, %v13129_v19, 0.0  ;;  %20338 = vst [vmem:[#allocation14_spill] sm:$0xff] %v16663_v20 }
 0x364   :  { %13146 = vpow2.f32 %v3322_v21  ;;  %12861 = vmatpush3.bf16.msra.mxu1 %v20335_v61  ;;  %12050 = vmatprep.mubr.msk.f32.mxu1 %vm3229_vm2, %v16624_v50  ;;  %v16642_v44 = vpop.f32.mrb[250].mxu0 }
 0x365   :  { %v16637_v57 = vpop.eup %13136  ;;  %v3324_v1 = vmul.f32 1.442695, %v3293_v2  ;;  %v3940_v49 = vmul.f32 1.442695, %v3924_v40  ;;  %12887 = vmatprep.subr.bf16.mxu1 %v20337_v54  ;;  %3342 = vadd.xlane.f32.xlu1 %v3341_v5  ;;  %v16651_v37 = vpop.f32.mrb[251].mxu0 }
 0x366   :  { %v16645_v14 = vpop.eup %13138  ;;  %v3881_v29 = vpop.xlane.xlu1 %3880  ;;  %6467 = vmax.xlane.f32.xlu0 %v6466_v35 }
 0x367   :  { %13148 = vpow2.f32 %v3324_v1  ;;  %v3925_v60 = vsub.f32 %v16238_v17, %v3881_v29  ;;  %v3884_v19 = vpop.xlane.xlu0 %3883  ;;  %12051 = vmatmul.mubr.msk.f32.gmra.mrb[168].mxu1 %vm3229_vm2, %v16637_v57  ;;  %v3338_v17 = vsel %vm3229_vm2, %v16585_v6, 0.0  ;;  %v16693_v29 = vadd.f32 %v16608_v27, %v16099_v22 }
 0x368   :  { %13150 = vpow2.f32 %v3940_v49  ;;  %v3926_v34 = vsub.f32 %v16248_v38, %v3884_v19  ;;  %12053 = vmatprep.mubr.msk.f32.mxu1 %vm3229_vm2, %v16645_v14  ;;  %v16667_v61 = vpop.f32.mrb[252].mxu0  ;;  %v6475_v49 = vsel %vm3229_vm2, %v16663_v20, -inf  ;;  %v3347_v19 = vsel %vm3229_vm2, %v16615_v31, 0.0 }
 0x369   :  { %v16659_v42 = vpop.eup %13140  ;;  %v3942_v21 = vmul.f32 1.442695, %v3925_v60  ;;  %3339 = vadd.xlane.f32.xlu1 %v3338_v17  ;;  %v16673_v38 = vpop.f32.mrb[253].mxu0  ;;  %20339 = vst [vmem:[#allocation69_spill] sm:$0xff] %v16693_v29  ;;  %v16708_v17 = vld [vmem:[%s20086_s5 + $0x38] sm:$0xff] }
 0x36a   :  { %v16671_v48 = vpop.eup %13142  ;;  %v3944_v13 = vmul.f32 1.442695, %v3926_v34  ;;  %v3887_v2 = vpop.xlane.xlu1 %3886  ;;  %6473 = vmax.xlane.f32.xlu0 %v6472_v30  ;;  %v16712_v31 = vadd.f32 %v16708_v17, %v16602_v41  ;;  %v6478_v41 = vsel %vm3229_vm2, %v16693_v29, -inf }
 0x36b   :  { %13152 = vpow2.f32 %v3942_v21  ;;  %v3927_v26 = vsub.f32 %v16254_v45, %v3887_v2  ;;  %v3890_v23 = vpop.xlane.xlu0 %3889  ;;  %12054 = vmatmul.mubr.msk.f32.gmra.mrb[170].mxu1 %vm3229_vm2, %v16659_v42 }
 0x36c   :  { %13154 = vpow2.f32 %v3944_v13  ;;  %v3928_v6 = vsub.f32 %v16262_v24, %v3890_v23  ;;  %12056 = vmatprep.mubr.msk.f32.mxu1 %vm3229_vm2, %v16671_v48  ;;  %v16685_v5 = vpop.f32.mrb[254].mxu0  ;;  %20340 = vst [vmem:[#allocation70_spill] sm:$0xff] %v16712_v31 }
 0x36d   :  { %v16681_v40 = vpop.eup %13144  ;;  %v3946_v1 = vmul.f32 1.442695, %v3927_v26  ;;  %6476 = vmax.xlane.f32.xlu1 %v6475_v49  ;;  %v16695_v24 = vpop.f32.mrb[255].mxu0 }
 0x36e   :  { %v16689_v45 = vpop.eup %13146  ;;  %v3948_v35 = vmul.f32 1.442695, %v3928_v6  ;;  %v3893_v60 = vpop.xlane.xlu1 %3892  ;;  %3348 = vadd.xlane.f32.xlu0 %v3347_v19  ;;  %v6481_v19 = vsel %vm3229_vm2, %v16712_v31, -inf }
 0x36f   :  { %13156 = vpow2.f32 %v3946_v1  ;;  %v3929_v34 = vsub.f32 %v16265_v59, %v3893_v60  ;;  %v3896_v21 = vpop.xlane.xlu0 %3895  ;;  %12057 = vmatmul.mubr.msk.f32.gmra.mrb[172].mxu1 %vm3229_vm2, %v16681_v40 }
 0x370   :  { %13158 = vpow2.f32 %v3948_v35  ;;  %v3930_v22 = vsub.f32 %v16272_v11, %v3896_v21  ;;  %12059 = vmatprep.mubr.msk.f32.mxu1 %vm3229_vm2, %v16689_v45  ;;  %v16716_v13 = vpop.f32.mrb[0].mxu0  ;;  %v3344_v11 = vsel %vm3229_vm2, %v16605_v33, 0.0 }
 0x371   :  { %v16703_v27 = vpop.eup %13148  ;;  %v3950_v59 = vmul.f32 1.442695, %v3929_v34  ;;  %3345 = vadd.xlane.f32.xlu1 %v3344_v11  ;;  %v16722_v26 = vpop.f32.mrb[1].mxu0  ;;  %v16743_v34 = vld [vmem:[%s20086_s5 + $0x40] sm:$0xff]  ;;  %v3350_v11 = vsel %vm3229_vm2, %v16624_v50, 0.0 }
 0x372   :  { %v16720_v2 = vpop.eup %13150  ;;  %v3952_v30 = vmul.f32 1.442695, %v3930_v22  ;;  %v3899_v23 = vpop.xlane.xlu1 %3898  ;;  %6479 = vmax.xlane.f32.xlu0 %v6478_v41 }
 0x373   :  { %13160 = vpow2.f32 %v3950_v59  ;;  %v3931_v6 = vsub.f32 %v16275_v52, %v3899_v23  ;;  %v3902_v1 = vpop.xlane.xlu0 %3901  ;;  %12060 = vmatmul.mubr.msk.f32.gmra.mrb[174].mxu1 %vm3229_vm2, %v16703_v27 }
 0x374   :  { %13162 = vpow2.f32 %v3952_v30  ;;  %v3932_v33 = vsub.f32 %v16282_v28, %v3902_v1  ;;  %12118 = vmatprep.mubr.msk.f32.mxu1 %vm3229_vm2, %v16720_v2  ;;  %v16734_v60 = vpop.f32.mrb[2].mxu0  ;;  %v16747_v28 = vadd.f32 %v16743_v34, %v16630_v8 }
 0x375   :  { %v16730_v49 = vpop.eup %13152  ;;  %v3954_v35 = vmul.f32 1.442695, %v3931_v6  ;;  %6482 = vmax.xlane.f32.xlu1 %v6481_v19  ;;  %v16749_v22 = vpop.f32.mrb[3].mxu0  ;;  %v16762_v6 = vld [vmem:[%s20086_s5 + $0x48] sm:$0xff] }
 0x376   :  { %v16738_v52 = vpop.eup %13154  ;;  %20342 = vst [vmem:[#allocation72_spill] sm:$0xff] %v16747_v28  ;;  %v3956_v21 = vmul.f32 1.442695, %v3932_v33  ;;  %v3905_v59 = vpop.xlane.xlu1 %3904  ;;  %3351 = vadd.xlane.f32.xlu0 %v3350_v11  ;;  %v16766_v50 = vadd.f32 %v16762_v6, %v16620_v39  ;;  %v20345_v19 = vld [vmem:[#allocation15_spill] sm:$0xff] }
 0x377   :  { %20341 = vst [vmem:[#allocation71_spill] sm:$0xff] %v16738_v52  ;;  %13164 = vpow2.f32 %v3954_v35  ;;  %v3933_v30 = vsub.f32 %v16285_v12, %v3905_v59  ;;  %v3908_v23 = vpop.xlane.xlu0 %3907  ;;  %12119 = vmatmul.mubr.msk.f32.vlgmr.msra.gmra.mrb[176].mxu1 %vm3229_vm2, %v16730_v49 }
 0x378   :  { %13166 = vpow2.f32 %v3956_v21  ;;  %v3934_v8 = vsub.f32 %v16292_v56, %v3908_v23  ;;  %20344 = vst [vmem:[#allocation74_spill] sm:$0xff] %v16766_v50  ;;  %12889 = vmatpush3.bf16.msra.mxu1 %v20337_v54  ;;  %12121 = vmatprep.mubr.msk.f32.mxu1 %vm3229_vm2, %v16738_v52  ;;  %v16771_v1 = vpop.f32.mrb[4].mxu0  ;;  %v3353_v56 = vsel %vm3229_vm2, %v16637_v57, 0.0  ;;  %v6484_v54 = vsel %vm3229_vm2, %v16747_v28, -inf }
 0x379   :  { %v16757_v41 = vpop.eup %13156  ;;  %v3958_v12 = vmul.f32 1.442695, %v3933_v30  ;;  %12891 = vmatprep.subr.bf16.mxu1 %v20345_v19  ;;  %3354 = vadd.xlane.f32.xlu1 %v3353_v56  ;;  %v16778_v21 = vpop.f32.mrb[5].mxu0  ;;  %v16800_v56 = vld [vmem:[%s20086_s5 + $0x50] sm:$0xff] }
 0x37a   :  { %20343 = vst [vmem:[#allocation73_spill] sm:$0xff] %v16757_v41  ;;  %v16775_v33 = vpop.eup %13158  ;;  %v3960_v35 = vmul.f32 1.442695, %v3934_v8  ;;  %v3911_v39 = vpop.xlane.xlu1 %3910  ;;  %6485 = vmax.xlane.f32.xlu0 %v6484_v54 }
 0x37b   :  { %13168 = vpow2.f32 %v3958_v12  ;;  %v3935_v59 = vsub.f32 %v16295_v9, %v3911_v39  ;;  %v3914_v11 = vpop.xlane.xlu0 %3913  ;;  %12122 = vmatmul.mubr.msk.f32.gmra.mrb[178].mxu1 %vm3229_vm2, %v16757_v41  ;;  %v6487_v9 = vsel %vm3229_vm2, %v16766_v50, -inf }
 0x37c   :  { %13170 = vpow2.f32 %v3960_v35  ;;  %v3936_v57 = vsub.f32 %v16302_v36, %v3914_v11  ;;  %12893 = vmatpush3.bf16.msra.mxu1 %v20345_v19  ;;  %12124 = vmatprep.mubr.msk.f32.mxu1 %vm3229_vm2, %v16775_v33  ;;  %v16791_v8 = vpop.f32.mrb[6].mxu0  ;;  %v16804_v36 = vadd.f32 %v16800_v56, %v16651_v37  ;;  %v20348_v19 = vld [vmem:[#allocation16_spill] sm:$0xff] }
 0x37d   :  { %v16786_v30 = vpop.eup %13160  ;;  %v3962_v23 = vmul.f32 1.442695, %v3935_v59  ;;  %12895 = vmatprep.subr.bf16.mxu1 %v20348_v19  ;;  %6488 = vmax.xlane.f32.xlu1 %v6487_v9  ;;  %v16807_v39 = vpop.f32.mrb[7].mxu0  ;;  %v3356_v59 = vsel %vm3229_vm2, %v16645_v14, 0.0  ;;  %v16820_v9 = vld [vmem:[%s20086_s5 + $0x58] sm:$0xff] }
 0x37e   :  { %v16795_v12 = vpop.eup %13162  ;;  %20347 = vst [vmem:[#allocation75_spill] sm:$0xff] %v16804_v36  ;;  %v3964_v35 = vmul.f32 1.442695, %v3936_v57  ;;  %v3917_v54 = vpop.xlane.xlu1 %3916  ;;  %3357 = vadd.xlane.f32.xlu0 %v3356_v59  ;;  %v16824_v14 = vadd.f32 %v16820_v9, %v16642_v44 }
 0x37f   :  { %20346 = vst [vmem:[#allocation15_spill] sm:$0xff] %v16795_v12  ;;  %13172 = vpow2.f32 %v3962_v23  ;;  %v3937_v11 = vsub.f32 %v16305_v18, %v3917_v54  ;;  %v3920_v50 = vpop.xlane.xlu0 %3919  ;;  %12125 = vmatmul.mubr.msk.f32.gmra.mrb[180].mxu1 %vm3229_vm2, %v16786_v30  ;;  %v20351_v54 = vld [vmem:[#allocation17_spill] sm:$0xff] }
 0x380   :  { %13174 = vpow2.f32 %v3964_v35  ;;  %v3938_v37 = vsub.f32 %v16312_v46, %v3920_v50  ;;  %20350 = vst [vmem:[#allocation76_spill] sm:$0xff] %v16824_v14  ;;  %12897 = vmatpush3.bf16.msra.mxu1 %v20348_v19  ;;  %12127 = vmatprep.mubr.msk.f32.mxu1 %vm3229_vm2, %v16795_v12  ;;  %v16829_v23 = vpop.f32.mrb[8].mxu0  ;;  %v3359_v46 = vsel %vm3229_vm2, %v16659_v42, 0.0  ;;  %v6490_v19 = vsel %vm3229_vm2, %v16804_v36, -inf }
 0x381   :  { %v16815_v57 = vpop.eup %13164  ;;  %v3966_v18 = vmul.f32 1.442695, %v3937_v11  ;;  %12899 = vmatprep.subr.bf16.mxu1 %v20351_v54  ;;  %3360 = vadd.xlane.f32.xlu1 %v3359_v46  ;;  %v16836_v59 = vpop.f32.mrb[9].mxu0 }
 0x382   :  { %20349 = vst [vmem:[#allocation16_spill] sm:$0xff] %v16815_v57  ;;  %v16833_v50 = vpop.eup %13166  ;;  %v3968_v35 = vmul.f32 1.442695, %v3938_v37  ;;  %v3923_v44 = vpop.xlane.xlu1 %3922  ;;  %6491 = vmax.xlane.f32.xlu0 %v6490_v19 }
 0x383   :  { %13176 = vpow2.f32 %v3966_v18  ;;  %v3939_v11 = vsub.f32 %v16315_v0, %v3923_v44  ;;  %v4524_v28 = vpop.xlane.xlu0 %4523  ;;  %12128 = vmatmul.mubr.msk.f32.gmra.mrb[182].mxu1 %vm3229_vm2, %v16815_v57  ;;  %v6493_v0 = vsel %vm3229_vm2, %v16824_v14, -inf  ;;  %v20372_v57 = vld [vmem:[#allocation7_spill] sm:$0xff] }
 0x384   :  { %13178 = vpow2.f32 %v3968_v35  ;;  %v4570_v42 = vsub.f32 %v16322_v43, %v4524_v28  ;;  %12901 = vmatpush3.bf16.msra.mxu1 %v20351_v54  ;;  %12130 = vmatprep.mubr.msk.f32.mxu1 %vm3229_vm2, %v16833_v50  ;;  %v16849_v36 = vpop.f32.mrb[10].mxu0  ;;  %v16858_v35 = vld [vmem:[%s20086_s5 + $0x60] sm:$0xff] }
 0x385   :  { %v16844_v37 = vpop.eup %13168  ;;  %v3970_v46 = vmul.f32 1.442695, %v3939_v11  ;;  %v16862_v43 = vadd.f32 %v16858_v35, %v16673_v38  ;;  %v20355_v54 = vld [vmem:[#allocation18_spill] sm:$0xff]  ;;  %6494 = vmax.xlane.f32.xlu1 %v6493_v0  ;;  %v16865_v44 = vpop.f32.mrb[11].mxu0  ;;  %v3362_v11 = vsel %vm3229_vm2, %v16671_v48, 0.0  ;;  %v16878_v0 = vld [vmem:[%s20086_s5 + $0x68] sm:$0xff] }
 0x386   :  { %20352 = vst [vmem:[#allocation17_spill] sm:$0xff] %v16844_v37  ;;  %v16853_v18 = vpop.eup %13170  ;;  %v4586_v28 = vmul.f32 1.442695, %v4570_v42  ;;  %12927 = vmatprep.subr.bf16.mxu1 %v20355_v54  ;;  %v4527_v19 = vpop.xlane.xlu1 %4526  ;;  %3363 = vadd.xlane.f32.xlu0 %v3362_v11  ;;  %v20356_v38 = vld [vmem:[#allocation2_spill] sm:$0xff]  ;;  %v16882_v48 = vadd.f32 %v16878_v0, %v16667_v61 }
 0x387   :  { %20353 = vst [vmem:[#allocation77_spill] sm:$0xff] %v16853_v18  ;;  %20354 = vst [vmem:[#allocation78_spill] sm:$0xff] %v16862_v43  ;;  %13180 = vpow2.f32 %v3970_v46  ;;  %v4571_v14 = vsub.f32 %v16325_v32, %v4527_v19  ;;  %v4530_v31 = vpop.xlane.xlu0 %4529  ;;  %12131 = vmatmul.mubr.msk.f32.gmra.mrb[184].mxu1 %vm3229_vm2, %v16844_v37  ;;  %v6496_v61 = vsel %vm3229_vm2, %v16862_v43, -inf }
 0x388   :  { %13182 = vpow2.f32 %v4586_v28  ;;  %v4572_v42 = vsub.f32 %v20356_v38, %v4530_v31  ;;  %20358 = vst [vmem:[#allocation2_spill] sm:$0xff] %v16882_v48  ;;  %12133 = vmatprep.mubr.msk.f32.mxu1 %vm3229_vm2, %v16853_v18  ;;  %v16886_v46 = vpop.f32.mrb[12].mxu0  ;;  %v3365_v31 = vsel %vm3229_vm2, %v16681_v40, 0.0  ;;  %v20361_v40 = vld [vmem:[#allocation3_spill] sm:$0xff]  ;;  %v20366_v18 = vld [vmem:[#allocation5_spill] sm:$0xff] }
 0x389   :  { %v16873_v29 = vpop.eup %13172  ;;  %v4588_v32 = vmul.f32 1.442695, %v4571_v14  ;;  %3366 = vadd.xlane.f32.xlu1 %v3365_v31  ;;  %v16892_v11 = vpop.f32.mrb[13].mxu0  ;;  %v20360_v14 = vld [vmem:[#allocation4_spill] sm:$0xff] }
 0x38a   :  { %20357 = vst [vmem:[#allocation18_spill] sm:$0xff] %v16873_v29  ;;  %v16890_v28 = vpop.eup %13174  ;;  %v4590_v19 = vmul.f32 1.442695, %v4572_v42  ;;  %v4533_v38 = vpop.xlane.xlu1 %4532  ;;  %6497 = vmax.xlane.f32.xlu0 %v6496_v61 }
 0x38b   :  { %20359 = vst [vmem:[#allocation79_spill] sm:$0xff] %v16890_v28  ;;  %13184 = vpow2.f32 %v4588_v32  ;;  %v4573_v20 = vsub.f32 %v20360_v14, %v4533_v38  ;;  %v4536_v3 = vpop.xlane.xlu0 %4535  ;;  %12134 = vmatmul.mubr.msk.f32.gmra.mrb[186].mxu1 %vm3229_vm2, %v16873_v29  ;;  %v6499_v32 = vsel %vm3229_vm2, %v16882_v48, -inf  ;;  %v20365_v48 = vld [vmem:[#allocation6_spill] sm:$0xff] }
 0x38c   :  { %13186 = vpow2.f32 %v4590_v19  ;;  %v4574_v25 = vsub.f32 %v20361_v40, %v4536_v3  ;;  %12136 = vmatprep.mubr.msk.f32.mxu1 %vm3229_vm2, %v16890_v28  ;;  %v16904_v31 = vpop.f32.mrb[14].mxu0  ;;  %v16913_v19 = vld [vmem:[%s20086_s5 + $0x70] sm:$0xff]  ;;  %v3368_v40 = vsel %vm3229_vm2, %v16689_v45, 0.0 }
 0x38d   :  { %v16900_v62 = vpop.eup %13176  ;;  %v4592_v42 = vmul.f32 1.442695, %v4573_v20  ;;  %v16917_v3 = vadd.f32 %v16913_v19, %v16695_v24  ;;  %6500 = vmax.xlane.f32.xlu1 %v6499_v32  ;;  %v16919_v61 = vpop.f32.mrb[15].mxu0  ;;  %v16949_v32 = vld [vmem:[%s20086_s5] sm:$0xff] }
 0x38e   :  { %20362 = vst [vmem:[#allocation4_spill] sm:$0xff] %v16900_v62  ;;  %v16908_v38 = vpop.eup %13178  ;;  %v4594_v20 = vmul.f32 1.442695, %v4574_v25  ;;  %v4539_v14 = vpop.xlane.xlu1 %4538  ;;  %3369 = vadd.xlane.f32.xlu0 %v3368_v40  ;;  %v16932_v25 = vld [vmem:[%s20086_s5 + $0x78] sm:$0xff] }
 0x38f   :  { %20363 = vst [vmem:[#allocation3_spill] sm:$0xff] %v16908_v38  ;;  %20364 = vst [vmem:[#allocation80_spill] sm:$0xff] %v16917_v3  ;;  %13188 = vpow2.f32 %v4592_v42  ;;  %v4575_v43 = vsub.f32 %v20365_v48, %v4539_v14  ;;  %v4542_v29 = vpop.xlane.xlu0 %4541  ;;  %12137 = vmatmul.mubr.msk.f32.gmra.mrb[188].mxu1 %vm3229_vm2, %v16900_v62  ;;  %v16936_v45 = vadd.f32 %v16932_v25, %v16685_v5  ;;  %v6502_v40 = vsel %vm3229_vm2, %v16917_v3, -inf }
 0x390   :  { %13190 = vpow2.f32 %v4594_v20  ;;  %v4576_v24 = vsub.f32 %v20366_v18, %v4542_v29  ;;  %12139 = vmatprep.mubr.msk.f32.mxu1 %vm3229_vm2, %v16908_v38  ;;  %v16940_v42 = vpop.f32.mrb[16].mxu0  ;;  %v3371_v29 = vsel %vm3229_vm2, %v16703_v27, 0.0  ;;  %v16953_v5 = vadd.f32 %v16949_v32, %v16722_v26  ;;  %v20371_v27 = vld [vmem:[#allocation8_spill] sm:$0xff] }
 0x391   :  { %v16927_v10 = vpop.eup %13180  ;;  %20368 = vst [vmem:[#allocation5_spill] sm:$0xff] %v16936_v45  ;;  %v4596_v48 = vmul.f32 1.442695, %v4575_v43  ;;  %3372 = vadd.xlane.f32.xlu1 %v3371_v29  ;;  %v16955_v20 = vpop.f32.mrb[17].mxu0 }
 0x392   :  { %20367 = vst [vmem:[#allocation6_spill] sm:$0xff] %v16927_v10  ;;  %v16944_v18 = vpop.eup %13182  ;;  %20370 = vst [vmem:[#allocation82_spill] sm:$0xff] %v16953_v5  ;;  %v4598_v43 = vmul.f32 1.442695, %v4576_v24  ;;  %v4545_v14 = vpop.xlane.xlu1 %4544  ;;  %6503 = vmax.xlane.f32.xlu0 %v6502_v40 }
 0x393   :  { %20369 = vst [vmem:[#allocation81_spill] sm:$0xff] %v16944_v18  ;;  %13192 = vpow2.f32 %v4596_v48  ;;  %v4577_v38 = vsub.f32 %v20371_v27, %v4545_v14  ;;  %v4548_v62 = vpop.xlane.xlu0 %4547  ;;  %12140 = vmatmul.mubr.msk.f32.gmra.mrb[190].mxu1 %vm3229_vm2, %v16927_v10  ;;  %v6505_v48 = vsel %vm3229_vm2, %v16936_v45, -inf  ;;  %v7106_v27 = vsel %vm3229_vm2, %v16953_v5, -inf  ;;  %v20376_v45 = vld [vmem:[#allocation10_spill] sm:$0xff] }
 0x394   :  { %13194 = vpow2.f32 %v4598_v43  ;;  %v4578_v26 = vsub.f32 %v20372_v57, %v4548_v62  ;;  %12198 = vmatprep.mubr.msk.f32.mxu1 %vm3229_vm2, %v16944_v18  ;;  %v16967_v29 = vpop.f32.mrb[18].mxu0  ;;  %v16976_v43 = vld [vmem:[%s20086_s5 + $0x10] sm:$0xff]  ;;  %v20377_v18 = vld [vmem:[#allocation9_spill] sm:$0xff] }
 0x395   :  { %v16963_v63 = vpop.eup %13184  ;;  %v4600_v24 = vmul.f32 1.442695, %v4577_v38  ;;  %v16980_v62 = vadd.f32 %v16976_v43, %v16749_v22  ;;  %6506 = vmax.xlane.f32.xlu1 %v6505_v48  ;;  %v16982_v38 = vpop.f32.mrb[19].mxu0 }
 0x396   :  { %20373 = vst [vmem:[#allocation8_spill] sm:$0xff] %v16963_v63  ;;  %v16971_v14 = vpop.eup %13186  ;;  %v4602_v57 = vmul.f32 1.442695, %v4578_v26  ;;  %v4551_v40 = vpop.xlane.xlu1 %4550  ;;  %7107 = vmax.xlane.f32.xlu0 %v7106_v27  ;;  %v16995_v26 = vld [vmem:[%s20086_s5 + $0x8] sm:$0xff] }
 0x397   :  { %20374 = vst [vmem:[#allocation7_spill] sm:$0xff] %v16971_v14  ;;  %20375 = vst [vmem:[#allocation83_spill] sm:$0xff] %v16980_v62  ;;  %13196 = vpow2.f32 %v4600_v24  ;;  %v4579_v3 = vsub.f32 %v20376_v45, %v4551_v40  ;;  %v4554_v10 = vpop.xlane.xlu0 %4553  ;;  %12199 = vmatmul.mubr.msk.f32.vlgmr.msra.gmra.mrb[192].mxu1 %vm3229_vm2, %v16963_v63  ;;  %v16999_v24 = vadd.f32 %v16995_v26, %v16716_v13  ;;  %v20381_v40 = vld [vmem:[#allocation19_spill] sm:$0xff] }
 0x398   :  { %13198 = vpow2.f32 %v4602_v57  ;;  %v4580_v22 = vsub.f32 %v20377_v18, %v4554_v10  ;;  %12929 = vmatpush3.bf16.msra.mxu1 %v20355_v54  ;;  %12201 = vmatprep.mubr.msk.f32.mxu1 %vm3229_vm2, %v16971_v14  ;;  %v17004_v48 = vpop.f32.mrb[20].mxu0  ;;  %v3972_v10 = vsel %vm3229_vm2, %v16720_v2, 0.0  ;;  %v7112_v54 = vsel %vm3229_vm2, %v16980_v62, -inf  ;;  %v20383_v2 = vld [vmem:[#allocation39_spill] sm:$0xff] }
 0x399   :  { %v16990_v41 = vpop.eup %13188  ;;  %20379 = vst [vmem:[#allocation9_spill] sm:$0xff] %v16999_v24  ;;  %v4604_v45 = vmul.f32 1.442695, %v4579_v3  ;;  %12931 = vmatprep.subr.bf16.mxu1 %v20381_v40  ;;  %3973 = vadd.xlane.f32.xlu1 %v3972_v10  ;;  %v17011_v27 = vpop.f32.mrb[21].mxu0  ;;  %v20382_v3 = vld [vmem:[#allocation38_spill] sm:$0xff]  ;;  %v17024_v10 = vld [vmem:[%s20086_s5 + $0x18] sm:$0xff] }
 0x39a   :  { %20378 = vst [vmem:[#allocation10_spill] sm:$0xff] %v16990_v41  ;;  %v17008_v18 = vpop.eup %13190  ;;  %v4606_v57 = vmul.f32 1.442695, %v4580_v22  ;;  %v4557_v13 = vpop.xlane.xlu1 %4556  ;;  %7113 = vmax.xlane.f32.xlu0 %v7112_v54 }
 0x39b   :  { %20380 = vst [vmem:[#allocation84_spill] sm:$0xff] %v17008_v18  ;;  %13200 = vpow2.f32 %v4604_v45  ;;  %v4581_v5 = vsub.f32 %v20382_v3, %v4557_v13  ;;  %v4560_v14 = vpop.xlane.xlu0 %4559  ;;  %12202 = vmatmul.mubr.msk.f32.gmra.mrb[194].mxu1 %vm3229_vm2, %v16990_v41  ;;  %v17028_v45 = vadd.f32 %v17024_v10, %v16734_v60  ;;  %v17042_v3 = vld [vmem:[%s20086_s5 + $0x20] sm:$0xff]  ;;  %v20389_v41 = vld [vmem:[#allocation40_spill] sm:$0xff] }
 0x39c   :  { %13202 = vpow2.f32 %v4606_v57  ;;  %v4582_v22 = vsub.f32 %v20383_v2, %v4560_v14  ;;  %12933 = vmatpush3.bf16.msra.mxu1 %v20381_v40  ;;  %12204 = vmatprep.mubr.msk.f32.mxu1 %vm3229_vm2, %v17008_v18  ;;  %v17033_v57 = vpop.f32.mrb[22].mxu0  ;;  %v7109_v14 = vsel %vm3229_vm2, %v16999_v24, -inf  ;;  %v17046_v60 = vadd.f32 %v17042_v3, %v16778_v21  ;;  %v20388_v40 = vld [vmem:[#allocation20_spill] sm:$0xff]  ;;  %v20390_v21 = vld [vmem:[#allocation41_spill] sm:$0xff] }
 0x39d   :  { %v17019_v63 = vpop.eup %13192  ;;  %20385 = vst [vmem:[#allocation38_spill] sm:$0xff] %v17028_v45  ;;  %v4608_v13 = vmul.f32 1.442695, %v4581_v5  ;;  %12935 = vmatprep.subr.bf16.mxu1 %v20388_v40  ;;  %7110 = vmax.xlane.f32.xlu1 %v7109_v14  ;;  %v17049_v2 = vpop.f32.mrb[23].mxu0  ;;  %v3984_v24 = vsel %vm3229_vm2, %v16775_v33, 0.0  ;;  %v17062_v14 = vld [vmem:[%s20086_s5 + $0x28] sm:$0xff] }
 0x39e   :  { %20384 = vst [vmem:[#allocation19_spill] sm:$0xff] %v17019_v63  ;;  %v17037_v54 = vpop.eup %13194  ;;  %20387 = vst [vmem:[#allocation85_spill] sm:$0xff] %v17046_v60  ;;  %v4610_v5 = vmul.f32 1.442695, %v4582_v22  ;;  %v4563_v62 = vpop.xlane.xlu1 %4562  ;;  %3985 = vadd.xlane.f32.xlu0 %v3984_v24  ;;  %v17066_v33 = vadd.f32 %v17062_v14, %v16771_v1 }
 0x39f   :  { %20386 = vst [vmem:[#allocation39_spill] sm:$0xff] %v17037_v54  ;;  %13204 = vpow2.f32 %v4608_v13  ;;  %v4583_v18 = vsub.f32 %v20389_v41, %v4563_v62  ;;  %v4566_v28 = vpop.xlane.xlu0 %4565  ;;  %12205 = vmatmul.mubr.msk.f32.gmra.mrb[196].mxu1 %vm3229_vm2, %v17019_v63  ;;  %v17080_v13 = vld [vmem:[%s20086_s5 + $0x30] sm:$0xff] }
 0x3a0   :  { %13206 = vpow2.f32 %v4610_v5  ;;  %v4584_v22 = vsub.f32 %v20390_v21, %v4566_v28  ;;  %20392 = vst [vmem:[#allocation40_spill] sm:$0xff] %v17066_v33  ;;  %12937 = vmatpush3.bf16.msra.mxu1 %v20388_v40  ;;  %12207 = vmatprep.mubr.msk.f32.mxu1 %vm3229_vm2, %v17037_v54  ;;  %v17071_v62 = vpop.f32.mrb[24].mxu0  ;;  %v7115_v28 = vsel %vm3229_vm2, %v17028_v45, -inf  ;;  %v17084_v1 = vadd.f32 %v17080_v13, %v16807_v39  ;;  %v20395_v5 = vld [vmem:[#allocation21_spill] sm:$0xff]  ;;  %v20396_v54 = vld [vmem:[#allocation42_spill] sm:$0xff]  ;;  %v20397_v39 = vld [vmem:[#allocation43_spill] sm:$0xff] }
 0x3a1   :  { %v17057_v12 = vpop.eup %13196  ;;  %v4612_v41 = vmul.f32 1.442695, %v4583_v18  ;;  %12939 = vmatprep.subr.bf16.mxu1 %v20395_v5  ;;  %7116 = vmax.xlane.f32.xlu1 %v7115_v28  ;;  %v17087_v40 = vpop.f32.mrb[25].mxu0  ;;  %v7118_v45 = vsel %vm3229_vm2, %v17046_v60, -inf  ;;  %v17099_v28 = vadd.f32 %v16708_v17, %v16791_v8  ;;  %v20402_v8 = vld [vmem:[#allocation22_spill] sm:$0xff] }
 0x3a2   :  { %20391 = vst [vmem:[#allocation20_spill] sm:$0xff] %v17057_v12  ;;  %v17075_v24 = vpop.eup %13198  ;;  %20394 = vst [vmem:[#allocation86_spill] sm:$0xff] %v17084_v1  ;;  %v4614_v18 = vmul.f32 1.442695, %v4584_v22  ;;  %v4569_v21 = vpop.xlane.xlu1 %4568  ;;  %7119 = vmax.xlane.f32.xlu0 %v7118_v45 }
 0x3a3   :  { %20393 = vst [vmem:[#allocation41_spill] sm:$0xff] %v17075_v24  ;;  %13208 = vpow2.f32 %v4612_v41  ;;  %v4585_v63 = vsub.f32 %v20396_v54, %v4569_v21  ;;  %v5170_v47 = vpop.xlane.xlu0 %5169  ;;  %12208 = vmatmul.mubr.msk.f32.gmra.mrb[198].mxu1 %vm3229_vm2, %v17057_v12  ;;  %20399 = vst [vmem:[#allocation42_spill] sm:$0xff] %v17099_v28  ;;  %v7121_v54 = vsel %vm3229_vm2, %v17066_v33, -inf  ;;  %v7124_v21 = vsel %vm3229_vm2, %v17084_v1, -inf }
 0x3a4   :  { %13210 = vpow2.f32 %v4614_v18  ;;  %v5216_v22 = vsub.f32 %v20397_v39, %v5170_v47  ;;  %12941 = vmatpush3.bf16.msra.mxu1 %v20395_v5  ;;  %12210 = vmatprep.mubr.msk.f32.mxu1 %vm3229_vm2, %v17075_v24  ;;  %v17104_v45 = vpop.f32.mrb[26].mxu0  ;;  %v17112_v47 = vadd.f32 %v16743_v34, %v16836_v59  ;;  %v20403_v39 = vld [vmem:[#allocation44_spill] sm:$0xff]  ;;  %v20404_v59 = vld [vmem:[#allocation45_spill] sm:$0xff] }
 0x3a5   :  { %v17095_v52 = vpop.eup %13200  ;;  %v4616_v37 = vmul.f32 1.442695, %v4585_v63  ;;  %12967 = vmatprep.subr.bf16.mxu1 %v20402_v8  ;;  %7122 = vmax.xlane.f32.xlu1 %v7121_v54  ;;  %v17115_v63 = vpop.f32.mrb[27].mxu0  ;;  %v17127_v54 = vadd.f32 %v16762_v6, %v16829_v23 }
 0x3a6   :  { %20398 = vst [vmem:[#allocation21_spill] sm:$0xff] %v17095_v52  ;;  %v17108_v41 = vpop.eup %13202  ;;  %20401 = vst [vmem:[#allocation87_spill] sm:$0xff] %v17112_v47  ;;  %v5232_v18 = vmul.f32 1.442695, %v5216_v22  ;;  %v5173_v5 = vpop.xlane.xlu1 %5172  ;;  %7125 = vmax.xlane.f32.xlu0 %v7124_v21 }
 0x3a7   :  { %20400 = vst [vmem:[#allocation43_spill] sm:$0xff] %v17108_v41  ;;  %13212 = vpow2.f32 %v4616_v37  ;;  %v5217_v60 = vsub.f32 %v20403_v39, %v5173_v5  ;;  %v5176_v33 = vpop.xlane.xlu0 %5175  ;;  %12211 = vmatmul.mubr.msk.f32.gmra.mrb[200].mxu1 %vm3229_vm2, %v17095_v52  ;;  %20406 = vst [vmem:[#allocation44_spill] sm:$0xff] %v17127_v54 }
 0x3a8   :  { %13214 = vpow2.f32 %v5232_v18  ;;  %v5218_v22 = vsub.f32 %v20404_v59, %v5176_v33  ;;  %12213 = vmatprep.mubr.msk.f32.mxu1 %vm3229_vm2, %v17108_v41  ;;  %v17131_v37 = vpop.f32.mrb[28].mxu0  ;;  %v7127_v18 = vsel %vm3229_vm2, %v17099_v28, -inf  ;;  %v17139_v33 = vadd.f32 %v16800_v56, %v16865_v44  ;;  %v20409_v59 = vld [vmem:[#allocation46_spill] sm:$0xff]  ;;  %v20410_v28 = vld [vmem:[#allocation47_spill] sm:$0xff] }
 0x3a9   :  { %v17123_v12 = vpop.eup %13204  ;;  %v5234_v24 = vmul.f32 1.442695, %v5217_v60  ;;  %7128 = vmax.xlane.f32.xlu1 %v7127_v18  ;;  %v17141_v39 = vpop.f32.mrb[29].mxu0  ;;  %v7130_v60 = vsel %vm3229_vm2, %v17112_v47, -inf }
 0x3aa   :  { %20405 = vst [vmem:[#allocation22_spill] sm:$0xff] %v17123_v12  ;;  %v17135_v5 = vpop.eup %13206  ;;  %20408 = vst [vmem:[#allocation88_spill] sm:$0xff] %v17139_v33  ;;  %v5236_v21 = vmul.f32 1.442695, %v5218_v22  ;;  %v5179_v23 = vpop.xlane.xlu1 %5178  ;;  %7131 = vmax.xlane.f32.xlu0 %v7130_v60  ;;  %v17153_v22 = vadd.f32 %v16820_v9, %v16849_v36 }
 0x3ab   :  { %20407 = vst [vmem:[#allocation45_spill] sm:$0xff] %v17135_v5  ;;  %13216 = vpow2.f32 %v5234_v24  ;;  %v5219_v1 = vsub.f32 %v20409_v59, %v5179_v23  ;;  %v5182_v41 = vpop.xlane.xlu0 %5181  ;;  %12214 = vmatmul.mubr.msk.f32.gmra.mrb[202].mxu1 %vm3229_vm2, %v17123_v12  ;;  %v20414_v59 = vld [vmem:[#allocation48_spill] sm:$0xff] }
 0x3ac   :  { %13218 = vpow2.f32 %v5236_v21  ;;  %v5220_v44 = vsub.f32 %v20410_v28, %v5182_v41  ;;  %20411 = vst [vmem:[#allocation46_spill] sm:$0xff] %v17153_v22  ;;  %12216 = vmatprep.mubr.msk.f32.mxu1 %vm3229_vm2, %v17135_v5  ;;  %v17157_v24 = vpop.f32.mrb[30].mxu0  ;;  %v7133_v21 = vsel %vm3229_vm2, %v17127_v54, -inf  ;;  %v17165_v28 = vadd.f32 %v16858_v35, %v16892_v11  ;;  %v20415_v54 = vld [vmem:[#allocation49_spill] sm:$0xff] }
 0x3ad   :  { %v17149_v52 = vpop.eup %13208  ;;  %v5238_v18 = vmul.f32 1.442695, %v5219_v1  ;;  %7134 = vmax.xlane.f32.xlu1 %v7133_v21  ;;  %v17167_v60 = vpop.f32.mrb[31].mxu0  ;;  %v7136_v1 = vsel %vm3229_vm2, %v17139_v33, -inf }
 0x3ae   :  { %v17161_v23 = vpop.eup %13210  ;;  %20413 = vst [vmem:[#allocation89_spill] sm:$0xff] %v17165_v28  ;;  %v5240_v41 = vmul.f32 1.442695, %v5220_v44  ;;  %v5185_v36 = vpop.xlane.xlu1 %5184  ;;  %7137 = vmax.xlane.f32.xlu0 %v7136_v1  ;;  %v17179_v44 = vadd.f32 %v16878_v0, %v16886_v46  ;;  %v7142_v46 = vsel %vm3229_vm2, %v17165_v28, -inf }
 0x3af   :  { %20412 = vst [vmem:[#allocation47_spill] sm:$0xff] %v17161_v23  ;;  %13220 = vpow2.f32 %v5238_v18  ;;  %v5221_v47 = vsub.f32 %v20414_v59, %v5185_v36  ;;  %v5188_v12 = vpop.xlane.xlu0 %5187  ;;  %12217 = vmatmul.mubr.msk.f32.gmra.mrb[204].mxu1 %vm3229_vm2, %v17149_v52  ;;  %v7139_v18 = vsel %vm3229_vm2, %v17153_v22, -inf  ;;  %v20418_v22 = vld [vmem:[#allocation51_spill] sm:$0xff] }
 0x3b0   :  { %13222 = vpow2.f32 %v5240_v41  ;;  %v5222_v11 = vsub.f32 %v20415_v54, %v5188_v12  ;;  %20416 = vst [vmem:[#allocation48_spill] sm:$0xff] %v17179_v44  ;;  %12219 = vmatprep.mubr.msk.f32.mxu1 %vm3229_vm2, %v17161_v23  ;;  %v17189_v41 = vadd.f32 %v16913_v19, %v16919_v61  ;;  %v17201_v61 = vadd.f32 %v16932_v25, %v16904_v31 }
 0x3b1   :  { %v17175_v5 = vpop.eup %13212  ;;  %v5242_v21 = vmul.f32 1.442695, %v5221_v47  ;;  %7140 = vmax.xlane.f32.xlu1 %v7139_v18  ;;  %v20417_v47 = vld [vmem:[#allocation50_spill] sm:$0xff] }
 0x3b2   :  { %v17185_v36 = vpop.eup %13214  ;;  %v5244_v12 = vmul.f32 1.442695, %v5222_v11  ;;  %v5191_v54 = vpop.xlane.xlu1 %5190  ;;  %7143 = vmax.xlane.f32.xlu0 %v7142_v46  ;;  %v7148_v31 = vsel %vm3229_vm2, %v17189_v41, -inf  ;;  %v20419_v46 = vld [vmem:[#allocation52_spill] sm:$0xff] }
 0x3b3   :  { %13224 = vpow2.f32 %v5242_v21  ;;  %v5223_v1 = vsub.f32 %v20417_v47, %v5191_v54  ;;  %v5194_v59 = vpop.xlane.xlu0 %5193  ;;  %12220 = vmatmul.mubr.msk.f32.gmra.mrb[206].mxu1 %vm3229_vm2, %v17175_v5  ;;  %v7145_v21 = vsel %vm3229_vm2, %v17179_v44, -inf }
 0x3b4   :  { %13226 = vpow2.f32 %v5244_v12  ;;  %v5224_v33 = vsub.f32 %v20418_v22, %v5194_v59  ;;  %12278 = vmatprep.mubr.msk.f32.mxu1 %vm3229_vm2, %v17185_v36  ;;  %v17211_v12 = vadd.f32 %v16949_v32, %v16955_v20  ;;  %v20420_v59 = vld [vmem:[#allocation53_spill] sm:$0xff]  ;;  %v17223_v32 = vadd.f32 %v16995_v26, %v16940_v42 }
 0x3b5   :  { %v17197_v23 = vpop.eup %13216  ;;  %v5246_v11 = vmul.f32 1.442695, %v5223_v1  ;;  %7146 = vmax.xlane.f32.xlu1 %v7145_v21  ;;  %v17234_v21 = vadd.f32 %v16976_v43, %v16982_v38 }
 0x3b6   :  { %v17207_v18 = vpop.eup %13218  ;;  %v5248_v22 = vmul.f32 1.442695, %v5224_v33  ;;  %v5197_v54 = vpop.xlane.xlu1 %5196  ;;  %7149 = vmax.xlane.f32.xlu0 %v7148_v31  ;;  %v7151_v33 = vsel %vm3229_vm2, %v17201_v61, -inf  ;;  %v7752_v26 = vsel %vm3229_vm2, %v17211_v12, -inf }
 0x3b7   :  { %13228 = vpow2.f32 %v5246_v11  ;;  %v5225_v47 = vsub.f32 %v20419_v46, %v5197_v54  ;;  %v5200_v1 = vpop.xlane.xlu0 %5199  ;;  %12279 = vmatmul.mubr.msk.f32.vlgmr.msra.gmra.mrb[208].mxu1 %vm3229_vm2, %v17197_v23  ;;  %v20421_v54 = vld [vmem:[#allocation23_spill] sm:$0xff] }
 0x3b8   :  { %13230 = vpow2.f32 %v5248_v22  ;;  %v5226_v44 = vsub.f32 %v20420_v59, %v5200_v1  ;;  %12969 = vmatpush3.bf16.msra.mxu1 %v20402_v8  ;;  %12281 = vmatprep.mubr.msk.f32.mxu1 %vm3229_vm2, %v17207_v18  ;;  %v20422_v8 = vld [vmem:[#allocation54_spill] sm:$0xff]  ;;  %v7755_v59 = vsel %vm3229_vm2, %v17223_v32, -inf }
 0x3b9   :  { %v17219_v28 = vpop.eup %13220  ;;  %v5250_v20 = vmul.f32 1.442695, %v5225_v47  ;;  %12971 = vmatprep.subr.bf16.mxu1 %v20421_v54  ;;  %7152 = vmax.xlane.f32.xlu1 %v7151_v33  ;;  %v20423_v47 = vld [vmem:[#allocation55_spill] sm:$0xff]  ;;  %v17258_v33 = vadd.f32 %v17042_v3, %v17011_v27 }
 0x3ba   :  { %v17230_v11 = vpop.eup %13222  ;;  %v5252_v22 = vmul.f32 1.442695, %v5226_v44  ;;  %v5203_v42 = vpop.xlane.xlu1 %5202  ;;  %7753 = vmax.xlane.f32.xlu0 %v7752_v26  ;;  %v17247_v44 = vadd.f32 %v17024_v10, %v16967_v29  ;;  %v7758_v10 = vsel %vm3229_vm2, %v17234_v21, -inf }
 0x3bb   :  { %13232 = vpow2.f32 %v5250_v20  ;;  %v5227_v31 = vsub.f32 %v20422_v8, %v5203_v42  ;;  %v5206_v46 = vpop.xlane.xlu0 %5205  ;;  %12282 = vmatmul.mubr.msk.f32.gmra.mrb[210].mxu1 %vm3229_vm2, %v17219_v28  ;;  %v20424_v42 = vld [vmem:[#allocation24_spill] sm:$0xff] }
 0x3bc   :  { %13234 = vpow2.f32 %v5252_v22  ;;  %v5228_v43 = vsub.f32 %v20423_v47, %v5206_v46  ;;  %12973 = vmatpush3.bf16.msra.mxu1 %v20421_v54  ;;  %12284 = vmatprep.mubr.msk.f32.mxu1 %vm3229_vm2, %v17230_v11  ;;  %v20425_v54 = vld [vmem:[#allocation56_spill] sm:$0xff]  ;;  %v17271_v46 = vadd.f32 %v17062_v14, %v17004_v48  ;;  %v7764_v14 = vsel %vm3229_vm2, %v17258_v33, -inf }
 0x3bd   :  { %v17243_v38 = vpop.eup %13224  ;;  %v5254_v1 = vmul.f32 1.442695, %v5227_v31  ;;  %12975 = vmatprep.subr.bf16.mxu1 %v20424_v42  ;;  %7756 = vmax.xlane.f32.xlu1 %v7755_v59  ;;  %v20426_v31 = vld [vmem:[#allocation57_spill] sm:$0xff]  ;;  %v17282_v59 = vadd.f32 %v17080_v13, %v17049_v2  ;;  %v8165_v13 = vld [vmem:[%s20081_s2 + $0xc0] sm:$0xff] }
 0x3be   :  { %v17254_v20 = vpop.eup %13226  ;;  %v5256_v22 = vmul.f32 1.442695, %v5228_v43  ;;  %v5209_v29 = vpop.xlane.xlu1 %5208  ;;  %7759 = vmax.xlane.f32.xlu0 %v7758_v10  ;;  %20427 = vst [vmem:[#allocation49_spill] sm:$0xff] %v17271_v46  ;;  %v7761_v43 = vsel %vm3229_vm2, %v17247_v44, -inf }
 0x3bf   :  { %13236 = vpow2.f32 %v5254_v1  ;;  %v5229_v26 = vsub.f32 %v20425_v54, %v5209_v29  ;;  %v5212_v8 = vpop.xlane.xlu0 %5211  ;;  %12285 = vmatmul.mubr.msk.f32.gmra.mrb[212].mxu1 %vm3229_vm2, %v17243_v38  ;;  %20428 = vst [vmem:[#allocation50_spill] sm:$0xff] %v17282_v59  ;;  %v20429_v29 = vld [vmem:[#allocation25_spill] sm:$0xff] }
 0x3c0   :  { %13238 = vpow2.f32 %v5256_v22  ;;  %v5230_v27 = vsub.f32 %v20426_v31, %v5212_v8  ;;  %12977 = vmatpush3.bf16.msra.mxu1 %v20424_v42  ;;  %12287 = vmatprep.mubr.msk.f32.mxu1 %vm3229_vm2, %v17254_v20  ;;  %v20430_v42 = vld [vmem:[#allocation58_spill] sm:$0xff]  ;;  %v8166_v8 = vld [vmem:[%s20081_s2 + $0xc8] sm:$0xff] }
 0x3c1   :  { %v17267_v3 = vpop.eup %13228  ;;  %v5258_v47 = vmul.f32 1.442695, %v5229_v26  ;;  %12979 = vmatprep.subr.bf16.mxu1 %v20429_v29  ;;  %7762 = vmax.xlane.f32.xlu1 %v7761_v43  ;;  %v20431_v26 = vld [vmem:[#allocation59_spill] sm:$0xff]  ;;  %v7767_v43 = vsel %vm3229_vm2, %v17271_v46, -inf }
 0x3c2   :  { %v17278_v1 = vpop.eup %13230  ;;  %v5260_v22 = vmul.f32 1.442695, %v5230_v27  ;;  %v5215_v48 = vpop.xlane.xlu1 %5214  ;;  %7765 = vmax.xlane.f32.xlu0 %v7764_v14  ;;  %v17301_v27 = vadd.f32 %v16708_v17, %v17033_v57  ;;  %v17312_v14 = vadd.f32 %v16743_v34, %v17087_v40  ;;  %v7770_v57 = vsel %vm3229_vm2, %v17282_v59, -inf  ;;  %v20436_v34 = vld [vmem:[#allocation61_spill] sm:$0xff] }
 0x3c3   :  { %13240 = vpow2.f32 %v5258_v47  ;;  %v5231_v10 = vsub.f32 %v20430_v42, %v5215_v48  ;;  %v5816_v54 = vpop.xlane.xlu0 %5815  ;;  %12288 = vmatmul.mubr.msk.f32.gmra.mrb[214].mxu1 %vm3229_vm2, %v17267_v3 }
 0x3c4   :  { %13242 = vpow2.f32 %v5260_v22  ;;  %v5862_v2 = vsub.f32 %v20431_v26, %v5816_v54  ;;  %20432 = vst [vmem:[#allocation51_spill] sm:$0xff] %v17301_v27  ;;  %12981 = vmatpush3.bf16.msra.mxu1 %v20429_v29  ;;  %12290 = vmatprep.mubr.msk.f32.mxu1 %vm3229_vm2, %v17278_v1  ;;  %v13102_v22 = vpack.c.bf16 %v8166_v8, %v8165_v13  ;;  %20433 = vst [vmem:[#allocation52_spill] sm:$0xff] %v17312_v14  ;;  %v20434_v54 = vld [vmem:[#allocation26_spill] sm:$0xff]  ;;  %v20435_v29 = vld [vmem:[#allocation60_spill] sm:$0xff] }
 0x3c5   :  { %v17297_v31 = vpop.eup %13232  ;;  %v5262_v47 = vmul.f32 1.442695, %v5231_v10  ;;  %13007 = vmatprep.subr.bf16.mxu1 %v20434_v54  ;;  %7768 = vmax.xlane.f32.xlu1 %v7767_v43  ;;  %v8168_v13 = vld [vmem:[%s20081_s2 + $0xd8] sm:$0xff] }
 0x3c6   :  { %v17308_v48 = vpop.eup %13234  ;;  %v5878_v42 = vmul.f32 1.442695, %v5862_v2  ;;  %v5819_v17 = vpop.xlane.xlu1 %5818  ;;  %7771 = vmax.xlane.f32.xlu0 %v7770_v57  ;;  %13103 = vmatprep.subr.bf16.mxu0 %v13102_v22  ;;  %v8167_v2 = vld [vmem:[%s20081_s2 + $0xd0] sm:$0xff]  ;;  %v17341_v57 = vadd.f32 %v16800_v56, %v17115_v63  ;;  %v17353_v63 = vadd.f32 %v16820_v9, %v17104_v45 }
 0x3c7   :  { %13244 = vpow2.f32 %v5262_v47  ;;  %v5863_v10 = vsub.f32 %v20435_v29, %v5819_v17  ;;  %v5822_v26 = vpop.xlane.xlu0 %5821  ;;  %12291 = vmatmul.mubr.msk.f32.gmra.mrb[216].mxu1 %vm3229_vm2, %v17297_v31  ;;  %13105 = vmatpush3.bf16.msra.mxu0 %v13102_v22  ;;  %v17331_v47 = vadd.f32 %v16762_v6, %v17071_v62  ;;  %v7773_v22 = vsel %vm3229_vm2, %v17301_v27, -inf  ;;  %v20439_v62 = vld [vmem:[#allocation62_spill] sm:$0xff]  ;;  %v20443_v45 = vld [vmem:[#allocation64_spill] sm:$0xff] }
 0x3c8   :  { %13246 = vpow2.f32 %v5878_v42  ;;  %v5864_v40 = vsub.f32 %v20436_v34, %v5822_v26  ;;  %12293 = vmatprep.mubr.msk.f32.mxu1 %vm3229_vm2, %v17308_v48  ;;  %v13106_v42 = vpack.c.bf16 %v8168_v13, %v8167_v2  ;;  %20438 = vst [vmem:[#allocation23_spill] sm:$0xff] %v17341_v57  ;;  %v7776_v6 = vsel %vm3229_vm2, %v17312_v14, -inf  ;;  %v20440_v2 = vld [vmem:[#allocation63_spill] sm:$0xff]  ;;  %20441 = vst [vmem:[#allocation54_spill] sm:$0xff] %v17353_v63  ;;  %v20472_v27 = vld [vmem:[#allocation6_spill] sm:$0xff] }
 0x3c9   :  { %v17327_v8 = vpop.eup %13236  ;;  %20437 = vst [vmem:[#allocation53_spill] sm:$0xff] %v17331_v47  ;;  %v5880_v43 = vmul.f32 1.442695, %v5863_v10  ;;  %7774 = vmax.xlane.f32.xlu1 %v7773_v22  ;;  %v7782_v9 = vsel %vm3229_vm2, %v17341_v57, -inf  ;;  %v20469_v57 = vld [vmem:[#allocation81_spill] sm:$0xff]  ;;  %v4017_v59 = vsel %vm3229_vm2, %v20472_v27, 0.0 }
 0x3ca   :  { %v17337_v17 = vpop.eup %13238  ;;  %v5882_v29 = vmul.f32 1.442695, %v5864_v40  ;;  %v5825_v26 = vpop.xlane.xlu1 %5824  ;;  %7777 = vmax.xlane.f32.xlu0 %v7776_v6  ;;  %13107 = vmatprep.subr.bf16.mxu0 %v13106_v42 }
 0x3cb   :  { %13248 = vpow2.f32 %v5880_v43  ;;  %v5865_v10 = vsub.f32 %v20439_v62, %v5825_v26  ;;  %v5828_v34 = vpop.xlane.xlu0 %5827  ;;  %12294 = vmatmul.mubr.msk.f32.gmra.mrb[218].mxu1 %vm3229_vm2, %v17327_v8  ;;  %13109 = vmatpush3.bf16.msra.mxu0 %v13106_v42  ;;  %v7779_v43 = vsel %vm3229_vm2, %v17331_v47, -inf  ;;  %v4618_v47 = vsel %vm3229_vm2, %v20469_v57, 0.0 }
 0x3cc   :  { %13250 = vpow2.f32 %v5882_v29  ;;  %v5866_v13 = vsub.f32 %v20440_v2, %v5828_v34  ;;  %12296 = vmatprep.mubr.msk.f32.mxu1 %vm3229_vm2, %v17337_v17  ;;  %v17363_v29 = vadd.f32 %v16858_v35, %v17141_v39  ;;  %v17375_v35 = vadd.f32 %v16878_v0, %v17131_v37 }
 0x3cd   :  { %v17349_v56 = vpop.eup %13240  ;;  %v5884_v40 = vmul.f32 1.442695, %v5865_v10  ;;  %7780 = vmax.xlane.f32.xlu1 %v7779_v43  ;;  %v20444_v10 = vld [vmem:[#allocation65_spill] sm:$0xff]  ;;  %v17385_v43 = vadd.f32 %v16913_v19, %v17167_v60  ;;  %v17397_v19 = vadd.f32 %v16932_v25, %v17157_v24 }
 0x3ce   :  { %v17359_v22 = vpop.eup %13242  ;;  %20442 = vst [vmem:[#allocation55_spill] sm:$0xff] %v17363_v29  ;;  %v5886_v42 = vmul.f32 1.442695, %v5866_v13  ;;  %v5831_v26 = vpop.xlane.xlu1 %5830  ;;  %7783 = vmax.xlane.f32.xlu0 %v7782_v9  ;;  %20445 = vst [vmem:[#allocation24_spill] sm:$0xff] %v17375_v35  ;;  %v7785_v13 = vsel %vm3229_vm2, %v17353_v63, -inf  ;;  %v7788_v0 = vsel %vm3229_vm2, %v17363_v29, -inf }
 0x3cf   :  { %13252 = vpow2.f32 %v5884_v40  ;;  %v5867_v6 = vsub.f32 %v20443_v45, %v5831_v26  ;;  %v5834_v62 = vpop.xlane.xlu0 %5833  ;;  %12297 = vmatmul.mubr.msk.f32.gmra.mrb[220].mxu1 %vm3229_vm2, %v17349_v56  ;;  %20446 = vst [vmem:[#allocation56_spill] sm:$0xff] %v17385_v43  ;;  %20447 = vst [vmem:[#allocation57_spill] sm:$0xff] %v17397_v19  ;;  %v20468_v29 = vld [vmem:[#allocation12_spill] sm:$0xff] }
 0x3d0   :  { %13254 = vpow2.f32 %v5886_v42  ;;  %v5868_v34 = vsub.f32 %v20444_v10, %v5834_v62  ;;  %12299 = vmatprep.mubr.msk.f32.mxu1 %vm3229_vm2, %v17359_v22 }
 0x3d1   :  { %v17371_v2 = vpop.eup %13244  ;;  %v5888_v39 = vmul.f32 1.442695, %v5867_v6  ;;  %7786 = vmax.xlane.f32.xlu1 %v7785_v13 }
 0x3d2   :  { %v17381_v40 = vpop.eup %13246  ;;  %v5890_v42 = vmul.f32 1.442695, %v5868_v34  ;;  %v5837_v26 = vpop.xlane.xlu1 %5836  ;;  %7789 = vmax.xlane.f32.xlu0 %v7788_v0 }
 0x3d3   :  { %13256 = vpow2.f32 %v5888_v39  ;;  %v5869_v37 = vsub.f32 %v16515_v15, %v5837_v26  ;;  %v5840_v9 = vpop.xlane.xlu0 %5839  ;;  %12300 = vmatmul.mubr.msk.f32.gmra.mrb[222].mxu1 %vm3229_vm2, %v17371_v2  ;;  %v7791_v15 = vsel %vm3229_vm2, %v17375_v35, -inf  ;;  %v7797_v26 = vsel %vm3229_vm2, %v17397_v19, -inf }
 0x3d4   :  { %13258 = vpow2.f32 %v5890_v42  ;;  %v5870_v45 = vsub.f32 %v16523_v7, %v5840_v9  ;;  %12358 = vmatprep.mubr.msk.f32.mxu1 %vm3229_vm2, %v17381_v40  ;;  %v7794_v7 = vsel %vm3229_vm2, %v17385_v43, -inf }
 0x3d5   :  { %v17393_v6 = vpop.eup %13248  ;;  %v5892_v60 = vmul.f32 1.442695, %v5869_v37  ;;  %7792 = vmax.xlane.f32.xlu1 %v7791_v15  ;;  %v20448_v37 = vld [vmem:[#allocation27_spill] sm:$0xff] }
 0x3d6   :  { %v17403_v62 = vpop.eup %13250  ;;  %v5894_v10 = vmul.f32 1.442695, %v5870_v45  ;;  %v5843_v34 = vpop.xlane.xlu1 %5842  ;;  %7795 = vmax.xlane.f32.xlu0 %v7794_v7  ;;  %v20449_v7 = vld [vmem:[#allocation28_spill] sm:$0xff] }
 0x3d7   :  { %13260 = vpow2.f32 %v5892_v60  ;;  %v5871_v39 = vsub.f32 %v16526_v16, %v5843_v34  ;;  %v5846_v25 = vpop.xlane.xlu0 %5845  ;;  %12359 = vmatmul.mubr.msk.f32.vlgmr.msra.gmra.mrb[224].mxu1 %vm3229_vm2, %v17393_v6 }
 0x3d8   :  { %13262 = vpow2.f32 %v5894_v10  ;;  %v5872_v24 = vsub.f32 %v16534_v55, %v5846_v25  ;;  %13009 = vmatpush3.bf16.msra.mxu1 %v20434_v54  ;;  %12361 = vmatprep.mubr.msk.f32.mxu1 %vm3229_vm2, %v17403_v62  ;;  %v3975_v55 = vsel %vm3229_vm2, %v16730_v49, 0.0  ;;  %v3987_v49 = vsel %vm3229_vm2, %v16786_v30, 0.0 }
 0x3d9   :  { %v17411_v13 = vpop.eup %13252  ;;  %v5896_v42 = vmul.f32 1.442695, %v5871_v39  ;;  %13011 = vmatprep.subr.bf16.mxu1 %v20448_v37  ;;  %7798 = vmax.xlane.f32.xlu1 %v7797_v26 }
 0x3da   :  { %v17418_v16 = vpop.eup %13254  ;;  %v5898_v0 = vmul.f32 1.442695, %v5872_v24  ;;  %v5849_v9 = vpop.xlane.xlu1 %5848  ;;  %3976 = vadd.xlane.f32.xlu0 %v3975_v55 }
 0x3db   :  { %13264 = vpow2.f32 %v5896_v42  ;;  %v5873_v45 = vsub.f32 %v16537_v53, %v5849_v9  ;;  %v5852_v54 = vpop.xlane.xlu0 %5851  ;;  %12362 = vmatmul.mubr.msk.f32.gmra.mrb[226].mxu1 %vm3229_vm2, %v17411_v13  ;;  %v20451_v9 = vld [vmem:[#allocation29_spill] sm:$0xff] }
 0x3dc   :  { %13266 = vpow2.f32 %v5898_v0  ;;  %v5874_v60 = vsub.f32 %v16545_v4, %v5852_v54  ;;  %13013 = vmatpush3.bf16.msra.mxu1 %v20448_v37  ;;  %12364 = vmatprep.mubr.msk.f32.mxu1 %vm3229_vm2, %v17418_v16  ;;  %v3996_v4 = vsel %vm3229_vm2, %v16833_v50, 0.0  ;;  %v20450_v50 = vld [vmem:[#allocation17_spill] sm:$0xff]  ;;  %v20453_v54 = vld [vmem:[#allocation66_spill] sm:$0xff] }
 0x3dd   :  { %v17427_v15 = vpop.eup %13256  ;;  %v5900_v10 = vmul.f32 1.442695, %v5873_v45  ;;  %13015 = vmatprep.subr.bf16.mxu1 %v20449_v7  ;;  %3988 = vadd.xlane.f32.xlu1 %v3987_v49  ;;  %v3999_v0 = vsel %vm3229_vm2, %v20450_v50, 0.0  ;;  %v20452_v45 = vld [vmem:[#allocation71_spill] sm:$0xff] }
 0x3de   :  { %v17434_v53 = vpop.eup %13258  ;;  %v5902_v34 = vmul.f32 1.442695, %v5874_v60  ;;  %v5855_v39 = vpop.xlane.xlu1 %5854  ;;  %3997 = vadd.xlane.f32.xlu0 %v3996_v4 }
 0x3df   :  { %13268 = vpow2.f32 %v5900_v10  ;;  %v5875_v25 = vsub.f32 %v16549_v51, %v5855_v39  ;;  %v5858_v24 = vpop.xlane.xlu0 %5857  ;;  %12365 = vmatmul.mubr.msk.f32.gmra.mrb[228].mxu1 %vm3229_vm2, %v17427_v15 }
 0x3e0   :  { %13270 = vpow2.f32 %v5902_v34  ;;  %v5876_v30 = vsub.f32 %v16557_v58, %v5858_v24  ;;  %13017 = vmatpush3.bf16.msra.mxu1 %v20449_v7  ;;  %12367 = vmatprep.mubr.msk.f32.mxu1 %vm3229_vm2, %v17434_v53  ;;  %v3978_v58 = vsel %vm3229_vm2, %v20452_v45, 0.0  ;;  %v20454_v7 = vld [vmem:[#allocation15_spill] sm:$0xff] }
 0x3e1   :  { %v17443_v42 = vpop.eup %13260  ;;  %v5904_v26 = vmul.f32 1.442695, %v5875_v25  ;;  %13019 = vmatprep.subr.bf16.mxu1 %v20451_v9  ;;  %4000 = vadd.xlane.f32.xlu1 %v3999_v0  ;;  %v3990_v39 = vsel %vm3229_vm2, %v20454_v7, 0.0  ;;  %v20455_v25 = vld [vmem:[#allocation30_spill] sm:$0xff]  ;;  %v20458_v45 = vld [vmem:[#allocation67_spill] sm:$0xff] }
 0x3e2   :  { %v17450_v51 = vpop.eup %13262  ;;  %v5906_v37 = vmul.f32 1.442695, %v5876_v30  ;;  %v5861_v55 = vpop.xlane.xlu1 %5860  ;;  %3979 = vadd.xlane.f32.xlu0 %v3978_v58  ;;  %v20456_v30 = vld [vmem:[#allocation79_spill] sm:$0xff] }
 0x3e3   :  { %13272 = vpow2.f32 %v5904_v26  ;;  %v5877_v60 = vsub.f32 %v20453_v54, %v5861_v55  ;;  %v17456_v10 = vpop.xlane.xlu0 %3330  ;;  %12368 = vmatmul.mubr.msk.f32.gmra.mrb[230].mxu1 %vm3229_vm2, %v17443_v42  ;;  %v4008_v26 = vsel %vm3229_vm2, %v20456_v30, 0.0  ;;  %v20459_v54 = vld [vmem:[#allocation16_spill] sm:$0xff] }
 0x3e4   :  { %13274 = vpow2.f32 %v5906_v37  ;;  %13021 = vmatpush3.bf16.msra.mxu1 %v20451_v9  ;;  %12370 = vmatprep.mubr.msk.f32.mxu1 %vm3229_vm2, %v17450_v51  ;;  %v20457_v37 = vld [vmem:[#allocation73_spill] sm:$0xff]  ;;  %v20460_v30 = vld [vmem:[#allocation68_spill] sm:$0xff] }
 0x3e5   :  { %v17460_v49 = vpop.eup %13264  ;;  %v5908_v34 = vmul.f32 1.442695, %v5877_v60  ;;  %13047 = vmatprep.subr.bf16.mxu1 %v20455_v25  ;;  %3991 = vadd.xlane.f32.xlu1 %v3990_v39  ;;  %v3981_v9 = vsel %vm3229_vm2, %v20457_v37, 0.0  ;;  %v3993_v60 = vsel %vm3229_vm2, %v20459_v54, 0.0  ;;  %v20461_v37 = vld [vmem:[#allocation4_spill] sm:$0xff]  ;;  %v20463_v54 = vld [vmem:[#allocation77_spill] sm:$0xff] }
 0x3e6   :  { %v17467_v4 = vpop.eup %13266  ;;  %v6465_v24 = vpop.xlane.xlu1 %6464  ;;  %4009 = vadd.xlane.f32.xlu0 %v4008_v26 }
 0x3e7   :  { %13276 = vpow2.f32 %v5908_v34  ;;  %12371 = vmatmul.mubr.msk.f32.gmra.mrb[232].mxu1 %vm3229_vm2, %v17460_v49  ;;  %v17474_v50 = vpop.xlane.xlu0 %3327  ;;  %v6509_v58 = vsub.f32 %v20458_v45, %v6465_v24  ;;  %v4011_v24 = vsel %vm3229_vm2, %v20461_v37, 0.0  ;;  %v20465_v37 = vld [vmem:[#allocation18_spill] sm:$0xff] }
 0x3e8   :  { %12373 = vmatprep.mubr.msk.f32.mxu1 %vm3229_vm2, %v17467_v4 }
 0x3e9   :  { %v17476_v0 = vpop.eup %13268  ;;  %3982 = vadd.xlane.f32.xlu1 %v3981_v9  ;;  %v6526_v45 = vmul.f32 1.442695, %v6509_v58  ;;  %v4005_v58 = vsel %vm3229_vm2, %v20465_v37, 0.0 }
 0x3ea   :  { %v17482_v55 = vpop.eup %13270  ;;  %v17487_v34 = vpop.xlane.xlu1 %3336  ;;  %3994 = vadd.xlane.f32.xlu0 %v3993_v60  ;;  %v4002_v60 = vsel %vm3229_vm2, %v20463_v54, 0.0 }
 0x3eb   :  { %12374 = vmatmul.mubr.msk.f32.gmra.mrb[234].mxu1 %vm3229_vm2, %v17476_v0  ;;  %v6462_v7 = vpop.xlane.xlu0 %6461 }
 0x3ec   :  { %v6508_v26 = vsub.f32 %v20460_v30, %v6462_v7  ;;  %12376 = vmatprep.mubr.msk.f32.mxu1 %vm3229_vm2, %v17482_v55 }
 0x3ed   :  { %v17491_v39 = vpop.eup %13272  ;;  %4012 = vadd.xlane.f32.xlu1 %v4011_v24  ;;  %v20466_v24 = vld [vmem:[#allocation11_spill] sm:$0xff] }
 0x3ee   :  { %v17498_v9 = vpop.eup %13274  ;;  %v6524_v19 = vmul.f32 1.442695, %v6508_v26  ;;  %v6471_v43 = vpop.xlane.xlu1 %6470  ;;  %4003 = vadd.xlane.f32.xlu0 %v4002_v60  ;;  %v20467_v26 = vld [vmem:[#allocation3_spill] sm:$0xff] }
 0x3ef   :  { %20462 = vst [vmem:[#allocation25_spill] sm:$0xff] %v17498_v9  ;;  %12377 = vmatmul.mubr.msk.f32.gmra.mrb[236].mxu1 %vm3229_vm2, %v17491_v39  ;;  %v17504_v7 = vpop.xlane.xlu0 %3333  ;;  %v6511_v54 = vsub.f32 %v20466_v24, %v6471_v43  ;;  %v4014_v60 = vsel %vm3229_vm2, %v20467_v26, 0.0 }
 0x3f0   :  { %13278 = vpow2.f32 %v6524_v19  ;;  %12379 = vmatprep.mubr.msk.f32.mxu1 %vm3229_vm2, %v17498_v9 }
 0x3f1   :  { %v17506_v30 = vpop.eup %13276  ;;  %13280 = vpow2.f32 %v6526_v45  ;;  %4006 = vadd.xlane.f32.xlu1 %v4005_v58  ;;  %v6530_v37 = vmul.f32 1.442695, %v6511_v54  ;;  %v20470_v45 = vld [vmem:[#allocation84_spill] sm:$0xff] }
 0x3f2   :  { %20464 = vst [vmem:[#allocation58_spill] sm:$0xff] %v17506_v30  ;;  %v17515_v35 = vpop.xlane.xlu1 %3342  ;;  %4015 = vadd.xlane.f32.xlu0 %v4014_v60  ;;  %v4630_v43 = vsel %vm3229_vm2, %v20470_v45, 0.0  ;;  %v20471_v60 = vld [vmem:[#allocation13_spill] sm:$0xff]  ;;  %v20476_v45 = vld [vmem:[#allocation14_spill] sm:$0xff] }
 0x3f3   :  { %12380 = vmatmul.mubr.msk.f32.gmra.mrb[238].mxu1 %vm3229_vm2, %v17506_v30  ;;  %v6468_v19 = vpop.xlane.xlu0 %6467 }
 0x3f4   :  { %v6510_v63 = vsub.f32 %v20468_v29, %v6468_v19  ;;  %v20473_v29 = vld [vmem:[#allocation8_spill] sm:$0xff] }
 0x3f5   :  { %4619 = vadd.xlane.f32.xlu1 %v4618_v47  ;;  %v4621_v57 = vsel %vm3229_vm2, %v20473_v29, 0.0 }
 0x3f6   :  { %v6528_v58 = vmul.f32 1.442695, %v6510_v63  ;;  %v17524_v24 = vpop.xlane.xlu1 %3339  ;;  %4631 = vadd.xlane.f32.xlu0 %v4630_v43 }
 0x3f7   :  { %v6474_v26 = vpop.xlane.xlu0 %6473 }
 0x3f8   :  { %13282 = vpow2.f32 %v6528_v58  ;;  %v6512_v14 = vsub.f32 %v20471_v60, %v6474_v26  ;;  %v20479_v60 = vld [vmem:[#allocation31_spill] sm:$0xff] }
 0x3f9   :  { %13284 = vpow2.f32 %v6530_v37  ;;  %4018 = vadd.xlane.f32.xlu1 %v4017_v59  ;;  %v20477_v59 = vld [vmem:[#allocation19_spill] sm:$0xff] }
 0x3fa   :  { %v17531_v47 = vpop.eup %13278  ;;  %v6532_v54 = vmul.f32 1.442695, %v6512_v14  ;;  %v6477_v19 = vpop.xlane.xlu1 %6476  ;;  %4622 = vadd.xlane.f32.xlu0 %v4621_v57  ;;  %v4633_v27 = vsel %vm3229_vm2, %v20477_v59, 0.0  ;;  %v20478_v14 = vld [vmem:[#allocation41_spill] sm:$0xff] }
 0x3fb   :  { %20474 = vst [vmem:[#allocation59_spill] sm:$0xff] %v17531_v47  ;;  %v17533_v63 = vpop.eup %13280  ;;  %v6513_v43 = vsub.f32 %v20476_v45, %v6477_v19  ;;  %12438 = vmatprep.mubr.msk.f32.mxu1 %vm3229_vm2, %v17531_v47  ;;  %v17538_v58 = vpop.xlane.xlu0 %3348  ;;  %v4642_v26 = vsel %vm3229_vm2, %v20478_v14, 0.0  ;;  %v20481_v45 = vld [vmem:[#allocation21_spill] sm:$0xff]  ;;  %v20484_v14 = vld [vmem:[#allocation32_spill] sm:$0xff] }
 0x3fc   :  { %20475 = vst [vmem:[#allocation26_spill] sm:$0xff] %v17533_v63  ;;  %13286 = vpow2.f32 %v6532_v54  ;;  %12439 = vmatmul.mubr.msk.f32.vlgmr.msra.gmra.mrb[240].mxu1 %vm3229_vm2, %v17533_v63  ;;  %v20480_v54 = vld [vmem:[#allocation69_spill] sm:$0xff]  ;;  %v4645_v47 = vsel %vm3229_vm2, %v20481_v45, 0.0 }
 0x3fd   :  { %v6534_v37 = vmul.f32 1.442695, %v6513_v43  ;;  %13049 = vmatpush3.bf16.msra.mxu1 %v20455_v25  ;;  %4634 = vadd.xlane.f32.xlu1 %v4633_v27  ;;  %v20482_v25 = vld [vmem:[#allocation7_spill] sm:$0xff]  ;;  %v20488_v45 = vld [vmem:[#allocation45_spill] sm:$0xff] }
 0x3fe   :  { %13051 = vmatprep.subr.bf16.mxu1 %v20479_v60  ;;  %v17548_v29 = vpop.xlane.xlu1 %3345  ;;  %4643 = vadd.xlane.f32.xlu0 %v4642_v26  ;;  %v4624_v43 = vsel %vm3229_vm2, %v20482_v25, 0.0  ;;  %v20486_v26 = vld [vmem:[#allocation70_spill] sm:$0xff]  ;;  %v4654_v25 = vsel %vm3229_vm2, %v20488_v45, 0.0  ;;  %v20494_v45 = vld [vmem:[#allocation20_spill] sm:$0xff] }
 0x3ff   :  { %13288 = vpow2.f32 %v6534_v37  ;;  %v6480_v57 = vpop.xlane.xlu0 %6479 }
 0x400   :  { %v6514_v19 = vsub.f32 %v20480_v54, %v6480_v57 }
 0x401   :  { %13053 = vmatpush3.bf16.msra.mxu1 %v20479_v60  ;;  %4646 = vadd.xlane.f32.xlu1 %v4645_v47  ;;  %v20487_v47 = vld [vmem:[#allocation39_spill] sm:$0xff] }
 0x402   :  { %v17556_v59 = vpop.eup %13282  ;;  %v6536_v27 = vmul.f32 1.442695, %v6514_v19  ;;  %13055 = vmatprep.subr.bf16.mxu1 %v20484_v14  ;;  %v6483_v63 = vpop.xlane.xlu1 %6482  ;;  %4625 = vadd.xlane.f32.xlu0 %v4624_v43  ;;  %v4636_v60 = vsel %vm3229_vm2, %v20487_v47, 0.0  ;;  %v20490_v43 = vld [vmem:[#allocation33_spill] sm:$0xff]  ;;  %v20491_v47 = vld [vmem:[#allocation72_spill] sm:$0xff] }
 0x403   :  { %20483 = vst [vmem:[#allocation60_spill] sm:$0xff] %v17556_v59  ;;  %v17559_v37 = vpop.eup %13284  ;;  %v6515_v57 = vsub.f32 %v20486_v26, %v6483_v63  ;;  %12441 = vmatprep.mubr.msk.f32.mxu1 %vm3229_vm2, %v17556_v59  ;;  %v17564_v54 = vpop.xlane.xlu0 %3351  ;;  %v4639_v59 = vsel %vm3229_vm2, %v20494_v45, 0.0 }
 0x404   :  { %20485 = vst [vmem:[#allocation61_spill] sm:$0xff] %v17559_v37  ;;  %13290 = vpow2.f32 %v6536_v27  ;;  %12442 = vmatmul.mubr.msk.f32.gmra.mrb[242].mxu1 %vm3229_vm2, %v17559_v37  ;;  %v20492_v37 = vld [vmem:[#allocation10_spill] sm:$0xff] }
 0x405   :  { %v6538_v19 = vmul.f32 1.442695, %v6515_v57  ;;  %13057 = vmatpush3.bf16.msra.mxu1 %v20484_v14  ;;  %4637 = vadd.xlane.f32.xlu1 %v4636_v60  ;;  %v4627_v14 = vsel %vm3229_vm2, %v20492_v37, 0.0  ;;  %v4657_v37 = vsel %vm3229_vm2, %v17149_v52, 0.0 }
 0x406   :  { %v17573_v63 = vpop.eup %13286  ;;  %13059 = vmatprep.subr.bf16.mxu1 %v20490_v43  ;;  %v17576_v26 = vpop.xlane.xlu1 %3354  ;;  %4655 = vadd.xlane.f32.xlu0 %v4654_v25  ;;  %v20495_v25 = vld [vmem:[#allocation34_spill] sm:$0xff] }
 0x407   :  { %20489 = vst [vmem:[#allocation62_spill] sm:$0xff] %v17573_v63  ;;  %13292 = vpow2.f32 %v6538_v19  ;;  %12444 = vmatprep.mubr.msk.f32.mxu1 %vm3229_vm2, %v17573_v63  ;;  %v6486_v27 = vpop.xlane.xlu0 %6485  ;;  %v20496_v63 = vld [vmem:[#allocation74_spill] sm:$0xff] }
 0x408   :  { %v6516_v57 = vsub.f32 %v20491_v47, %v6486_v27  ;;  %v20497_v47 = vld [vmem:[#allocation43_spill] sm:$0xff] }
 0x409   :  { %v17583_v60 = vpop.eup %13288  ;;  %13061 = vmatpush3.bf16.msra.mxu1 %v20490_v43  ;;  %4628 = vadd.xlane.f32.xlu1 %v4627_v14 }
 0x40a   :  { %20493 = vst [vmem:[#allocation63_spill] sm:$0xff] %v17583_v60  ;;  %v6540_v30 = vmul.f32 1.442695, %v6516_v57  ;;  %13087 = vmatprep.subr.bf16.mxu1 %v20495_v25  ;;  %v6489_v19 = vpop.xlane.xlu1 %6488  ;;  %4640 = vadd.xlane.f32.xlu0 %v4639_v59  ;;  %v4648_v57 = vsel %vm3229_vm2, %v20497_v47, 0.0 }
 0x40b   :  { %v6517_v46 = vsub.f32 %v20496_v63, %v6489_v19  ;;  %12445 = vmatmul.mubr.msk.f32.gmra.mrb[244].mxu1 %vm3229_vm2, %v17583_v60  ;;  %v17592_v27 = vpop.xlane.xlu0 %3357  ;;  %v20499_v63 = vld [vmem:[#allocation75_spill] sm:$0xff]  ;;  %v20500_v19 = vld [vmem:[#allocation22_spill] sm:$0xff] }
 0x40c   :  { %13294 = vpow2.f32 %v6540_v30  ;;  %v4651_v52 = vsel %vm3229_vm2, %v20500_v19, 0.0  ;;  %v5267_v19 = vsel %vm3229_vm2, %v17197_v23, 0.0  ;;  %v5270_v23 = vsel %vm3229_vm2, %v17207_v18, 0.0 }
 0x40d   :  { %v6542_v43 = vmul.f32 1.442695, %v6517_v46  ;;  %4658 = vadd.xlane.f32.xlu1 %v4657_v37  ;;  %v20501_v37 = vld [vmem:[#allocation47_spill] sm:$0xff] }
 0x40e   :  { %v17598_v14 = vpop.eup %13290  ;;  %v17600_v45 = vpop.xlane.xlu1 %3360  ;;  %4649 = vadd.xlane.f32.xlu0 %v4648_v57  ;;  %v4660_v47 = vsel %vm3229_vm2, %v20501_v37, 0.0  ;;  %v20503_v37 = vld [vmem:[#allocation78_spill] sm:$0xff] }
 0x40f   :  { %20498 = vst [vmem:[#allocation64_spill] sm:$0xff] %v17598_v14  ;;  %13296 = vpow2.f32 %v6542_v43  ;;  %12447 = vmatprep.mubr.msk.f32.mxu1 %vm3229_vm2, %v17598_v14  ;;  %v6492_v59 = vpop.xlane.xlu0 %6491  ;;  %v20502_v43 = vld [vmem:[#allocation76_spill] sm:$0xff] }
 0x410   :  { %v6518_v30 = vsub.f32 %v20499_v63, %v6492_v59  ;;  %v4663_v59 = vsel %vm3229_vm2, %v17175_v5, 0.0  ;;  %v5264_v5 = vsel %vm3229_vm2, %v17185_v36, 0.0  ;;  %v5273_v36 = vsel %vm3229_vm2, %v17219_v28, 0.0  ;;  %v20505_v28 = vld [vmem:[#allocation80_spill] sm:$0xff] }
 0x411   :  { %v17607_v46 = vpop.eup %13292  ;;  %4652 = vadd.xlane.f32.xlu1 %v4651_v52 }
 0x412   :  { %v6544_v60 = vmul.f32 1.442695, %v6518_v30  ;;  %v6495_v9 = vpop.xlane.xlu1 %6494  ;;  %4661 = vadd.xlane.f32.xlu0 %v4660_v47  ;;  %12448 = vmatmul.mubr.msk.f32.gmra.mrb[246].mxu1 %vm3229_vm2, %v17607_v46 }
 0x413   :  { %v6519_v57 = vsub.f32 %v20502_v43, %v6495_v9  ;;  %v17614_v14 = vpop.xlane.xlu0 %3363 }
 0x414   :  { %13298 = vpow2.f32 %v6544_v60 }
 0x415   :  { %v6546_v63 = vmul.f32 1.442695, %v6519_v57  ;;  %4664 = vadd.xlane.f32.xlu1 %v4663_v59  ;;  %v20504_v59 = vld [vmem:[#allocation2_spill] sm:$0xff] }
 0x416   :  { %v17620_v52 = vpop.eup %13294  ;;  %v17622_v30 = vpop.xlane.xlu1 %3366  ;;  %5268 = vadd.xlane.f32.xlu0 %v5267_v19 }
 0x417   :  { %13300 = vpow2.f32 %v6546_v63  ;;  %12450 = vmatprep.mubr.msk.f32.mxu1 %vm3229_vm2, %v17620_v52  ;;  %v6498_v9 = vpop.xlane.xlu0 %6497 }
 0x418   :  { %v6520_v60 = vsub.f32 %v20503_v37, %v6498_v9  ;;  %v5276_v37 = vsel %vm3229_vm2, %v17230_v11, 0.0 }
 0x419   :  { %v17629_v47 = vpop.eup %13296  ;;  %5265 = vadd.xlane.f32.xlu1 %v5264_v5 }
 0x41a   :  { %v6548_v43 = vmul.f32 1.442695, %v6520_v60  ;;  %v6501_v57 = vpop.xlane.xlu1 %6500  ;;  %5271 = vadd.xlane.f32.xlu0 %v5270_v23  ;;  %12451 = vmatmul.mubr.msk.f32.gmra.mrb[248].mxu1 %vm3229_vm2, %v17629_v47 }
 0x41b   :  { %v6521_v63 = vsub.f32 %v20504_v59, %v6501_v57  ;;  %v17636_v19 = vpop.xlane.xlu0 %3369 }
 0x41c   :  { %13302 = vpow2.f32 %v6548_v43  ;;  %v5279_v43 = vsel %vm3229_vm2, %v17243_v38, 0.0 }
 0x41d   :  { %v6550_v9 = vmul.f32 1.442695, %v6521_v63  ;;  %5274 = vadd.xlane.f32.xlu1 %v5273_v36  ;;  %13304 = vrcp.f32 %v17456_v10  ;;  %v5285_v10 = vsel %vm3229_vm2, %v17267_v3, 0.0  ;;  %v20507_v36 = vld [vmem:[#allocation82_spill] sm:$0xff] }
 0x41e   :  { %v17642_v18 = vpop.eup %13298  ;;  %v17645_v60 = vpop.xlane.xlu1 %3372  ;;  %5277 = vadd.xlane.f32.xlu0 %v5276_v37 }
 0x41f   :  { %13306 = vpow2.f32 %v6550_v9  ;;  %12453 = vmatprep.mubr.msk.f32.mxu1 %vm3229_vm2, %v17642_v18  ;;  %v6504_v5 = vpop.xlane.xlu0 %6503  ;;  %v5282_v9 = vsel %vm3229_vm2, %v17254_v20, 0.0 }
 0x420   :  { %13308 = vrcp.f32 %v17474_v50  ;;  %v6522_v23 = vsub.f32 %v20505_v28, %v6504_v5  ;;  %v20506_v50 = vld [vmem:[#allocation5_spill] sm:$0xff] }
 0x421   :  { %v17653_v11 = vpop.eup %13300  ;;  %13310 = vrcp.f32 %v17487_v34  ;;  %5280 = vadd.xlane.f32.xlu1 %v5279_v43 }
 0x422   :  { %13312 = vrcp.f32 %v17504_v7  ;;  %v6552_v57 = vmul.f32 1.442695, %v6522_v23  ;;  %v6507_v59 = vpop.xlane.xlu1 %6506  ;;  %5286 = vadd.xlane.f32.xlu0 %v5285_v10  ;;  %12454 = vmatmul.mubr.msk.f32.gmra.mrb[250].mxu1 %vm3229_vm2, %v17653_v11  ;;  %v5288_v7 = vsel %vm3229_vm2, %v17278_v1, 0.0  ;;  %v5291_v1 = vsel %vm3229_vm2, %v17297_v31, 0.0 }
 0x423   :  { %13314 = vrcp.f32 %v17515_v35  ;;  %v6523_v38 = vsub.f32 %v20506_v50, %v6507_v59  ;;  %v7108_v63 = vpop.xlane.xlu0 %7107 }
 0x424   :  { %13316 = vpow2.f32 %v6552_v57  ;;  %v7154_v34 = vsub.f32 %v20507_v36, %v7108_v63 }
 0x425   :  { %13318 = vrcp.f32 %v17524_v24  ;;  %v6554_v3 = vmul.f32 1.442695, %v6523_v38  ;;  %5283 = vadd.xlane.f32.xlu1 %v5282_v9  ;;  %v20508_v24 = vld [vmem:[#allocation83_spill] sm:$0xff]  ;;  %v20509_v38 = vld [vmem:[#allocation9_spill] sm:$0xff]  ;;  %v5297_v9 = vsel %vm3229_vm2, %v17327_v8, 0.0  ;;  %v5306_v8 = vsel %vm3229_vm2, %v17359_v22, 0.0 }
 0x426   :  { %v17669_v37 = vpop.eup %13302  ;;  %13320 = vrcp.f32 %v17538_v58  ;;  %v7170_v35 = vmul.f32 1.442695, %v7154_v34  ;;  %v17672_v5 = vpop.xlane.xlu1 %3973  ;;  %5289 = vadd.xlane.f32.xlu0 %v5288_v7  ;;  %v5294_v58 = vsel %vm3229_vm2, %v17308_v48, 0.0  ;;  %v5913_v22 = vsel %vm3229_vm2, %v17393_v6, 0.0 }
 0x427   :  { %13322 = vpow2.f32 %v6554_v3  ;;  %12456 = vmatprep.mubr.msk.f32.mxu1 %vm3229_vm2, %v17669_v37  ;;  %v7114_v20 = vpop.xlane.xlu0 %7113  ;;  %v13305_v28 = vpop.eup %13304 }
 0x428   :  { %13324 = vpow2.f32 %v7170_v35  ;;  %v7156_v23 = vsub.f32 %v20508_v24, %v7114_v20  ;;  %v5303_v35 = vsel %vm3229_vm2, %v17349_v56, 0.0  ;;  %v17708_v24 = vsel %vm3229_vm2, %v17381_v40, 0.0 }
 0x429   :  { %v17679_v43 = vpop.eup %13306  ;;  %13326 = vrcp.f32 %v17548_v29  ;;  %5292 = vadd.xlane.f32.xlu1 %v5291_v1  ;;  %v17718_v40 = vsel %vm3229_vm2, %v17403_v62, 0.0 }
 0x42a   :  { %v13309_v10 = vpop.eup %13308  ;;  %13328 = vrcp.f32 %v17564_v54  ;;  %v12040_v57 = vpop.f32.mrb[160].mxu1  ;;  %5295 = vadd.xlane.f32.xlu0 %v5294_v58  ;;  %12457 = vmatmul.mubr.msk.f32.gmra.mrb[252].mxu1 %vm3229_vm2, %v17679_v43  ;;  %v7174_v48 = vmul.f32 1.442695, %v7156_v23  ;;  %v20510_v23 = vld [vmem:[#allocation38_spill] sm:$0xff] }
 0x42b   :  { %v7111_v59 = vpop.xlane.xlu1 %7110  ;;  %v13311_v50 = vpop.eup %13310  ;;  %13330 = vrcp.f32 %v17576_v26  ;;  %v3584_v31 = vmul.f32 %v13305_v28, %v12040_v57  ;;  %v5300_v26 = vsel %vm3229_vm2, %v17337_v17, 0.0  ;;  %v20511_v57 = vld [vmem:[#allocation85_spill] sm:$0xff] }
 0x42c   :  { %v7155_v63 = vsub.f32 %v20509_v38, %v7111_v59  ;;  %v3488_v29 = vpop.f32.mrb[161].mxu1  ;;  %v17689_v36 = vpop.xlane.xlu0 %3985  ;;  %13332 = vrcp.f32 %v17592_v27  ;;  %v17726_v38 = vld [vmem:[%s20085_s4 + $0x8] sm:$0xff] }
 0x42d   :  { %v13313_v34 = vpop.eup %13312  ;;  %v3583_v54 = vmul.f32 %v13309_v10, %v3488_v29  ;;  %13334 = vrcp.f32 %v17600_v45  ;;  %5298 = vadd.xlane.f32.xlu1 %v5297_v9  ;;  %v5309_v45 = vsel %vm3229_vm2, %v17371_v2, 0.0  ;;  %v3600_v6 = vmul.f32 %v17726_v38, %v3584_v31 }
 0x42e   :  { %v13315_v3 = vpop.eup %13314  ;;  %v7172_v7 = vmul.f32 1.442695, %v7155_v63  ;;  %13336 = vrcp.f32 %v17614_v14  ;;  %v12043_v27 = vpop.f32.mrb[162].mxu1  ;;  %5301 = vadd.xlane.f32.xlu0 %v5300_v26  ;;  %v17732_v63 = vld [vmem:[%s20085_s4] sm:$0xff]  ;;  %v17742_v31 = vsel %vm3229_vm2, %v17411_v13, 0.0 }
 0x42f   :  { %v17699_v20 = vpop.eup %13316  ;;  %v7117_v28 = vpop.xlane.xlu1 %7116  ;;  %v3586_v56 = vmul.f32 %v13311_v50, %v12043_v27  ;;  %v3599_v29 = vmul.f32 %v17732_v63, %v3583_v54  ;;  %v17746_v54 = vsel %vm3229_vm2, %v17418_v16, 0.0  ;;  %v20514_v16 = vld [vmem:[#allocation86_spill] sm:$0xff] }
 0x430   :  { %v13319_v17 = vpop.eup %13318  ;;  %13338 = vpow2.f32 %v7172_v7  ;;  %v7157_v1 = vsub.f32 %v20510_v23, %v7117_v28  ;;  %v3498_v58 = vpop.f32.mrb[163].mxu1  ;;  %12459 = vmatprep.mubr.msk.f32.mxu1 %vm3229_vm2, %v17699_v20 }
 0x431   :  { %v7120_v14 = vpop.xlane.xlu0 %7119  ;;  %v13321_v10 = vpop.eup %13320  ;;  %13340 = vpow2.f32 %v7174_v48  ;;  %v3585_v2 = vmul.f32 %v13313_v34, %v3498_v58  ;;  %5304 = vadd.xlane.f32.xlu1 %v5303_v35  ;;  %v20513_v35 = vld [vmem:[#allocation40_spill] sm:$0xff] }
 0x432   :  { %v7158_v59 = vsub.f32 %v20511_v57, %v7120_v14  ;;  %v17720_v50 = vpop.eup %13322  ;;  %13342 = vrcp.f32 %v17622_v30  ;;  %v7176_v62 = vmul.f32 1.442695, %v7157_v1  ;;  %v12046_v48 = vpop.f32.mrb[164].mxu1  ;;  %5307 = vadd.xlane.f32.xlu0 %v5306_v8  ;;  %v17753_v8 = vsel %vm3229_vm2, %v17427_v15, 0.0  ;;  %v17767_v15 = vld [vmem:[%s20085_s4 + $0x28] sm:$0xff] }
 0x433   :  { %v17735_v34 = vpop.eup %13324  ;;  %13344 = vrcp.f32 %v17636_v19  ;;  %v7123_v9 = vpop.xlane.xlu1 %7122  ;;  %12460 = vmatmul.mubr.msk.f32.gmra.mrb[254].mxu1 %vm3229_vm2, %v17720_v50  ;;  %v3588_v26 = vmul.f32 %v13315_v3, %v12046_v48  ;;  %v17760_v3 = vsel %vm3229_vm2, %v17434_v53, 0.0  ;;  %v3622_v14 = vsel %vm128_vm0, %v3600_v6, 0.0  ;;  %20515 = vst [vmem:[#allocation27_spill] sm:$0xff] %v17767_v15  ;;  %v17775_v53 = vld [vmem:[%s20085_s4 + $0x18] sm:$0xff] }
 0x434   :  { %20512 = vst [vmem:[#allocation65_spill] sm:$0xff] %v17735_v34  ;;  %v7178_v30 = vmul.f32 1.442695, %v7158_v59  ;;  %v13327_v7 = vpop.eup %13326  ;;  %13346 = vpow2.f32 %v7176_v62  ;;  %v7159_v19 = vsub.f32 %v20513_v35, %v7123_v9  ;;  %v3508_v27 = vpop.f32.mrb[165].mxu1  ;;  %12518 = vmatprep.mubr.msk.f32.mxu1 %vm3229_vm2, %v17735_v34  ;;  %v3615_v57 = vsel %vm128_vm0, %v3599_v29, 0.0  ;;  %20516 = vst [vmem:[#allocation28_spill] sm:$0xff] %v17775_v53 }
 0x435   :  { %v7126_v28 = vpop.xlane.xlu0 %7125  ;;  %v17755_v13 = vpop.eup %13328  ;;  %v3587_v23 = vmul.f32 %v13319_v17, %v3508_v27  ;;  %v3604_v59 = vmul.f32 %v17767_v15, %v3588_v26  ;;  %5310 = vadd.xlane.f32.xlu1 %v5309_v45  ;;  %v3602_v6 = vmul.f32 %v17775_v53, %v3586_v56  ;;  %v17781_v29 = vld [vmem:[%s20085_s4 + $0x10] sm:$0xff]  ;;  %v17787_v45 = vld [vmem:[%s20085_s4 + $0x20] sm:$0xff] }
 0x436   :  { %13348 = vpow2.f32 %v7178_v30  ;;  %v7160_v1 = vsub.f32 %v20514_v16, %v7126_v28  ;;  %v13331_v58 = vpop.eup %13330  ;;  %v7180_v62 = vmul.f32 1.442695, %v7159_v19  ;;  %20517 = vst [vmem:[#allocation17_spill] sm:$0xff] %v17781_v29  ;;  %v3601_v30 = vmul.f32 %v17781_v29, %v3585_v2  ;;  %v12049_v26 = vpop.f32.mrb[166].mxu1  ;;  %5914 = vadd.xlane.f32.xlu0 %v5913_v22  ;;  %v20518_v28 = vld [vmem:[#allocation42_spill] sm:$0xff] }
 0x437   :  { %v17770_v17 = vpop.eup %13332  ;;  %v3603_v48 = vmul.f32 %v17787_v45, %v3587_v23  ;;  %v7129_v35 = vpop.xlane.xlu1 %7128  ;;  %v3623_v56 = vsel %vm128_vm0, %v3604_v59, 0.0  ;;  %v3590_v27 = vmul.f32 %v13321_v10, %v12049_v26  ;;  %v17802_v59 = vld [vmem:[%s20085_s4 + $0x38] sm:$0xff]  ;;  %v20519_v26 = vld [vmem:[#allocation87_spill] sm:$0xff] }
 0x438   :  { %v7182_v9 = vmul.f32 1.442695, %v7160_v1  ;;  %v17790_v19 = vpop.eup %13334  ;;  %13350 = vpow2.f32 %v7180_v62  ;;  %v7161_v16 = vsub.f32 %v20518_v28, %v7129_v35  ;;  %v3518_v2 = vpop.f32.mrb[167].mxu1  ;;  %v3624_v15 = vadd.f32 %v3623_v56, %v3622_v14 }
 0x439   :  { %v7132_v53 = vpop.xlane.xlu0 %7131  ;;  %v17794_v29 = vpop.eup %13336  ;;  %v3616_v34 = vsel %vm128_vm0, %v3603_v48, 0.0  ;;  %v3589_v23 = vmul.f32 %v13327_v7, %v3518_v2  ;;  %v3606_v10 = vmul.f32 %v17802_v59, %v3590_v27  ;;  %5911 = vadd.xlane.f32.xlu1 %v17708_v24  ;;  %v3636_v7 = vsel %vm128_vm0, %v3602_v6, 0.0  ;;  %v20520_v2 = vld [vmem:[#allocation44_spill] sm:$0xff] }
 0x43a   :  { %13352 = vpow2.f32 %v7182_v9  ;;  %v17797_v1 = vpop.eup %13338  ;;  %v3617_v22 = vadd.f32 %v3616_v34, %v3615_v57  ;;  %v7184_v62 = vmul.f32 1.442695, %v7161_v16  ;;  %v7162_v35 = vsub.f32 %v20519_v26, %v7132_v53  ;;  %v17815_v57 = vld [vmem:[%s20085_s4 + $0x30] sm:$0xff]  ;;  %v12052_v9 = vpop.f32.mrb[168].mxu1  ;;  %5917 = vadd.xlane.f32.xlu0 %v17718_v40 }
 0x43b   :  { %v17807_v14 = vpop.eup %13340  ;;  %13354 = vrcp.f32 %v17645_v60  ;;  %v3629_v34 = vsel %vm128_vm0, %v3601_v30, 0.0  ;;  %v3605_v48 = vmul.f32 %v17815_v57, %v3589_v23  ;;  %v7135_v56 = vpop.xlane.xlu1 %7134  ;;  %12519 = vmatmul.mubr.msk.f32.vlgmr.msra.gmra.mrb[0].mxu1 %vm3229_vm2, %v17797_v1  ;;  %v3637_v60 = vsel %vm128_vm0, %v3606_v10, 0.0  ;;  %v20521_v10 = vld [vmem:[#allocation35_spill] sm:$0xff] }
 0x43c   :  { %v17821_v24 = vpop.eup %13342  ;;  %13356 = vpow2.f32 %v7184_v62  ;;  %v7186_v53 = vmul.f32 1.442695, %v7162_v35  ;;  %v3592_v6 = vmul.f32 %v13331_v58, %v12052_v9  ;;  %13089 = vmatpush3.bf16.msra.mxu1 %v20495_v25  ;;  %v3528_v30 = vpop.f32.mrb[169].mxu1  ;;  %12521 = vmatprep.mubr.msk.f32.mxu1 %vm3229_vm2, %v17807_v14  ;;  %v3638_v40 = vadd.f32 %v3637_v60, %v3636_v7  ;;  %v17838_v25 = vld [vmem:[%s20085_s4 + $0x48] sm:$0xff]  ;;  %v20522_v7 = vld [vmem:[#allocation88_spill] sm:$0xff] }
 0x43d   :  { %v7138_v27 = vpop.xlane.xlu0 %7137  ;;  %v17827_v28 = vpop.eup %13344  ;;  %v3630_v16 = vsel %vm128_vm0, %v3605_v48, 0.0  ;;  %v7163_v23 = vsub.f32 %v20520_v2, %v7135_v56  ;;  %v3591_v26 = vmul.f32 %v17755_v13, %v3528_v30  ;;  %13091 = vmatprep.subr.bf16.mxu1 %v20521_v10  ;;  %5920 = vadd.xlane.f32.xlu1 %v17742_v31  ;;  %v5931_v31 = vsel %vm3229_vm2, %v17443_v42, 0.0 }
 0x43e   :  { %v17833_v62 = vpop.eup %13346  ;;  %v3631_v58 = vadd.f32 %v3630_v16, %v3629_v34  ;;  %13358 = vpow2.f32 %v7186_v53  ;;  %v3608_v35 = vmul.f32 %v17838_v25, %v3592_v6  ;;  %v7164_v9 = vsub.f32 %v20522_v7, %v7138_v27  ;;  %v17849_v34 = vld [vmem:[%s20085_s4 + $0x40] sm:$0xff]  ;;  %v12055_v60 = vpop.f32.mrb[170].mxu1  ;;  %5923 = vadd.xlane.f32.xlu0 %v17746_v54  ;;  %v20524_v7 = vld [vmem:[#allocation36_spill] sm:$0xff] }
 0x43f   :  { %13360 = vrcp.f32 %v17672_v5  ;;  %v7188_v13 = vmul.f32 1.442695, %v7163_v23  ;;  %v3607_v56 = vmul.f32 %v17849_v34, %v3591_v26  ;;  %v7141_v53 = vpop.xlane.xlu1 %7140  ;;  %12522 = vmatmul.mubr.msk.f32.gmra.mrb[2].mxu1 %vm3229_vm2, %v17833_v62  ;;  %v3594_v30 = vmul.f32 %v17790_v19, %v12055_v60  ;;  %v20523_v27 = vld [vmem:[#allocation46_spill] sm:$0xff]  ;;  %v3538_v2 = vpop.f32.mrb[171].mxu1 }
 0x440   :  { %v17843_v48 = vpop.eup %13348  ;;  %v3625_v5 = vsel %vm128_vm0, %v3608_v35, 0.0  ;;  %v7190_v6 = vmul.f32 1.442695, %v7164_v9  ;;  %v7165_v16 = vsub.f32 %v20523_v27, %v7141_v53  ;;  %13093 = vmatpush3.bf16.msra.mxu1 %v20521_v10  ;;  %v3593_v42 = vmul.f32 %v17770_v17, %v3538_v2  ;;  %v17871_v10 = vld [vmem:[%s20085_s4 + $0x58] sm:$0xff]  ;;  %v17881_v17 = vld [vmem:[%s20085_s4 + $0x50] sm:$0xff] }
 0x441   :  { %12524 = vmatprep.mubr.msk.f32.mxu1 %vm3229_vm2, %v17843_v48  ;;  %v7144_v54 = vpop.xlane.xlu0 %7143  ;;  %v3626_v23 = vadd.f32 %v3625_v5, %v3624_v15  ;;  %13362 = vpow2.f32 %v7188_v13  ;;  %v3618_v26 = vsel %vm128_vm0, %v3607_v56, 0.0  ;;  %13095 = vmatprep.subr.bf16.mxu1 %v20524_v7  ;;  %v3610_v9 = vmul.f32 %v17871_v10, %v3594_v30  ;;  %v20525_v13 = vld [vmem:[#allocation89_spill] sm:$0xff]  ;;  %v20526_v30 = vld [vmem:[#allocation48_spill] sm:$0xff] }
 0x442   :  { %v17866_v35 = vpop.eup %13350  ;;  %v3619_v19 = vadd.f32 %v3618_v26, %v3617_v22  ;;  %13364 = vpow2.f32 %v7190_v6  ;;  %v7192_v60 = vmul.f32 1.442695, %v7165_v16  ;;  %5926 = vadd.xlane.f32.xlu1 %v17753_v8  ;;  %v3609_v22 = vmul.f32 %v17881_v17, %v3593_v42  ;;  %v12058_v53 = vpop.f32.mrb[172].mxu1  ;;  %5932 = vadd.xlane.f32.xlu0 %v5931_v31 }
 0x443   :  { %13366 = vrcp.f32 %v17689_v36  ;;  %v7166_v56 = vsub.f32 %v20525_v13, %v7144_v54  ;;  %v7147_v5 = vpop.xlane.xlu1 %7146  ;;  %12525 = vmatmul.mubr.msk.f32.gmra.mrb[4].mxu1 %vm3229_vm2, %v17866_v35  ;;  %v5934_v8 = vsel %vm3229_vm2, %v17450_v51, 0.0  ;;  %v3639_v36 = vsel %vm128_vm0, %v3610_v9, 0.0  ;;  %v3548_v16 = vpop.f32.mrb[173].mxu1  ;;  %v20527_v9 = vld [vmem:[#allocation37_spill] sm:$0xff] }
 0x444   :  { %v17875_v15 = vpop.eup %13352  ;;  %13368 = vpow2.f32 %v7192_v60  ;;  %v3596_v6 = vmul.f32 %v17821_v24, %v12058_v53  ;;  %v7167_v27 = vsub.f32 %v20526_v30, %v7147_v5  ;;  %13097 = vmatpush3.bf16.msra.mxu1 %v20524_v7  ;;  %v3640_v54 = vadd.f32 %v3639_v36, %v3638_v40  ;;  %v17903_v7 = vld [vmem:[%s20085_s4 + $0x68] sm:$0xff] }
 0x445   :  { %12527 = vmatprep.mubr.msk.f32.mxu1 %vm3229_vm2, %v17875_v15  ;;  %v7150_v31 = vpop.xlane.xlu0 %7149  ;;  %v13355_v2 = vpop.eup %13354  ;;  %v3632_v26 = vsel %vm128_vm0, %v3609_v22, 0.0  ;;  %v7194_v42 = vmul.f32 1.442695, %v7166_v56  ;;  %v3595_v51 = vmul.f32 %v17794_v29, %v3548_v16  ;;  %13099 = vmatprep.subr.bf16.mxu1 %v20527_v9  ;;  %v17911_v29 = vld [vmem:[%s20085_s4 + $0x60] sm:$0xff]  ;;  %v5937_v5 = vsel %vm3229_vm2, %v17460_v49, 0.0 }
 0x446   :  { %v17898_v60 = vpop.eup %13356  ;;  %v3633_v24 = vadd.f32 %v3632_v26, %v3631_v58  ;;  %v3612_v13 = vmul.f32 %v17903_v7, %v3596_v6  ;;  %v7196_v53 = vmul.f32 1.442695, %v7167_v27  ;;  %v7168_v40 = vsub.f32 %v17189_v41, %v7150_v31  ;;  %5929 = vadd.xlane.f32.xlu1 %v17760_v3  ;;  %v12061_v22 = vpop.f32.mrb[174].mxu1  ;;  %5935 = vadd.xlane.f32.xlu0 %v5934_v8 }
 0x447   :  { %13370 = vpow2.f32 %v7194_v42  ;;  %v3611_v58 = vmul.f32 %v17911_v29, %v3595_v51  ;;  %v7153_v56 = vpop.xlane.xlu1 %7152  ;;  %12528 = vmatmul.mubr.msk.f32.gmra.mrb[6].mxu1 %vm3229_vm2, %v17898_v60  ;;  %v5940_v41 = vsel %vm3229_vm2, %v17467_v4, 0.0  ;;  %v3598_v30 = vmul.f32 %v13355_v2, %v12061_v22  ;;  %v3558_v27 = vpop.f32.mrb[175].mxu1  ;;  %v17932_v2 = vld [vmem:[%s20085_s4 + $0x78] sm:$0xff] }
 0x448   :  { %v17920_v3 = vpop.eup %13358  ;;  %v3627_v36 = vsel %vm128_vm0, %v3612_v13, 0.0  ;;  %13372 = vpow2.f32 %v7196_v53  ;;  %v7198_v6 = vmul.f32 1.442695, %v7168_v40  ;;  %13101 = vmatpush3.bf16.msra.mxu1 %v20527_v9  ;;  %v7169_v49 = vsub.f32 %v17201_v61, %v7153_v56 }
 0x449   :  { %v7754_v8 = vpop.xlane.xlu0 %7753  ;;  %v13361_v16 = vpop.eup %13360  ;;  %v3628_v31 = vadd.f32 %v3627_v36, %v3626_v23  ;;  %v3620_v26 = vsel %vm128_vm0, %v3611_v58, 0.0  ;;  %v3597_v42 = vmul.f32 %v17827_v28, %v3558_v27  ;;  %12530 = vmatprep.mubr.msk.f32.mxu1 %vm3229_vm2, %v17920_v3  ;;  %v3614_v51 = vmul.f32 %v17932_v2, %v3598_v30  ;;  %v17941_v28 = vld [vmem:[%s20085_s4 + $0x70] sm:$0xff] }
 0x44a   :  { %v3621_v4 = vadd.f32 %v3620_v26, %v3619_v19  ;;  %13374 = vpow2.f32 %v7198_v6  ;;  %v7800_v23 = vsub.f32 %v17211_v12, %v7754_v8  ;;  %5938 = vadd.xlane.f32.xlu1 %v5937_v5  ;;  %v7200_v61 = vmul.f32 1.442695, %v7169_v49  ;;  %v17944_v13 = vpop.f32.mrb[176].mxu1  ;;  %5941 = vadd.xlane.f32.xlu0 %v5940_v41 }
 0x44b   :  { %v17936_v9 = vpop.eup %13362  ;;  %v3613_v19 = vmul.f32 %v17941_v28, %v3597_v42  ;;  %v7757_v53 = vpop.xlane.xlu1 %7756  ;;  %v5943_v40 = vsel %vm3229_vm2, %v17476_v0, 0.0  ;;  %v3641_v12 = vsel %vm128_vm0, %v3614_v51, 0.0  ;;  %v5946_v41 = vsel %vm3229_vm2, %v17482_v55, 0.0 }
 0x44c   :  { %v17948_v58 = vpop.eup %13364  ;;  %v7816_v22 = vmul.f32 1.442695, %v7800_v23  ;;  %v7801_v56 = vsub.f32 %v17223_v32, %v7757_v53  ;;  %12531 = vmatmul.mubr.msk.f32.gmra.mrb[8].mxu1 %vm3229_vm2, %v17936_v9  ;;  %v4134_v5 = vpop.f32.mrb[177].mxu1  ;;  %12630 = vmatprep.mubr.msk.f32.mxu0 %vm128_vm0, %v3621_v4  ;;  %v3642_v30 = vadd.f32 %v3641_v12, %v3640_v54  ;;  %13376 = vpow2.f32 %v7200_v61  ;;  %v20528_v61 = vld [vmem:[#allocation25_spill] sm:$0xff] }
 0x44d   :  { %v7760_v36 = vpop.xlane.xlu0 %7759  ;;  %v13367_v6 = vpop.eup %13366  ;;  %v3634_v0 = vsel %vm128_vm0, %v3613_v19, 0.0  ;;  %v4229_v27 = vmul.f32 %v13361_v16, %v4134_v5  ;;  %12533 = vmatprep.mubr.msk.f32.mxu1 %vm3229_vm2, %v17948_v58  ;;  %12631 = vmatmul.mubr.msk.f32.vlgmr.msra.gmra.mrb[32].mxu0 %vm128_vm0, %v3628_v31  ;;  %v5949_v51 = vsel %vm3229_vm2, %v17491_v39, 0.0  ;;  %v5952_v19 = vsel %vm3229_vm2, %v20528_v61, 0.0  ;;  %v20529_v39 = vld [vmem:[#allocation49_spill] sm:$0xff] }
 0x44e   :  { %v17961_v32 = vpop.eup %13368  ;;  %v3635_v8 = vadd.f32 %v3634_v0, %v3633_v24  ;;  %13378 = vpow2.f32 %v7816_v22  ;;  %v7818_v26 = vmul.f32 1.442695, %v7801_v56  ;;  %v7802_v49 = vsub.f32 %v17234_v21, %v7760_v36  ;;  %5944 = vadd.xlane.f32.xlu1 %v5943_v40  ;;  %v17964_v42 = vpop.f32.mrb[178].mxu1  ;;  %5947 = vadd.xlane.f32.xlu0 %v5946_v41  ;;  %v20530_v36 = vld [vmem:[#allocation58_spill] sm:$0xff] }
 0x44f   :  { %v7763_v55 = vpop.xlane.xlu1 %7762  ;;  %v17969_v31 = vpop.f32.mrb[179].mxu1  ;;  %v5955_v41 = vsel %vm3229_vm2, %v20530_v36, 0.0 }
 0x450   :  { %13380 = vpow2.f32 %v7818_v26  ;;  %v7820_v54 = vmul.f32 1.442695, %v7802_v49  ;;  %v7803_v16 = vsub.f32 %v17247_v44, %v7763_v55  ;;  %12534 = vmatmul.mubr.msk.f32.gmra.mrb[10].mxu1 %vm3229_vm2, %v17961_v32  ;;  %12633 = vmatprep.mubr.msk.f32.mxu0 %vm128_vm0, %v3635_v8  ;;  %v20531_v8 = vld [vmem:[#allocation50_spill] sm:$0xff] }
 0x451   :  { %v7766_v24 = vpop.xlane.xlu0 %7765  ;;  %v17972_v4 = vpop.eup %13370  ;;  %12634 = vmatmul.mubr.msk.f32.gmra.mrb[34].mxu0 %vm128_vm0, %v3642_v30  ;;  %v4245_v30 = vmul.f32 %v17732_v63, %v4229_v27  ;;  %v20532_v55 = vld [vmem:[#allocation26_spill] sm:$0xff] }
 0x452   :  { %v7804_v21 = vsub.f32 %v17258_v33, %v7766_v24  ;;  %v17978_v23 = vpop.eup %13372  ;;  %13382 = vpow2.f32 %v7820_v54  ;;  %v7822_v44 = vmul.f32 1.442695, %v7803_v16  ;;  %12536 = vmatprep.mubr.msk.f32.mxu1 %vm3229_vm2, %v17972_v4  ;;  %5950 = vadd.xlane.f32.xlu1 %v5949_v51  ;;  %v17984_v12 = vpop.f32.mrb[180].mxu1  ;;  %v6559_v54 = vsel %vm3229_vm2, %v20532_v55, 0.0 }
 0x453   :  { %v7769_v40 = vpop.xlane.xlu1 %7768  ;;  %5953 = vadd.xlane.f32.xlu0 %v5952_v19  ;;  %v4154_v56 = vpop.f32.mrb[181].mxu1 }
 0x454   :  { %v7824_v53 = vmul.f32 1.442695, %v7804_v21  ;;  %v17986_v33 = vpop.eup %13374  ;;  %13384 = vpow2.f32 %v7822_v44  ;;  %v7805_v22 = vsub.f32 %v20529_v39, %v7769_v40  ;;  %12537 = vmatmul.mubr.msk.f32.gmra.mrb[12].mxu1 %vm3229_vm2, %v17978_v23  ;;  %v4233_v0 = vmul.f32 %v13367_v6, %v4154_v56  ;;  %v20533_v6 = vld [vmem:[#allocation51_spill] sm:$0xff]  ;;  %v20535_v56 = vld [vmem:[#allocation52_spill] sm:$0xff] }
 0x455   :  { %v7772_v5 = vpop.xlane.xlu0 %7771  ;;  %12539 = vmatprep.mubr.msk.f32.mxu1 %vm3229_vm2, %v17986_v33  ;;  %v4261_v39 = vsel %vm128_vm0, %v4245_v30, 0.0 }
 0x456   :  { %13386 = vpow2.f32 %v7824_v53  ;;  %v7806_v26 = vsub.f32 %v20531_v8, %v7772_v5  ;;  %v7826_v49 = vmul.f32 1.442695, %v7805_v22  ;;  %5956 = vadd.xlane.f32.xlu1 %v5955_v41  ;;  %v17999_v16 = vpop.eup %13376  ;;  %v4249_v24 = vmul.f32 %v17787_v45, %v4233_v0  ;;  %v18002_v44 = vpop.f32.mrb[182].mxu1  ;;  %v20534_v53 = vld [vmem:[#allocation59_spill] sm:$0xff]  ;;  %v20536_v8 = vld [vmem:[#allocation60_spill] sm:$0xff] }
 0x457   :  { %v7775_v51 = vpop.xlane.xlu1 %7774  ;;  %6560 = vadd.xlane.f32.xlu0 %v6559_v54  ;;  %v18009_v61 = vpop.f32.mrb[183].mxu1  ;;  %v6556_v40 = vsel %vm3229_vm2, %v20534_v53, 0.0  ;;  %v20540_v53 = vld [vmem:[#allocation61_spill] sm:$0xff] }
 0x458   :  { %v7828_v21 = vmul.f32 1.442695, %v7806_v26  ;;  %v18004_v63 = vpop.eup %13378  ;;  %13388 = vpow2.f32 %v7826_v49  ;;  %v7807_v27 = vsub.f32 %v20533_v6, %v7775_v51  ;;  %12540 = vmatmul.mubr.msk.f32.gmra.mrb[14].mxu1 %vm3229_vm2, %v17999_v16  ;;  %v4262_v22 = vsel %vm128_vm0, %v4249_v24, 0.0  ;;  %v20538_v24 = vld [vmem:[#allocation53_spill] sm:$0xff] }
 0x459   :  { %v7778_v19 = vpop.xlane.xlu0 %7777  ;;  %12598 = vmatprep.mubr.msk.f32.mxu1 %vm3229_vm2, %v18004_v63  ;;  %v18020_v41 = vadd.f32 %v4262_v22, %v4261_v39  ;;  %v6562_v26 = vsel %vm3229_vm2, %v20536_v8, 0.0 }
 0x45a   :  { %13390 = vpow2.f32 %v7828_v21  ;;  %v7808_v5 = vsub.f32 %v20535_v56, %v7778_v19  ;;  %v18018_v36 = vpop.eup %13380  ;;  %v7830_v0 = vmul.f32 1.442695, %v7807_v27  ;;  %6557 = vadd.xlane.f32.xlu1 %v6556_v40  ;;  %v18024_v30 = vpop.f32.mrb[184].mxu1  ;;  %v20539_v27 = vld [vmem:[#allocation23_spill] sm:$0xff]  ;;  %v6565_v40 = vsel %vm3229_vm2, %v20540_v53, 0.0  ;;  %v20542_v56 = vld [vmem:[#allocation62_spill] sm:$0xff] }
 0x45b   :  { %v7781_v55 = vpop.xlane.xlu1 %7780  ;;  %6563 = vadd.xlane.f32.xlu0 %v6562_v26  ;;  %v18031_v51 = vpop.f32.mrb[185].mxu1 }
 0x45c   :  { %v7832_v49 = vmul.f32 1.442695, %v7808_v5  ;;  %v18026_v54 = vpop.eup %13382  ;;  %13392 = vpow2.f32 %v7830_v0  ;;  %v7809_v21 = vsub.f32 %v20538_v24, %v7781_v55  ;;  %12599 = vmatmul.mubr.msk.f32.vlgmr.msra.gmra.mrb[16].mxu1 %vm3229_vm2, %v18018_v36  ;;  %v6568_v5 = vsel %vm3229_vm2, %v20542_v56, 0.0  ;;  %v20544_v55 = vld [vmem:[#allocation54_spill] sm:$0xff] }
 0x45d   :  { %20537 = vst [vmem:[#allocation29_spill] sm:$0xff] %v18026_v54  ;;  %v7784_v6 = vpop.xlane.xlu0 %7783  ;;  %12601 = vmatprep.mubr.msk.f32.mxu1 %vm3229_vm2, %v18026_v54 }
 0x45e   :  { %13394 = vpow2.f32 %v7832_v49  ;;  %v7810_v19 = vsub.f32 %v20539_v27, %v7784_v6  ;;  %v18038_v39 = vpop.eup %13384  ;;  %v7834_v22 = vmul.f32 1.442695, %v7809_v21  ;;  %6566 = vadd.xlane.f32.xlu1 %v6565_v40  ;;  %v18044_v49 = vpop.f32.mrb[186].mxu1  ;;  %v20545_v27 = vld [vmem:[#allocation55_spill] sm:$0xff] }
 0x45f   :  { %20541 = vst [vmem:[#allocation71_spill] sm:$0xff] %v18038_v39  ;;  %v7787_v26 = vpop.xlane.xlu1 %7786  ;;  %6569 = vadd.xlane.f32.xlu0 %v6568_v5  ;;  %v18049_v6 = vpop.f32.mrb[187].mxu1  ;;  %v6577_v5 = vsel %vm3229_vm2, %v17607_v46, 0.0  ;;  %v20550_v46 = vld [vmem:[#allocation56_spill] sm:$0xff] }
 0x460   :  { %v18042_v0 = vpop.eup %13386  ;;  %v7836_v8 = vmul.f32 1.442695, %v7810_v19  ;;  %13396 = vpow2.f32 %v7834_v22  ;;  %v7811_v24 = vsub.f32 %v20544_v55, %v7787_v26  ;;  %12602 = vmatmul.mubr.msk.f32.gmra.mrb[18].mxu1 %vm3229_vm2, %v18038_v39  ;;  %v20546_v19 = vld [vmem:[#allocation63_spill] sm:$0xff] }
 0x461   :  { %20543 = vst [vmem:[#allocation66_spill] sm:$0xff] %v18042_v0  ;;  %v7790_v21 = vpop.xlane.xlu0 %7789  ;;  %12604 = vmatprep.mubr.msk.f32.mxu1 %vm3229_vm2, %v18042_v0  ;;  %v6571_v40 = vsel %vm3229_vm2, %v20546_v19, 0.0  ;;  %v20549_v0 = vld [vmem:[#allocation24_spill] sm:$0xff] }
 0x462   :  { %13398 = vpow2.f32 %v7836_v8  ;;  %v7812_v53 = vsub.f32 %v20545_v27, %v7790_v21  ;;  %v18056_v56 = vpop.eup %13388  ;;  %v7838_v22 = vmul.f32 1.442695, %v7811_v24  ;;  %6572 = vadd.xlane.f32.xlu1 %v6571_v40  ;;  %v18062_v8 = vpop.f32.mrb[188].mxu1 }
 0x463   :  { %20547 = vst [vmem:[#allocation15_spill] sm:$0xff] %v18056_v56  ;;  %v7793_v39 = vpop.xlane.xlu1 %7792  ;;  %6578 = vadd.xlane.f32.xlu0 %v6577_v5  ;;  %v18067_v27 = vpop.f32.mrb[189].mxu1 }
 0x464   :  { %v18060_v26 = vpop.eup %13390  ;;  %v7840_v55 = vmul.f32 1.442695, %v7812_v53  ;;  %13400 = vpow2.f32 %v7838_v22  ;;  %v7813_v21 = vsub.f32 %v20549_v0, %v7793_v39  ;;  %12605 = vmatmul.mubr.msk.f32.gmra.mrb[20].mxu1 %vm3229_vm2, %v18056_v56  ;;  %v20551_v53 = vld [vmem:[#allocation64_spill] sm:$0xff]  ;;  %v6580_v39 = vsel %vm3229_vm2, %v17620_v52, 0.0 }
 0x465   :  { %20548 = vst [vmem:[#allocation30_spill] sm:$0xff] %v18060_v26  ;;  %v7796_v24 = vpop.xlane.xlu0 %7795  ;;  %12607 = vmatprep.mubr.msk.f32.mxu1 %vm3229_vm2, %v18060_v26  ;;  %v6574_v40 = vsel %vm3229_vm2, %v20551_v53, 0.0  ;;  %v20553_v26 = vld [vmem:[#allocation57_spill] sm:$0xff]  ;;  %v6583_v52 = vsel %vm3229_vm2, %v17629_v47, 0.0 }
 0x466   :  { %13402 = vpow2.f32 %v7840_v55  ;;  %v7814_v19 = vsub.f32 %v20550_v46, %v7796_v24  ;;  %v18074_v54 = vpop.eup %13392  ;;  %v7842_v22 = vmul.f32 1.442695, %v7813_v21  ;;  %6575 = vadd.xlane.f32.xlu1 %v6574_v40  ;;  %v18080_v55 = vpop.f32.mrb[190].mxu1 }
 0x467   :  { %v7799_v56 = vpop.xlane.xlu1 %7798  ;;  %6581 = vadd.xlane.f32.xlu0 %v6580_v39  ;;  %v18085_v46 = vpop.f32.mrb[191].mxu1 }
 0x468   :  { %v18078_v0 = vpop.eup %13394  ;;  %v7844_v5 = vmul.f32 1.442695, %v7814_v19  ;;  %13404 = vpow2.f32 %v7842_v22  ;;  %v7815_v24 = vsub.f32 %v20553_v26, %v7799_v56  ;;  %12608 = vmatmul.mubr.msk.f32.gmra.mrb[22].mxu1 %vm3229_vm2, %v18074_v54  ;;  %v6586_v56 = vsel %vm3229_vm2, %v17642_v18, 0.0 }
 0x469   :  { %20552 = vst [vmem:[#allocation79_spill] sm:$0xff] %v18078_v0  ;;  %v3977_v21 = vpop.xlane.xlu0 %3976  ;;  %12610 = vmatprep.mubr.msk.f32.mxu1 %vm3229_vm2, %v18078_v0  ;;  %v6589_v18 = vsel %vm3229_vm2, %v17653_v11, 0.0 }
 0x46a   :  { %13406 = vpow2.f32 %v7844_v5  ;;  %v18091_v19 = vpop.eup %13396  ;;  %v7846_v53 = vmul.f32 1.442695, %v7815_v24  ;;  %6584 = vadd.xlane.f32.xlu1 %v6583_v52  ;;  %v18097_v22 = vpop.f32.mrb[192].mxu1  ;;  %v6592_v24 = vsel %vm3229_vm2, %v17669_v37, 0.0  ;;  %v6595_v37 = vsel %vm3229_vm2, %v17679_v43, 0.0 }
 0x46b   :  { %20554 = vst [vmem:[#allocation73_spill] sm:$0xff] %v18091_v19  ;;  %13408 = vrcp.f32 %v3977_v21  ;;  %v3989_v40 = vpop.xlane.xlu1 %3988  ;;  %6587 = vadd.xlane.f32.xlu0 %v6586_v56  ;;  %v18101_v39 = vpop.f32.mrb[193].mxu1 }
 0x46c   :  { %v18095_v26 = vpop.eup %13398  ;;  %13410 = vpow2.f32 %v7846_v53  ;;  %12611 = vmatmul.mubr.msk.f32.gmra.mrb[24].mxu1 %vm3229_vm2, %v18091_v19 }
 0x46d   :  { %20555 = vst [vmem:[#allocation67_spill] sm:$0xff] %v18095_v26  ;;  %v3998_v47 = vpop.xlane.xlu0 %3997  ;;  %13412 = vrcp.f32 %v3989_v40  ;;  %12613 = vmatprep.mubr.msk.f32.mxu1 %vm3229_vm2, %v18095_v26 }
 0x46e   :  { %v18107_v5 = vpop.eup %13400  ;;  %13414 = vrcp.f32 %v3998_v47  ;;  %6590 = vadd.xlane.f32.xlu1 %v6589_v18  ;;  %v18113_v53 = vpop.f32.mrb[194].mxu1  ;;  %v6598_v47 = vsel %vm3229_vm2, %v17699_v20, 0.0  ;;  %v6601_v20 = vsel %vm3229_vm2, %v17720_v50, 0.0 }
 0x46f   :  { %20556 = vst [vmem:[#allocation16_spill] sm:$0xff] %v18107_v5  ;;  %v4001_v52 = vpop.xlane.xlu1 %4000  ;;  %6593 = vadd.xlane.f32.xlu0 %v6592_v24  ;;  %v18117_v56 = vpop.f32.mrb[195].mxu1 }
 0x470   :  { %v18111_v21 = vpop.eup %13402  ;;  %13416 = vrcp.f32 %v4001_v52  ;;  %12614 = vmatmul.mubr.msk.f32.gmra.mrb[26].mxu1 %vm3229_vm2, %v18107_v5 }
 0x471   :  { %20557 = vst [vmem:[#allocation68_spill] sm:$0xff] %v18111_v21  ;;  %v3980_v11 = vpop.xlane.xlu0 %3979  ;;  %12616 = vmatprep.mubr.msk.f32.mxu1 %vm3229_vm2, %v18111_v21 }
 0x472   :  { %13418 = vrcp.f32 %v3980_v11  ;;  %v18123_v40 = vpop.eup %13404  ;;  %6596 = vadd.xlane.f32.xlu1 %v6595_v37  ;;  %v18129_v52 = vpop.f32.mrb[196].mxu1 }
 0x473   :  { %20558 = vst [vmem:[#allocation4_spill] sm:$0xff] %v18123_v40  ;;  %v3992_v24 = vpop.xlane.xlu1 %3991  ;;  %6599 = vadd.xlane.f32.xlu0 %v6598_v47  ;;  %v18133_v11 = vpop.f32.mrb[197].mxu1  ;;  %v7205_v47 = vsel %vm3229_vm2, %v17797_v1, 0.0  ;;  %v20561_v1 = vld [vmem:[#allocation65_spill] sm:$0xff] }
 0x474   :  { %v18127_v18 = vpop.eup %13406  ;;  %13420 = vrcp.f32 %v3992_v24  ;;  %12617 = vmatmul.mubr.msk.f32.gmra.mrb[28].mxu1 %vm3229_vm2, %v18123_v40 }
 0x475   :  { %20559 = vst [vmem:[#allocation77_spill] sm:$0xff] %v18127_v18  ;;  %v13409_v5 = vpop.eup %13408  ;;  %v4010_v43 = vpop.xlane.xlu0 %4009  ;;  %12619 = vmatprep.mubr.msk.f32.mxu1 %vm3229_vm2, %v18127_v18  ;;  %v7202_v18 = vsel %vm3229_vm2, %v20561_v1, 0.0 }
 0x476   :  { %v4230_v21 = vmul.f32 %v13409_v5, %v17944_v13  ;;  %13422 = vrcp.f32 %v4010_v43  ;;  %v18140_v37 = vpop.eup %13410  ;;  %6602 = vadd.xlane.f32.xlu1 %v6601_v20  ;;  %v18144_v26 = vpop.f32.mrb[198].mxu1 }
 0x477   :  { %v13413_v24 = vpop.eup %13412  ;;  %v3983_v40 = vpop.xlane.xlu1 %3982  ;;  %20560 = vst [vmem:[#allocation18_spill] sm:$0xff] %v18144_v26  ;;  %7206 = vadd.xlane.f32.xlu0 %v7205_v47  ;;  %v20562_v47 = vld [vmem:[#allocation27_spill] sm:$0xff] }
 0x478   :  { %v13415_v19 = vpop.eup %13414  ;;  %v4246_v13 = vmul.f32 %v17726_v38, %v4230_v21  ;;  %v4234_v5 = vmul.f32 %v13413_v24, %v17984_v12  ;;  %13424 = vrcp.f32 %v3983_v40  ;;  %12620 = vmatmul.mubr.msk.f32.gmra.mrb[30].mxu1 %vm3229_vm2, %v18140_v37  ;;  %v18150_v50 = vpop.f32.mrb[199].mxu1  ;;  %v7208_v38 = vsel %vm3229_vm2, %v17807_v14, 0.0 }
 0x479   :  { %v3995_v43 = vpop.xlane.xlu0 %3994  ;;  %v4237_v20 = vmul.f32 %v13415_v19, %v18031_v51  ;;  %v7211_v51 = vsel %vm3229_vm2, %v17833_v62, 0.0  ;;  %v7214_v62 = vsel %vm3229_vm2, %v17843_v48, 0.0 }
 0x47a   :  { %13426 = vrcp.f32 %v3995_v43  ;;  %v13417_v0 = vpop.eup %13416  ;;  %v4250_v26 = vmul.f32 %v20562_v47, %v4234_v5  ;;  %7203 = vadd.xlane.f32.xlu1 %v7202_v18  ;;  %v18159_v24 = vpop.f32.mrb[200].mxu1  ;;  %v4268_v43 = vsel %vm128_vm0, %v4246_v13, 0.0 }
 0x47b   :  { %v4238_v21 = vmul.f32 %v13417_v0, %v18024_v30  ;;  %v4013_v40 = vpop.xlane.xlu1 %4012  ;;  %7209 = vadd.xlane.f32.xlu0 %v7208_v38  ;;  %v4253_v19 = vmul.f32 %v17849_v34, %v4237_v20  ;;  %v18167_v14 = vpop.f32.mrb[201].mxu1 }
 0x47c   :  { %v13419_v12 = vpop.eup %13418  ;;  %v4269_v5 = vsel %vm128_vm0, %v4250_v26, 0.0  ;;  %13428 = vrcp.f32 %v4013_v40 }
 0x47d   :  { %v4231_v18 = vmul.f32 %v13419_v12, %v17969_v31  ;;  %v4004_v1 = vpop.xlane.xlu0 %4003  ;;  %v4270_v30 = vadd.f32 %v4269_v5, %v4268_v43  ;;  %v4254_v0 = vmul.f32 %v17838_v25, %v4238_v21  ;;  %v4264_v47 = vsel %vm128_vm0, %v4253_v19, 0.0  ;;  %v20563_v21 = vld [vmem:[#allocation17_spill] sm:$0xff] }
 0x47e   :  { %13430 = vrcp.f32 %v4004_v1  ;;  %v13421_v38 = vpop.eup %13420  ;;  %7212 = vadd.xlane.f32.xlu1 %v7211_v51  ;;  %v4265_v13 = vadd.f32 %v4264_v47, %v18020_v41  ;;  %v18176_v40 = vpop.f32.mrb[202].mxu1  ;;  %v7217_v41 = vsel %vm3229_vm2, %v17866_v35, 0.0 }
 0x47f   :  { %v4271_v31 = vsel %vm128_vm0, %v4254_v0, 0.0  ;;  %v4235_v20 = vmul.f32 %v13421_v38, %v18009_v61  ;;  %v4007_v12 = vpop.xlane.xlu1 %4006  ;;  %7215 = vadd.xlane.f32.xlu0 %v7214_v62  ;;  %v4247_v43 = vmul.f32 %v20563_v21, %v4231_v18  ;;  %v18179_v19 = vpop.f32.mrb[203].mxu1  ;;  %v7223_v0 = vsel %vm3229_vm2, %v17898_v60, 0.0 }
 0x480   :  { %v13423_v26 = vpop.eup %13422  ;;  %v4272_v5 = vadd.f32 %v4271_v31, %v4270_v30  ;;  %13432 = vrcp.f32 %v4007_v12  ;;  %v20564_v12 = vld [vmem:[#allocation28_spill] sm:$0xff] }
 0x481   :  { %v4016_v51 = vpop.xlane.xlu0 %4015  ;;  %v4241_v48 = vmul.f32 %v13423_v26, %v18067_v27  ;;  %v4251_v1 = vmul.f32 %v17815_v57, %v4235_v20  ;;  %v4275_v27 = vsel %vm128_vm0, %v4247_v43, 0.0 }
 0x482   :  { %13434 = vrcp.f32 %v4016_v51  ;;  %v13425_v61 = vpop.eup %13424  ;;  %7218 = vadd.xlane.f32.xlu1 %v7217_v41  ;;  %v18189_v62 = vpop.f32.mrb[204].mxu1 }
 0x483   :  { %v4257_v18 = vmul.f32 %v17911_v29, %v4241_v48  ;;  %v4232_v47 = vmul.f32 %v13425_v61, %v17964_v42  ;;  %v4620_v38 = vpop.xlane.xlu1 %4619  ;;  %7224 = vadd.xlane.f32.xlu0 %v7223_v0  ;;  %v4276_v35 = vsel %vm128_vm0, %v4251_v1, 0.0  ;;  %v18194_v26 = vpop.f32.mrb[205].mxu1  ;;  %v7220_v42 = vsel %vm3229_vm2, %v17875_v15, 0.0 }
 0x484   :  { %v13427_v30 = vpop.eup %13426  ;;  %13436 = vrcp.f32 %v4620_v38  ;;  %v4277_v20 = vadd.f32 %v4276_v35, %v4275_v27  ;;  %v7232_v27 = vsel %vm3229_vm2, %v17948_v58, 0.0 }
 0x485   :  { %v4236_v57 = vmul.f32 %v13427_v30, %v18002_v44  ;;  %v4632_v31 = vpop.xlane.xlu0 %4631  ;;  %v4266_v60 = vsel %vm128_vm0, %v4257_v18, 0.0  ;;  %v4248_v21 = vmul.f32 %v20564_v12, %v4232_v47  ;;  %v7226_v44 = vsel %vm3229_vm2, %v17920_v3, 0.0 }
 0x486   :  { %13438 = vrcp.f32 %v4632_v31  ;;  %v4267_v51 = vadd.f32 %v4266_v60, %v4265_v13  ;;  %v13429_v48 = vpop.eup %13428  ;;  %7221 = vadd.xlane.f32.xlu1 %v7220_v42  ;;  %v18205_v18 = vpop.f32.mrb[206].mxu1 }
 0x487   :  { %v4252_v43 = vmul.f32 %v17802_v59, %v4236_v57  ;;  %v4282_v1 = vsel %vm128_vm0, %v4248_v21, 0.0  ;;  %v4242_v61 = vmul.f32 %v13429_v48, %v18062_v8  ;;  %v4019_v0 = vpop.xlane.xlu1 %4018  ;;  %7227 = vadd.xlane.f32.xlu0 %v7226_v44  ;;  %v18210_v59 = vpop.f32.mrb[207].mxu1  ;;  %v7229_v8 = vsel %vm3229_vm2, %v17936_v9, 0.0 }
 0x488   :  { %v13431_v41 = vpop.eup %13430  ;;  %12636 = vmatprep.mubr.msk.f32.mxu0 %vm128_vm0, %v4267_v51  ;;  %13440 = vrcp.f32 %v4019_v0  ;;  %v7235_v48 = vsel %vm3229_vm2, %v17961_v32, 0.0  ;;  %v7238_v44 = vsel %vm3229_vm2, %v17972_v4, 0.0 }
 0x489   :  { %v4283_v15 = vsel %vm128_vm0, %v4252_v43, 0.0  ;;  %v4239_v13 = vmul.f32 %v13431_v41, %v18049_v6  ;;  %v4623_v30 = vpop.xlane.xlu0 %4622  ;;  %v4258_v47 = vmul.f32 %v17903_v7, %v4242_v61 }
 0x48a   :  { %v4284_v3 = vadd.f32 %v4283_v15, %v4282_v1  ;;  %13442 = vrcp.f32 %v4623_v30  ;;  %v13433_v38 = vpop.eup %13432  ;;  %7230 = vadd.xlane.f32.xlu1 %v7229_v8  ;;  %v18220_v12 = vpop.f32.mrb[208].mxu1 }
 0x48b   :  { %v4255_v35 = vmul.f32 %v17881_v17, %v4239_v13  ;;  %v4273_v6 = vsel %vm128_vm0, %v4258_v47, 0.0  ;;  %v4240_v31 = vmul.f32 %v13433_v38, %v18044_v49  ;;  %v4635_v60 = vpop.xlane.xlu1 %4634  ;;  %7233 = vadd.xlane.f32.xlu0 %v7232_v27  ;;  %v18222_v21 = vpop.f32.mrb[209].mxu1  ;;  %v7241_v13 = vsel %vm3229_vm2, %v17978_v23, 0.0 }
 0x48c   :  { %v13435_v57 = vpop.eup %13434  ;;  %13444 = vrcp.f32 %v4635_v60  ;;  %v4274_v42 = vadd.f32 %v4273_v6, %v4272_v5 }
 0x48d   :  { %v4644_v9 = vpop.xlane.xlu0 %4643  ;;  %v4243_v51 = vmul.f32 %v13435_v57, %v18085_v46  ;;  %v4278_v58 = vsel %vm128_vm0, %v4255_v35, 0.0  ;;  %v4256_v17 = vmul.f32 %v17871_v10, %v4240_v31 }
 0x48e   :  { %13446 = vrcp.f32 %v4644_v9  ;;  %v4279_v49 = vadd.f32 %v4278_v58, %v4277_v20  ;;  %v13437_v43 = vpop.eup %13436  ;;  %7236 = vadd.xlane.f32.xlu1 %v7235_v48  ;;  %12637 = vmatmul.mubr.msk.f32.gmra.mrb[36].mxu0 %vm128_vm0, %v4274_v42  ;;  %v18235_v61 = vpop.f32.mrb[210].mxu1 }
 0x48f   :  { %v4259_v5 = vmul.f32 %v17941_v28, %v4243_v51  ;;  %v4285_v46 = vsel %vm128_vm0, %v4256_v17, 0.0  ;;  %v4875_v1 = vmul.f32 %v13437_v43, %v18101_v39  ;;  %v4647_v10 = vpop.xlane.xlu1 %4646  ;;  %7239 = vadd.xlane.f32.xlu0 %v7238_v44  ;;  %v18238_v0 = vpop.f32.mrb[211].mxu1  ;;  %v18246_v39 = vld [vmem:[%s20085_s4] sm:$0xff]  ;;  %v7851_v51 = vsel %vm3229_vm2, %v18018_v36, 0.0  ;;  %v18270_v17 = vld [vmem:[%s20085_s4 + $0x8] sm:$0xff] }
 0x490   :  { %v13439_v41 = vpop.eup %13438  ;;  %v4286_v32 = vadd.f32 %v4285_v46, %v4284_v3  ;;  %13448 = vrcp.f32 %v4647_v10  ;;  %v18282_v46 = vld [vmem:[%s20085_s4 + $0x28] sm:$0xff] }
 0x491   :  { %v4879_v20 = vmul.f32 %v13439_v41, %v18133_v11  ;;  %v4626_v15 = vpop.xlane.xlu0 %4625  ;;  %v4280_v4 = vsel %vm128_vm0, %v4259_v5, 0.0  ;;  %v4891_v3 = vmul.f32 %v18246_v39, %v4875_v1  ;;  %v7244_v11 = vsel %vm3229_vm2, %v17986_v33, 0.0 }
 0x492   :  { %13450 = vrcp.f32 %v4626_v15  ;;  %v4281_v30 = vadd.f32 %v4280_v4, %v4279_v49  ;;  %v13441_v47 = vpop.eup %13440  ;;  %7242 = vadd.xlane.f32.xlu1 %v7241_v13  ;;  %v18253_v23 = vpop.f32.mrb[212].mxu1 }
 0x493   :  { %v4895_v8 = vmul.f32 %v17787_v45, %v4879_v20  ;;  %v4244_v27 = vmul.f32 %v13441_v47, %v18080_v55  ;;  %v4638_v35 = vpop.xlane.xlu1 %4637  ;;  %7245 = vadd.xlane.f32.xlu0 %v7244_v11  ;;  %v4907_v57 = vsel %vm128_vm0, %v4891_v3, 0.0  ;;  %v18258_v31 = vpop.f32.mrb[213].mxu1  ;;  %v7247_v55 = vsel %vm3229_vm2, %v17999_v16, 0.0 }
 0x494   :  { %v13443_v38 = vpop.eup %13442  ;;  %12639 = vmatprep.mubr.msk.f32.mxu0 %vm128_vm0, %v4281_v30  ;;  %13452 = vrcp.f32 %v4638_v35  ;;  %v20566_v35 = vld [vmem:[#allocation71_spill] sm:$0xff] }
 0x495   :  { %v4876_v6 = vmul.f32 %v13443_v38, %v18097_v22  ;;  %v4656_v60 = vpop.xlane.xlu0 %4655  ;;  %v4908_v33 = vsel %vm128_vm0, %v4895_v8, 0.0  ;;  %v4260_v45 = vmul.f32 %v17932_v2, %v4244_v27 }
 0x496   :  { %13454 = vrcp.f32 %v4656_v60  ;;  %v4909_v9 = vadd.f32 %v4908_v33, %v4907_v57  ;;  %v13445_v42 = vpop.eup %13444  ;;  %7248 = vadd.xlane.f32.xlu1 %v7247_v55  ;;  %v18274_v16 = vpop.f32.mrb[214].mxu1  ;;  %v7857_v57 = vsel %vm3229_vm2, %v20566_v35, 0.0  ;;  %v20567_v60 = vld [vmem:[#allocation66_spill] sm:$0xff]  ;;  %v18351_v35 = vld [vmem:[%s20085_s4 + $0x38] sm:$0xff] }
 0x497   :  { %v4287_v22 = vsel %vm128_vm0, %v4260_v45, 0.0  ;;  %v4892_v48 = vmul.f32 %v18270_v17, %v4876_v6  ;;  %v4880_v49 = vmul.f32 %v13445_v42, %v18129_v52  ;;  %v4629_v43 = vpop.xlane.xlu1 %4628  ;;  %7852 = vadd.xlane.f32.xlu0 %v7851_v51  ;;  %v18277_v36 = vpop.f32.mrb[215].mxu1  ;;  %v7848_v52 = vsel %vm3229_vm2, %v18004_v63, 0.0 }
 0x498   :  { %v13447_v58 = vpop.eup %13446  ;;  %13456 = vrcp.f32 %v4629_v43  ;;  %v4288_v41 = vadd.f32 %v4287_v22, %v4286_v32  ;;  %v7860_v33 = vsel %vm3229_vm2, %v20567_v60, 0.0 }
 0x499   :  { %v4883_v44 = vmul.f32 %v13447_v58, %v18167_v14  ;;  %v4641_v5 = vpop.xlane.xlu0 %4640  ;;  %v4896_v1 = vmul.f32 %v18282_v46, %v4880_v49  ;;  %v20565_v14 = vld [vmem:[#allocation29_spill] sm:$0xff]  ;;  %v4914_v4 = vsel %vm128_vm0, %v4892_v48, 0.0 }
 0x49a   :  { %13458 = vrcp.f32 %v4641_v5  ;;  %v13449_v10 = vpop.eup %13448  ;;  %7849 = vadd.xlane.f32.xlu1 %v7848_v52  ;;  %12640 = vmatmul.mubr.msk.f32.gmra.mrb[38].mxu0 %vm128_vm0, %v4288_v41  ;;  %v7854_v20 = vsel %vm3229_vm2, %v20565_v14, 0.0  ;;  %v18294_v47 = vpop.f32.mrb[216].mxu1 }
 0x49b   :  { %v4899_v32 = vmul.f32 %v17849_v34, %v4883_v44  ;;  %v4915_v13 = vsel %vm128_vm0, %v4896_v1, 0.0  ;;  %v4884_v30 = vmul.f32 %v13449_v10, %v18159_v24  ;;  %v4659_v3 = vpop.xlane.xlu1 %4658  ;;  %7855 = vadd.xlane.f32.xlu0 %v7854_v20  ;;  %v18297_v8 = vpop.f32.mrb[217].mxu1  ;;  %v18325_v44 = vld [vmem:[%s20085_s4 + $0x30] sm:$0xff]  ;;  %v7869_v1 = vsel %vm3229_vm2, %v18074_v54, 0.0 }
 0x49c   :  { %v13451_v15 = vpop.eup %13450  ;;  %v4916_v63 = vadd.f32 %v4915_v13, %v4914_v4  ;;  %13460 = vrcp.f32 %v4659_v3  ;;  %v20569_v4 = vld [vmem:[#allocation18_spill] sm:$0xff] }
 0x49d   :  { %v4877_v11 = vmul.f32 %v13451_v15, %v18117_v56  ;;  %v4650_v38 = vpop.xlane.xlu0 %4649  ;;  %v4910_v34 = vsel %vm128_vm0, %v4899_v32, 0.0  ;;  %v4900_v27 = vmul.f32 %v17838_v25, %v4884_v30  ;;  %v18312_v25 = vld [vmem:[%s20085_s4 + $0x10] sm:$0xff] }
 0x49e   :  { %13462 = vrcp.f32 %v4650_v38  ;;  %v4911_v24 = vadd.f32 %v4910_v34, %v4909_v9  ;;  %v13453_v6 = vpop.eup %13452  ;;  %7858 = vadd.xlane.f32.xlu1 %v7857_v57  ;;  %v18307_v51 = vpop.f32.mrb[218].mxu1 }
 0x49f   :  { %v4917_v56 = vsel %vm128_vm0, %v4900_v27, 0.0  ;;  %v4881_v55 = vmul.f32 %v13453_v6, %v18150_v50  ;;  %v4653_v42 = vpop.xlane.xlu1 %4652  ;;  %7861 = vadd.xlane.f32.xlu0 %v7860_v33  ;;  %v4893_v9 = vmul.f32 %v18312_v25, %v4877_v11  ;;  %v18317_v22 = vpop.f32.mrb[219].mxu1  ;;  %v20568_v50 = vld [vmem:[#allocation15_spill] sm:$0xff]  ;;  %v20570_v11 = vld [vmem:[#allocation30_spill] sm:$0xff] }
 0x4a0   :  { %v13455_v45 = vpop.eup %13454  ;;  %v18315_v58 = vadd.f32 %v4917_v56, %v4916_v63  ;;  %13464 = vrcp.f32 %v4653_v42  ;;  %v7863_v43 = vsel %vm3229_vm2, %v20568_v50, 0.0  ;;  %v7866_v38 = vsel %vm3229_vm2, %v20570_v11, 0.0  ;;  %v20571_v6 = vld [vmem:[#allocation79_spill] sm:$0xff]  ;;  %v18388_v11 = vld [vmem:[%s20085_s4 + $0x58] sm:$0xff] }
 0x4a1   :  { %v4662_v48 = vpop.xlane.xlu0 %4661  ;;  %v4887_v49 = vmul.f32 %v13455_v45, %v18194_v26  ;;  %v4897_v5 = vmul.f32 %v18325_v44, %v4881_v55  ;;  %v4921_v32 = vsel %vm128_vm0, %v4893_v9, 0.0  ;;  %v7872_v60 = vsel %vm3229_vm2, %v20571_v6, 0.0 }
 0x4a2   :  { %13466 = vrcp.f32 %v4662_v48  ;;  %v13457_v41 = vpop.eup %13456  ;;  %7864 = vadd.xlane.f32.xlu1 %v7863_v43  ;;  %v18332_v20 = vpop.f32.mrb[220].mxu1 }
 0x4a3   :  { %v4903_v52 = vmul.f32 %v17911_v29, %v4887_v49  ;;  %v4878_v26 = vmul.f32 %v13457_v41, %v18113_v53  ;;  %v4665_v14 = vpop.xlane.xlu1 %4664  ;;  %7870 = vadd.xlane.f32.xlu0 %v7869_v1  ;;  %v4922_v15 = vsel %vm128_vm0, %v4897_v5, 0.0  ;;  %v18337_v30 = vpop.f32.mrb[221].mxu1  ;;  %v18343_v53 = vld [vmem:[%s20085_s4 + $0x18] sm:$0xff]  ;;  %v20573_v1 = vld [vmem:[#allocation67_spill] sm:$0xff] }
 0x4a4   :  { %v13459_v10 = vpop.eup %13458  ;;  %13468 = vrcp.f32 %v4665_v14  ;;  %v4923_v29 = vadd.f32 %v4922_v15, %v4921_v32  ;;  %v20572_v5 = vld [vmem:[#allocation73_spill] sm:$0xff] }
 0x4a5   :  { %v4882_v13 = vmul.f32 %v13459_v10, %v20569_v4  ;;  %v5269_v3 = vpop.xlane.xlu0 %5268  ;;  %v4912_v54 = vsel %vm128_vm0, %v4903_v52, 0.0  ;;  %v4894_v63 = vmul.f32 %v18343_v53, %v4878_v26  ;;  %v7878_v52 = vsel %vm3229_vm2, %v20573_v1, 0.0 }
 0x4a6   :  { %v4913_v34 = vadd.f32 %v4912_v54, %v4911_v24  ;;  %v13461_v27 = vpop.eup %13460  ;;  %7867 = vadd.xlane.f32.xlu1 %v7866_v38  ;;  %v18358_v42 = vpop.f32.mrb[222].mxu1  ;;  %v20574_v38 = vld [vmem:[#allocation16_spill] sm:$0xff] }
 0x4a7   :  { %v4898_v57 = vmul.f32 %v18351_v35, %v4882_v13  ;;  %v4928_v45 = vsel %vm128_vm0, %v4894_v63, 0.0  ;;  %v4888_v56 = vmul.f32 %v13461_v27, %v18189_v62  ;;  %v5266_v55 = vpop.xlane.xlu1 %5265  ;;  %7873 = vadd.xlane.f32.xlu0 %v7872_v60  ;;  %v18363_v48 = vpop.f32.mrb[223].mxu1  ;;  %v7875_v62 = vsel %vm3229_vm2, %v20572_v5, 0.0 }
 0x4a8   :  { %v13463_v33 = vpop.eup %13462  ;;  %12642 = vmatprep.mubr.msk.f32.mxu0 %vm128_vm0, %v4913_v34  ;;  %13470 = vrcp.f32 %v5266_v55  ;;  %v7881_v34 = vsel %vm3229_vm2, %v20574_v38, 0.0 }
 0x4a9   :  { %v4929_v24 = vsel %vm128_vm0, %v4898_v57, 0.0  ;;  %v4885_v9 = vmul.f32 %v13463_v33, %v18179_v19  ;;  %v5272_v49 = vpop.xlane.xlu0 %5271  ;;  %v4904_v43 = vmul.f32 %v17903_v7, %v4888_v56  ;;  %13472 = vrcp.f32 %v5269_v3  ;;  %v18373_v19 = vld [vmem:[%s20085_s4 + $0x50] sm:$0xff] }
 0x4aa   :  { %v4930_v50 = vadd.f32 %v4929_v24, %v4928_v45  ;;  %v13465_v41 = vpop.eup %13464  ;;  %7876 = vadd.xlane.f32.xlu1 %v7875_v62  ;;  %v18378_v15 = vpop.f32.mrb[224].mxu1 }
 0x4ab   :  { %v4901_v10 = vmul.f32 %v18373_v19, %v4885_v9  ;;  %v4919_v14 = vsel %vm128_vm0, %v4904_v43, 0.0  ;;  %v4886_v7 = vmul.f32 %v13465_v41, %v18176_v40  ;;  %v5275_v32 = vpop.xlane.xlu1 %5274  ;;  %7879 = vadd.xlane.f32.xlu0 %v7878_v52  ;;  %v18380_v4 = vpop.f32.mrb[225].mxu1  ;;  %v20576_v43 = vld [vmem:[#allocation4_spill] sm:$0xff] }
 0x4ac   :  { %v13467_v26 = vpop.eup %13466  ;;  %13474 = vrcp.f32 %v5275_v32  ;;  %v4920_v3 = vadd.f32 %v4919_v14, %v18315_v58  ;;  %v7893_v32 = vsel %vm3229_vm2, %v18140_v37, 0.0 }
 0x4ad   :  { %v5278_v13 = vpop.xlane.xlu0 %5277  ;;  %v4889_v54 = vmul.f32 %v13467_v26, %v18210_v59  ;;  %v4924_v63 = vsel %vm128_vm0, %v4901_v10, 0.0  ;;  %v4902_v40 = vmul.f32 %v18388_v11, %v4886_v7  ;;  %v20575_v59 = vld [vmem:[#allocation68_spill] sm:$0xff] }
 0x4ae   :  { %13476 = vrcp.f32 %v5278_v13  ;;  %v4925_v27 = vadd.f32 %v4924_v63, %v4923_v29  ;;  %v13469_v57 = vpop.eup %13468  ;;  %7882 = vadd.xlane.f32.xlu1 %v7881_v34  ;;  %12643 = vmatmul.mubr.msk.f32.gmra.mrb[40].mxu0 %vm128_vm0, %v4920_v3  ;;  %v7884_v58 = vsel %vm3229_vm2, %v20575_v59, 0.0  ;;  %v18399_v56 = vpop.f32.mrb[226].mxu1 }
 0x4af   :  { %13478 = vrcp.f32 %v5272_v49  ;;  %v4905_v6 = vmul.f32 %v17941_v28, %v4889_v54  ;;  %v4931_v60 = vsel %vm128_vm0, %v4902_v40, 0.0  ;;  %v4890_v33 = vmul.f32 %v13469_v57, %v18205_v18  ;;  %v5281_v45 = vpop.xlane.xlu1 %5280  ;;  %7885 = vadd.xlane.f32.xlu0 %v7884_v58  ;;  %v18401_v29 = vpop.f32.mrb[227].mxu1  ;;  %v20577_v18 = vld [vmem:[#allocation77_spill] sm:$0xff] }
 0x4b0   :  { %v4932_v55 = vadd.f32 %v4931_v60, %v4930_v50  ;;  %13480 = vrcp.f32 %v5281_v45  ;;  %v7887_v28 = vsel %vm3229_vm2, %v20576_v43, 0.0  ;;  %v7890_v41 = vsel %vm3229_vm2, %v20577_v18, 0.0 }
 0x4b1   :  { %v5287_v24 = vpop.xlane.xlu0 %5286  ;;  %v4926_v9 = vsel %vm128_vm0, %v4905_v6, 0.0  ;;  %v4906_v49 = vmul.f32 %v17932_v2, %v4890_v33 }
 0x4b2   :  { %13482 = vrcp.f32 %v5287_v24  ;;  %v4927_v5 = vadd.f32 %v4926_v9, %v4925_v27  ;;  %v13471_v62 = vpop.eup %13470  ;;  %7888 = vadd.xlane.f32.xlu1 %v7887_v28  ;;  %v18410_v10 = vpop.f32.mrb[228].mxu1 }
 0x4b3   :  { %v13473_v1 = vpop.eup %13472  ;;  %v4933_v50 = vsel %vm128_vm0, %v4906_v49, 0.0  ;;  %v5284_v52 = vpop.xlane.xlu1 %5283  ;;  %7891 = vadd.xlane.f32.xlu0 %v7890_v41  ;;  %v5521_v2 = vmul.f32 %v13471_v62, %v18222_v21 }
 0x4b4   :  { %12645 = vmatprep.mubr.msk.f32.mxu0 %vm128_vm0, %v4927_v5  ;;  %13484 = vrcp.f32 %v5284_v52  ;;  %v18414_v26 = vpop.f32.mrb[229].mxu1  ;;  %v4934_v7 = vadd.f32 %v4933_v50, %v4932_v55  ;;  %v5522_v3 = vmul.f32 %v13473_v1, %v18220_v12 }
 0x4b5   :  { %v5290_v14 = vpop.xlane.xlu0 %5289  ;;  %v5537_v37 = vmul.f32 %v18246_v39, %v5521_v2 }
 0x4b6   :  { %13486 = vrcp.f32 %v5290_v14  ;;  %v13475_v13 = vpop.eup %13474  ;;  %7894 = vadd.xlane.f32.xlu1 %v7893_v32  ;;  %12646 = vmatmul.mubr.msk.f32.gmra.mrb[42].mxu0 %vm128_vm0, %v4934_v7  ;;  %v18421_v21 = vpop.f32.mrb[230].mxu1  ;;  %v5538_v59 = vmul.f32 %v18270_v17, %v5522_v3 }
 0x4b7   :  { %v5524_v63 = vmul.f32 %v13475_v13, %v18235_v61  ;;  %v5293_v40 = vpop.xlane.xlu1 %5292  ;;  %v18424_v27 = vpop.f32.mrb[231].mxu1  ;;  %v18431_v61 = vld [vmem:[%s20085_s4 + $0x20] sm:$0xff]  ;;  %v5553_v43 = vsel %vm128_vm0, %v5537_v37, 0.0 }
 0x4b8   :  { %v13477_v54 = vpop.eup %13476  ;;  %13488 = vrcp.f32 %v5293_v40 }
 0x4b9   :  { %v13479_v38 = vpop.eup %13478  ;;  %v5525_v34 = vmul.f32 %v13477_v54, %v18258_v31  ;;  %v5296_v57 = vpop.xlane.xlu0 %5295  ;;  %v5540_v60 = vmul.f32 %v18343_v53, %v5524_v63 }
 0x4ba   :  { %13490 = vrcp.f32 %v5296_v57  ;;  %v13481_v12 = vpop.eup %13480  ;;  %v5523_v31 = vmul.f32 %v13479_v38, %v18238_v0  ;;  %v18437_v55 = vpop.f32.mrb[232].mxu1 }
 0x4bb   :  { %v5541_v58 = vmul.f32 %v18431_v61, %v5525_v34  ;;  %v5526_v33 = vmul.f32 %v13481_v12, %v18253_v23  ;;  %v5299_v45 = vpop.xlane.xlu1 %5298  ;;  %v18440_v9 = vpop.f32.mrb[233].mxu1  ;;  %v5560_v23 = vsel %vm128_vm0, %v5538_v59, 0.0 }
 0x4bc   :  { %v13483_v6 = vpop.eup %13482  ;;  %13492 = vrcp.f32 %v5299_v45  ;;  %v5539_v14 = vmul.f32 %v18312_v25, %v5523_v31 }
 0x4bd   :  { %v5528_v24 = vmul.f32 %v13483_v6, %v18274_v16  ;;  %v5302_v49 = vpop.xlane.xlu0 %5301  ;;  %v5554_v28 = vsel %vm128_vm0, %v5541_v58, 0.0  ;;  %v5542_v5 = vmul.f32 %v18282_v46, %v5526_v33  ;;  %v5574_v16 = vsel %vm128_vm0, %v5540_v60, 0.0 }
 0x4be   :  { %13494 = vrcp.f32 %v5302_v49  ;;  %v5555_v0 = vadd.f32 %v5554_v28, %v5553_v43  ;;  %v13485_v62 = vpop.eup %13484  ;;  %v18450_v2 = vpop.f32.mrb[234].mxu1  ;;  %v5567_v59 = vsel %vm128_vm0, %v5539_v14, 0.0 }
 0x4bf   :  { %v5544_v18 = vmul.f32 %v18351_v35, %v5528_v24  ;;  %v5561_v1 = vsel %vm128_vm0, %v5542_v5, 0.0  ;;  %v5527_v50 = vmul.f32 %v13485_v62, %v18277_v36  ;;  %v5305_v52 = vpop.xlane.xlu1 %5304  ;;  %v18455_v3 = vpop.f32.mrb[235].mxu1  ;;  %v18461_v36 = vld [vmem:[%s20085_s4 + $0x40] sm:$0xff] }
 0x4c0   :  { %v13487_v41 = vpop.eup %13486  ;;  %v5562_v7 = vadd.f32 %v5561_v1, %v5560_v23  ;;  %13496 = vrcp.f32 %v5305_v52 }
 0x4c1   :  { %v5575_v32 = vsel %vm128_vm0, %v5544_v18, 0.0  ;;  %v5529_v13 = vmul.f32 %v13487_v41, %v18297_v8  ;;  %v5308_v54 = vpop.xlane.xlu0 %5307  ;;  %v5543_v40 = vmul.f32 %v18325_v44, %v5527_v50 }
 0x4c2   :  { %v5576_v63 = vadd.f32 %v5575_v32, %v5574_v16  ;;  %13498 = vrcp.f32 %v5308_v54  ;;  %v13489_v38 = vpop.eup %13488  ;;  %v18465_v12 = vpop.f32.mrb[236].mxu1 }
 0x4c3   :  { %v5545_v34 = vmul.f32 %v18461_v36, %v5529_v13  ;;  %v5530_v37 = vmul.f32 %v13489_v38, %v18294_v47  ;;  %v5311_v8 = vpop.xlane.xlu1 %5310  ;;  %v5568_v58 = vsel %vm128_vm0, %v5543_v40, 0.0  ;;  %v18470_v31 = vpop.f32.mrb[237].mxu1  ;;  %v18476_v47 = vld [vmem:[%s20085_s4 + $0x48] sm:$0xff] }
 0x4c4   :  { %v13491_v57 = vpop.eup %13490  ;;  %13500 = vrcp.f32 %v5311_v8  ;;  %v5569_v45 = vadd.f32 %v5568_v58, %v5567_v59  ;;  %v18502_v8 = vld [vmem:[%s20085_s4 + $0x68] sm:$0xff] }
 0x4c5   :  { %v5531_v6 = vmul.f32 %v13491_v57, %v18317_v22  ;;  %v5915_v60 = vpop.xlane.xlu0 %5914  ;;  %v5556_v33 = vsel %vm128_vm0, %v5545_v34, 0.0  ;;  %v5546_v24 = vmul.f32 %v18476_v47, %v5530_v37 }
 0x4c6   :  { %v5557_v49 = vadd.f32 %v5556_v33, %v5555_v0  ;;  %v13493_v43 = vpop.eup %13492  ;;  %v18482_v18 = vpop.f32.mrb[238].mxu1 }
 0x4c7   :  { %v5547_v28 = vmul.f32 %v18373_v19, %v5531_v6  ;;  %v5563_v22 = vsel %vm128_vm0, %v5546_v24, 0.0  ;;  %v5532_v62 = vmul.f32 %v13493_v43, %v18307_v51  ;;  %v5912_v23 = vpop.xlane.xlu1 %5911  ;;  %v18484_v16 = vpop.f32.mrb[239].mxu1  ;;  %v18492_v51 = vld [vmem:[%s20085_s4 + $0x60] sm:$0xff] }
 0x4c8   :  { %v13495_v5 = vpop.eup %13494  ;;  %v5564_v41 = vadd.f32 %v5563_v22, %v5562_v7  ;;  %13502 = vrcp.f32 %v5912_v23 }
 0x4c9   :  { %v5918_v1 = vpop.xlane.xlu0 %5917  ;;  %v5533_v50 = vmul.f32 %v13495_v5, %v18337_v30  ;;  %v5570_v0 = vsel %vm128_vm0, %v5547_v28, 0.0  ;;  %v5548_v52 = vmul.f32 %v18388_v11, %v5532_v62  ;;  %13504 = vrcp.f32 %v5915_v60  ;;  %v18520_v28 = vld [vmem:[%s20085_s4 + $0x78] sm:$0xff] }
 0x4ca   :  { %v5571_v14 = vadd.f32 %v5570_v0, %v5569_v45  ;;  %v13497_v32 = vpop.eup %13496 }
 0x4cb   :  { %v5549_v7 = vmul.f32 %v18492_v51, %v5533_v50  ;;  %v5577_v54 = vsel %vm128_vm0, %v5548_v52, 0.0  ;;  %v5534_v40 = vmul.f32 %v13497_v32, %v18332_v20  ;;  %v5921_v30 = vpop.xlane.xlu1 %5920  ;;  %v18508_v20 = vld [vmem:[%s20085_s4 + $0x70] sm:$0xff] }
 0x4cc   :  { %v13499_v13 = vpop.eup %13498  ;;  %v5578_v38 = vadd.f32 %v5577_v54, %v5576_v63  ;;  %13506 = vrcp.f32 %v5921_v30 }
 0x4cd   :  { %v5924_v34 = vpop.xlane.xlu0 %5923  ;;  %v5558_v57 = vsel %vm128_vm0, %v5549_v7, 0.0  ;;  %v5535_v37 = vmul.f32 %v13499_v13, %v18363_v48  ;;  %v5550_v59 = vmul.f32 %v18502_v8, %v5534_v40 }
 0x4ce   :  { %13508 = vrcp.f32 %v5924_v34  ;;  %v5559_v58 = vadd.f32 %v5558_v57, %v5557_v49  ;;  %v13501_v6 = vpop.eup %13500 }
 0x4cf   :  { %13510 = vrcp.f32 %v5918_v1  ;;  %v5551_v63 = vmul.f32 %v18508_v20, %v5535_v37  ;;  %v5565_v48 = vsel %vm128_vm0, %v5550_v59, 0.0  ;;  %v5536_v60 = vmul.f32 %v13501_v6, %v18358_v42  ;;  %v5927_v33 = vpop.xlane.xlu1 %5926  ;;  %v18514_v45 = vpop.f32.mrb[240].mxu1 }
 0x4d0   :  { %12648 = vmatprep.mubr.msk.f32.mxu0 %vm128_vm0, %v5559_v58  ;;  %13512 = vrcp.f32 %v5927_v33  ;;  %v5566_v49 = vadd.f32 %v5565_v48, %v5564_v41  ;;  %v18523_v22 = vpop.f32.mrb[241].mxu1 }
 0x4d1   :  { %v5933_v24 = vpop.xlane.xlu0 %5932  ;;  %v5572_v43 = vsel %vm128_vm0, %v5551_v63, 0.0  ;;  %v5552_v5 = vmul.f32 %v18520_v28, %v5536_v60 }
 0x4d2   :  { %13514 = vrcp.f32 %v5933_v24  ;;  %v5573_v42 = vadd.f32 %v5572_v43, %v5571_v14  ;;  %v13503_v62 = vpop.eup %13502  ;;  %12649 = vmatmul.mubr.msk.f32.gmra.mrb[44].mxu0 %vm128_vm0, %v5566_v49 }
 0x4d3   :  { %v13505_v23 = vpop.eup %13504  ;;  %v5579_v1 = vsel %vm128_vm0, %v5552_v5, 0.0  ;;  %v5930_v41 = vpop.xlane.xlu1 %5929  ;;  %v6167_v50 = vmul.f32 %v13503_v62, %v18380_v4 }
 0x4d4   :  { %12651 = vmatprep.mubr.msk.f32.mxu0 %vm128_vm0, %v5573_v42  ;;  %13516 = vrcp.f32 %v5930_v41  ;;  %v5580_v52 = vadd.f32 %v5579_v1, %v5578_v38  ;;  %v6168_v7 = vmul.f32 %v13505_v23, %v18378_v15 }
 0x4d5   :  { %v5936_v0 = vpop.xlane.xlu0 %5935  ;;  %v6183_v57 = vmul.f32 %v18246_v39, %v6167_v50 }
 0x4d6   :  { %13518 = vrcp.f32 %v5936_v0  ;;  %v13507_v32 = vpop.eup %13506  ;;  %12652 = vmatmul.mubr.msk.f32.gmra.mrb[46].mxu0 %vm128_vm0, %v5580_v52  ;;  %v6184_v15 = vmul.f32 %v18270_v17, %v6168_v7 }
 0x4d7   :  { %v6170_v13 = vmul.f32 %v13507_v32, %v18399_v56  ;;  %v5939_v54 = vpop.xlane.xlu1 %5938  ;;  %v18533_v34 = vpop.f32.mrb[242].mxu1  ;;  %v6199_v33 = vsel %vm128_vm0, %v6183_v57, 0.0 }
 0x4d8   :  { %v13509_v14 = vpop.eup %13508  ;;  %13520 = vrcp.f32 %v5939_v54  ;;  %v18536_v38 = vpop.f32.mrb[243].mxu1 }
 0x4d9   :  { %v13511_v40 = vpop.eup %13510  ;;  %v6171_v30 = vmul.f32 %v13509_v14, %v18414_v26  ;;  %v5942_v4 = vpop.xlane.xlu0 %5941  ;;  %v6186_v6 = vmul.f32 %v18343_v53, %v6170_v13 }
 0x4da   :  { %13522 = vrcp.f32 %v5942_v4  ;;  %v13513_v37 = vpop.eup %13512  ;;  %v6169_v56 = vmul.f32 %v13511_v40, %v18401_v29  ;;  %v6206_v29 = vsel %vm128_vm0, %v6184_v15, 0.0 }
 0x4db   :  { %v6187_v59 = vmul.f32 %v18431_v61, %v6171_v30  ;;  %v6172_v26 = vmul.f32 %v13513_v37, %v18410_v10  ;;  %v5945_v63 = vpop.xlane.xlu1 %5944  ;;  %v6220_v10 = vsel %vm128_vm0, %v6186_v6, 0.0 }
 0x4dc   :  { %v13515_v58 = vpop.eup %13514  ;;  %13524 = vrcp.f32 %v5945_v63  ;;  %v6185_v50 = vmul.f32 %v18312_v25, %v6169_v56 }
 0x4dd   :  { %v6174_v48 = vmul.f32 %v13515_v58, %v18421_v21  ;;  %v5948_v60 = vpop.xlane.xlu0 %5947  ;;  %v6200_v24 = vsel %vm128_vm0, %v6187_v59, 0.0  ;;  %v6188_v49 = vmul.f32 %v18282_v46, %v6172_v26 }
 0x4de   :  { %13526 = vrcp.f32 %v5948_v60  ;;  %v6201_v43 = vadd.f32 %v6200_v24, %v6199_v33  ;;  %v13517_v5 = vpop.eup %13516  ;;  %v18552_v1 = vpop.f32.mrb[244].mxu1  ;;  %v6213_v37 = vsel %vm128_vm0, %v6185_v50, 0.0 }
 0x4df   :  { %v6190_v42 = vmul.f32 %v18351_v35, %v6174_v48  ;;  %v6207_v21 = vsel %vm128_vm0, %v6188_v49, 0.0  ;;  %v6173_v23 = vmul.f32 %v13517_v5, %v18424_v27  ;;  %v5951_v41 = vpop.xlane.xlu1 %5950  ;;  %v18557_v7 = vpop.f32.mrb[245].mxu1 }
 0x4e0   :  { %v13519_v62 = vpop.eup %13518  ;;  %v6208_v0 = vadd.f32 %v6207_v21, %v6206_v29  ;;  %13528 = vrcp.f32 %v5951_v41 }
 0x4e1   :  { %v6221_v52 = vsel %vm128_vm0, %v6190_v42, 0.0  ;;  %v6175_v32 = vmul.f32 %v13519_v62, %v18440_v9  ;;  %v5954_v14 = vpop.xlane.xlu0 %5953  ;;  %v6189_v54 = vmul.f32 %v18325_v44, %v6173_v23 }
 0x4e2   :  { %v6222_v13 = vadd.f32 %v6221_v52, %v6220_v10  ;;  %13530 = vrcp.f32 %v5954_v14  ;;  %v13521_v40 = vpop.eup %13520 }
 0x4e3   :  { %v6191_v27 = vmul.f32 %v18461_v36, %v6175_v32  ;;  %v6176_v4 = vmul.f32 %v13521_v40, %v18437_v55  ;;  %v5957_v57 = vpop.xlane.xlu1 %5956  ;;  %v6214_v15 = vsel %vm128_vm0, %v6189_v54, 0.0 }
 0x4e4   :  { %v13523_v30 = vpop.eup %13522  ;;  %13532 = vrcp.f32 %v5957_v57  ;;  %v6215_v56 = vadd.f32 %v6214_v15, %v6213_v37 }
 0x4e5   :  { %v6177_v9 = vmul.f32 %v13523_v30, %v18455_v3  ;;  %v6561_v59 = vpop.xlane.xlu0 %6560  ;;  %v6202_v58 = vsel %vm128_vm0, %v6191_v27, 0.0  ;;  %v6192_v6 = vmul.f32 %v18476_v47, %v6176_v4  ;;  %v18567_v48 = vpop.f32.mrb[246].mxu1 }
 0x4e6   :  { %v6203_v26 = vadd.f32 %v6202_v58, %v6201_v43  ;;  %v13525_v63 = vpop.eup %13524  ;;  %v18572_v3 = vpop.f32.mrb[247].mxu1 }
 0x4e7   :  { %v6193_v55 = vmul.f32 %v18373_v19, %v6177_v9  ;;  %v6209_v33 = vsel %vm128_vm0, %v6192_v6, 0.0  ;;  %v6178_v24 = vmul.f32 %v13525_v63, %v18450_v2  ;;  %v6558_v49 = vpop.xlane.xlu1 %6557 }
 0x4e8   :  { %v13527_v60 = vpop.eup %13526  ;;  %v6210_v5 = vadd.f32 %v6209_v33, %v6208_v0  ;;  %13534 = vrcp.f32 %v6558_v49 }
 0x4e9   :  { %v6564_v29 = vpop.xlane.xlu0 %6563  ;;  %v6179_v42 = vmul.f32 %v13527_v60, %v18470_v31  ;;  %v6216_v43 = vsel %vm128_vm0, %v6193_v55, 0.0  ;;  %v6194_v62 = vmul.f32 %v18388_v11, %v6178_v24  ;;  %13536 = vrcp.f32 %v6561_v59 }
 0x4ea   :  { %v6217_v10 = vadd.f32 %v6216_v43, %v6215_v56  ;;  %v13529_v21 = vpop.eup %13528 }
 0x4eb   :  { %v6195_v23 = vmul.f32 %v18492_v51, %v6179_v42  ;;  %v6223_v2 = vsel %vm128_vm0, %v6194_v62, 0.0  ;;  %v6180_v50 = vmul.f32 %v13529_v21, %v18465_v12  ;;  %v6567_v52 = vpop.xlane.xlu1 %6566 }
 0x4ec   :  { %v13531_v41 = vpop.eup %13530  ;;  %v6224_v0 = vadd.f32 %v6223_v2, %v6222_v13  ;;  %13538 = vrcp.f32 %v6567_v52 }
 0x4ed   :  { %v6570_v32 = vpop.xlane.xlu0 %6569  ;;  %v6204_v31 = vsel %vm128_vm0, %v6195_v23, 0.0  ;;  %v6181_v14 = vmul.f32 %v13531_v41, %v18484_v16  ;;  %v6196_v54 = vmul.f32 %v18502_v8, %v6180_v50  ;;  %v18583_v30 = vpop.f32.mrb[248].mxu1 }
 0x4ee   :  { %13540 = vrcp.f32 %v6570_v32  ;;  %v6205_v40 = vadd.f32 %v6204_v31, %v6203_v26  ;;  %v13533_v27 = vpop.eup %13532  ;;  %v18588_v37 = vpop.f32.mrb[249].mxu1 }
 0x4ef   :  { %13542 = vrcp.f32 %v6564_v29  ;;  %v6197_v4 = vmul.f32 %v18508_v20, %v6181_v14  ;;  %v6211_v12 = vsel %vm128_vm0, %v6196_v54, 0.0  ;;  %v6182_v13 = vmul.f32 %v13533_v27, %v18482_v18  ;;  %v6573_v57 = vpop.xlane.xlu1 %6572 }
 0x4f0   :  { %12654 = vmatprep.mubr.msk.f32.mxu0 %vm128_vm0, %v6205_v40  ;;  %13544 = vrcp.f32 %v6573_v57  ;;  %v6212_v15 = vadd.f32 %v6211_v12, %v6210_v5 }
 0x4f1   :  { %v6579_v16 = vpop.xlane.xlu0 %6578  ;;  %v6218_v9 = vsel %vm128_vm0, %v6197_v4, 0.0  ;;  %v6198_v59 = vmul.f32 %v18520_v28, %v6182_v13 }
 0x4f2   :  { %13546 = vrcp.f32 %v6579_v16  ;;  %v6219_v58 = vadd.f32 %v6218_v9, %v6217_v10  ;;  %v13535_v56 = vpop.eup %13534  ;;  %12655 = vmatmul.mubr.msk.f32.gmra.mrb[48].mxu0 %vm128_vm0, %v6212_v15 }
 0x4f3   :  { %v13537_v6 = vpop.eup %13536  ;;  %v6225_v18 = vsel %vm128_vm0, %v6198_v59, 0.0  ;;  %v6576_v26 = vpop.xlane.xlu1 %6575  ;;  %v6813_v63 = vmul.f32 %v13535_v56, %v18523_v22 }
 0x4f4   :  { %12657 = vmatprep.mubr.msk.f32.mxu0 %vm128_vm0, %v6219_v58  ;;  %13548 = vrcp.f32 %v6576_v26  ;;  %v6226_v60 = vadd.f32 %v6225_v18, %v6224_v0  ;;  %v6814_v24 = vmul.f32 %v13537_v6, %v18514_v45 }
 0x4f5   :  { %v6582_v55 = vpop.xlane.xlu0 %6581  ;;  %v18598_v49 = vpop.f32.mrb[250].mxu1  ;;  %v6829_v21 = vmul.f32 %v18246_v39, %v6813_v63 }
 0x4f6   :  { %13550 = vrcp.f32 %v6582_v55  ;;  %v13539_v33 = vpop.eup %13538  ;;  %12658 = vmatmul.mubr.msk.f32.gmra.mrb[50].mxu0 %vm128_vm0, %v6226_v60  ;;  %v6768_v43 = vpop.f32.mrb[251].mxu1  ;;  %v6830_v45 = vmul.f32 %v18270_v17, %v6814_v24 }
 0x4f7   :  { %v6816_v29 = vmul.f32 %v13539_v33, %v18533_v34  ;;  %v6585_v42 = vpop.xlane.xlu1 %6584  ;;  %v6845_v39 = vsel %vm128_vm0, %v6829_v21, 0.0 }
 0x4f8   :  { %v13541_v5 = vpop.eup %13540  ;;  %13552 = vrcp.f32 %v6585_v42 }
 0x4f9   :  { %v13543_v62 = vpop.eup %13542  ;;  %v6817_v10 = vmul.f32 %v13541_v5, %v18557_v7  ;;  %v6588_v22 = vpop.xlane.xlu0 %6587  ;;  %v6832_v0 = vmul.f32 %v18343_v53, %v6816_v29 }
 0x4fa   :  { %13554 = vrcp.f32 %v6588_v22  ;;  %v13545_v23 = vpop.eup %13544  ;;  %v6815_v50 = vmul.f32 %v13543_v62, %v18536_v38  ;;  %v6852_v38 = vsel %vm128_vm0, %v6830_v45, 0.0 }
 0x4fb   :  { %v6833_v41 = vmul.f32 %v18431_v61, %v6817_v10  ;;  %v6818_v34 = vmul.f32 %v13545_v23, %v18552_v1  ;;  %v6591_v52 = vpop.xlane.xlu1 %6590  ;;  %v6866_v57 = vsel %vm128_vm0, %v6832_v0, 0.0 }
 0x4fc   :  { %v13547_v2 = vpop.eup %13546  ;;  %13556 = vrcp.f32 %v6591_v52  ;;  %v6831_v16 = vmul.f32 %v18312_v25, %v6815_v50 }
 0x4fd   :  { %v6820_v7 = vmul.f32 %v13547_v2, %v18567_v48  ;;  %v6594_v32 = vpop.xlane.xlu0 %6593  ;;  %v6846_v31 = vsel %vm128_vm0, %v6833_v41, 0.0  ;;  %v6834_v17 = vmul.f32 %v18282_v46, %v6818_v34  ;;  %v12458_v40 = vpop.f32.mrb[252].mxu1 }
 0x4fe   :  { %13558 = vrcp.f32 %v6594_v32  ;;  %v6847_v14 = vadd.f32 %v6846_v31, %v6845_v39  ;;  %v13549_v54 = vpop.eup %13548  ;;  %v6778_v13 = vpop.f32.mrb[253].mxu1  ;;  %v6859_v55 = vsel %vm128_vm0, %v6831_v16, 0.0 }
 0x4ff   :  { %v6836_v1 = vmul.f32 %v18351_v35, %v6820_v7  ;;  %v6853_v4 = vsel %vm128_vm0, %v6834_v17, 0.0  ;;  %v6819_v48 = vmul.f32 %v13549_v54, %v18572_v3  ;;  %v6597_v12 = vpop.xlane.xlu1 %6596 }
 0x500   :  { %v13551_v27 = vpop.eup %13550  ;;  %v6854_v46 = vadd.f32 %v6853_v4, %v6852_v38  ;;  %13560 = vrcp.f32 %v6597_v12 }
 0x501   :  { %v6821_v15 = vmul.f32 %v13551_v27, %v18588_v37  ;;  %v6600_v9 = vpop.xlane.xlu0 %6599  ;;  %v6867_v59 = vsel %vm128_vm0, %v6836_v1, 0.0  ;;  %v6835_v56 = vmul.f32 %v18325_v44, %v6819_v48 }
 0x502   :  { %13562 = vrcp.f32 %v6600_v9  ;;  %v6868_v58 = vadd.f32 %v6867_v59, %v6866_v57  ;;  %v13553_v6 = vpop.eup %13552 }
 0x503   :  { %v6837_v3 = vmul.f32 %v18461_v36, %v6821_v15  ;;  %v6822_v26 = vmul.f32 %v13553_v6, %v18583_v30  ;;  %v6603_v63 = vpop.xlane.xlu1 %6602  ;;  %v6860_v60 = vsel %vm128_vm0, %v6835_v56, 0.0 }
 0x504   :  { %v13555_v18 = vpop.eup %13554  ;;  %13564 = vrcp.f32 %v6603_v63  ;;  %v6861_v5 = vadd.f32 %v6860_v60, %v6859_v55 }
 0x505   :  { %v6848_v37 = vsel %vm128_vm0, %v6837_v3, 0.0  ;;  %v7207_v33 = vpop.xlane.xlu0 %7206  ;;  %v6823_v24 = vmul.f32 %v13555_v18, %v6768_v43  ;;  %v6838_v29 = vmul.f32 %v18476_v47, %v6822_v26 }
 0x506   :  { %v6849_v44 = vadd.f32 %v6848_v37, %v6847_v14  ;;  %v13557_v42 = vpop.eup %13556  ;;  %v12461_v62 = vpop.f32.mrb[254].mxu1 }
 0x507   :  { %v6839_v10 = vmul.f32 %v18373_v19, %v6823_v24  ;;  %v6855_v30 = vsel %vm128_vm0, %v6838_v29, 0.0  ;;  %v6824_v21 = vmul.f32 %v13557_v42, %v18598_v49  ;;  %v6788_v23 = vpop.f32.mrb[255].mxu1  ;;  %v7204_v45 = vpop.xlane.xlu1 %7203  ;;  %v18649_v42 = vld [vmem:[%s20085_s4] sm:$0xff] }
 0x508   :  { %v13559_v22 = vpop.eup %13558  ;;  %v6856_v41 = vadd.f32 %v6855_v30, %v6854_v46  ;;  %13566 = vrcp.f32 %v7204_v45 }
 0x509   :  { %v6825_v2 = vmul.f32 %v13559_v22, %v6778_v13  ;;  %v6862_v50 = vsel %vm128_vm0, %v6839_v10, 0.0  ;;  %v7210_v43 = vpop.xlane.xlu0 %7209  ;;  %v6840_v34 = vmul.f32 %v18388_v11, %v6824_v21  ;;  %13568 = vrcp.f32 %v7207_v33 }
 0x50a   :  { %v6863_v52 = vadd.f32 %v6862_v50, %v6861_v5  ;;  %v13561_v0 = vpop.eup %13560  ;;  %13570 = vrcp.f32 %v7210_v43 }
 0x50b   :  { %v6841_v7 = vmul.f32 %v18492_v51, %v6825_v2  ;;  %v6826_v39 = vmul.f32 %v13561_v0, %v12458_v40  ;;  %v6869_v31 = vsel %vm128_vm0, %v6840_v34, 0.0  ;;  %v7213_v49 = vpop.xlane.xlu1 %7212  ;;  %v18656_v34 = vld [vmem:[%s20085_s4 + $0x8] sm:$0xff] }
 0x50c   :  { %v13563_v32 = vpop.eup %13562  ;;  %v6870_v14 = vadd.f32 %v6869_v31, %v6868_v58  ;;  %13572 = vrcp.f32 %v7213_v49 }
 0x50d   :  { %v6850_v17 = vsel %vm128_vm0, %v6841_v7, 0.0  ;;  %v6827_v54 = vmul.f32 %v13563_v32, %v6788_v23  ;;  %v7216_v38 = vpop.xlane.xlu0 %7215  ;;  %v6842_v1 = vmul.f32 %v18502_v8, %v6826_v39 }
 0x50e   :  { %v6851_v27 = vadd.f32 %v6850_v17, %v6849_v44  ;;  %13574 = vrcp.f32 %v7216_v38  ;;  %v13565_v4 = vpop.eup %13564  ;;  %v12520_v12 = vpop.f32.mrb[0].mxu1 }
 0x50f   :  { %v6843_v48 = vmul.f32 %v18508_v20, %v6827_v54  ;;  %v6857_v40 = vsel %vm128_vm0, %v6842_v1, 0.0  ;;  %v6828_v13 = vmul.f32 %v13565_v4, %v12461_v62  ;;  %v7364_v57 = vpop.f32.mrb[1].mxu1  ;;  %v7219_v16 = vpop.xlane.xlu1 %7218 }
 0x510   :  { %12660 = vmatprep.mubr.msk.f32.mxu0 %vm128_vm0, %v6851_v27  ;;  %13576 = vrcp.f32 %v7219_v16  ;;  %v6858_v9 = vadd.f32 %v6857_v40, %v6856_v41 }
 0x511   :  { %v6864_v46 = vsel %vm128_vm0, %v6843_v48, 0.0  ;;  %v7225_v15 = vpop.xlane.xlu0 %7224  ;;  %v6844_v59 = vmul.f32 %v18520_v28, %v6828_v13 }
 0x512   :  { %v6865_v58 = vadd.f32 %v6864_v46, %v6863_v52  ;;  %13578 = vrcp.f32 %v7225_v15  ;;  %v13567_v56 = vpop.eup %13566  ;;  %v12523_v6 = vpop.f32.mrb[2].mxu1  ;;  %12661 = vmatmul.mubr.msk.f32.gmra.mrb[52].mxu0 %vm128_vm0, %v6858_v9 }
 0x513   :  { %v6871_v3 = vsel %vm128_vm0, %v6844_v59, 0.0  ;;  %v7459_v18 = vmul.f32 %v13567_v56, %v7364_v57  ;;  %v7374_v26 = vpop.f32.mrb[3].mxu1  ;;  %v7222_v63 = vpop.xlane.xlu1 %7221 }
 0x514   :  { %12663 = vmatprep.mubr.msk.f32.mxu0 %vm128_vm0, %v6865_v58  ;;  %v13569_v55 = vpop.eup %13568  ;;  %v6872_v60 = vadd.f32 %v6871_v3, %v6870_v14  ;;  %13580 = vrcp.f32 %v7222_v63  ;;  %v18665_v14 = vld [vmem:[%s20085_s4 + $0x28] sm:$0xff]  ;;  %v18684_v58 = vld [vmem:[%s20085_s4 + $0x30] sm:$0xff] }
 0x515   :  { %v7228_v37 = vpop.xlane.xlu0 %7227  ;;  %v13571_v33 = vpop.eup %13570  ;;  %v7460_v44 = vmul.f32 %v13569_v55, %v12520_v12  ;;  %v7475_v62 = vmul.f32 %v18649_v42, %v7459_v18 }
 0x516   :  { %13582 = vrcp.f32 %v7228_v37  ;;  %v13573_v24 = vpop.eup %13572  ;;  %v12526_v5 = vpop.f32.mrb[4].mxu1  ;;  %12664 = vmatmul.mubr.msk.f32.gmra.mrb[54].mxu0 %vm128_vm0, %v6872_v60  ;;  %v7461_v41 = vmul.f32 %v13571_v33, %v7374_v26 }
 0x517   :  { %v7384_v10 = vpop.f32.mrb[5].mxu1  ;;  %v7231_v22 = vpop.xlane.xlu1 %7230  ;;  %v7462_v30 = vmul.f32 %v13573_v24, %v12523_v6  ;;  %v7476_v52 = vmul.f32 %v18656_v34, %v7460_v44  ;;  %v7491_v0 = vsel %vm128_vm0, %v7475_v62, 0.0 }
 0x518   :  { %v13575_v29 = vpop.eup %13574  ;;  %13584 = vrcp.f32 %v7231_v22  ;;  %v7477_v27 = vmul.f32 %v18312_v25, %v7461_v41 }
 0x519   :  { %v7463_v21 = vmul.f32 %v13575_v29, %v7384_v10  ;;  %v7234_v23 = vpop.xlane.xlu0 %7233  ;;  %v7478_v31 = vmul.f32 %v18343_v53, %v7462_v30  ;;  %v18673_v53 = vld [vmem:[%s20084_s3 + $0x6] ss:$0 sm:$0xff]  ;;  %v7498_v12 = vsel %vm128_vm0, %v7476_v52, 0.0  ;;  %v13826_v29 = vld [vmem:[%s20083_s0 + $0x8] sm:$0xff] }
 0x51a   :  { %13586 = vrcp.f32 %v7234_v23  ;;  %v13577_v45 = vpop.eup %13576  ;;  %v12529_v50 = vpop.f32.mrb[6].mxu1  ;;  %v7505_v55 = vsel %vm128_vm0, %v7477_v27, 0.0  ;;  %v13827_v30 = vld [vmem:[%s20083_s0] sm:$0xff] }
 0x51b   :  { %v7479_v2 = vmul.f32 %v18431_v61, %v7463_v21  ;;  %v7464_v7 = vmul.f32 %v13577_v45, %v12526_v5  ;;  %v7394_v32 = vpop.f32.mrb[7].mxu1  ;;  %v7237_v39 = vpop.xlane.xlu1 %7236  ;;  %v7512_v46 = vsel %vm128_vm0, %v7478_v31, 0.0 }
 0x51c   :  { %v13579_v43 = vpop.eup %13578  ;;  %13588 = vrcp.f32 %v7237_v39 }
 0x51d   :  { %v7492_v49 = vsel %vm128_vm0, %v7479_v2, 0.0  ;;  %v7466_v17 = vmul.f32 %v13579_v43, %v12529_v50  ;;  %v7240_v61 = vpop.xlane.xlu0 %7239  ;;  %v7480_v54 = vmul.f32 %v18665_v14, %v7464_v7 }
 0x51e   :  { %v7493_v38 = vadd.f32 %v7492_v49, %v7491_v0  ;;  %13590 = vrcp.f32 %v7240_v61  ;;  %v13581_v1 = vpop.eup %13580  ;;  %v13828_v61 = vld [vmem:[%s20083_s0 + $0x18] sm:$0xff] }
 0x51f   :  { %v7482_v4 = vmul.f32 %v18351_v35, %v7466_v17  ;;  %v7499_v40 = vsel %vm128_vm0, %v7480_v54, 0.0  ;;  %v7465_v13 = vmul.f32 %v13581_v1, %v7394_v32  ;;  %v12532_v57 = vpop.f32.mrb[8].mxu1  ;;  %v7243_v16 = vpop.xlane.xlu1 %7242 }
 0x520   :  { %v13583_v48 = vpop.eup %13582  ;;  %v7500_v15 = vadd.f32 %v7499_v40, %v7498_v12  ;;  %13592 = vrcp.f32 %v7243_v16  ;;  %v7404_v35 = vpop.f32.mrb[9].mxu1 }
 0x521   :  { %v7513_v25 = vsel %vm128_vm0, %v7482_v4, 0.0  ;;  %v12632_v9 = vpop.f32.mrb[32].mxu0  ;;  %v7481_v56 = vmul.f32 %v18684_v58, %v7465_v13  ;;  %v7467_v6 = vmul.f32 %v13583_v48, %v7404_v35  ;;  %v7246_v18 = vpop.xlane.xlu0 %7245  ;;  %v13829_v4 = vld [vmem:[%s20083_s0 + $0x10] sm:$0xff] }
 0x522   :  { %v18679_v59 = vadd.f32 %v7513_v25, %v7512_v46  ;;  %v8342_v3 = vadd.f32 %v12632_v9, %v18673_v53  ;;  %v8336_v26 = vpop.f32.mrb[33].mxu0  ;;  %v13585_v63 = vpop.eup %13584  ;;  %13594 = vrcp.f32 %v7246_v18 }
 0x523   :  { %v8337_v60 = vadd.f32 %v18673_v53, %v8336_v26  ;;  %v7506_v33 = vsel %vm128_vm0, %v7481_v56, 0.0  ;;  %v7468_v24 = vmul.f32 %v13585_v63, %v12532_v57  ;;  %v7483_v5 = vmul.f32 %v18461_v36, %v7467_v6  ;;  %v12535_v62 = vpop.f32.mrb[10].mxu1  ;;  %v7249_v10 = vpop.xlane.xlu1 %7248 }
 0x524   :  { %v13587_v37 = vpop.eup %13586  ;;  %v18695_v44 = vadd.f32 %v13826_v29, %v8342_v3  ;;  %v7507_v22 = vadd.f32 %v7506_v33, %v7505_v55  ;;  %13596 = vrcp.f32 %v7249_v10  ;;  %v7414_v23 = vpop.f32.mrb[11].mxu1 }
 0x525   :  { %v18700_v21 = vadd.f32 %v13827_v30, %v8337_v60  ;;  %v12635_v45 = vpop.f32.mrb[34].mxu0  ;;  %v7484_v36 = vmul.f32 %v18476_v47, %v7468_v24  ;;  %v7494_v41 = vsel %vm128_vm0, %v7483_v5, 0.0  ;;  %v7469_v2 = vmul.f32 %v13587_v37, %v7414_v23  ;;  %v7853_v43 = vpop.xlane.xlu0 %7852 }
 0x526   :  { %v8352_v50 = vadd.f32 %v12635_v45, %v18673_v53  ;;  %v8346_v52 = vpop.f32.mrb[35].mxu0  ;;  %v13589_v0 = vpop.eup %13588  ;;  %v7495_v7 = vadd.f32 %v7494_v41, %v7493_v38  ;;  %13598 = vrcp.f32 %v7853_v43  ;;  %v8530_v39 = vsel %vm128_vm0, %v18695_v44, 0.0 }
 0x527   :  { %v8347_v32 = vadd.f32 %v18673_v53, %v8346_v52  ;;  %v7501_v49 = vsel %vm128_vm0, %v7484_v36, 0.0  ;;  %v7470_v17 = vmul.f32 %v13589_v0, %v12535_v62  ;;  %v7485_v47 = vmul.f32 %v18373_v19, %v7469_v2  ;;  %v12538_v1 = vpop.f32.mrb[12].mxu1  ;;  %8531 = vadd.xlane.f32.xlu1 %v8530_v39  ;;  %v7850_v38 = vpop.xlane.xlu1 %7849 }
 0x528   :  { %v13591_v31 = vpop.eup %13590  ;;  %v18713_v54 = vadd.f32 %v13828_v61, %v8352_v50  ;;  %v7502_v27 = vadd.f32 %v7501_v49, %v7500_v15  ;;  %v7424_v12 = vpop.f32.mrb[13].mxu1  ;;  %13600 = vrcp.f32 %v7850_v38  ;;  %v8527_v19 = vsel %vm128_vm0, %v18700_v21, 0.0 }
 0x529   :  { %v18718_v48 = vadd.f32 %v13829_v4, %v8347_v32  ;;  %v7486_v40 = vmul.f32 %v18388_v11, %v7470_v17  ;;  %v7508_v13 = vsel %vm128_vm0, %v7485_v47, 0.0  ;;  %v7471_v57 = vmul.f32 %v13591_v31, %v7424_v12  ;;  %8528 = vadd.xlane.f32.xlu0 %v8527_v19  ;;  %v7856_v16 = vpop.xlane.xlu0 %7855 }
 0x52a   :  { %v8536_v46 = vsel %vm128_vm0, %v18713_v54, 0.0  ;;  %v13593_v15 = vpop.eup %13592  ;;  %v7509_v25 = vadd.f32 %v7508_v13, %v7507_v22 }
 0x52b   :  { %v8533_v35 = vsel %vm128_vm0, %v18718_v48, 0.0  ;;  %v7515_v9 = vsel %vm128_vm0, %v7486_v40, 0.0  ;;  %v7472_v56 = vmul.f32 %v13593_v15, %v12538_v1  ;;  %v7487_v6 = vmul.f32 %v18492_v51, %v7471_v57  ;;  %v12541_v3 = vpop.f32.mrb[14].mxu1  ;;  %8537 = vadd.xlane.f32.xlu1 %v8536_v46  ;;  %v7859_v11 = vpop.xlane.xlu1 %7858  ;;  %v13830_v15 = vld [vmem:[%s20085_s4 + $0x20] sm:$0xff] }
 0x52c   :  { %v13595_v18 = vpop.eup %13594  ;;  %v7516_v26 = vadd.f32 %v7515_v9, %v18679_v59  ;;  %v7434_v63 = vpop.f32.mrb[15].mxu1  ;;  %13602 = vrcp.f32 %v7859_v11 }
 0x52d   :  { %v7488_v55 = vmul.f32 %v18502_v8, %v7472_v56  ;;  %v7496_v60 = vsel %vm128_vm0, %v7487_v6, 0.0  ;;  %13604 = vrcp.f32 %v7856_v16  ;;  %v7473_v37 = vmul.f32 %v13595_v18, %v7434_v63  ;;  %8534 = vadd.xlane.f32.xlu0 %v8533_v35  ;;  %v7862_v33 = vpop.xlane.xlu0 %7861 }
 0x52e   :  { %v13597_v24 = vpop.eup %13596  ;;  %v7497_v5 = vadd.f32 %v7496_v60, %v7495_v7  ;;  %13606 = vrcp.f32 %v7862_v33  ;;  %v13832_v33 = vld [vmem:[%s20085_s4 + $0x10] sm:$0xff] }
 0x52f   :  { %v7503_v51 = vsel %vm128_vm0, %v7488_v55, 0.0  ;;  %v7474_v29 = vmul.f32 %v13597_v24, %v12541_v3  ;;  %v7489_v62 = vmul.f32 %v18508_v20, %v7473_v37  ;;  %v12600_v10 = vpop.f32.mrb[16].mxu1  ;;  %v7865_v59 = vpop.xlane.xlu1 %7864  ;;  %v13831_v3 = vld [vmem:[%s20085_s4 + $0x18] sm:$0xff] }
 0x530   :  { %v13599_v22 = vpop.eup %13598  ;;  %v7504_v30 = vadd.f32 %v7503_v51, %v7502_v27  ;;  %v8010_v23 = vpop.f32.mrb[17].mxu1  ;;  %13608 = vrcp.f32 %v7865_v59  ;;  %12666 = vmatprep.mubr.msk.f32.mxu0 %vm128_vm0, %v7497_v5 }
 0x531   :  { %v7490_v45 = vmul.f32 %v18520_v28, %v7474_v29  ;;  %v7510_v36 = vsel %vm128_vm0, %v7489_v62, 0.0  ;;  %v7871_v41 = vpop.xlane.xlu0 %7870  ;;  %v8106_v17 = vmul.f32 %v13599_v22, %v12600_v10 }
 0x532   :  { %v13601_v2 = vpop.eup %13600  ;;  %v7511_v50 = vadd.f32 %v7510_v36, %v7509_v25  ;;  %13610 = vrcp.f32 %v7871_v41  ;;  %12667 = vmatmul.mubr.msk.f32.gmra.mrb[56].mxu0 %vm128_vm0, %v7504_v30 }
 0x533   :  { %v7517_v43 = vsel %vm128_vm0, %v7490_v45, 0.0  ;;  %v12603_v52 = vpop.f32.mrb[18].mxu1  ;;  %v7868_v0 = vpop.xlane.xlu1 %7867  ;;  %v8105_v32 = vmul.f32 %v13601_v2, %v8010_v23  ;;  %v8122_v57 = vmul.f32 %v18656_v34, %v8106_v17 }
 0x534   :  { %v7518_v7 = vadd.f32 %v7517_v43, %v7516_v26  ;;  %v8020_v39 = vpop.f32.mrb[19].mxu1  ;;  %13612 = vrcp.f32 %v7868_v0  ;;  %12669 = vmatprep.mubr.msk.f32.mxu0 %vm128_vm0, %v7511_v50 }
 0x535   :  { %v7874_v31 = vpop.xlane.xlu0 %7873  ;;  %v8121_v27 = vmul.f32 %v18649_v42, %v8105_v32  ;;  %v8144_v60 = vsel %vm128_vm0, %v8122_v57, 0.0  ;;  %v13834_v32 = vld [vmem:[%s20085_s4 + $0x40] sm:$0xff] }
 0x536   :  { %v13603_v49 = vpop.eup %13602  ;;  %13614 = vrcp.f32 %v7874_v31  ;;  %12670 = vmatmul.mubr.msk.f32.gmra.mrb[58].mxu0 %vm128_vm0, %v7518_v7 }
 0x537   :  { %v13605_v47 = vpop.eup %13604  ;;  %v12606_v61 = vpop.f32.mrb[20].mxu1  ;;  %v8108_v12 = vmul.f32 %v13603_v49, %v12603_v52  ;;  %v8137_v42 = vsel %vm128_vm0, %v8121_v27, 0.0 }
 0x538   :  { %v7877_v1 = vpop.xlane.xlu1 %7876  ;;  %v13607_v38 = vpop.eup %13606  ;;  %v8107_v16 = vmul.f32 %v13605_v47, %v8020_v39 }
 0x539   :  { %v8030_v4 = vpop.f32.mrb[21].mxu1  ;;  %13616 = vrcp.f32 %v7877_v1  ;;  %v7880_v40 = vpop.xlane.xlu0 %7879  ;;  %v8124_v34 = vmul.f32 %v13831_v3, %v8108_v12 }
 0x53a   :  { %v8109_v19 = vmul.f32 %v13607_v38, %v8030_v4  ;;  %v13609_v13 = vpop.eup %13608  ;;  %13618 = vrcp.f32 %v7880_v40  ;;  %v8123_v24 = vmul.f32 %v13832_v33, %v8107_v16 }
 0x53b   :  { %v8110_v46 = vmul.f32 %v13609_v13, %v12606_v61  ;;  %v12609_v35 = vpop.f32.mrb[22].mxu1  ;;  %v8158_v23 = vsel %vm128_vm0, %v8124_v34, 0.0  ;;  %v13835_v61 = vld [vmem:[%s20085_s4 + $0x48] sm:$0xff]  ;;  %v13836_v13 = vld [vmem:[%s20085_s4 + $0x50] sm:$0xff] }
 0x53c   :  { %v8125_v25 = vmul.f32 %v13830_v15, %v8109_v19  ;;  %v7883_v9 = vpop.xlane.xlu1 %7882  ;;  %v13611_v56 = vpop.eup %13610  ;;  %v8151_v52 = vsel %vm128_vm0, %v8123_v24, 0.0 }
 0x53d   :  { %v8040_v6 = vpop.f32.mrb[23].mxu1  ;;  %13620 = vrcp.f32 %v7883_v9  ;;  %v8126_v11 = vmul.f32 %v18665_v14, %v8110_v46  ;;  %v8112_v26 = vmul.f32 %v13611_v56, %v12609_v35  ;;  %v7886_v63 = vpop.xlane.xlu0 %7885  ;;  %v13833_v14 = vld [vmem:[%s20085_s4 + $0x38] sm:$0xff] }
 0x53e   :  { %v8138_v18 = vsel %vm128_vm0, %v8125_v25, 0.0  ;;  %v13613_v55 = vpop.eup %13612  ;;  %13622 = vrcp.f32 %v7886_v63  ;;  %v13837_v35 = vld [vmem:[%s20085_s4 + $0x58] sm:$0xff] }
 0x53f   :  { %v8139_v37 = vadd.f32 %v8138_v18, %v8137_v42  ;;  %v8145_v5 = vsel %vm128_vm0, %v8126_v11, 0.0  ;;  %v8128_v51 = vmul.f32 %v13833_v14, %v8112_v26  ;;  %v8111_v29 = vmul.f32 %v13613_v55, %v8040_v6  ;;  %v12612_v62 = vpop.f32.mrb[24].mxu1  ;;  %v13838_v18 = vld [vmem:[%s20085_s4 + $0x60] sm:$0xff] }
 0x540   :  { %v7889_v10 = vpop.xlane.xlu1 %7888  ;;  %v13615_v59 = vpop.eup %13614  ;;  %v8146_v22 = vadd.f32 %v8145_v5, %v8144_v60 }
 0x541   :  { %13624 = vrcp.f32 %v7889_v10  ;;  %v8050_v30 = vpop.f32.mrb[25].mxu1  ;;  %v8159_v45 = vsel %vm128_vm0, %v8128_v51, 0.0  ;;  %v8127_v36 = vmul.f32 %v18684_v58, %v8111_v29  ;;  %v7892_v2 = vpop.xlane.xlu0 %7891 }
 0x542   :  { %v8113_v41 = vmul.f32 %v13615_v59, %v8050_v30  ;;  %v8160_v43 = vadd.f32 %v8159_v45, %v8158_v23  ;;  %13626 = vrcp.f32 %v7892_v2 }
 0x543   :  { %v13617_v50 = vpop.eup %13616  ;;  %v8152_v0 = vsel %vm128_vm0, %v8127_v36, 0.0  ;;  %v12615_v31 = vpop.f32.mrb[26].mxu1 }
 0x544   :  { %v8114_v7 = vmul.f32 %v13617_v50, %v12612_v62  ;;  %v8129_v39 = vmul.f32 %v13834_v32, %v8113_v41  ;;  %v7895_v49 = vpop.xlane.xlu1 %7894  ;;  %v13619_v17 = vpop.eup %13618  ;;  %v8153_v47 = vadd.f32 %v8152_v0, %v8151_v52 }
 0x545   :  { %13628 = vrcp.f32 %v7895_v49  ;;  %v8060_v58 = vpop.f32.mrb[27].mxu1 }
 0x546   :  { %v8130_v1 = vmul.f32 %v13835_v61, %v8114_v7  ;;  %v8140_v38 = vsel %vm128_vm0, %v8129_v39, 0.0  ;;  %v8115_v27 = vmul.f32 %v13619_v17, %v8060_v58  ;;  %v13841_v17 = vld [vmem:[%s20083_s0 + $0x38] sm:$0xff]  ;;  %v13842_v58 = vld [vmem:[%s20083_s0 + $0x30] sm:$0xff] }
 0x547   :  { %v13621_v4 = vpop.eup %13620  ;;  %v8141_v12 = vadd.f32 %v8140_v38, %v8139_v37  ;;  %v12618_v16 = vpop.f32.mrb[28].mxu1 }
 0x548   :  { %v8147_v19 = vsel %vm128_vm0, %v8130_v1, 0.0  ;;  %v8116_v40 = vmul.f32 %v13621_v4, %v12615_v31  ;;  %v8131_v57 = vmul.f32 %v13836_v13, %v8115_v27  ;;  %v13623_v46 = vpop.eup %13622  ;;  %v8070_v25 = vpop.f32.mrb[29].mxu1 }
 0x549   :  { %v8148_v15 = vadd.f32 %v8147_v19, %v8146_v22  ;;  %v8117_v42 = vmul.f32 %v13623_v46, %v8070_v25 }
 0x54a   :  { %v8132_v9 = vmul.f32 %v13837_v35, %v8116_v40  ;;  %v8154_v56 = vsel %vm128_vm0, %v8131_v57, 0.0  ;;  %v13843_v40 = vld [vmem:[%s20083_s0 + $0x48] sm:$0xff]  ;;  %v13844_v57 = vld [vmem:[%s20083_s0 + $0x40] sm:$0xff] }
 0x54b   :  { %v13625_v6 = vpop.eup %13624  ;;  %v8155_v3 = vadd.f32 %v8154_v56, %v8153_v47  ;;  %v8133_v26 = vmul.f32 %v13838_v18, %v8117_v42  ;;  %v12621_v63 = vpop.f32.mrb[30].mxu1  ;;  %v13845_v42 = vld [vmem:[%s20083_s0 + $0x58] sm:$0xff] }
 0x54c   :  { %v8161_v34 = vsel %vm128_vm0, %v8132_v9, 0.0  ;;  %v8118_v11 = vmul.f32 %v13625_v6, %v12618_v16  ;;  %v13627_v55 = vpop.eup %13626  ;;  %v8080_v37 = vpop.f32.mrb[31].mxu1 }
 0x54d   :  { %v8162_v60 = vadd.f32 %v8161_v34, %v8160_v43  ;;  %v8142_v24 = vsel %vm128_vm0, %v8133_v26, 0.0  ;;  %v8119_v5 = vmul.f32 %v13627_v55, %v8080_v37  ;;  %v13840_v43 = vld [vmem:[%s20083_s0 + $0x20] sm:$0xff]  ;;  %v13847_v37 = vld [vmem:[%s20083_s0 + $0x68] sm:$0xff] }
 0x54e   :  { %v8134_v33 = vmul.f32 %v18502_v8, %v8118_v11  ;;  %v8143_v51 = vadd.f32 %v8142_v24, %v8141_v12  ;;  %v13848_v24 = vld [vmem:[%s20083_s0 + $0x60] sm:$0xff] }
 0x54f   :  { %v13629_v14 = vpop.eup %13628  ;;  %v8135_v10 = vmul.f32 %v18508_v20, %v8119_v5 }
 0x550   :  { %v8149_v29 = vsel %vm128_vm0, %v8134_v33, 0.0  ;;  %v8120_v62 = vmul.f32 %v13629_v14, %v12621_v63  ;;  %12672 = vmatprep.mubr.msk.f32.mxu0 %vm128_vm0, %v8143_v51 }
 0x551   :  { %v8150_v59 = vadd.f32 %v8149_v29, %v8148_v15  ;;  %v8156_v30 = vsel %vm128_vm0, %v8135_v10, 0.0 }
 0x552   :  { %v8136_v22 = vmul.f32 %v18520_v28, %v8120_v62  ;;  %v8157_v23 = vadd.f32 %v8156_v30, %v8155_v3  ;;  %v13839_v28 = vld [vmem:[%s20083_s0 + $0x28] sm:$0xff]  ;;  %v13846_v3 = vld [vmem:[%s20083_s0 + $0x50] sm:$0xff] }
 0x553   :  { %12673 = vmatmul.mubr.msk.f32.gmra.mrb[60].mxu0 %vm128_vm0, %v8150_v59 }
 0x554   :  { %v8163_v8 = vsel %vm128_vm0, %v8136_v22, 0.0  ;;  %12675 = vmatprep.mubr.msk.f32.mxu0 %vm128_vm0, %v8157_v23  ;;  %v13849_v22 = vld [vmem:[%s20083_s0 + $0x78] sm:$0xff]  ;;  %v13850_v23 = vld [vmem:[%s20083_s0 + $0x70] sm:$0xff] }
 0x555   :  { %v8164_v45 = vadd.f32 %v8163_v8, %v8162_v60 }
 0x557   :  { %12676 = vmatmul.mubr.msk.f32.gmra.mrb[62].mxu0 %vm128_vm0, %v8164_v45 }
 0x561   :  { %v12638_v36 = vpop.f32.mrb[36].mxu0 }
 0x562   :  { %v8362_v20 = vadd.f32 %v12638_v36, %v18673_v53  ;;  %v8356_v41 = vpop.f32.mrb[37].mxu0 }
 0x563   :  { %v8357_v2 = vadd.f32 %v18673_v53, %v8356_v41 }
 0x564   :  { %v18801_v50 = vadd.f32 %v13839_v28, %v8362_v20 }
 0x565   :  { %v18806_v52 = vadd.f32 %v13840_v43, %v8357_v2  ;;  %v13851_v43 = vld [vmem:[%s20083_s0 + $0x88] sm:$0xff] }
 0x566   :  { %v8542_v0 = vsel %vm128_vm0, %v18801_v50, 0.0 }
 0x567   :  { %8543 = vadd.xlane.f32.xlu1 %v8542_v0  ;;  %v8539_v7 = vsel %vm128_vm0, %v18806_v52, 0.0 }
 0x568   :  { %8540 = vadd.xlane.f32.xlu0 %v8539_v7  ;;  %v13852_v7 = vld [vmem:[%s20083_s0 + $0x80] sm:$0xff] }
 0x56d   :  { %v12641_v32 = vpop.f32.mrb[38].mxu0 }
 0x56e   :  { %v8372_v39 = vadd.f32 %v12641_v32, %v18673_v53  ;;  %v8366_v31 = vpop.f32.mrb[39].mxu0 }
 0x56f   :  { %v8367_v49 = vadd.f32 %v18673_v53, %v8366_v31 }
 0x570   :  { %v18817_v47 = vadd.f32 %v13841_v17, %v8372_v39 }
 0x571   :  { %v18822_v61 = vadd.f32 %v13842_v58, %v8367_v49 }
 0x572   :  { %v8548_v1 = vsel %vm128_vm0, %v18817_v47, 0.0 }
 0x573   :  { %8549 = vadd.xlane.f32.xlu1 %v8548_v1  ;;  %v8545_v38 = vsel %vm128_vm0, %v18822_v61, 0.0 }
 0x574   :  { %8546 = vadd.xlane.f32.xlu0 %v8545_v38  ;;  %v13853_v38 = vld [vmem:[%s20083_s0 + $0x98] sm:$0xff] }
 0x581   :  { %v12644_v27 = vpop.f32.mrb[40].mxu0 }
 0x582   :  { %v8382_v4 = vadd.f32 %v12644_v27, %v18673_v53  ;;  %v8376_v12 = vpop.f32.mrb[41].mxu0 }
 0x583   :  { %v8377_v19 = vadd.f32 %v18673_v53, %v8376_v12 }
 0x584   :  { %v18833_v13 = vadd.f32 %v13843_v40, %v8382_v4  ;;  %v13854_v4 = vld [vmem:[%s20083_s0 + $0x90] sm:$0xff] }
 0x585   :  { %v18838_v16 = vadd.f32 %v13844_v57, %v8377_v19 }
 0x586   :  { %v8554_v46 = vsel %vm128_vm0, %v18833_v13, 0.0 }
 0x587   :  { %8555 = vadd.xlane.f32.xlu1 %v8554_v46  ;;  %v8551_v15 = vsel %vm128_vm0, %v18838_v16, 0.0 }
 0x588   :  { %8552 = vadd.xlane.f32.xlu0 %v8551_v15 }
 0x589   :  { %v12647_v25 = vpop.f32.mrb[42].mxu0 }
 0x58a   :  { %v8392_v35 = vadd.f32 %v12647_v25, %v18673_v53  ;;  %v8386_v9 = vpop.f32.mrb[43].mxu0 }
 0x58b   :  { %v8387_v56 = vadd.f32 %v18673_v53, %v8386_v9 }
 0x58c   :  { %v18849_v6 = vadd.f32 %v13845_v42, %v8392_v35  ;;  %v13855_v35 = vld [vmem:[%s20083_s0 + $0xa8] sm:$0xff] }
 0x58d   :  { %v18854_v34 = vadd.f32 %v13846_v3, %v8387_v56  ;;  %v13856_v56 = vld [vmem:[%s20083_s0 + $0xa0] sm:$0xff] }
 0x58e   :  { %v8560_v11 = vsel %vm128_vm0, %v18849_v6, 0.0 }
 0x58f   :  { %8561 = vadd.xlane.f32.xlu1 %v8560_v11  ;;  %v8557_v18 = vsel %vm128_vm0, %v18854_v34, 0.0 }
 0x590   :  { %8558 = vadd.xlane.f32.xlu0 %v8557_v18 }
 0x5a5   :  { %v12650_v26 = vpop.f32.mrb[44].mxu0 }
 0x5a6   :  { %v8402_v63 = vadd.f32 %v12650_v26, %v18673_v53  ;;  %v8396_v55 = vpop.f32.mrb[45].mxu0 }
 0x5a7   :  { %v8397_v60 = vadd.f32 %v18673_v53, %v8396_v55 }
 0x5a8   :  { %v18865_v33 = vadd.f32 %v13847_v37, %v8402_v63 }
 0x5a9   :  { %v18870_v5 = vadd.f32 %v13848_v24, %v8397_v60  ;;  %v12653_v14 = vpop.f32.mrb[46].mxu0  ;;  %v13857_v60 = vld [vmem:[%s20083_s0 + $0xb8] sm:$0xff]  ;;  %v13858_v24 = vld [vmem:[%s20083_s0 + $0xb0] sm:$0xff] }
 0x5aa   :  { %v8412_v51 = vadd.f32 %v12653_v14, %v18673_v53  ;;  %v8406_v29 = vpop.f32.mrb[47].mxu0  ;;  %v8566_v62 = vsel %vm128_vm0, %v18865_v33, 0.0 }
 0x5ab   :  { %v8407_v10 = vadd.f32 %v18673_v53, %v8406_v29  ;;  %8567 = vadd.xlane.f32.xlu1 %v8566_v62  ;;  %v8563_v59 = vsel %vm128_vm0, %v18870_v5, 0.0 }
 0x5ac   :  { %v18881_v30 = vadd.f32 %v13849_v22, %v8412_v51  ;;  %8564 = vadd.xlane.f32.xlu0 %v8563_v59 }
 0x5ad   :  { %v18886_v8 = vadd.f32 %v13850_v23, %v8407_v10  ;;  %v13859_v23 = vld [vmem:[%s20083_s0 + $0xc8] sm:$0xff] }
 0x5ae   :  { %v8572_v45 = vsel %vm128_vm0, %v18881_v30, 0.0 }
 0x5af   :  { %8573 = vadd.xlane.f32.xlu1 %v8572_v45  ;;  %v8569_v36 = vsel %vm128_vm0, %v18886_v8, 0.0 }
 0x5b0   :  { %8570 = vadd.xlane.f32.xlu0 %v8569_v36  ;;  %v13860_v36 = vld [vmem:[%s20083_s0 + $0xc0] sm:$0xff] }
 0x5c5   :  { %v12656_v20 = vpop.f32.mrb[48].mxu0 }
 0x5c6   :  { %v8422_v41 = vadd.f32 %v12656_v20, %v18673_v53  ;;  %v8416_v2 = vpop.f32.mrb[49].mxu0 }
 0x5c7   :  { %v8417_v28 = vadd.f32 %v18673_v53, %v8416_v2 }
 0x5c8   :  { %v18897_v0 = vadd.f32 %v13851_v43, %v8422_v41 }
 0x5c9   :  { %v18902_v32 = vadd.f32 %v13852_v7, %v8417_v28  ;;  %v12659_v39 = vpop.f32.mrb[50].mxu0 }
 0x5ca   :  { %v8432_v31 = vadd.f32 %v12659_v39, %v18673_v53  ;;  %v8426_v49 = vpop.f32.mrb[51].mxu0  ;;  %v8578_v17 = vsel %vm128_vm0, %v18897_v0, 0.0 }
 0x5cb   :  { %v8427_v58 = vadd.f32 %v18673_v53, %v8426_v49  ;;  %8579 = vadd.xlane.f32.xlu1 %v8578_v17  ;;  %v8575_v1 = vsel %vm128_vm0, %v18902_v32, 0.0  ;;  %v13862_v17 = vld [vmem:[%s20083_s0 + $0xd0] sm:$0xff] }
 0x5cc   :  { %v18913_v27 = vadd.f32 %v13853_v38, %v8432_v31  ;;  %8576 = vadd.xlane.f32.xlu0 %v8575_v1  ;;  %v13861_v31 = vld [vmem:[%s20083_s0 + $0xd8] sm:$0xff] }
 0x5cd   :  { %v18918_v12 = vadd.f32 %v13854_v4, %v8427_v58  ;;  %v8532_v4 = vpop.xlane.xlu1 %8531 }
 0x5ce   :  { %v8584_v19 = vsel %vm128_vm0, %v18913_v27, 0.0 }
 0x5cf   :  { %8585 = vadd.xlane.f32.xlu1 %v8584_v19  ;;  %v8581_v40 = vsel %vm128_vm0, %v18918_v12, 0.0  ;;  %v8529_v19 = vpop.xlane.xlu0 %8528 }
 0x5d0   :  { %8582 = vadd.xlane.f32.xlu0 %v8581_v40 }
 0x5d1   :  { %v8538_v40 = vpop.xlane.xlu1 %8537 }
 0x5e5   :  { %v12662_v57 = vpop.f32.mrb[52].mxu0 }
 0x5e6   :  { %v8442_v46 = vadd.f32 %v12662_v57, %v18673_v53  ;;  %v8436_v15 = vpop.f32.mrb[53].mxu0 }
 0x5e7   :  { %v8437_v25 = vadd.f32 %v18673_v53, %v8436_v15  ;;  %v8535_v15 = vpop.xlane.xlu0 %8534 }
 0x5e8   :  { %v18929_v9 = vadd.f32 %v13855_v35, %v8442_v46  ;;  %v8625_v46 = vmul.f32 0.03125, %v8532_v4 }
 0x5e9   :  { %v18934_v42 = vadd.f32 %v13856_v56, %v8437_v25  ;;  %v12665_v3 = vpop.f32.mrb[54].mxu0  ;;  %v8624_v56 = vmul.f32 0.03125, %v8529_v19 }
 0x5ea   :  { %v8452_v11 = vadd.f32 %v12665_v3, %v18673_v53  ;;  %v8446_v18 = vpop.f32.mrb[55].mxu0  ;;  %v8590_v26 = vsel %vm128_vm0, %v18929_v9, 0.0 }
 0x5eb   :  { %v8447_v63 = vadd.f32 %v18673_v53, %v8446_v18  ;;  %8591 = vadd.xlane.f32.xlu1 %v8590_v26  ;;  %v8587_v55 = vsel %vm128_vm0, %v18934_v42, 0.0 }
 0x5ec   :  { %v18945_v37 = vadd.f32 %v13857_v60, %v8452_v11  ;;  %8588 = vadd.xlane.f32.xlu0 %v8587_v55  ;;  %v13863_v11 = vld [vmem:[%s20083_s0 + $0xe8] sm:$0xff] }
 0x5ed   :  { %v18950_v14 = vadd.f32 %v13858_v24, %v8447_v63  ;;  %v13864_v63 = vld [vmem:[%s20083_s0 + $0xe0] sm:$0xff]  ;;  %v19001_v24 = vsub.f32 %v18695_v44, %v8625_v46  ;;  %v13865_v44 = vld [vmem:[%s20083_s0 + $0xf8] sm:$0xff] }
 0x5ee   :  { %v8596_v51 = vsel %vm128_vm0, %v18945_v37, 0.0 }
 0x5ef   :  { %8597 = vadd.xlane.f32.xlu1 %v8596_v51  ;;  %v8593_v29 = vsel %vm128_vm0, %v18950_v14, 0.0  ;;  %v8627_v51 = vmul.f32 0.03125, %v8538_v40 }
 0x5f0   :  { %8594 = vadd.xlane.f32.xlu0 %v8593_v29 }
 0x5f4   :  { %v8544_v26 = vpop.xlane.xlu1 %8543 }
 0x5f5   :  { %v8541_v29 = vpop.xlane.xlu0 %8540 }
 0x605   :  { %v12668_v62 = vpop.f32.mrb[56].mxu0 }
 0x606   :  { %v8462_v10 = vadd.f32 %v12668_v62, %v18673_v53  ;;  %v8456_v59 = vpop.f32.mrb[57].mxu0 }
 0x607   :  { %v8457_v22 = vadd.f32 %v18673_v53, %v8456_v59 }
 0x608   :  { %v18961_v45 = vadd.f32 %v13859_v23, %v8462_v10  ;;  %v8626_v23 = vmul.f32 0.03125, %v8535_v15 }
 0x609   :  { %v18966_v20 = vadd.f32 %v13860_v36, %v8457_v22  ;;  %v12671_v41 = vpop.f32.mrb[58].mxu0  ;;  %v19007_v22 = vsub.f32 %v18700_v21, %v8624_v56  ;;  %v13866_v21 = vld [vmem:[%s20083_s0 + $0xf0] sm:$0xff] }
 0x60a   :  { %v8472_v2 = vadd.f32 %v12671_v41, %v18673_v53  ;;  %v8466_v28 = vpop.f32.mrb[59].mxu0  ;;  %v8602_v43 = vsel %vm128_vm0, %v18961_v45, 0.0 }
 0x60b   :  { %v8467_v7 = vadd.f32 %v18673_v53, %v8466_v28  ;;  %8603 = vadd.xlane.f32.xlu1 %v8602_v43  ;;  %v8599_v39 = vsel %vm128_vm0, %v18966_v20, 0.0  ;;  %v8550_v28 = vpop.xlane.xlu1 %8549 }
 0x60c   :  { %v18977_v49 = vadd.f32 %v13861_v31, %v8472_v2  ;;  %8600 = vadd.xlane.f32.xlu0 %v8599_v39  ;;  %v8547_v39 = vpop.xlane.xlu0 %8546 }
 0x60d   :  { %v18982_v58 = vadd.f32 %v13862_v17, %v8467_v7  ;;  %v8629_v7 = vmul.f32 0.03125, %v8544_v26  ;;  %v8689_v17 = vmul.f32 %v19001_v24, %v19001_v24 }
 0x60e   :  { %v8608_v1 = vsel %vm128_vm0, %v18977_v49, 0.0 }
 0x60f   :  { %8609 = vadd.xlane.f32.xlu1 %v8608_v1  ;;  %v8605_v38 = vsel %vm128_vm0, %v18982_v58, 0.0  ;;  %v19030_v1 = vsub.f32 %v18718_v48, %v8626_v23  ;;  %v19037_v40 = vsub.f32 %v18801_v50, %v8629_v7  ;;  %v8723_v15 = vsel %vm128_vm0, %v8689_v17, 0.0 }
 0x610   :  { %8606 = vadd.xlane.f32.xlu0 %v8605_v38  ;;  %v8628_v38 = vmul.f32 0.03125, %v8541_v29 }
 0x614   :  { %v8556_v19 = vpop.xlane.xlu1 %8555 }
 0x615   :  { %v8553_v46 = vpop.xlane.xlu0 %8552  ;;  %v8633_v26 = vmul.f32 0.03125, %v8556_v19 }
 0x616   :  { %v8632_v29 = vmul.f32 0.03125, %v8553_v46 }
 0x61c   :  { %v8562_v50 = vpop.xlane.xlu1 %8561 }
 0x61d   :  { %v8635_v23 = vmul.f32 0.03125, %v8562_v50 }
 0x626   :  { %v12674_v57 = vpop.f32.mrb[60].mxu0 }
 0x627   :  { %v8482_v25 = vadd.f32 %v12674_v57, %v18673_v53  ;;  %v8476_v35 = vpop.f32.mrb[61].mxu0  ;;  %v8631_v57 = vmul.f32 0.03125, %v8550_v28 }
 0x628   :  { %v8477_v3 = vadd.f32 %v18673_v53, %v8476_v35  ;;  %v8630_v35 = vmul.f32 0.03125, %v8547_v39 }
 0x629   :  { %v18993_v18 = vadd.f32 %v13863_v11, %v8482_v25  ;;  %v19043_v25 = vsub.f32 %v18806_v52, %v8628_v38  ;;  %v19049_v11 = vsub.f32 %v18817_v47, %v8631_v57  ;;  %v8693_v52 = vmul.f32 %v19037_v40, %v19037_v40 }
 0x62a   :  { %v18998_v55 = vadd.f32 %v13864_v63, %v8477_v3  ;;  %v12677_v60 = vpop.f32.mrb[62].mxu0  ;;  %v8690_v3 = vmul.f32 %v19030_v1, %v19030_v1  ;;  %v8559_v63 = vpop.xlane.xlu0 %8558 }
 0x62b   :  { %v8492_v62 = vadd.f32 %v12677_v60, %v18673_v53  ;;  %v8486_v10 = vpop.f32.mrb[63].mxu0  ;;  %v8614_v59 = vsel %vm128_vm0, %v18993_v18, 0.0  ;;  %v8634_v28 = vmul.f32 0.03125, %v8559_v63 }
 0x62c   :  { %v8487_v36 = vadd.f32 %v18673_v53, %v8486_v10  ;;  %8615 = vadd.xlane.f32.xlu1 %v8614_v59  ;;  %v8611_v41 = vsel %vm128_vm0, %v18998_v55, 0.0  ;;  %v19023_v53 = vsub.f32 %v18713_v54, %v8627_v51  ;;  %v8688_v54 = vmul.f32 %v19007_v22, %v19007_v22 }
 0x62d   :  { %v19015_v2 = vadd.f32 %v13865_v44, %v8492_v62  ;;  %8612 = vadd.xlane.f32.xlu0 %v8611_v41  ;;  %v19055_v51 = vsub.f32 %v18822_v61, %v8630_v35  ;;  %v8726_v62 = vsel %vm128_vm0, %v8690_v3, 0.0  ;;  %v8692_v10 = vmul.f32 %v19043_v25, %v19043_v25 }
 0x62e   :  { %v19020_v43 = vadd.f32 %v13866_v21, %v8487_v36  ;;  %v8691_v48 = vmul.f32 %v19023_v53, %v19023_v53  ;;  %v8720_v56 = vsel %vm128_vm0, %v8688_v54, 0.0  ;;  %v19061_v59 = vsub.f32 %v18833_v13, %v8633_v26 }
 0x62f   :  { %v8620_v31 = vsel %vm128_vm0, %v19015_v2, 0.0  ;;  %v8735_v41 = vsel %vm128_vm0, %v8693_v52, 0.0  ;;  %v8695_v61 = vmul.f32 %v19049_v11, %v19049_v11  ;;  %v19067_v44 = vsub.f32 %v18838_v16, %v8632_v29 }
 0x630   :  { %8621 = vadd.xlane.f32.xlu1 %v8620_v31  ;;  %v8617_v4 = vsel %vm128_vm0, %v19020_v43, 0.0  ;;  %v8729_v60 = vsel %vm128_vm0, %v8691_v48, 0.0  ;;  %v8732_v21 = vsel %vm128_vm0, %v8692_v10, 0.0  ;;  %v8694_v7 = vmul.f32 %v19055_v51, %v19055_v51 }
 0x631   :  { %8618 = vadd.xlane.f32.xlu0 %v8617_v4  ;;  %v19073_v13 = vsub.f32 %v18849_v6, %v8635_v23  ;;  %v8741_v31 = vsel %vm128_vm0, %v8695_v61, 0.0  ;;  %v8697_v17 = vmul.f32 %v19061_v59, %v19061_v59  ;;  %v19079_v16 = vsub.f32 %v18854_v34, %v8634_v28  ;;  %v9019_v23 = vld [vmem:[%s20081_s2 + $0xe8] sm:$0xff]  ;;  %v9021_v61 = vld [vmem:[%s20081_s2 + $0xf8] sm:$0xff] }
 0x632   :  { %v8738_v54 = vsel %vm128_vm0, %v8694_v7, 0.0  ;;  %v8696_v19 = vmul.f32 %v19067_v44, %v19067_v44 }
 0x633   :  { %v8699_v34 = vmul.f32 %v19073_v13, %v19073_v13  ;;  %v8698_v3 = vmul.f32 %v19079_v16, %v19079_v16 }
 0x634   :  { %8724 = vadd.xlane.f32.xlu1 %v8723_v15  ;;  %v8747_v15 = vsel %vm128_vm0, %v8697_v17, 0.0 }
 0x635   :  { %8721 = vadd.xlane.f32.xlu0 %v8720_v56  ;;  %v8744_v56 = vsel %vm128_vm0, %v8696_v19, 0.0  ;;  %v8753_v50 = vsel %vm128_vm0, %v8699_v34, 0.0 }
 0x638   :  { %8730 = vadd.xlane.f32.xlu1 %v8729_v60  ;;  %v8568_v47 = vpop.xlane.xlu1 %8567 }
 0x639   :  { %8727 = vadd.xlane.f32.xlu0 %v8726_v62  ;;  %v8565_v36 = vpop.xlane.xlu0 %8564  ;;  %v8637_v39 = vmul.f32 0.03125, %v8568_v47  ;;  %v9018_v47 = vld [vmem:[%s20081_s2 + $0xe0] sm:$0xff] }
 0x63a   :  { %v8636_v38 = vmul.f32 0.03125, %v8565_v36  ;;  %v13110_v36 = vpack.c.bf16 %v9019_v23, %v9018_v47 }
 0x63b   :  { %v19085_v6 = vsub.f32 %v18865_v33, %v8637_v39 }
 0x63c   :  { %8736 = vadd.xlane.f32.xlu1 %v8735_v41  ;;  %v8574_v4 = vpop.xlane.xlu1 %8573  ;;  %v19091_v48 = vsub.f32 %v18870_v5, %v8636_v38  ;;  %v8750_v5 = vsel %vm128_vm0, %v8698_v3, 0.0  ;;  %13111 = vmatprep.subr.bf16.mxu1 %v13110_v36  ;;  %v9020_v41 = vld [vmem:[%s20081_s2 + $0xf0] sm:$0xff] }
 0x63d   :  { %8733 = vadd.xlane.f32.xlu0 %v8732_v21  ;;  %v8571_v57 = vpop.xlane.xlu0 %8570  ;;  %v8639_v46 = vmul.f32 0.03125, %v8574_v4  ;;  %v8701_v26 = vmul.f32 %v19085_v6, %v19085_v6  ;;  %13113 = vmatpush3.bf16.msra.mxu1 %v13110_v36  ;;  %v13114_v28 = vpack.c.bf16 %v9021_v61, %v9020_v41 }
 0x63e   :  { %v8638_v35 = vmul.f32 0.03125, %v8571_v57  ;;  %v8700_v60 = vmul.f32 %v19091_v48, %v19091_v48 }
 0x63f   :  { %v19097_v33 = vsub.f32 %v18881_v30, %v8639_v46  ;;  %v8759_v52 = vsel %vm128_vm0, %v8701_v26, 0.0  ;;  %13115 = vmatprep.subr.bf16.mxu1 %v13114_v28 }
 0x640   :  { %8742 = vadd.xlane.f32.xlu1 %v8741_v31  ;;  %v19103_v63 = vsub.f32 %v18886_v8, %v8638_v35  ;;  %v8756_v29 = vsel %vm128_vm0, %v8700_v60, 0.0 }
 0x641   :  { %8739 = vadd.xlane.f32.xlu0 %v8738_v54  ;;  %v8703_v30 = vmul.f32 %v19097_v33, %v19097_v33  ;;  %13117 = vmatpush3.bf16.msra.mxu1 %v13114_v28 }
 0x642   :  { %v8702_v62 = vmul.f32 %v19103_v63, %v19103_v63 }
 0x643   :  { %v8765_v8 = vsel %vm128_vm0, %v8703_v30, 0.0 }
 0x644   :  { %8748 = vadd.xlane.f32.xlu1 %v8747_v15  ;;  %v8762_v10 = vsel %vm128_vm0, %v8702_v62, 0.0 }
 0x645   :  { %8745 = vadd.xlane.f32.xlu0 %v8744_v56 }
 0x648   :  { %8754 = vadd.xlane.f32.xlu1 %v8753_v50 }
 0x649   :  { %8751 = vadd.xlane.f32.xlu0 %v8750_v5 }
 0x64c   :  { %8760 = vadd.xlane.f32.xlu1 %v8759_v52 }
 0x64d   :  { %8757 = vadd.xlane.f32.xlu0 %v8756_v29 }
 0x650   :  { %8766 = vadd.xlane.f32.xlu1 %v8765_v8 }
 0x651   :  { %8763 = vadd.xlane.f32.xlu0 %v8762_v10 }
 0x658   :  { %v8580_v21 = vpop.xlane.xlu1 %8579 }
 0x659   :  { %v8641_v7 = vmul.f32 0.03125, %v8580_v21  ;;  %v8577_v39 = vpop.xlane.xlu0 %8576 }
 0x65a   :  { %v8640_v31 = vmul.f32 0.03125, %v8577_v39 }
 0x65b   :  { %v19129_v17 = vsub.f32 %v18897_v0, %v8641_v7 }
 0x65c   :  { %v19132_v38 = vsub.f32 %v18902_v32, %v8640_v31  ;;  %v8586_v4 = vpop.xlane.xlu1 %8585 }
 0x65d   :  { %v8643_v54 = vmul.f32 0.03125, %v8586_v4  ;;  %v8583_v19 = vpop.xlane.xlu0 %8582  ;;  %v8705_v57 = vmul.f32 %v19129_v17, %v19129_v17 }
 0x65e   :  { %v8642_v46 = vmul.f32 0.03125, %v8583_v19  ;;  %v8704_v15 = vmul.f32 %v19132_v38, %v19132_v38 }
 0x65f   :  { %v19139_v34 = vsub.f32 %v18913_v27, %v8643_v54  ;;  %v8771_v35 = vsel %vm128_vm0, %v8705_v57, 0.0 }
 0x660   :  { %v19143_v0 = vsub.f32 %v18918_v12, %v8642_v46  ;;  %8772 = vadd.xlane.f32.xlu1 %v8771_v35  ;;  %v8768_v32 = vsel %vm128_vm0, %v8704_v15, 0.0 }
 0x661   :  { %8769 = vadd.xlane.f32.xlu0 %v8768_v32  ;;  %v8707_v56 = vmul.f32 %v19139_v34, %v19139_v34 }
 0x662   :  { %v8706_v3 = vmul.f32 %v19143_v0, %v19143_v0 }
 0x663   :  { %v8777_v50 = vsel %vm128_vm0, %v8707_v56, 0.0 }
 0x664   :  { %8778 = vadd.xlane.f32.xlu1 %v8777_v50  ;;  %v8774_v27 = vsel %vm128_vm0, %v8706_v3, 0.0 }
 0x665   :  { %8775 = vadd.xlane.f32.xlu0 %v8774_v27 }
 0x678   :  { %v8592_v26 = vpop.xlane.xlu1 %8591 }
 0x679   :  { %v8645_v5 = vmul.f32 0.03125, %v8592_v26  ;;  %v8589_v12 = vpop.xlane.xlu0 %8588 }
 0x67a   :  { %v8644_v60 = vmul.f32 0.03125, %v8589_v12 }
 0x67b   :  { %v19153_v52 = vsub.f32 %v18929_v9, %v8645_v5 }
 0x67c   :  { %v19156_v30 = vsub.f32 %v18934_v42, %v8644_v60  ;;  %v8598_v29 = vpop.xlane.xlu1 %8597 }
 0x67d   :  { %v8647_v62 = vmul.f32 0.03125, %v8598_v29  ;;  %v8595_v8 = vpop.xlane.xlu0 %8594  ;;  %v8709_v10 = vmul.f32 %v19153_v52, %v19153_v52 }
 0x67e   :  { %v8646_v47 = vmul.f32 0.03125, %v8595_v8  ;;  %v8708_v23 = vmul.f32 %v19156_v30, %v19156_v30 }
 0x67f   :  { %v19163_v36 = vsub.f32 %v18945_v37, %v8647_v62  ;;  %v8783_v41 = vsel %vm128_vm0, %v8709_v10, 0.0 }
 0x680   :  { %v19167_v9 = vsub.f32 %v18950_v14, %v8646_v47  ;;  %8784 = vadd.xlane.f32.xlu1 %v8783_v41  ;;  %v8780_v42 = vsel %vm128_vm0, %v8708_v23, 0.0 }
 0x681   :  { %8781 = vadd.xlane.f32.xlu0 %v8780_v42  ;;  %v8711_v61 = vmul.f32 %v19163_v36, %v19163_v36 }
 0x682   :  { %v8710_v28 = vmul.f32 %v19167_v9, %v19167_v9 }
 0x683   :  { %v8789_v21 = vsel %vm128_vm0, %v8711_v61, 0.0 }
 0x684   :  { %8790 = vadd.xlane.f32.xlu1 %v8789_v21  ;;  %v8786_v37 = vsel %vm128_vm0, %v8710_v28, 0.0 }
 0x685   :  { %8787 = vadd.xlane.f32.xlu0 %v8786_v37 }
 0x698   :  { %v8604_v7 = vpop.xlane.xlu1 %8603 }
 0x699   :  { %v8649_v39 = vmul.f32 0.03125, %v8604_v7  ;;  %v8601_v14 = vpop.xlane.xlu0 %8600 }
 0x69a   :  { %v8648_v31 = vmul.f32 0.03125, %v8601_v14 }
 0x69b   :  { %v19177_v4 = vsub.f32 %v18961_v45, %v8649_v39 }
 0x69c   :  { %v19180_v54 = vsub.f32 %v18966_v20, %v8648_v31  ;;  %v8610_v19 = vpop.xlane.xlu1 %8609 }
 0x69d   :  { %v8651_v57 = vmul.f32 0.03125, %v8610_v19  ;;  %v8607_v46 = vpop.xlane.xlu0 %8606  ;;  %v8713_v15 = vmul.f32 %v19177_v4, %v19177_v4 }
 0x69e   :  { %v8650_v35 = vmul.f32 0.03125, %v8607_v46  ;;  %v8712_v32 = vmul.f32 %v19180_v54, %v19180_v54 }
 0x69f   :  { %v19187_v56 = vsub.f32 %v18977_v49, %v8651_v57  ;;  %v8795_v3 = vsel %vm128_vm0, %v8713_v15, 0.0 }
 0x6a0   :  { %v19191_v45 = vsub.f32 %v18982_v58, %v8650_v35  ;;  %8796 = vadd.xlane.f32.xlu1 %v8795_v3  ;;  %v8792_v20 = vsel %vm128_vm0, %v8712_v32, 0.0 }
 0x6a1   :  { %8793 = vadd.xlane.f32.xlu0 %v8792_v20  ;;  %v8715_v50 = vmul.f32 %v19187_v56, %v19187_v56 }
 0x6a2   :  { %v8714_v27 = vmul.f32 %v19191_v45, %v19191_v45 }
 0x6a3   :  { %v8801_v26 = vsel %vm128_vm0, %v8715_v50, 0.0 }
 0x6a4   :  { %8802 = vadd.xlane.f32.xlu1 %v8801_v26  ;;  %v8798_v49 = vsel %vm128_vm0, %v8714_v27, 0.0 }
 0x6a5   :  { %8799 = vadd.xlane.f32.xlu0 %v8798_v49 }
 0x6b9   :  { %v8616_v5 = vpop.xlane.xlu1 %8615 }
 0x6ba   :  { %v8653_v12 = vmul.f32 0.03125, %v8616_v5  ;;  %v8613_v58 = vpop.xlane.xlu0 %8612 }
 0x6bb   :  { %v8652_v60 = vmul.f32 0.03125, %v8613_v58 }
 0x6bc   :  { %v19201_v29 = vsub.f32 %v18993_v18, %v8653_v12 }
 0x6bd   :  { %v19204_v62 = vsub.f32 %v18998_v55, %v8652_v60  ;;  %v8622_v8 = vpop.xlane.xlu1 %8621 }
 0x6be   :  { %v8655_v10 = vmul.f32 0.03125, %v8622_v8  ;;  %v8619_v47 = vpop.xlane.xlu0 %8618  ;;  %v8717_v23 = vmul.f32 %v19201_v29, %v19201_v29 }
 0x6bf   :  { %v8654_v41 = vmul.f32 0.03125, %v8619_v47  ;;  %v8716_v42 = vmul.f32 %v19204_v62, %v19204_v62 }
 0x6c0   :  { %v19211_v61 = vsub.f32 %v19015_v2, %v8655_v10  ;;  %v8807_v28 = vsel %vm128_vm0, %v8717_v23, 0.0  ;;  %v19227_v23 = vld [vmem:[%s20084_s3 + $0x7] ss:$0 sm:$0xff] }
 0x6c1   :  { %v19215_v18 = vsub.f32 %v19020_v43, %v8654_v41  ;;  %8808 = vadd.xlane.f32.xlu1 %v8807_v28  ;;  %v8725_v55 = vpop.xlane.xlu1 %8724  ;;  %v8804_v21 = vsel %vm128_vm0, %v8716_v42, 0.0 }
 0x6c2   :  { %v8817_v37 = vmul.f32 0.03125, %v8725_v55  ;;  %8805 = vadd.xlane.f32.xlu0 %v8804_v21  ;;  %v8722_v7 = vpop.xlane.xlu0 %8721  ;;  %v8719_v39 = vmul.f32 %v19211_v61, %v19211_v61 }
 0x6c3   :  { %v8816_v14 = vmul.f32 0.03125, %v8722_v7  ;;  %v8718_v2 = vmul.f32 %v19215_v18, %v19215_v18 }
 0x6c4   :  { %v8849_v31 = vadd.f32 1e-05, %v8817_v37  ;;  %v8813_v19 = vsel %vm128_vm0, %v8719_v39, 0.0 }
 0x6c5   :  { %v8848_v57 = vadd.f32 1e-05, %v8816_v14  ;;  %8814 = vadd.xlane.f32.xlu1 %v8813_v19  ;;  %v8731_v43 = vpop.xlane.xlu1 %8730  ;;  %v8810_v46 = vsel %vm128_vm0, %v8718_v2, 0.0  ;;  %v19234_v14 = vld [vmem:[%s20084_s3 + $0x8] ss:$0 sm:$0xff] }
 0x6c6   :  { %13630 = vrsqrt.f32 %v8849_v31  ;;  %v8819_v15 = vmul.f32 0.03125, %v8731_v43  ;;  %8811 = vadd.xlane.f32.xlu0 %v8810_v46  ;;  %v8728_v35 = vpop.xlane.xlu0 %8727 }
 0x6c7   :  { %13632 = vrsqrt.f32 %v8848_v57  ;;  %v8818_v32 = vmul.f32 0.03125, %v8728_v35 }
 0x6c8   :  { %v8851_v3 = vadd.f32 1e-05, %v8819_v15 }
 0x6c9   :  { %v8850_v20 = vadd.f32 1e-05, %v8818_v32  ;;  %v8737_v50 = vpop.xlane.xlu1 %8736 }
 0x6ca   :  { %13634 = vrsqrt.f32 %v8851_v3  ;;  %v8821_v27 = vmul.f32 0.03125, %v8737_v50  ;;  %v8734_v26 = vpop.xlane.xlu0 %8733 }
 0x6cb   :  { %13636 = vrsqrt.f32 %v8850_v20  ;;  %v8820_v49 = vmul.f32 0.03125, %v8734_v26 }
 0x6cc   :  { %v8853_v5 = vadd.f32 1e-05, %v8821_v27 }
 0x6cd   :  { %v8852_v12 = vadd.f32 1e-05, %v8820_v49  ;;  %v8743_v58 = vpop.xlane.xlu1 %8742 }
 0x6ce   :  { %13638 = vrsqrt.f32 %v8853_v5  ;;  %v8823_v60 = vmul.f32 0.03125, %v8743_v58  ;;  %v8740_v8 = vpop.xlane.xlu0 %8739 }
 0x6cf   :  { %13640 = vrsqrt.f32 %v8852_v12  ;;  %v8822_v10 = vmul.f32 0.03125, %v8740_v8 }
 0x6d0   :  { %v13631_v47 = vpop.eup %13630  ;;  %v8855_v41 = vadd.f32 1e-05, %v8823_v60 }
 0x6d1   :  { %v13633_v42 = vpop.eup %13632  ;;  %v8913_v28 = vmul.f32 %v13631_v47, %v19001_v24  ;;  %v8854_v55 = vadd.f32 1e-05, %v8822_v10  ;;  %v8749_v21 = vpop.xlane.xlu1 %8748 }
 0x6d2   :  { %13642 = vrsqrt.f32 %v8855_v41  ;;  %v8825_v37 = vmul.f32 0.03125, %v8749_v21  ;;  %v8746_v7 = vpop.xlane.xlu0 %8745  ;;  %v8912_v39 = vmul.f32 %v13633_v42, %v19007_v22 }
 0x6d3   :  { %v8950_v2 = vmul.f32 %v19227_v23, %v8913_v28  ;;  %13644 = vrsqrt.f32 %v8854_v55  ;;  %v8824_v31 = vmul.f32 0.03125, %v8746_v7 }
 0x6d4   :  { %v13635_v19 = vpop.eup %13634  ;;  %v8857_v57 = vadd.f32 1e-05, %v8825_v37  ;;  %v8949_v24 = vmul.f32 %v19227_v23, %v8912_v39 }
 0x6d5   :  { %v13637_v43 = vpop.eup %13636  ;;  %v8915_v46 = vmul.f32 %v13635_v19, %v19023_v53  ;;  %v8856_v15 = vadd.f32 1e-05, %v8824_v31  ;;  %v8755_v35 = vpop.xlane.xlu1 %8754  ;;  %v19244_v50 = vadd.f32 %v19234_v14, %v8950_v2 }
 0x6d6   :  { %13646 = vrsqrt.f32 %v8857_v57  ;;  %v8827_v22 = vmul.f32 0.03125, %v8755_v35  ;;  %v8752_v32 = vpop.xlane.xlu0 %8751  ;;  %v19240_v3 = vadd.f32 %v19234_v14, %v8949_v24  ;;  %v8914_v20 = vmul.f32 %v13637_v43, %v19030_v1 }
 0x6d7   :  { %v8952_v27 = vmul.f32 %v19227_v23, %v8915_v46  ;;  %13648 = vrsqrt.f32 %v8856_v15  ;;  %v8826_v26 = vmul.f32 0.03125, %v8752_v32 }
 0x6d8   :  { %v13639_v49 = vpop.eup %13638  ;;  %v8859_v5 = vadd.f32 1e-05, %v8827_v22  ;;  %12686 = vmatprep.mubr.msk.f32.mxu1 %vm128_vm0, %v19240_v3  ;;  %v8951_v53 = vmul.f32 %v19227_v23, %v8914_v20 }
 0x6d9   :  { %v13641_v12 = vpop.eup %13640  ;;  %v8917_v58 = vmul.f32 %v13639_v49, %v19037_v40  ;;  %v8858_v60 = vadd.f32 1e-05, %v8826_v26  ;;  %v8761_v8 = vpop.xlane.xlu1 %8760  ;;  %12687 = vmatmul.mubr.msk.f32.vlgmr.msra.gmra.mrb[32].mxu1 %vm128_vm0, %v19244_v50  ;;  %v19258_v42 = vadd.f32 %v19234_v14, %v8952_v27 }
 0x6da   :  { %13650 = vrsqrt.f32 %v8859_v5  ;;  %v8829_v1 = vmul.f32 0.03125, %v8761_v8  ;;  %v8758_v10 = vpop.xlane.xlu0 %8757  ;;  %v19254_v47 = vadd.f32 %v19234_v14, %v8951_v53  ;;  %v8916_v41 = vmul.f32 %v13641_v12, %v19043_v25 }
 0x6db   :  { %v8954_v28 = vmul.f32 %v19227_v23, %v8917_v58  ;;  %13652 = vrsqrt.f32 %v8858_v60  ;;  %v8828_v40 = vmul.f32 0.03125, %v8758_v10 }
 0x6dc   :  { %v13643_v55 = vpop.eup %13642  ;;  %v8861_v21 = vadd.f32 1e-05, %v8829_v1  ;;  %12689 = vmatprep.mubr.msk.f32.mxu1 %vm128_vm0, %v19254_v47  ;;  %v8953_v37 = vmul.f32 %v19227_v23, %v8916_v41 }
 0x6dd   :  { %v13645_v7 = vpop.eup %13644  ;;  %v8919_v39 = vmul.f32 %v13643_v55, %v19049_v11  ;;  %v8860_v2 = vadd.f32 1e-05, %v8828_v40  ;;  %v8767_v31 = vpop.xlane.xlu1 %8766  ;;  %12690 = vmatmul.mubr.msk.f32.gmra.mrb[34].mxu1 %vm128_vm0, %v19258_v42  ;;  %v19272_v43 = vadd.f32 %v19234_v14, %v8954_v28 }
 0x6de   :  { %13654 = vrsqrt.f32 %v8861_v21  ;;  %v8831_v25 = vmul.f32 0.03125, %v8767_v31  ;;  %v8764_v19 = vpop.xlane.xlu0 %8763  ;;  %v19268_v57 = vadd.f32 %v19234_v14, %v8953_v37  ;;  %v8918_v24 = vmul.f32 %v13645_v7, %v19055_v51 }
 0x6df   :  { %v8956_v46 = vmul.f32 %v19227_v23, %v8919_v39  ;;  %13656 = vrsqrt.f32 %v8860_v2  ;;  %v8830_v11 = vmul.f32 0.03125, %v8764_v19 }
 0x6e0   :  { %v13647_v15 = vpop.eup %13646  ;;  %v8863_v35 = vadd.f32 1e-05, %v8831_v25  ;;  %12692 = vmatprep.mubr.msk.f32.mxu1 %vm128_vm0, %v19268_v57  ;;  %v8955_v22 = vmul.f32 %v19227_v23, %v8918_v24 }
 0x6e1   :  { %v13649_v32 = vpop.eup %13648  ;;  %v8921_v20 = vmul.f32 %v13647_v15, %v19061_v59  ;;  %v8862_v27 = vadd.f32 1e-05, %v8830_v11  ;;  %12693 = vmatmul.mubr.msk.f32.gmra.mrb[36].mxu1 %vm128_vm0, %v19272_v43  ;;  %v19286_v49 = vadd.f32 %v19234_v14, %v8956_v46 }
 0x6e2   :  { %13658 = vrsqrt.f32 %v8863_v35  ;;  %v19282_v51 = vadd.f32 %v19234_v14, %v8955_v22  ;;  %v8920_v26 = vmul.f32 %v13649_v32, %v19067_v44 }
 0x6e3   :  { %v8958_v5 = vmul.f32 %v19227_v23, %v8921_v20  ;;  %13660 = vrsqrt.f32 %v8862_v27 }
 0x6e4   :  { %v13651_v53 = vpop.eup %13650  ;;  %12695 = vmatprep.mubr.msk.f32.mxu1 %vm128_vm0, %v19282_v51  ;;  %v8957_v59 = vmul.f32 %v19227_v23, %v8920_v26 }
 0x6e5   :  { %v13653_v12 = vpop.eup %13652  ;;  %v8923_v58 = vmul.f32 %v13651_v53, %v19073_v13  ;;  %12696 = vmatmul.mubr.msk.f32.gmra.mrb[38].mxu1 %vm128_vm0, %v19286_v49  ;;  %v19300_v8 = vadd.f32 %v19234_v14, %v8958_v5 }
 0x6e6   :  { %v19296_v44 = vadd.f32 %v19234_v14, %v8957_v59  ;;  %v8922_v60 = vmul.f32 %v13653_v12, %v19079_v16 }
 0x6e7   :  { %v8960_v1 = vmul.f32 %v19227_v23, %v8923_v58 }
 0x6e8   :  { %v13655_v10 = vpop.eup %13654  ;;  %12698 = vmatprep.mubr.msk.f32.mxu1 %vm128_vm0, %v19296_v44  ;;  %v8959_v41 = vmul.f32 %v19227_v23, %v8922_v60 }
 0x6e9   :  { %v13657_v13 = vpop.eup %13656  ;;  %v8925_v28 = vmul.f32 %v13655_v10, %v19085_v6  ;;  %12699 = vmatmul.mubr.msk.f32.gmra.mrb[40].mxu1 %vm128_vm0, %v19300_v8  ;;  %v19314_v55 = vadd.f32 %v19234_v14, %v8960_v1 }
 0x6ea   :  { %v19310_v40 = vadd.f32 %v19234_v14, %v8959_v41  ;;  %v8924_v16 = vmul.f32 %v13657_v13, %v19091_v48 }
 0x6eb   :  { %v8962_v21 = vmul.f32 %v19227_v23, %v8925_v28 }
 0x6ec   :  { %v13659_v37 = vpop.eup %13658  ;;  %12701 = vmatprep.mubr.msk.f32.mxu1 %vm128_vm0, %v19310_v40  ;;  %v8961_v7 = vmul.f32 %v19227_v23, %v8924_v16 }
 0x6ed   :  { %v13661_v6 = vpop.eup %13660  ;;  %v8927_v39 = vmul.f32 %v13659_v37, %v19097_v33  ;;  %12702 = vmatmul.mubr.msk.f32.gmra.mrb[42].mxu1 %vm128_vm0, %v19314_v55  ;;  %v8773_v2 = vpop.xlane.xlu1 %8772  ;;  %v19328_v25 = vadd.f32 %v19234_v14, %v8962_v21 }
 0x6ee   :  { %v19324_v48 = vadd.f32 %v19234_v14, %v8961_v7  ;;  %v8926_v31 = vmul.f32 %v13661_v6, %v19103_v63  ;;  %v8833_v24 = vmul.f32 0.03125, %v8773_v2  ;;  %v8770_v46 = vpop.xlane.xlu0 %8769 }
 0x6ef   :  { %v8964_v19 = vmul.f32 %v19227_v23, %v8927_v39  ;;  %v8832_v11 = vmul.f32 0.03125, %v8770_v46 }
 0x6f0   :  { %12704 = vmatprep.mubr.msk.f32.mxu1 %vm128_vm0, %v19324_v48  ;;  %v8963_v33 = vmul.f32 %v19227_v23, %v8926_v31  ;;  %v8865_v15 = vadd.f32 1e-05, %v8833_v24 }
 0x6f1   :  { %12705 = vmatmul.mubr.msk.f32.gmra.mrb[44].mxu1 %vm128_vm0, %v19328_v25  ;;  %v8864_v35 = vadd.f32 1e-05, %v8832_v11  ;;  %v8779_v22 = vpop.xlane.xlu1 %8778  ;;  %v19340_v32 = vadd.f32 %v19234_v14, %v8964_v19 }
 0x6f2   :  { %v19337_v63 = vadd.f32 %v19234_v14, %v8963_v33  ;;  %13662 = vrsqrt.f32 %v8865_v15  ;;  %v8835_v20 = vmul.f32 0.03125, %v8779_v22  ;;  %v8776_v27 = vpop.xlane.xlu0 %8775 }
 0x6f3   :  { %13664 = vrsqrt.f32 %v8864_v35  ;;  %v8834_v26 = vmul.f32 0.03125, %v8776_v27 }
 0x6f4   :  { %12707 = vmatprep.mubr.msk.f32.mxu1 %vm128_vm0, %v19337_v63  ;;  %v8867_v5 = vadd.f32 1e-05, %v8835_v20 }
 0x6f5   :  { %12708 = vmatmul.mubr.msk.f32.gmra.mrb[46].mxu1 %vm128_vm0, %v19340_v32  ;;  %v8866_v53 = vadd.f32 1e-05, %v8834_v26 }
 0x6f6   :  { %13666 = vrsqrt.f32 %v8867_v5 }
 0x6f7   :  { %13668 = vrsqrt.f32 %v8866_v53 }
 0x6fc   :  { %v13663_v59 = vpop.eup %13662 }
 0x6fd   :  { %v13665_v12 = vpop.eup %13664  ;;  %v8929_v58 = vmul.f32 %v13663_v59, %v19129_v17 }
 0x6fe   :  { %v8928_v60 = vmul.f32 %v13665_v12, %v19132_v38 }
 0x6ff   :  { %v8966_v1 = vmul.f32 %v19227_v23, %v8929_v58 }
 0x700   :  { %v13667_v10 = vpop.eup %13666  ;;  %v8965_v41 = vmul.f32 %v19227_v23, %v8928_v60 }
 0x701   :  { %v13669_v13 = vpop.eup %13668  ;;  %v8931_v28 = vmul.f32 %v13667_v10, %v19139_v34  ;;  %v19356_v37 = vadd.f32 %v19234_v14, %v8966_v1 }
 0x702   :  { %v19352_v16 = vadd.f32 %v19234_v14, %v8965_v41  ;;  %v8930_v21 = vmul.f32 %v13669_v13, %v19143_v0 }
 0x703   :  { %v8968_v17 = vmul.f32 %v19227_v23, %v8931_v28 }
 0x704   :  { %12710 = vmatprep.mubr.msk.f32.mxu1 %vm128_vm0, %v19352_v16  ;;  %v8967_v38 = vmul.f32 %v19227_v23, %v8930_v21 }
 0x705   :  { %12711 = vmatmul.mubr.msk.f32.gmra.mrb[48].mxu1 %vm128_vm0, %v19356_v37  ;;  %v19368_v7 = vadd.f32 %v19234_v14, %v8968_v17 }
 0x706   :  { %v19365_v34 = vadd.f32 %v19234_v14, %v8967_v38 }
 0x708   :  { %12713 = vmatprep.mubr.msk.f32.mxu1 %vm128_vm0, %v19365_v34 }
 0x709   :  { %12714 = vmatmul.mubr.msk.f32.gmra.mrb[50].mxu1 %vm128_vm0, %v19368_v7 }
 0x70d   :  { %v8785_v0 = vpop.xlane.xlu1 %8784 }
 0x70e   :  { %v8837_v6 = vmul.f32 0.03125, %v8785_v0  ;;  %v8782_v39 = vpop.xlane.xlu0 %8781 }
 0x70f   :  { %v8836_v2 = vmul.f32 0.03125, %v8782_v39 }
 0x710   :  { %v8869_v31 = vadd.f32 1e-05, %v8837_v6 }
 0x711   :  { %v8868_v19 = vadd.f32 1e-05, %v8836_v2  ;;  %v8791_v24 = vpop.xlane.xlu1 %8790 }
 0x712   :  { %13670 = vrsqrt.f32 %v8869_v31  ;;  %v8839_v46 = vmul.f32 0.03125, %v8791_v24  ;;  %v8788_v11 = vpop.xlane.xlu0 %8787 }
 0x713   :  { %13672 = vrsqrt.f32 %v8868_v19  ;;  %v8838_v33 = vmul.f32 0.03125, %v8788_v11 }
 0x714   :  { %v8871_v15 = vadd.f32 1e-05, %v8839_v46 }
 0x715   :  { %v8870_v35 = vadd.f32 1e-05, %v8838_v33 }
 0x716   :  { %13674 = vrsqrt.f32 %v8871_v15 }
 0x717   :  { %13676 = vrsqrt.f32 %v8870_v35 }
 0x71c   :  { %v13671_v22 = vpop.eup %13670 }
 0x71d   :  { %v13673_v20 = vpop.eup %13672  ;;  %v8933_v27 = vmul.f32 %v13671_v22, %v19153_v52 }
 0x71e   :  { %v8932_v26 = vmul.f32 %v13673_v20, %v19156_v30 }
 0x71f   :  { %v8970_v5 = vmul.f32 %v19227_v23, %v8933_v27 }
 0x720   :  { %v13675_v53 = vpop.eup %13674  ;;  %v8969_v59 = vmul.f32 %v19227_v23, %v8932_v26 }
 0x721   :  { %v13677_v12 = vpop.eup %13676  ;;  %v8935_v58 = vmul.f32 %v13675_v53, %v19163_v36  ;;  %v19384_v10 = vadd.f32 %v19234_v14, %v8970_v5 }
 0x722   :  { %v19380_v60 = vadd.f32 %v19234_v14, %v8969_v59  ;;  %v8934_v1 = vmul.f32 %v13677_v12, %v19167_v9 }
 0x723   :  { %v8972_v52 = vmul.f32 %v19227_v23, %v8935_v58 }
 0x724   :  { %12716 = vmatprep.mubr.msk.f32.mxu1 %vm128_vm0, %v19380_v60  ;;  %v8971_v30 = vmul.f32 %v19227_v23, %v8934_v1 }
 0x725   :  { %12717 = vmatmul.mubr.msk.f32.gmra.mrb[52].mxu1 %vm128_vm0, %v19384_v10  ;;  %v19396_v41 = vadd.f32 %v19234_v14, %v8972_v52 }
 0x726   :  { %v19393_v36 = vadd.f32 %v19234_v14, %v8971_v30 }
 0x728   :  { %12719 = vmatprep.mubr.msk.f32.mxu1 %vm128_vm0, %v19393_v36 }
 0x729   :  { %12720 = vmatmul.mubr.msk.f32.gmra.mrb[54].mxu1 %vm128_vm0, %v19396_v41 }
 0x72d   :  { %v8797_v9 = vpop.xlane.xlu1 %8796 }
 0x72e   :  { %v8841_v13 = vmul.f32 0.03125, %v8797_v9  ;;  %v8794_v28 = vpop.xlane.xlu0 %8793 }
 0x72f   :  { %v8840_v21 = vmul.f32 0.03125, %v8794_v28 }
 0x730   :  { %v8873_v17 = vadd.f32 1e-05, %v8841_v13 }
 0x731   :  { %v8872_v38 = vadd.f32 1e-05, %v8840_v21  ;;  %v8803_v0 = vpop.xlane.xlu1 %8802 }
 0x732   :  { %13678 = vrsqrt.f32 %v8873_v17  ;;  %v8843_v6 = vmul.f32 0.03125, %v8803_v0  ;;  %v8800_v39 = vpop.xlane.xlu0 %8799 }
 0x733   :  { %13680 = vrsqrt.f32 %v8872_v38  ;;  %v8842_v2 = vmul.f32 0.03125, %v8800_v39 }
 0x734   :  { %v8875_v31 = vadd.f32 1e-05, %v8843_v6 }
 0x735   :  { %v8874_v19 = vadd.f32 1e-05, %v8842_v2 }
 0x736   :  { %13682 = vrsqrt.f32 %v8875_v31 }
 0x737   :  { %13684 = vrsqrt.f32 %v8874_v19 }
 0x73c   :  { %v13679_v24 = vpop.eup %13678 }
 0x73d   :  { %v13681_v46 = vpop.eup %13680  ;;  %v8937_v11 = vmul.f32 %v13679_v24, %v19177_v4 }
 0x73e   :  { %v8936_v33 = vmul.f32 %v13681_v46, %v19180_v54 }
 0x73f   :  { %v8974_v15 = vmul.f32 %v19227_v23, %v8937_v11 }
 0x740   :  { %v13683_v35 = vpop.eup %13682  ;;  %v8973_v22 = vmul.f32 %v19227_v23, %v8936_v33 }
 0x741   :  { %v13685_v20 = vpop.eup %13684  ;;  %v8939_v27 = vmul.f32 %v13683_v35, %v19187_v56  ;;  %v19412_v53 = vadd.f32 %v19234_v14, %v8974_v15 }
 0x742   :  { %v19408_v26 = vadd.f32 %v19234_v14, %v8973_v22  ;;  %v8938_v5 = vmul.f32 %v13685_v20, %v19191_v45 }
 0x743   :  { %v8976_v4 = vmul.f32 %v19227_v23, %v8939_v27 }
 0x744   :  { %12722 = vmatprep.mubr.msk.f32.mxu1 %vm128_vm0, %v19408_v26  ;;  %v8975_v54 = vmul.f32 %v19227_v23, %v8938_v5 }
 0x745   :  { %12723 = vmatmul.mubr.msk.f32.gmra.mrb[56].mxu1 %vm128_vm0, %v19412_v53  ;;  %v19424_v59 = vadd.f32 %v19234_v14, %v8976_v4 }
 0x746   :  { %v19421_v56 = vadd.f32 %v19234_v14, %v8975_v54 }
 0x748   :  { %12725 = vmatprep.mubr.msk.f32.mxu1 %vm128_vm0, %v19421_v56 }
 0x749   :  { %12726 = vmatmul.mubr.msk.f32.gmra.mrb[58].mxu1 %vm128_vm0, %v19424_v59 }
 0x74e   :  { %v8809_v45 = vpop.xlane.xlu1 %8808 }
 0x74f   :  { %v8845_v12 = vmul.f32 0.03125, %v8809_v45  ;;  %v8806_v58 = vpop.xlane.xlu0 %8805 }
 0x750   :  { %v8844_v1 = vmul.f32 0.03125, %v8806_v58 }
 0x751   :  { %v8877_v52 = vadd.f32 1e-05, %v8845_v12 }
 0x752   :  { %v8876_v30 = vadd.f32 1e-05, %v8844_v1  ;;  %v8815_v9 = vpop.xlane.xlu1 %8814 }
 0x753   :  { %13686 = vrsqrt.f32 %v8877_v52  ;;  %v8847_v13 = vmul.f32 0.03125, %v8815_v9  ;;  %v8812_v28 = vpop.xlane.xlu0 %8811 }
 0x754   :  { %13688 = vrsqrt.f32 %v8876_v30  ;;  %v8846_v21 = vmul.f32 0.03125, %v8812_v28 }
 0x755   :  { %v8879_v17 = vadd.f32 1e-05, %v8847_v13 }
 0x756   :  { %v8878_v38 = vadd.f32 1e-05, %v8846_v21 }
 0x757   :  { %13690 = vrsqrt.f32 %v8879_v17 }
 0x758   :  { %13692 = vrsqrt.f32 %v8878_v38 }
 0x75d   :  { %v13687_v0 = vpop.eup %13686 }
 0x75e   :  { %v13689_v6 = vpop.eup %13688  ;;  %v8941_v39 = vmul.f32 %v13687_v0, %v19201_v29 }
 0x75f   :  { %v8940_v2 = vmul.f32 %v13689_v6, %v19204_v62 }
 0x760   :  { %v8978_v31 = vmul.f32 %v19227_v23, %v8941_v39 }
 0x761   :  { %v13691_v19 = vpop.eup %13690  ;;  %v8977_v24 = vmul.f32 %v19227_v23, %v8940_v2 }
 0x762   :  { %v13693_v46 = vpop.eup %13692  ;;  %v8943_v11 = vmul.f32 %v13691_v19, %v19211_v61  ;;  %v19440_v35 = vadd.f32 %v19234_v14, %v8978_v31 }
 0x763   :  { %v19436_v33 = vadd.f32 %v19234_v14, %v8977_v24  ;;  %v8942_v15 = vmul.f32 %v13693_v46, %v19215_v18  ;;  %v19461_v18 = vld [vmem:[%s20084_s3 + $0x9] ss:$0 sm:$0xff] }
 0x764   :  { %v8980_v29 = vmul.f32 %v19227_v23, %v8943_v11 }
 0x765   :  { %12728 = vmatprep.mubr.msk.f32.mxu1 %vm128_vm0, %v19436_v33  ;;  %v8979_v62 = vmul.f32 %v19227_v23, %v8942_v15 }
 0x766   :  { %12729 = vmatmul.mubr.msk.f32.gmra.mrb[60].mxu1 %vm128_vm0, %v19440_v35  ;;  %v19452_v22 = vadd.f32 %v19234_v14, %v8980_v29 }
 0x767   :  { %v19449_v61 = vadd.f32 %v19234_v14, %v8979_v62 }
 0x769   :  { %12731 = vmatprep.mubr.msk.f32.mxu1 %vm128_vm0, %v19449_v61 }
 0x76a   :  { %12732 = vmatmul.mubr.msk.f32.gmra.mrb[62].mxu1 %vm128_vm0, %v19452_v22 }
 0x7ac   :  { %v12688_v23 = vpop.f32.mrb[32].mxu1 }
 0x7ad   :  { %v9195_v20 = vadd.f32 %v12688_v23, %v19461_v18  ;;  %v9189_v27 = vpop.f32.mrb[33].mxu1 }
 0x7ae   :  { %v9190_v5 = vadd.f32 %v19461_v18, %v9189_v27 }
 0x7af   :  { %v9349_v4 = vmax.f32 %v9195_v20, 0.0 }
 0x7b0   :  { %v9348_v14 = vmax.f32 %v9190_v5, 0.0  ;;  %v12691_v54 = vpop.f32.mrb[34].mxu1 }
 0x7b1   :  { %v19466_v45 = vadd.f32 %v9349_v4, %v19244_v50  ;;  %v9205_v12 = vadd.f32 %v12691_v54, %v19461_v18  ;;  %v9199_v58 = vpop.f32.mrb[35].mxu1 }
 0x7b2   :  { %v19470_v1 = vadd.f32 %v9348_v14, %v19240_v3  ;;  %v9200_v52 = vadd.f32 %v19461_v18, %v9199_v58 }
 0x7b3   :  { %v9351_v30 = vmax.f32 %v9205_v12, 0.0  ;;  %v9415_v9 = vsel %vm128_vm0, %v19466_v45, 0.0 }
 0x7b4   :  { %v9350_v13 = vmax.f32 %v9200_v52, 0.0  ;;  %9416 = vadd.xlane.f32.xlu1 %v9415_v9  ;;  %v12694_v28 = vpop.f32.mrb[36].mxu1  ;;  %v9412_v21 = vsel %vm128_vm0, %v19470_v1, 0.0 }
 0x7b5   :  { %v19478_v50 = vadd.f32 %v9351_v30, %v19258_v42  ;;  %v9215_v17 = vadd.f32 %v12694_v28, %v19461_v18  ;;  %9413 = vadd.xlane.f32.xlu0 %v9412_v21  ;;  %v9209_v3 = vpop.f32.mrb[37].mxu1 }
 0x7b6   :  { %v19482_v38 = vadd.f32 %v9350_v13, %v19254_v47  ;;  %v9210_v0 = vadd.f32 %v19461_v18, %v9209_v3 }
 0x7b7   :  { %v9353_v6 = vmax.f32 %v9215_v17, 0.0  ;;  %v9421_v39 = vsel %vm128_vm0, %v19478_v50, 0.0 }
 0x7b8   :  { %v9352_v2 = vmax.f32 %v9210_v0, 0.0  ;;  %9422 = vadd.xlane.f32.xlu1 %v9421_v39  ;;  %v12697_v31 = vpop.f32.mrb[38].mxu1  ;;  %v9418_v42 = vsel %vm128_vm0, %v19482_v38, 0.0 }
 0x7b9   :  { %v19490_v19 = vadd.f32 %v9353_v6, %v19272_v43  ;;  %v9225_v24 = vadd.f32 %v12697_v31, %v19461_v18  ;;  %9419 = vadd.xlane.f32.xlu0 %v9418_v42  ;;  %v9219_v47 = vpop.f32.mrb[39].mxu1 }
 0x7ba   :  { %v19494_v46 = vadd.f32 %v9352_v2, %v19268_v57  ;;  %v9220_v11 = vadd.f32 %v19461_v18, %v9219_v47 }
 0x7bb   :  { %v9355_v15 = vmax.f32 %v9225_v24, 0.0  ;;  %v9427_v29 = vsel %vm128_vm0, %v19490_v19, 0.0 }
 0x7bc   :  { %v9354_v62 = vmax.f32 %v9220_v11, 0.0  ;;  %9428 = vadd.xlane.f32.xlu1 %v9427_v29  ;;  %v12700_v23 = vpop.f32.mrb[40].mxu1  ;;  %v9424_v43 = vsel %vm128_vm0, %v19494_v46, 0.0 }
 0x7bd   :  { %v19502_v20 = vadd.f32 %v9355_v15, %v19286_v49  ;;  %v9235_v27 = vadd.f32 %v12700_v23, %v19461_v18  ;;  %9425 = vadd.xlane.f32.xlu0 %v9424_v43  ;;  %v9229_v57 = vpop.f32.mrb[41].mxu1 }
 0x7be   :  { %v19506_v5 = vadd.f32 %v9354_v62, %v19282_v51  ;;  %v9230_v4 = vadd.f32 %v19461_v18, %v9229_v57 }
 0x7bf   :  { %v9357_v14 = vmax.f32 %v9235_v27, 0.0  ;;  %v9433_v54 = vsel %vm128_vm0, %v19502_v20, 0.0 }
 0x7c0   :  { %v9356_v12 = vmax.f32 %v9230_v4, 0.0  ;;  %9434 = vadd.xlane.f32.xlu1 %v9433_v54  ;;  %v12703_v58 = vpop.f32.mrb[42].mxu1  ;;  %v9430_v49 = vsel %vm128_vm0, %v19506_v5, 0.0 }
 0x7c1   :  { %v19514_v52 = vadd.f32 %v9357_v14, %v19300_v8  ;;  %v9245_v30 = vadd.f32 %v12703_v58, %v19461_v18  ;;  %9431 = vadd.xlane.f32.xlu0 %v9430_v49  ;;  %v9239_v51 = vpop.f32.mrb[43].mxu1 }
 0x7c2   :  { %v19518_v9 = vadd.f32 %v9356_v12, %v19296_v44  ;;  %v9240_v13 = vadd.f32 %v19461_v18, %v9239_v51 }
 0x7c3   :  { %v9359_v28 = vmax.f32 %v9245_v30, 0.0  ;;  %v9439_v21 = vsel %vm128_vm0, %v19514_v52, 0.0 }
 0x7c4   :  { %v9358_v17 = vmax.f32 %v9240_v13, 0.0  ;;  %9440 = vadd.xlane.f32.xlu1 %v9439_v21  ;;  %v12706_v3 = vpop.f32.mrb[44].mxu1  ;;  %v9436_v8 = vsel %vm128_vm0, %v19518_v9, 0.0 }
 0x7c5   :  { %v19526_v0 = vadd.f32 %v9359_v28, %v19314_v55  ;;  %v9255_v6 = vadd.f32 %v12706_v3, %v19461_v18  ;;  %9437 = vadd.xlane.f32.xlu0 %v9436_v8  ;;  %v9249_v44 = vpop.f32.mrb[45].mxu1 }
 0x7c6   :  { %v19530_v39 = vadd.f32 %v9358_v17, %v19310_v40  ;;  %v9250_v2 = vadd.f32 %v19461_v18, %v9249_v44 }
 0x7c7   :  { %v9361_v31 = vmax.f32 %v9255_v6, 0.0  ;;  %v9445_v42 = vsel %vm128_vm0, %v19526_v0, 0.0 }
 0x7c8   :  { %v9360_v24 = vmax.f32 %v9250_v2, 0.0  ;;  %9446 = vadd.xlane.f32.xlu1 %v9445_v42  ;;  %v12709_v47 = vpop.f32.mrb[46].mxu1  ;;  %v9442_v55 = vsel %vm128_vm0, %v19530_v39, 0.0 }
 0x7c9   :  { %v19538_v11 = vadd.f32 %v9361_v31, %v19328_v25  ;;  %v9265_v15 = vadd.f32 %v12709_v47, %v19461_v18  ;;  %9443 = vadd.xlane.f32.xlu0 %v9442_v55  ;;  %v9259_v40 = vpop.f32.mrb[47].mxu1 }
 0x7ca   :  { %v19542_v29 = vadd.f32 %v9360_v24, %v19324_v48  ;;  %v9260_v62 = vadd.f32 %v19461_v18, %v9259_v40 }
 0x7cb   :  { %v9363_v23 = vmax.f32 %v9265_v15, 0.0  ;;  %v9451_v43 = vsel %vm128_vm0, %v19538_v11, 0.0 }
 0x7cc   :  { %v9362_v27 = vmax.f32 %v9260_v62, 0.0  ;;  %9452 = vadd.xlane.f32.xlu1 %v9451_v43  ;;  %v9448_v57 = vsel %vm128_vm0, %v19542_v29, 0.0 }
 0x7cd   :  { %v19550_v25 = vadd.f32 %v9363_v23, %v19340_v32  ;;  %9449 = vadd.xlane.f32.xlu0 %v9448_v57 }
 0x7ce   :  { %v19553_v4 = vadd.f32 %v9362_v27, %v19337_v63 }
 0x7cf   :  { %v9457_v48 = vsel %vm128_vm0, %v19550_v25, 0.0 }
 0x7d0   :  { %9458 = vadd.xlane.f32.xlu1 %v9457_v48  ;;  %v9454_v14 = vsel %vm128_vm0, %v19553_v4, 0.0 }
 0x7d1   :  { %9455 = vadd.xlane.f32.xlu0 %v9454_v14 }
 0x7d8   :  { %v12712_v54 = vpop.f32.mrb[48].mxu1 }
 0x7d9   :  { %v9275_v12 = vadd.f32 %v12712_v54, %v19461_v18  ;;  %v9269_v58 = vpop.f32.mrb[49].mxu1 }
 0x7da   :  { %v9270_v49 = vadd.f32 %v19461_v18, %v9269_v58 }
 0x7db   :  { %v9365_v32 = vmax.f32 %v9275_v12, 0.0 }
 0x7dc   :  { %v9364_v30 = vmax.f32 %v9270_v49, 0.0  ;;  %v12715_v51 = vpop.f32.mrb[50].mxu1 }
 0x7dd   :  { %v19562_v63 = vadd.f32 %v9365_v32, %v19356_v37  ;;  %v9285_v13 = vadd.f32 %v12715_v51, %v19461_v18  ;;  %v9279_v28 = vpop.f32.mrb[51].mxu1 }
 0x7de   :  { %v19566_v21 = vadd.f32 %v9364_v30, %v19352_v16  ;;  %v9280_v17 = vadd.f32 %v19461_v18, %v9279_v28 }
 0x7df   :  { %v9367_v3 = vmax.f32 %v9285_v13, 0.0  ;;  %v9463_v8 = vsel %vm128_vm0, %v19562_v63, 0.0 }
 0x7e0   :  { %v9366_v6 = vmax.f32 %v9280_v17, 0.0  ;;  %9464 = vadd.xlane.f32.xlu1 %v9463_v8  ;;  %v9460_v44 = vsel %vm128_vm0, %v19566_v21, 0.0 }
 0x7e1   :  { %v19574_v37 = vadd.f32 %v9367_v3, %v19368_v7  ;;  %9461 = vadd.xlane.f32.xlu0 %v9460_v44 }
 0x7e2   :  { %v19577_v2 = vadd.f32 %v9366_v6, %v19365_v34 }
 0x7e3   :  { %v9469_v16 = vsel %vm128_vm0, %v19574_v37, 0.0 }
 0x7e4   :  { %9470 = vadd.xlane.f32.xlu1 %v9469_v16  ;;  %v9466_v31 = vsel %vm128_vm0, %v19577_v2, 0.0 }
 0x7e5   :  { %9467 = vadd.xlane.f32.xlu0 %v9466_v31 }
 0x7f8   :  { %v12718_v42 = vpop.f32.mrb[52].mxu1 }
 0x7f9   :  { %v9295_v24 = vadd.f32 %v12718_v42, %v19461_v18  ;;  %v9289_v47 = vpop.f32.mrb[53].mxu1 }
 0x7fa   :  { %v9290_v55 = vadd.f32 %v19461_v18, %v9289_v47 }
 0x7fb   :  { %v9369_v7 = vmax.f32 %v9295_v24, 0.0 }
 0x7fc   :  { %v9368_v15 = vmax.f32 %v9290_v55, 0.0  ;;  %v12721_v40 = vpop.f32.mrb[54].mxu1 }
 0x7fd   :  { %v19586_v34 = vadd.f32 %v9369_v7, %v19384_v10  ;;  %v9305_v62 = vadd.f32 %v12721_v40, %v19461_v18  ;;  %v9299_v23 = vpop.f32.mrb[55].mxu1 }
 0x7fe   :  { %v19590_v43 = vadd.f32 %v9368_v15, %v19380_v60  ;;  %v9300_v27 = vadd.f32 %v19461_v18, %v9299_v23 }
 0x7ff   :  { %v9371_v57 = vmax.f32 %v9305_v62, 0.0  ;;  %v9475_v48 = vsel %vm128_vm0, %v19586_v34, 0.0 }
 0x800   :  { %v9370_v14 = vmax.f32 %v9300_v27, 0.0  ;;  %9476 = vadd.xlane.f32.xlu1 %v9475_v48  ;;  %v9472_v54 = vsel %vm128_vm0, %v19590_v43, 0.0 }
 0x801   :  { %v19598_v10 = vadd.f32 %v9371_v57, %v19396_v41  ;;  %9473 = vadd.xlane.f32.xlu0 %v9472_v54 }
 0x802   :  { %v19601_v12 = vadd.f32 %v9370_v14, %v19393_v36 }
 0x803   :  { %v9481_v60 = vsel %vm128_vm0, %v19598_v10, 0.0 }
 0x804   :  { %9482 = vadd.xlane.f32.xlu1 %v9481_v60  ;;  %v9478_v58 = vsel %vm128_vm0, %v19601_v12, 0.0 }
 0x805   :  { %9479 = vadd.xlane.f32.xlu0 %v9478_v58 }
 0x818   :  { %v12724_v49 = vpop.f32.mrb[56].mxu1 }
 0x819   :  { %v9315_v32 = vadd.f32 %v12724_v49, %v19461_v18  ;;  %v9309_v30 = vpop.f32.mrb[57].mxu1 }
 0x81a   :  { %v9310_v51 = vadd.f32 %v19461_v18, %v9309_v30 }
 0x81b   :  { %v9373_v41 = vmax.f32 %v9315_v32, 0.0 }
 0x81c   :  { %v9372_v13 = vmax.f32 %v9310_v51, 0.0  ;;  %v12727_v28 = vpop.f32.mrb[58].mxu1 }
 0x81d   :  { %v19610_v36 = vadd.f32 %v9373_v41, %v19412_v53  ;;  %v9325_v17 = vadd.f32 %v12727_v28, %v19461_v18  ;;  %v9319_v3 = vpop.f32.mrb[59].mxu1 }
 0x81e   :  { %v19614_v8 = vadd.f32 %v9372_v13, %v19408_v26  ;;  %v9320_v6 = vadd.f32 %v19461_v18, %v9319_v3 }
 0x81f   :  { %v9375_v44 = vmax.f32 %v9325_v17, 0.0  ;;  %v9487_v16 = vsel %vm128_vm0, %v19610_v36, 0.0 }
 0x820   :  { %v9374_v31 = vmax.f32 %v9320_v6, 0.0  ;;  %9488 = vadd.xlane.f32.xlu1 %v9487_v16  ;;  %v9484_v42 = vsel %vm128_vm0, %v19614_v8, 0.0 }
 0x821   :  { %v19622_v53 = vadd.f32 %v9375_v44, %v19424_v59  ;;  %9485 = vadd.xlane.f32.xlu0 %v9484_v42 }
 0x822   :  { %v19625_v24 = vadd.f32 %v9374_v31, %v19421_v56 }
 0x823   :  { %v9493_v26 = vsel %vm128_vm0, %v19622_v53, 0.0 }
 0x824   :  { %9494 = vadd.xlane.f32.xlu1 %v9493_v26  ;;  %v9490_v47 = vsel %vm128_vm0, %v19625_v24, 0.0 }
 0x825   :  { %9491 = vadd.xlane.f32.xlu0 %v9490_v47 }
 0x839   :  { %v12730_v55 = vpop.f32.mrb[60].mxu1 }
 0x83a   :  { %v9335_v7 = vadd.f32 %v12730_v55, %v19461_v18  ;;  %v9329_v15 = vpop.f32.mrb[61].mxu1 }
 0x83b   :  { %v9330_v40 = vadd.f32 %v19461_v18, %v9329_v15 }
 0x83c   :  { %v9377_v59 = vmax.f32 %v9335_v7, 0.0 }
 0x83d   :  { %v9376_v62 = vmax.f32 %v9330_v40, 0.0  ;;  %v12733_v23 = vpop.f32.mrb[62].mxu1 }
 0x83e   :  { %v19634_v56 = vadd.f32 %v9377_v59, %v19440_v35  ;;  %v9345_v27 = vadd.f32 %v12733_v23, %v19461_v18  ;;  %v9339_v57 = vpop.f32.mrb[63].mxu1 }
 0x83f   :  { %v19638_v48 = vadd.f32 %v9376_v62, %v19436_v33  ;;  %v9340_v14 = vadd.f32 %v19461_v18, %v9339_v57 }
 0x840   :  { %v9379_v54 = vmax.f32 %v9345_v27, 0.0  ;;  %v9499_v60 = vsel %vm128_vm0, %v19634_v56, 0.0 }
 0x841   :  { %v9378_v58 = vmax.f32 %v9340_v14, 0.0  ;;  %v9417_v49 = vpop.xlane.xlu1 %9416  ;;  %9500 = vadd.xlane.f32.xlu1 %v9499_v60  ;;  %v9496_v32 = vsel %vm128_vm0, %v19638_v48, 0.0 }
 0x842   :  { %v19646_v35 = vadd.f32 %v9379_v54, %v19452_v22  ;;  %v9509_v30 = vmul.f32 0.03125, %v9417_v49  ;;  %9497 = vadd.xlane.f32.xlu0 %v9496_v32  ;;  %v9414_v51 = vpop.xlane.xlu0 %9413 }
 0x843   :  { %v19649_v33 = vadd.f32 %v9378_v58, %v19449_v61  ;;  %v9508_v18 = vmul.f32 0.03125, %v9414_v51 }
 0x844   :  { %v19652_v41 = vsub.f32 %v19466_v45, %v9509_v30  ;;  %v9505_v13 = vsel %vm128_vm0, %v19646_v35, 0.0 }
 0x845   :  { %v19657_v28 = vsub.f32 %v19470_v1, %v9508_v18  ;;  %v9423_v17 = vpop.xlane.xlu1 %9422  ;;  %9506 = vadd.xlane.f32.xlu1 %v9505_v13  ;;  %v9502_v22 = vsel %vm128_vm0, %v19649_v33, 0.0 }
 0x846   :  { %v9511_v3 = vmul.f32 0.03125, %v9423_v17  ;;  %9503 = vadd.xlane.f32.xlu0 %v9502_v22  ;;  %v9420_v6 = vpop.xlane.xlu0 %9419  ;;  %v9573_v61 = vmul.f32 %v19652_v41, %v19652_v41 }
 0x847   :  { %v9510_v44 = vmul.f32 0.03125, %v9420_v6  ;;  %v9572_v45 = vmul.f32 %v19657_v28, %v19657_v28 }
 0x848   :  { %v19666_v16 = vsub.f32 %v19478_v50, %v9511_v3  ;;  %v9607_v1 = vsel %vm128_vm0, %v9573_v61, 0.0 }
 0x849   :  { %v19670_v31 = vsub.f32 %v19482_v38, %v9510_v44  ;;  %v9429_v42 = vpop.xlane.xlu1 %9428  ;;  %9608 = vadd.xlane.f32.xlu1 %v9607_v1  ;;  %v9604_v26 = vsel %vm128_vm0, %v9572_v45, 0.0 }
 0x84a   :  { %v9513_v47 = vmul.f32 0.03125, %v9429_v42  ;;  %9605 = vadd.xlane.f32.xlu0 %v9604_v26  ;;  %v9426_v55 = vpop.xlane.xlu0 %9425  ;;  %v9575_v7 = vmul.f32 %v19666_v16, %v19666_v16 }
 0x84b   :  { %v9512_v15 = vmul.f32 0.03125, %v9426_v55  ;;  %v9574_v50 = vmul.f32 %v19670_v31, %v19670_v31 }
 0x84c   :  { %v19678_v40 = vsub.f32 %v19490_v19, %v9513_v47  ;;  %v9613_v38 = vsel %vm128_vm0, %v9575_v7, 0.0 }
 0x84d   :  { %v19682_v59 = vsub.f32 %v19494_v46, %v9512_v15  ;;  %v9435_v62 = vpop.xlane.xlu1 %9434  ;;  %9614 = vadd.xlane.f32.xlu1 %v9613_v38  ;;  %v9610_v23 = vsel %vm128_vm0, %v9574_v50, 0.0 }
 0x84e   :  { %v9515_v27 = vmul.f32 0.03125, %v9435_v62  ;;  %9611 = vadd.xlane.f32.xlu0 %v9610_v23  ;;  %v9432_v57 = vpop.xlane.xlu0 %9431  ;;  %v9577_v14 = vmul.f32 %v19678_v40, %v19678_v40 }
 0x84f   :  { %v9514_v54 = vmul.f32 0.03125, %v9432_v57  ;;  %v9576_v19 = vmul.f32 %v19682_v59, %v19682_v59 }
 0x850   :  { %v19690_v60 = vsub.f32 %v19502_v20, %v9515_v27  ;;  %v9619_v46 = vsel %vm128_vm0, %v9577_v14, 0.0 }
 0x851   :  { %v19694_v58 = vsub.f32 %v19506_v5, %v9514_v54  ;;  %v9441_v49 = vpop.xlane.xlu1 %9440  ;;  %9620 = vadd.xlane.f32.xlu1 %v9619_v46  ;;  %v9616_v32 = vsel %vm128_vm0, %v9576_v19, 0.0 }
 0x852   :  { %v9517_v30 = vmul.f32 0.03125, %v9441_v49  ;;  %9617 = vadd.xlane.f32.xlu0 %v9616_v32  ;;  %v9438_v51 = vpop.xlane.xlu0 %9437  ;;  %v9579_v18 = vmul.f32 %v19690_v60, %v19690_v60 }
 0x853   :  { %v9516_v13 = vmul.f32 0.03125, %v9438_v51  ;;  %v9578_v20 = vmul.f32 %v19694_v58, %v19694_v58 }
 0x854   :  { %v19702_v17 = vsub.f32 %v19514_v52, %v9517_v30  ;;  %v9625_v5 = vsel %vm128_vm0, %v9579_v18, 0.0 }
 0x855   :  { %v19706_v22 = vsub.f32 %v19518_v9, %v9516_v13  ;;  %v9447_v3 = vpop.xlane.xlu1 %9446  ;;  %9626 = vadd.xlane.f32.xlu1 %v9625_v5  ;;  %v9622_v6 = vsel %vm128_vm0, %v9578_v20, 0.0 }
 0x856   :  { %v9519_v61 = vmul.f32 0.03125, %v9447_v3  ;;  %9623 = vadd.xlane.f32.xlu0 %v9622_v6  ;;  %v9444_v44 = vpop.xlane.xlu0 %9443  ;;  %v9581_v45 = vmul.f32 %v19702_v17, %v19702_v17 }
 0x857   :  { %v9518_v1 = vmul.f32 0.03125, %v9444_v44  ;;  %v9580_v52 = vmul.f32 %v19706_v22, %v19706_v22 }
 0x858   :  { %v19714_v42 = vsub.f32 %v19526_v0, %v9519_v61  ;;  %v9631_v9 = vsel %vm128_vm0, %v9581_v45, 0.0 }
 0x859   :  { %v19718_v26 = vsub.f32 %v19530_v39, %v9518_v1  ;;  %v9453_v47 = vpop.xlane.xlu1 %9452  ;;  %9632 = vadd.xlane.f32.xlu1 %v9631_v9  ;;  %v9628_v55 = vsel %vm128_vm0, %v9580_v52, 0.0 }
 0x85a   :  { %v9521_v7 = vmul.f32 0.03125, %v9453_v47  ;;  %9629 = vadd.xlane.f32.xlu0 %v9628_v55  ;;  %v9450_v15 = vpop.xlane.xlu0 %9449  ;;  %v9583_v50 = vmul.f32 %v19714_v42, %v19714_v42 }
 0x85b   :  { %v9520_v38 = vmul.f32 0.03125, %v9450_v15  ;;  %v9582_v0 = vmul.f32 %v19718_v26, %v19718_v26 }
 0x85c   :  { %v19726_v62 = vsub.f32 %v19538_v11, %v9521_v7  ;;  %v9637_v39 = vsel %vm128_vm0, %v9583_v50, 0.0 }
 0x85d   :  { %v19730_v23 = vsub.f32 %v19542_v29, %v9520_v38  ;;  %v9459_v27 = vpop.xlane.xlu1 %9458  ;;  %9638 = vadd.xlane.f32.xlu1 %v9637_v39  ;;  %v9634_v57 = vsel %vm128_vm0, %v9582_v0, 0.0 }
 0x85e   :  { %v9523_v14 = vmul.f32 0.03125, %v9459_v27  ;;  %9635 = vadd.xlane.f32.xlu0 %v9634_v57  ;;  %v9456_v54 = vpop.xlane.xlu0 %9455  ;;  %v9585_v19 = vmul.f32 %v19726_v62, %v19726_v62 }
 0x85f   :  { %v9522_v46 = vmul.f32 0.03125, %v9456_v54  ;;  %v9584_v11 = vmul.f32 %v19730_v23, %v19730_v23 }
 0x860   :  { %v19738_v49 = vsub.f32 %v19550_v25, %v9523_v14  ;;  %v9643_v29 = vsel %vm128_vm0, %v9585_v19, 0.0 }
 0x861   :  { %v19742_v32 = vsub.f32 %v19553_v4, %v9522_v46  ;;  %9644 = vadd.xlane.f32.xlu1 %v9643_v29  ;;  %v9640_v30 = vsel %vm128_vm0, %v9584_v11, 0.0 }
 0x862   :  { %9641 = vadd.xlane.f32.xlu0 %v9640_v30  ;;  %v9587_v51 = vmul.f32 %v19738_v49, %v19738_v49 }
 0x863   :  { %v9586_v18 = vmul.f32 %v19742_v32, %v19742_v32 }
 0x864   :  { %v9649_v13 = vsel %vm128_vm0, %v9587_v51, 0.0 }
 0x865   :  { %9650 = vadd.xlane.f32.xlu1 %v9649_v13  ;;  %v9646_v25 = vsel %vm128_vm0, %v9586_v18, 0.0 }
 0x866   :  { %9647 = vadd.xlane.f32.xlu0 %v9646_v25 }
 0x86d   :  { %v9465_v20 = vpop.xlane.xlu1 %9464 }
 0x86e   :  { %v9525_v5 = vmul.f32 0.03125, %v9465_v20  ;;  %v9462_v4 = vpop.xlane.xlu0 %9461 }
 0x86f   :  { %v9524_v3 = vmul.f32 0.03125, %v9462_v4 }
 0x870   :  { %v19752_v6 = vsub.f32 %v19562_v63, %v9525_v5 }
 0x871   :  { %v19755_v61 = vsub.f32 %v19566_v21, %v9524_v3  ;;  %v9471_v44 = vpop.xlane.xlu1 %9470 }
 0x872   :  { %v9527_v45 = vmul.f32 0.03125, %v9471_v44  ;;  %v9468_v1 = vpop.xlane.xlu0 %9467  ;;  %v9589_v52 = vmul.f32 %v19752_v6, %v19752_v6 }
 0x873   :  { %v9526_v9 = vmul.f32 0.03125, %v9468_v1  ;;  %v9588_v47 = vmul.f32 %v19755_v61, %v19755_v61 }
 0x874   :  { %v19762_v55 = vsub.f32 %v19574_v37, %v9527_v45  ;;  %v9655_v7 = vsel %vm128_vm0, %v9589_v52, 0.0 }
 0x875   :  { %v19766_v63 = vsub.f32 %v19577_v2, %v9526_v9  ;;  %9656 = vadd.xlane.f32.xlu1 %v9655_v7  ;;  %v9652_v21 = vsel %vm128_vm0, %v9588_v47, 0.0 }
 0x876   :  { %9653 = vadd.xlane.f32.xlu0 %v9652_v21  ;;  %v9591_v15 = vmul.f32 %v19762_v55, %v19762_v55 }
 0x877   :  { %v9590_v50 = vmul.f32 %v19766_v63, %v19766_v63 }
 0x878   :  { %v9661_v38 = vsel %vm128_vm0, %v9591_v15, 0.0 }
 0x879   :  { %9662 = vadd.xlane.f32.xlu1 %v9661_v38  ;;  %v9658_v37 = vsel %vm128_vm0, %v9590_v50, 0.0 }
 0x87a   :  { %9659 = vadd.xlane.f32.xlu0 %v9658_v37 }
 0x88d   :  { %v9477_v0 = vpop.xlane.xlu1 %9476 }
 0x88e   :  { %v9529_v39 = vmul.f32 0.03125, %v9477_v0  ;;  %v9474_v2 = vpop.xlane.xlu0 %9473 }
 0x88f   :  { %v9528_v27 = vmul.f32 0.03125, %v9474_v2 }
 0x890   :  { %v19776_v57 = vsub.f32 %v19586_v34, %v9529_v39 }
 0x891   :  { %v19779_v14 = vsub.f32 %v19590_v43, %v9528_v27  ;;  %v9483_v54 = vpop.xlane.xlu1 %9482 }
 0x892   :  { %v9531_v19 = vmul.f32 0.03125, %v9483_v54  ;;  %v9480_v46 = vpop.xlane.xlu0 %9479  ;;  %v9593_v11 = vmul.f32 %v19776_v57, %v19776_v57 }
 0x893   :  { %v9530_v29 = vmul.f32 0.03125, %v9480_v46  ;;  %v9592_v30 = vmul.f32 %v19779_v14, %v19779_v14 }
 0x894   :  { %v19786_v51 = vsub.f32 %v19598_v10, %v9531_v19  ;;  %v9667_v18 = vsel %vm128_vm0, %v9593_v11, 0.0 }
 0x895   :  { %v19790_v34 = vsub.f32 %v19601_v12, %v9530_v29  ;;  %9668 = vadd.xlane.f32.xlu1 %v9667_v18  ;;  %v9664_v43 = vsel %vm128_vm0, %v9592_v30, 0.0 }
 0x896   :  { %9665 = vadd.xlane.f32.xlu0 %v9664_v43  ;;  %v9595_v13 = vmul.f32 %v19786_v51, %v19786_v51 }
 0x897   :  { %v9594_v25 = vmul.f32 %v19790_v34, %v19790_v34 }
 0x898   :  { %v9673_v20 = vsel %vm128_vm0, %v9595_v13, 0.0 }
 0x899   :  { %9674 = vadd.xlane.f32.xlu1 %v9673_v20  ;;  %v9670_v10 = vsel %vm128_vm0, %v9594_v25, 0.0 }
 0x89a   :  { %9671 = vadd.xlane.f32.xlu0 %v9670_v10 }
 0x8ad   :  { %v9489_v5 = vpop.xlane.xlu1 %9488 }
 0x8ae   :  { %v9533_v4 = vmul.f32 0.03125, %v9489_v5  ;;  %v9486_v12 = vpop.xlane.xlu0 %9485 }
 0x8af   :  { %v9532_v3 = vmul.f32 0.03125, %v9486_v12 }
 0x8b0   :  { %v19800_v44 = vsub.f32 %v19610_v36, %v9533_v4 }
 0x8b1   :  { %v19803_v45 = vsub.f32 %v19614_v8, %v9532_v3  ;;  %v9495_v1 = vpop.xlane.xlu1 %9494 }
 0x8b2   :  { %v9535_v52 = vmul.f32 0.03125, %v9495_v1  ;;  %v9492_v9 = vpop.xlane.xlu0 %9491  ;;  %v9597_v47 = vmul.f32 %v19800_v44, %v19800_v44 }
 0x8b3   :  { %v9534_v7 = vmul.f32 0.03125, %v9492_v9  ;;  %v9596_v21 = vmul.f32 %v19803_v45, %v19803_v45 }
 0x8b4   :  { %v19810_v15 = vsub.f32 %v19622_v53, %v9535_v52  ;;  %v9679_v50 = vsel %vm128_vm0, %v9597_v47, 0.0 }
 0x8b5   :  { %v19814_v36 = vsub.f32 %v19625_v24, %v9534_v7  ;;  %9680 = vadd.xlane.f32.xlu1 %v9679_v50  ;;  %v9676_v8 = vsel %vm128_vm0, %v9596_v21, 0.0 }
 0x8b6   :  { %9677 = vadd.xlane.f32.xlu0 %v9676_v8  ;;  %v9599_v38 = vmul.f32 %v19810_v15, %v19810_v15 }
 0x8b7   :  { %v9598_v37 = vmul.f32 %v19814_v36, %v19814_v36 }
 0x8b8   :  { %v9685_v0 = vsel %vm128_vm0, %v9599_v38, 0.0 }
 0x8b9   :  { %9686 = vadd.xlane.f32.xlu1 %v9685_v0  ;;  %v9682_v53 = vsel %vm128_vm0, %v9598_v37, 0.0 }
 0x8ba   :  { %9683 = vadd.xlane.f32.xlu0 %v9682_v53 }
 0x8ce   :  { %v9501_v39 = vpop.xlane.xlu1 %9500 }
 0x8cf   :  { %v9537_v2 = vmul.f32 0.03125, %v9501_v39  ;;  %v9498_v24 = vpop.xlane.xlu0 %9497 }
 0x8d0   :  { %v9536_v27 = vmul.f32 0.03125, %v9498_v24 }
 0x8d1   :  { %v19824_v54 = vsub.f32 %v19634_v56, %v9537_v2 }
 0x8d2   :  { %v19827_v19 = vsub.f32 %v19638_v48, %v9536_v27  ;;  %v9507_v46 = vpop.xlane.xlu1 %9506 }
 0x8d3   :  { %v9539_v11 = vmul.f32 0.03125, %v9507_v46  ;;  %v9504_v29 = vpop.xlane.xlu0 %9503  ;;  %v9601_v30 = vmul.f32 %v19824_v54, %v19824_v54 }
 0x8d4   :  { %v9538_v18 = vmul.f32 0.03125, %v9504_v29  ;;  %v9600_v43 = vmul.f32 %v19827_v19, %v19827_v19 }
 0x8d5   :  { %v19834_v13 = vsub.f32 %v19646_v35, %v9539_v11  ;;  %v9691_v25 = vsel %vm128_vm0, %v9601_v30, 0.0  ;;  %v19850_v30 = vld [vmem:[%s20084_s3 + $0xa] ss:$0 sm:$0xff] }
 0x8d6   :  { %v19838_v56 = vsub.f32 %v19649_v33, %v9538_v18  ;;  %9692 = vadd.xlane.f32.xlu1 %v9691_v25  ;;  %v9609_v48 = vpop.xlane.xlu1 %9608  ;;  %v9688_v20 = vsel %vm128_vm0, %v9600_v43, 0.0 }
 0x8d7   :  { %v9701_v10 = vmul.f32 0.03125, %v9609_v48  ;;  %9689 = vadd.xlane.f32.xlu0 %v9688_v20  ;;  %v9606_v5 = vpop.xlane.xlu0 %9605  ;;  %v9603_v4 = vmul.f32 %v19834_v13, %v19834_v13 }
 0x8d8   :  { %v9700_v12 = vmul.f32 0.03125, %v9606_v5  ;;  %v9602_v35 = vmul.f32 %v19838_v56, %v19838_v56 }
 0x8d9   :  { %v9733_v3 = vadd.f32 1e-05, %v9701_v10  ;;  %v9697_v1 = vsel %vm128_vm0, %v9603_v4, 0.0  ;;  %v19856_v10 = vld [vmem:[%s20084_s3 + $0xb] ss:$0 sm:$0xff] }
 0x8da   :  { %v9732_v52 = vadd.f32 1e-05, %v9700_v12  ;;  %9698 = vadd.xlane.f32.xlu1 %v9697_v1  ;;  %v9615_v33 = vpop.xlane.xlu1 %9614  ;;  %v9694_v9 = vsel %vm128_vm0, %v9602_v35, 0.0 }
 0x8db   :  { %13694 = vrsqrt.f32 %v9733_v3  ;;  %v9703_v47 = vmul.f32 0.03125, %v9615_v33  ;;  %9695 = vadd.xlane.f32.xlu0 %v9694_v9  ;;  %v9612_v7 = vpop.xlane.xlu0 %9611 }
 0x8dc   :  { %13696 = vrsqrt.f32 %v9732_v52  ;;  %v9702_v21 = vmul.f32 0.03125, %v9612_v7 }
 0x8dd   :  { %v9735_v50 = vadd.f32 1e-05, %v9703_v47 }
 0x8de   :  { %v9734_v8 = vadd.f32 1e-05, %v9702_v21  ;;  %v9621_v38 = vpop.xlane.xlu1 %9620 }
 0x8df   :  { %13698 = vrsqrt.f32 %v9735_v50  ;;  %v9705_v37 = vmul.f32 0.03125, %v9621_v38  ;;  %v9618_v0 = vpop.xlane.xlu0 %9617 }
 0x8e0   :  { %13700 = vrsqrt.f32 %v9734_v8  ;;  %v9704_v53 = vmul.f32 0.03125, %v9618_v0 }
 0x8e1   :  { %v9737_v39 = vadd.f32 1e-05, %v9705_v37 }
 0x8e2   :  { %v9736_v2 = vadd.f32 1e-05, %v9704_v53  ;;  %v9627_v24 = vpop.xlane.xlu1 %9626 }
 0x8e3   :  { %13702 = vrsqrt.f32 %v9737_v39  ;;  %v9707_v27 = vmul.f32 0.03125, %v9627_v24  ;;  %v9624_v46 = vpop.xlane.xlu0 %9623 }
 0x8e4   :  { %13704 = vrsqrt.f32 %v9736_v2  ;;  %v9706_v11 = vmul.f32 0.03125, %v9624_v46 }
 0x8e5   :  { %v13695_v29 = vpop.eup %13694  ;;  %v9739_v18 = vadd.f32 1e-05, %v9707_v27 }
 0x8e6   :  { %v13697_v43 = vpop.eup %13696  ;;  %v9797_v25 = vmul.f32 %v13695_v29, %v19652_v41  ;;  %v9738_v48 = vadd.f32 1e-05, %v9706_v11  ;;  %v9633_v20 = vpop.xlane.xlu1 %9632 }
 0x8e7   :  { %v9796_v5 = vmul.f32 %v13697_v43, %v19657_v28  ;;  %13706 = vrsqrt.f32 %v9739_v18  ;;  %v9709_v4 = vmul.f32 0.03125, %v9633_v20  ;;  %v9630_v12 = vpop.xlane.xlu0 %9629 }
 0x8e8   :  { %v9834_v35 = vmul.f32 %v19850_v30, %v9797_v25  ;;  %13708 = vrsqrt.f32 %v9738_v48  ;;  %v9708_v3 = vmul.f32 0.03125, %v9630_v12 }
 0x8e9   :  { %v13699_v1 = vpop.eup %13698  ;;  %v9833_v52 = vmul.f32 %v19850_v30, %v9796_v5  ;;  %v9741_v41 = vadd.f32 1e-05, %v9709_v4 }
 0x8ea   :  { %v13701_v33 = vpop.eup %13700  ;;  %v9871_v9 = vadd.f32 %v19856_v10, %v9834_v35  ;;  %v9799_v47 = vmul.f32 %v13699_v1, %v19666_v16  ;;  %v9740_v7 = vadd.f32 1e-05, %v9708_v3  ;;  %v9639_v21 = vpop.xlane.xlu1 %9638 }
 0x8eb   :  { %v9870_v28 = vadd.f32 %v19856_v10, %v9833_v52  ;;  %v9798_v50 = vmul.f32 %v13701_v33, %v19670_v31  ;;  %13710 = vrsqrt.f32 %v9741_v41  ;;  %v9711_v8 = vmul.f32 0.03125, %v9639_v21  ;;  %v9636_v38 = vpop.xlane.xlu0 %9635 }
 0x8ec   :  { %9903 = vst.msk [vmem:[%s20087_s6 + $0x8] sm:$0xff] %vm128_vm0, %v9871_v9  ;;  %v9836_v37 = vmul.f32 %v19850_v30, %v9799_v47  ;;  %13712 = vrsqrt.f32 %v9740_v7  ;;  %v9710_v0 = vmul.f32 0.03125, %v9636_v38 }
 0x8ed   :  { %v13703_v53 = vpop.eup %13702  ;;  %9902 = vst.msk [vmem:[%s20087_s6] sm:$0xff] %vm128_vm0, %v9870_v28  ;;  %v9835_v16 = vmul.f32 %v19850_v30, %v9798_v50  ;;  %v9743_v31 = vadd.f32 1e-05, %v9711_v8 }
 0x8ee   :  { %v13705_v39 = vpop.eup %13704  ;;  %v9873_v2 = vadd.f32 %v19856_v10, %v9836_v37  ;;  %v9801_v24 = vmul.f32 %v13703_v53, %v19678_v40  ;;  %v9742_v27 = vadd.f32 1e-05, %v9710_v0  ;;  %v9645_v46 = vpop.xlane.xlu1 %9644 }
 0x8ef   :  { %v9872_v11 = vadd.f32 %v19856_v10, %v9835_v16  ;;  %v9800_v29 = vmul.f32 %v13705_v39, %v19682_v59  ;;  %13714 = vrsqrt.f32 %v9743_v31  ;;  %v9713_v18 = vmul.f32 0.03125, %v9645_v46  ;;  %v9642_v43 = vpop.xlane.xlu0 %9641 }
 0x8f0   :  { %9905 = vst.msk [vmem:[%s20087_s6 + $0x18] sm:$0xff] %vm128_vm0, %v9873_v2  ;;  %v9838_v25 = vmul.f32 %v19850_v30, %v9801_v24  ;;  %13716 = vrsqrt.f32 %v9742_v27  ;;  %v9712_v48 = vmul.f32 0.03125, %v9642_v43 }
 0x8f1   :  { %v13707_v20 = vpop.eup %13706  ;;  %9904 = vst.msk [vmem:[%s20087_s6 + $0x10] sm:$0xff] %vm128_vm0, %v9872_v11  ;;  %v9837_v40 = vmul.f32 %v19850_v30, %v9800_v29  ;;  %v9745_v59 = vadd.f32 1e-05, %v9713_v18 }
 0x8f2   :  { %v13709_v5 = vpop.eup %13708  ;;  %v9875_v4 = vadd.f32 %v19856_v10, %v9838_v25  ;;  %v9803_v12 = vmul.f32 %v13707_v20, %v19690_v60  ;;  %v9744_v35 = vadd.f32 1e-05, %v9712_v48  ;;  %v9651_v3 = vpop.xlane.xlu1 %9650 }
 0x8f3   :  { %v9874_v1 = vadd.f32 %v19856_v10, %v9837_v40  ;;  %v9802_v52 = vmul.f32 %v13709_v5, %v19694_v58  ;;  %13718 = vrsqrt.f32 %v9745_v59  ;;  %v9715_v41 = vmul.f32 0.03125, %v9651_v3  ;;  %v9648_v33 = vpop.xlane.xlu0 %9647 }
 0x8f4   :  { %9907 = vst.msk [vmem:[%s20087_s6 + $0x28] sm:$0xff] %vm128_vm0, %v9875_v4  ;;  %v9840_v9 = vmul.f32 %v19850_v30, %v9803_v12  ;;  %13720 = vrsqrt.f32 %v9744_v35  ;;  %v9714_v47 = vmul.f32 0.03125, %v9648_v33 }
 0x8f5   :  { %v13711_v7 = vpop.eup %13710  ;;  %9906 = vst.msk [vmem:[%s20087_s6 + $0x20] sm:$0xff] %vm128_vm0, %v9874_v1  ;;  %v9839_v60 = vmul.f32 %v19850_v30, %v9802_v52  ;;  %v9747_v58 = vadd.f32 1e-05, %v9715_v41 }
 0x8f6   :  { %v13713_v21 = vpop.eup %13712  ;;  %v9877_v28 = vadd.f32 %v19856_v10, %v9840_v9  ;;  %v9805_v50 = vmul.f32 %v13711_v7, %v19702_v17  ;;  %v9746_v8 = vadd.f32 1e-05, %v9714_v47 }
 0x8f7   :  { %v9876_v38 = vadd.f32 %v19856_v10, %v9839_v60  ;;  %v9804_v37 = vmul.f32 %v13713_v21, %v19706_v22  ;;  %13722 = vrsqrt.f32 %v9747_v58 }
 0x8f8   :  { %9909 = vst.msk [vmem:[%s20087_s6 + $0x38] sm:$0xff] %vm128_vm0, %v9877_v28  ;;  %v9842_v0 = vmul.f32 %v19850_v30, %v9805_v50  ;;  %13724 = vrsqrt.f32 %v9746_v8 }
 0x8f9   :  { %v13715_v53 = vpop.eup %13714  ;;  %9908 = vst.msk [vmem:[%s20087_s6 + $0x30] sm:$0xff] %vm128_vm0, %v9876_v38  ;;  %v9841_v17 = vmul.f32 %v19850_v30, %v9804_v37 }
 0x8fa   :  { %v13717_v16 = vpop.eup %13716  ;;  %v9879_v22 = vadd.f32 %v19856_v10, %v9842_v0  ;;  %v9807_v31 = vmul.f32 %v13715_v53, %v19714_v42 }
 0x8fb   :  { %v9878_v39 = vadd.f32 %v19856_v10, %v9841_v17  ;;  %v9806_v2 = vmul.f32 %v13717_v16, %v19718_v26 }
 0x8fc   :  { %9911 = vst.msk [vmem:[%s20087_s6 + $0x48] sm:$0xff] %vm128_vm0, %v9879_v22  ;;  %v9844_v24 = vmul.f32 %v19850_v30, %v9807_v31 }
 0x8fd   :  { %v13719_v27 = vpop.eup %13718  ;;  %9910 = vst.msk [vmem:[%s20087_s6 + $0x40] sm:$0xff] %vm128_vm0, %v9878_v39  ;;  %v9843_v46 = vmul.f32 %v19850_v30, %v9806_v2 }
 0x8fe   :  { %v13721_v42 = vpop.eup %13720  ;;  %v9881_v11 = vadd.f32 %v19856_v10, %v9844_v24  ;;  %v9809_v26 = vmul.f32 %v13719_v27, %v19726_v62 }
 0x8ff   :  { %v9880_v29 = vadd.f32 %v19856_v10, %v9843_v46  ;;  %v9808_v18 = vmul.f32 %v13721_v42, %v19730_v23 }
 0x900   :  { %9913 = vst.msk [vmem:[%s20087_s6 + $0x58] sm:$0xff] %vm128_vm0, %v9881_v11  ;;  %v9846_v43 = vmul.f32 %v19850_v30, %v9809_v26 }
 0x901   :  { %v13723_v25 = vpop.eup %13722  ;;  %9912 = vst.msk [vmem:[%s20087_s6 + $0x50] sm:$0xff] %vm128_vm0, %v9880_v29  ;;  %v9845_v48 = vmul.f32 %v19850_v30, %v9808_v18 }
 0x902   :  { %v13725_v62 = vpop.eup %13724  ;;  %v9883_v20 = vadd.f32 %v19856_v10, %v9846_v43  ;;  %v9811_v23 = vmul.f32 %v13723_v25, %v19738_v49  ;;  %v9657_v5 = vpop.xlane.xlu1 %9656 }
 0x903   :  { %v9882_v40 = vadd.f32 %v19856_v10, %v9845_v48  ;;  %v9810_v59 = vmul.f32 %v13725_v62, %v19742_v32  ;;  %v9717_v12 = vmul.f32 0.03125, %v9657_v5  ;;  %v9654_v35 = vpop.xlane.xlu0 %9653 }
 0x904   :  { %9915 = vst.msk [vmem:[%s20087_s6 + $0x68] sm:$0xff] %vm128_vm0, %v9883_v20  ;;  %v9848_v4 = vmul.f32 %v19850_v30, %v9811_v23  ;;  %v9716_v3 = vmul.f32 0.03125, %v9654_v35 }
 0x905   :  { %9914 = vst.msk [vmem:[%s20087_s6 + $0x60] sm:$0xff] %vm128_vm0, %v9882_v40  ;;  %v9847_v49 = vmul.f32 %v19850_v30, %v9810_v59  ;;  %v9749_v1 = vadd.f32 1e-05, %v9717_v12 }
 0x906   :  { %v9885_v32 = vadd.f32 %v19856_v10, %v9848_v4  ;;  %v9748_v41 = vadd.f32 1e-05, %v9716_v3  ;;  %v9663_v33 = vpop.xlane.xlu1 %9662 }
 0x907   :  { %v9884_v52 = vadd.f32 %v19856_v10, %v9847_v49  ;;  %13726 = vrsqrt.f32 %v9749_v1  ;;  %v9719_v9 = vmul.f32 0.03125, %v9663_v33  ;;  %v9660_v47 = vpop.xlane.xlu0 %9659 }
 0x908   :  { %9917 = vst.msk [vmem:[%s20087_s6 + $0x78] sm:$0xff] %vm128_vm0, %v9885_v32  ;;  %13728 = vrsqrt.f32 %v9748_v41  ;;  %v9718_v7 = vmul.f32 0.03125, %v9660_v47 }
 0x909   :  { %9916 = vst.msk [vmem:[%s20087_s6 + $0x70] sm:$0xff] %vm128_vm0, %v9884_v52  ;;  %v9751_v60 = vadd.f32 1e-05, %v9719_v9 }
 0x90a   :  { %v9750_v58 = vadd.f32 1e-05, %v9718_v7 }
 0x90b   :  { %13730 = vrsqrt.f32 %v9751_v60 }
 0x90c   :  { %13732 = vrsqrt.f32 %v9750_v58 }
 0x911   :  { %v13727_v21 = vpop.eup %13726 }
 0x912   :  { %v13729_v28 = vpop.eup %13728  ;;  %v9813_v50 = vmul.f32 %v13727_v21, %v19752_v6 }
 0x913   :  { %v9812_v8 = vmul.f32 %v13729_v28, %v19755_v61 }
 0x914   :  { %v9850_v38 = vmul.f32 %v19850_v30, %v9813_v50 }
 0x915   :  { %v13731_v37 = vpop.eup %13730  ;;  %v9849_v0 = vmul.f32 %v19850_v30, %v9812_v8 }
 0x916   :  { %v13733_v53 = vpop.eup %13732  ;;  %v9887_v17 = vadd.f32 %v19856_v10, %v9850_v38  ;;  %v9815_v16 = vmul.f32 %v13731_v37, %v19762_v55 }
 0x917   :  { %v9886_v22 = vadd.f32 %v19856_v10, %v9849_v0  ;;  %v9814_v31 = vmul.f32 %v13733_v53, %v19766_v63 }
 0x918   :  { %9919 = vst.msk [vmem:[%s20087_s6 + $0x88] sm:$0xff] %vm128_vm0, %v9887_v17  ;;  %v9852_v6 = vmul.f32 %v19850_v30, %v9815_v16 }
 0x919   :  { %9918 = vst.msk [vmem:[%s20087_s6 + $0x80] sm:$0xff] %vm128_vm0, %v9886_v22  ;;  %v9851_v61 = vmul.f32 %v19850_v30, %v9814_v31 }
 0x91a   :  { %v9889_v55 = vadd.f32 %v19856_v10, %v9852_v6 }
 0x91b   :  { %v9888_v39 = vadd.f32 %v19856_v10, %v9851_v61 }
 0x91c   :  { %9921 = vst.msk [vmem:[%s20087_s6 + $0x98] sm:$0xff] %vm128_vm0, %v9889_v55 }
 0x91d   :  { %9920 = vst.msk [vmem:[%s20087_s6 + $0x90] sm:$0xff] %vm128_vm0, %v9888_v39 }
 0x922   :  { %v9669_v63 = vpop.xlane.xlu1 %9668 }
 0x923   :  { %v9721_v2 = vmul.f32 0.03125, %v9669_v63  ;;  %v9666_v24 = vpop.xlane.xlu0 %9665 }
 0x924   :  { %v9720_v27 = vmul.f32 0.03125, %v9666_v24 }
 0x925   :  { %v9753_v46 = vadd.f32 1e-05, %v9721_v2 }
 0x926   :  { %v9752_v42 = vadd.f32 1e-05, %v9720_v27  ;;  %v9675_v11 = vpop.xlane.xlu1 %9674 }
 0x927   :  { %13734 = vrsqrt.f32 %v9753_v46  ;;  %v9723_v26 = vmul.f32 0.03125, %v9675_v11  ;;  %v9672_v29 = vpop.xlane.xlu0 %9671 }
 0x928   :  { %13736 = vrsqrt.f32 %v9752_v42  ;;  %v9722_v18 = vmul.f32 0.03125, %v9672_v29 }
 0x929   :  { %v9755_v43 = vadd.f32 1e-05, %v9723_v26 }
 0x92a   :  { %v9754_v25 = vadd.f32 1e-05, %v9722_v18 }
 0x92b   :  { %13738 = vrsqrt.f32 %v9755_v43 }
 0x92c   :  { %13740 = vrsqrt.f32 %v9754_v25 }
 0x931   :  { %v13735_v48 = vpop.eup %13734 }
 0x932   :  { %v13737_v62 = vpop.eup %13736  ;;  %v9817_v20 = vmul.f32 %v13735_v48, %v19776_v57 }
 0x933   :  { %v9816_v23 = vmul.f32 %v13737_v62, %v19779_v14 }
 0x934   :  { %v9854_v40 = vmul.f32 %v19850_v30, %v9817_v20 }
 0x935   :  { %v13739_v59 = vpop.eup %13738  ;;  %v9853_v5 = vmul.f32 %v19850_v30, %v9816_v23 }
 0x936   :  { %v13741_v4 = vpop.eup %13740  ;;  %v9891_v12 = vadd.f32 %v19856_v10, %v9854_v40  ;;  %v9819_v35 = vmul.f32 %v13739_v59, %v19786_v51 }
 0x937   :  { %v9890_v49 = vadd.f32 %v19856_v10, %v9853_v5  ;;  %v9818_v3 = vmul.f32 %v13741_v4, %v19790_v34 }
 0x938   :  { %9923 = vst.msk [vmem:[%s20087_s6 + $0xa8] sm:$0xff] %vm128_vm0, %v9891_v12  ;;  %v9856_v57 = vmul.f32 %v19850_v30, %v9819_v35 }
 0x939   :  { %9922 = vst.msk [vmem:[%s20087_s6 + $0xa0] sm:$0xff] %vm128_vm0, %v9890_v49  ;;  %v9855_v14 = vmul.f32 %v19850_v30, %v9818_v3 }
 0x93a   :  { %v9893_v51 = vadd.f32 %v19856_v10, %v9856_v57 }
 0x93b   :  { %v9892_v32 = vadd.f32 %v19856_v10, %v9855_v14 }
 0x93c   :  { %9925 = vst.msk [vmem:[%s20087_s6 + $0xb8] sm:$0xff] %vm128_vm0, %v9893_v51 }
 0x93d   :  { %9924 = vst.msk [vmem:[%s20087_s6 + $0xb0] sm:$0xff] %vm128_vm0, %v9892_v32 }
 0x942   :  { %v9681_v34 = vpop.xlane.xlu1 %9680 }
 0x943   :  { %v9725_v1 = vmul.f32 0.03125, %v9681_v34  ;;  %v9678_v52 = vpop.xlane.xlu0 %9677 }
 0x944   :  { %v9724_v41 = vmul.f32 0.03125, %v9678_v52 }
 0x945   :  { %v9757_v33 = vadd.f32 1e-05, %v9725_v1 }
 0x946   :  { %v9756_v9 = vadd.f32 1e-05, %v9724_v41  ;;  %v9687_v47 = vpop.xlane.xlu1 %9686 }
 0x947   :  { %13742 = vrsqrt.f32 %v9757_v33  ;;  %v9727_v7 = vmul.f32 0.03125, %v9687_v47  ;;  %v9684_v60 = vpop.xlane.xlu0 %9683 }
 0x948   :  { %13744 = vrsqrt.f32 %v9756_v9  ;;  %v9726_v58 = vmul.f32 0.03125, %v9684_v60 }
 0x949   :  { %v9759_v21 = vadd.f32 1e-05, %v9727_v7 }
 0x94a   :  { %v9758_v28 = vadd.f32 1e-05, %v9726_v58 }
 0x94b   :  { %13746 = vrsqrt.f32 %v9759_v21 }
 0x94c   :  { %13748 = vrsqrt.f32 %v9758_v28 }
 0x951   :  { %v13743_v50 = vpop.eup %13742 }
 0x952   :  { %v13745_v8 = vpop.eup %13744  ;;  %v9821_v38 = vmul.f32 %v13743_v50, %v19800_v44 }
 0x953   :  { %v9820_v37 = vmul.f32 %v13745_v8, %v19803_v45 }
 0x954   :  { %v9858_v0 = vmul.f32 %v19850_v30, %v9821_v38 }
 0x955   :  { %v13747_v53 = vpop.eup %13746  ;;  %v9857_v17 = vmul.f32 %v19850_v30, %v9820_v37 }
 0x956   :  { %v13749_v16 = vpop.eup %13748  ;;  %v9895_v22 = vadd.f32 %v19856_v10, %v9858_v0  ;;  %v9823_v31 = vmul.f32 %v13747_v53, %v19810_v15 }
 0x957   :  { %v9894_v6 = vadd.f32 %v19856_v10, %v9857_v17  ;;  %v9822_v61 = vmul.f32 %v13749_v16, %v19814_v36 }
 0x958   :  { %9927 = vst.msk [vmem:[%s20087_s6 + $0xc8] sm:$0xff] %vm128_vm0, %v9895_v22  ;;  %v9860_v44 = vmul.f32 %v19850_v30, %v9823_v31 }
 0x959   :  { %9926 = vst.msk [vmem:[%s20087_s6 + $0xc0] sm:$0xff] %vm128_vm0, %v9894_v6  ;;  %v9859_v45 = vmul.f32 %v19850_v30, %v9822_v61 }
 0x95a   :  { %v9897_v15 = vadd.f32 %v19856_v10, %v9860_v44 }
 0x95b   :  { %v9896_v55 = vadd.f32 %v19856_v10, %v9859_v45 }
 0x95c   :  { %9929 = vst.msk [vmem:[%s20087_s6 + $0xd8] sm:$0xff] %vm128_vm0, %v9897_v15 }
 0x95d   :  { %9928 = vst.msk [vmem:[%s20087_s6 + $0xd0] sm:$0xff] %vm128_vm0, %v9896_v55 }
 0x963   :  { %v9693_v36 = vpop.xlane.xlu1 %9692 }
 0x964   :  { %v9729_v39 = vmul.f32 0.03125, %v9693_v36  ;;  %v9690_v63 = vpop.xlane.xlu0 %9689 }
 0x965   :  { %v9728_v2 = vmul.f32 0.03125, %v9690_v63 }
 0x966   :  { %v9761_v24 = vadd.f32 1e-05, %v9729_v39 }
 0x967   :  { %v9760_v27 = vadd.f32 1e-05, %v9728_v2  ;;  %v9699_v46 = vpop.xlane.xlu1 %9698 }
 0x968   :  { %13750 = vrsqrt.f32 %v9761_v24  ;;  %v9731_v42 = vmul.f32 0.03125, %v9699_v46  ;;  %v9696_v11 = vpop.xlane.xlu0 %9695 }
 0x969   :  { %13752 = vrsqrt.f32 %v9760_v27  ;;  %v9730_v26 = vmul.f32 0.03125, %v9696_v11 }
 0x96a   :  { %v9763_v29 = vadd.f32 1e-05, %v9731_v42 }
 0x96b   :  { %v9762_v18 = vadd.f32 1e-05, %v9730_v26 }
 0x96c   :  { %13754 = vrsqrt.f32 %v9763_v29 }
 0x96d   :  { %13756 = vrsqrt.f32 %v9762_v18 }
 0x972   :  { %v13751_v43 = vpop.eup %13750 }
 0x973   :  { %v13753_v25 = vpop.eup %13752  ;;  %v9825_v48 = vmul.f32 %v13751_v43, %v19824_v54 }
 0x974   :  { %v9824_v62 = vmul.f32 %v13753_v25, %v19827_v19 }
 0x975   :  { %v9862_v20 = vmul.f32 %v19850_v30, %v9825_v48 }
 0x976   :  { %v13755_v23 = vpop.eup %13754  ;;  %v9861_v40 = vmul.f32 %v19850_v30, %v9824_v62 }
 0x977   :  { %v13757_v59 = vpop.eup %13756  ;;  %v9899_v5 = vadd.f32 %v19856_v10, %v9862_v20  ;;  %v9827_v4 = vmul.f32 %v13755_v23, %v19834_v13 }
 0x978   :  { %v9898_v12 = vadd.f32 %v19856_v10, %v9861_v40  ;;  %v9826_v35 = vmul.f32 %v13757_v59, %v19838_v56 }
 0x979   :  { %9931 = vst.msk [vmem:[%s20087_s6 + $0xe8] sm:$0xff] %vm128_vm0, %v9899_v5  ;;  %v9864_v54 = vmul.f32 %v19850_v30, %v9827_v4 }
 0x97a   :  { %9930 = vst.msk [vmem:[%s20087_s6 + $0xe0] sm:$0xff] %vm128_vm0, %v9898_v12  ;;  %v9863_v19 = vmul.f32 %v19850_v30, %v9826_v35 }
 0x97b   :  { %v9901_v13 = vadd.f32 %v19856_v10, %v9864_v54 }
 0x97c   :  { %v9900_v49 = vadd.f32 %v19856_v10, %v9863_v19 }
 0x97d   :  { %9933 = vst.msk [vmem:[%s20087_s6 + $0xf8] sm:$0xff] %vm128_vm0, %v9901_v13 }
 0x97e   :  { %9932 = vst.msk [vmem:[%s20087_s6 + $0xf0] sm:$0xff] %vm128_vm0, %v9900_v49 }

</bundles_post_ra>
